<compile_context>
chip_gen: v5e
topology: v5e:2x2
jax: 0.10.0
libtpu: 0.0.40
codegen_flags: <defaults>
</compile_context>

<pallas_src>
import numpy as np
import jax
import jax.numpy as jnp
from jax.experimental import pallas as pl
from jax.experimental.pallas import tpu as pltpu

F_OUT = 512     # hardcoded in the PyTorch module: Conv2d(in_channels, 512, 1)
BN_EPS = 1e-5


def branch_kernel(x_ref, wc_ref, ah_ref, aw_ref, scale_ref, shift_ref, out_ref):
    N, HW, C = x_ref.shape
    H = ah_ref.shape[1]
    W = aw_ref.shape[1]
    F = wc_ref.shape[2]

    x = x_ref[...]                                     # (N, HW, C)  bf16
    wc = wc_ref[0]                                     # (C, F)      bf16
    ah = ah_ref[0]                                     # (H, H)      bf16
    aw = aw_ref[0]                                     # (W, W)      bf16

    # 1) 1x1 conv first: (N*HW, C) @ (C, F) -> f32 accumulate. Full 512-lane MXU tiles.
    t = jnp.dot(x.reshape(N * HW, C), wc, preferred_element_type=jnp.float32)

    # 2) Fused adaptive-avg-pool + bilinear upsample, applied separably.
    #    A_h along H: batched (H,H) @ (H, W*F) over the N batch elements.
    t = t.astype(jnp.bfloat16).reshape(N, H, W * F)
    u = jax.lax.dot_general(
        jnp.broadcast_to(ah, (N, H, H)), t,
        dimension_numbers=(((2,), (1,)), ((0,), (0,))),
        preferred_element_type=jnp.float32)            # (N, H, W*F) f32

    #    A_w along W: batched (W,W) @ (W, F) over N*H rows.
    u = u.astype(jnp.bfloat16).reshape(N * H, W, F)
    v = jax.lax.dot_general(
        jnp.broadcast_to(aw, (N * H, W, W)), u,
        dimension_numbers=(((2,), (1,)), ((0,), (0,))),
        preferred_element_type=jnp.float32)            # (N*H, W, F) f32

    # 3) BatchNorm (inference) affine in f32 (conv bias folded into shift).
    y = v.reshape(N, HW, F) * scale_ref[0] + shift_ref[0]

    # 4) Lane-dense 512-wide store into this branch's channel slice of the concat buffer.
    out_ref[...] = y


def adaptive_avg_pool_matrix(in_size, out_size):
    """1-D operator matching torch.nn.AdaptiveAvgPool2d region rules."""
    P = np.zeros((out_size, in_size), np.float32)
    for i in range(out_size):
        start = (i * in_size) // out_size
        end = -(((-(i + 1)) * in_size) // out_size)   # ceil((i+1)*in/out)
        P[i, start:end] = 1.0 / (end - start)
    return P


def bilinear_upsample_matrix(in_size, out_size):
    """1-D operator matching F.interpolate(mode='bilinear', align_corners=False)."""
    U = np.zeros((out_size, in_size), np.float32)
    scale = in_size / out_size
    for o in range(out_size):
        src = scale * (o + 0.5) - 0.5
        src = max(src, 0.0)
        i0 = min(int(np.floor(src)), in_size - 1)
        i1 = min(i0 + 1, in_size - 1)
        lam = min(max(src - i0, 0.0), 1.0)
        U[o, i0] += 1.0 - lam
        U[o, i1] += lam
    return U


def make_params(key, in_channels, pool_sizes, H, W):
    """Deterministic synthetic parameters (conv weights/bias + BN affine & running stats)."""
    nb = len(pool_sizes)
    ks = jax.random.split(key, 6)
    conv_w = 0.1 * jax.random.normal(ks[0], (nb, F_OUT, in_channels), jnp.float32)
    conv_b = 0.1 * jax.random.normal(ks[1], (nb, F_OUT), jnp.float32)
    bn_gamma = 1.0 + 0.1 * jax.random.normal(ks[2], (nb, F_OUT), jnp.float32)
    bn_beta = 0.1 * jax.random.normal(ks[3], (nb, F_OUT), jnp.float32)
    bn_mean = 0.1 * jax.random.normal(ks[4], (nb, F_OUT), jnp.float32)
    bn_var = jax.random.uniform(ks[5], (nb, F_OUT), jnp.float32, 0.5, 1.5)

    # Separable per-branch spatial operators A = U_bilinear @ P_adaptive_pool.
    A_h = np.stack([bilinear_upsample_matrix(s, H) @ adaptive_avg_pool_matrix(H, s)
                    for s in pool_sizes])                          # (nb, H, H)
    A_w = np.stack([bilinear_upsample_matrix(s, W) @ adaptive_avg_pool_matrix(W, s)
                    for s in pool_sizes])                          # (nb, W, W)
    A_h = jnp.asarray(A_h, jnp.bfloat16)   # bf16 MXU operands; f32 accumulation in-kernel
    A_w = jnp.asarray(A_w, jnp.bfloat16)

    Wc = jnp.transpose(conv_w, (0, 2, 1)).astype(jnp.bfloat16)     # (nb, C, 512)
    scale = bn_gamma / jnp.sqrt(bn_var + BN_EPS)                   # (nb, 512) f32
    shift = (conv_b - bn_mean) * scale + bn_beta                   # conv bias folded in
    return A_h, A_w, Wc, scale[:, None, :], shift[:, None, :]


def _pyramid_pooling_forward(x_nchw, params):
    # TODO(synk): BatchNorm is inference-mode (running stats); torch training-mode batch
    # statistics would need an extra cross-batch reduction pass.
    A_h, A_w, Wc, scale, shift = params
    N, C, H, W = x_nchw.shape
    HW = H * W
    nb, _, F = Wc.shape

    x_nhwc = jnp.transpose(x_nchw, (0, 2, 3, 1))                   # (N,H,W,C) f32
    x_hwc = x_nhwc.reshape(N, HW, C).astype(jnp.bfloat16)          # bf16 kernel input

    flops = 2 * nb * N * HW * F * (C + H + W)
    bytes_accessed = (nb * x_hwc.size * 2 + A_h.size * 2 + A_w.size * 2 + Wc.size * 2
                      + (scale.size + shift.size) * 4 + N * HW * nb * F * 4)

    branch_out = pl.pallas_call(
        branch_kernel,
        out_shape=jax.ShapeDtypeStruct((N, HW, nb * F), jnp.float32),
        grid_spec=pltpu.PrefetchScalarGridSpec(
            num_scalar_prefetch=0,
            grid=(nb,),                                            # one step per branch
            in_specs=[
                pl.BlockSpec((N, HW, C), lambda b: (0, 0, 0)),     # x (whole batch)
                pl.BlockSpec((1, C, F), lambda b: (b, 0, 0)),      # conv weight
                pl.BlockSpec((1, H, H), lambda b: (b, 0, 0)),      # A_h
                pl.BlockSpec((1, W, W), lambda b: (b, 0, 0)),      # A_w
                pl.BlockSpec((1, 1, F), lambda b: (b, 0, 0)),      # bn scale
                pl.BlockSpec((1, 1, F), lambda b: (b, 0, 0)),      # bn shift (+conv bias)
            ],
            out_specs=pl.BlockSpec((N, HW, F), lambda b: (0, 0, b)),  # 512-wide channel slice
        ),
        compiler_params=pltpu.CompilerParams(dimension_semantics=("parallel",)),
        cost_estimate=pl.CostEstimate(flops=flops, transcendentals=0,
                                      bytes_accessed=bytes_accessed),
    )(x_hwc, Wc, A_h, A_w, scale, shift)

    # torch.cat([x, b0, b1, ...], dim=1) done in NHWC (lane-dense) + one NCHW transpose,
    # fused by XLA under this same jit.
    cat_nhwc = jnp.concatenate([x_nhwc, branch_out.reshape(N, H, W, nb * F)], axis=-1)
    return jnp.transpose(cat_nhwc, (0, 3, 1, 2))


pyramid_pooling_forward = jax.jit(_pyramid_pooling_forward)


if __name__ == "__main__":
    N, C_in, H, W = 2, 4, 16, 16
    pool_sizes = (1, 2, 3, 6)
    nb = len(pool_sizes)

    key = jax.random.PRNGKey(0)
    kx, kp = jax.random.split(key)
    x = jax.random.normal(kx, (N, C_in, H, W), jnp.float32)
    params = make_params(kp, C_in, pool_sizes, H, W)

    out = jax.block_until_ready(pyramid_pooling_forward(x, params))
    assert out.shape == (N, C_in + F_OUT * nb, H, W), out.shape

    # Pure-JAX reference mirroring the kernel math (same bf16 casts, f32 accumulation)
    # to sanity-check the Pallas lowering.
    A_h, A_w, Wc, scale, shift = params
    xb = jnp.transpose(x, (0, 2, 3, 1)).reshape(N, H * W, C_in).astype(jnp.bfloat16)
    t = jnp.einsum('nqc,bcf->bnqf', xb, Wc, preferred_element_type=jnp.float32)
    t = t.astype(jnp.bfloat16).reshape(nb, N, H, W, F_OUT)
    u = jnp.einsum('bij,bnjwf->bniwf', A_h, t, preferred_element_type=jnp.float32)
    u = u.astype(jnp.bfloat16)
    v = jnp.einsum('bij,bnhjf->bnhif', A_w, u, preferred_element_type=jnp.float32)
    y = v.reshape(nb, N, H * W, F_OUT) * scale[:, None] + shift[:, None]
    ref_branch = jnp.transpose(y.reshape(nb, N, H, W, F_OUT), (0, 1, 4, 2, 3))
    ref = jnp.concatenate([x] + [ref_branch[b] for b in range(nb)], axis=1)

    assert jnp.allclose(out, ref, atol=2e-3, rtol=2e-3)

    print("KERNEL_OK")
</pallas_src>

<mosaic_0001>
module attributes {stable_mosaic.version = 11 : i64} {
  func.func @branch_kernel(%arg0: i32, %arg1: memref<2x256x4xbf16, #tpu.memory_space<vmem>>, %arg2: memref<1x4x512xbf16, #tpu.memory_space<vmem>>, %arg3: memref<1x16x16xbf16, #tpu.memory_space<vmem>>, %arg4: memref<1x16x16xbf16, #tpu.memory_space<vmem>>, %arg5: memref<1x1x512xf32, #tpu.memory_space<vmem>>, %arg6: memref<1x1x512xf32, #tpu.memory_space<vmem>>, %arg7: memref<2x256x512xf32, #tpu.memory_space<vmem>>) attributes {dimension_semantics = [#tpu.dimension_semantics<parallel>], iteration_bounds = array<i64: 4>, scalar_prefetch = 0 : i64, scratch_operands = 0 : i64, tpu.core_type = #tpu.core_type<tc>, window_params = [{pipeline_mode = #tpu.pipeline_mode<synchronous>, transform_indices = @transform_0, window_bounds = array<i64: 2, 256, 4>}, {transform_indices = @transform_1, window_bounds = array<i64: 1, 4, 512>}, {transform_indices = @transform_2, window_bounds = array<i64: 1, 16, 16>}, {transform_indices = @transform_3, window_bounds = array<i64: 1, 16, 16>}, {transform_indices = @transform_4, window_bounds = array<i64: 1, 1, 512>}, {transform_indices = @transform_5, window_bounds = array<i64: 1, 1, 512>}, {transform_indices = @transform_6, window_bounds = array<i64: 2, 256, 512>}]} {
    %c0 = arith.constant 0 : index
    %c0_0 = arith.constant 0 : index
    %c0_1 = arith.constant 0 : index
    %0 = vector.load %arg1[%c0, %c0_0, %c0_1] : memref<2x256x4xbf16, #tpu.memory_space<vmem>>, vector<2x256x4xbf16>
    %c0_2 = arith.constant 0 : index
    %c0_3 = arith.constant 0 : index
    %c0_4 = arith.constant 0 : index
    %1 = vector.load %arg2[%c0_2, %c0_3, %c0_4] : memref<1x4x512xbf16, #tpu.memory_space<vmem>>, vector<1x4x512xbf16>
    %2 = vector.shape_cast %1 : vector<1x4x512xbf16> to vector<4x512xbf16>
    %c0_5 = arith.constant 0 : index
    %c0_6 = arith.constant 0 : index
    %c0_7 = arith.constant 0 : index
    %3 = vector.load %arg3[%c0_5, %c0_6, %c0_7] : memref<1x16x16xbf16, #tpu.memory_space<vmem>>, vector<1x16x16xbf16>
    %4 = vector.shape_cast %3 : vector<1x16x16xbf16> to vector<16x16xbf16>
    %c0_8 = arith.constant 0 : index
    %c0_9 = arith.constant 0 : index
    %c0_10 = arith.constant 0 : index
    %5 = vector.load %arg4[%c0_8, %c0_9, %c0_10] : memref<1x16x16xbf16, #tpu.memory_space<vmem>>, vector<1x16x16xbf16>
    %6 = vector.shape_cast %5 : vector<1x16x16xbf16> to vector<16x16xbf16>
    %7 = vector.shape_cast %0 : vector<2x256x4xbf16> to vector<512x4xbf16>
    %cst = arith.constant dense<0.000000e+00> : vector<512x512xf32>
    %8 = tpu.matmul %7, %2, %cst {dimension_numbers = #tpu.dot_dimension_numbers<[1], [0], [0], [1], [0, 0, 1, 1], [], []>} : vector<512x4xbf16>, vector<4x512xbf16>, vector<512x512xf32> -> vector<512x512xf32>
    %9 = arith.truncf %8 : vector<512x512xf32> to vector<512x512xbf16>
    %10 = vector.shape_cast %9 : vector<512x512xbf16> to vector<2x16x8192xbf16>
    %11 = vector.shape_cast %4 : vector<16x16xbf16> to vector<1x16x16xbf16>
    %12 = vector.broadcast %11 : vector<1x16x16xbf16> to vector<2x16x16xbf16>
    %cst_11 = arith.constant dense<0.000000e+00> : vector<2x16x8192xf32>
    %13 = tpu.matmul %12, %10, %cst_11 {dimension_numbers = #tpu.dot_dimension_numbers<[2], [1], [1], [2], [0, 0, 0, 1, 1, 2], [0], [0]>} : vector<2x16x16xbf16>, vector<2x16x8192xbf16>, vector<2x16x8192xf32> -> vector<2x16x8192xf32>
    %14 = arith.truncf %13 : vector<2x16x8192xf32> to vector<2x16x8192xbf16>
    %15 = vector.shape_cast %14 : vector<2x16x8192xbf16> to vector<32x16x512xbf16>
    %16 = vector.shape_cast %6 : vector<16x16xbf16> to vector<1x16x16xbf16>
    %17 = vector.broadcast %16 : vector<1x16x16xbf16> to vector<32x16x16xbf16>
    %cst_12 = arith.constant dense<0.000000e+00> : vector<32x16x512xf32>
    %18 = tpu.matmul %17, %15, %cst_12 {dimension_numbers = #tpu.dot_dimension_numbers<[2], [1], [1], [2], [0, 0, 0, 1, 1, 2], [0], [0]>} : vector<32x16x16xbf16>, vector<32x16x512xbf16>, vector<32x16x512xf32> -> vector<32x16x512xf32>
    %19 = vector.shape_cast %18 : vector<32x16x512xf32> to vector<2x256x512xf32>
    %c0_13 = arith.constant 0 : index
    %c0_14 = arith.constant 0 : index
    %c0_15 = arith.constant 0 : index
    %20 = vector.load %arg5[%c0_13, %c0_14, %c0_15] : memref<1x1x512xf32, #tpu.memory_space<vmem>>, vector<1x1x512xf32>
    %21 = vector.shape_cast %20 : vector<1x1x512xf32> to vector<1x512xf32>
    %22 = vector.shape_cast %21 : vector<1x512xf32> to vector<1x1x512xf32>
    %23 = vector.broadcast %22 : vector<1x1x512xf32> to vector<2x256x512xf32>
    %24 = arith.mulf %19, %23 : vector<2x256x512xf32>
    %c0_16 = arith.constant 0 : index
    %c0_17 = arith.constant 0 : index
    %c0_18 = arith.constant 0 : index
    %25 = vector.load %arg6[%c0_16, %c0_17, %c0_18] : memref<1x1x512xf32, #tpu.memory_space<vmem>>, vector<1x1x512xf32>
    %26 = vector.shape_cast %25 : vector<1x1x512xf32> to vector<1x512xf32>
    %27 = vector.shape_cast %26 : vector<1x512xf32> to vector<1x1x512xf32>
    %28 = vector.broadcast %27 : vector<1x1x512xf32> to vector<2x256x512xf32>
    %29 = arith.addf %24, %28 : vector<2x256x512xf32>
    %c0_19 = arith.constant 0 : index
    %c0_20 = arith.constant 0 : index
    %c0_21 = arith.constant 0 : index
    %30 = vector.load %arg7[%c0_19, %c0_20, %c0_21] : memref<2x256x512xf32, #tpu.memory_space<vmem>>, vector<2x256x512xf32>
    tpu.vector_store %arg7[%c0_19, %c0_20, %c0_21], %29 {strides = array<i32>} : memref<2x256x512xf32, #tpu.memory_space<vmem>>, vector<2x256x512xf32>,
    return
  }
  func.func @transform_0(%arg0: i32) -> (i32, i32, i32) {
    %c0_i32 = arith.constant 0 : i32
    %c0_i32_0 = arith.constant 0 : i32
    %c0_i32_1 = arith.constant 0 : i32
    %c0_i32_2 = arith.constant 0 : i32
    return %c0_i32, %c0_i32_0, %c0_i32_1 : i32, i32, i32
  }
  func.func @transform_1(%arg0: i32) -> (i32, i32, i32) {
    %c0_i32 = arith.constant 0 : i32
    %c0_i32_0 = arith.constant 0 : i32
    %c0_i32_1 = arith.constant 0 : i32
    return %arg0, %c0_i32, %c0_i32_0 : i32, i32, i32
  }
  func.func @transform_2(%arg0: i32) -> (i32, i32, i32) {
    %c0_i32 = arith.constant 0 : i32
    %c0_i32_0 = arith.constant 0 : i32
    %c0_i32_1 = arith.constant 0 : i32
    return %arg0, %c0_i32, %c0_i32_0 : i32, i32, i32
  }
  func.func @transform_3(%arg0: i32) -> (i32, i32, i32) {
    %c0_i32 = arith.constant 0 : i32
    %c0_i32_0 = arith.constant 0 : i32
    %c0_i32_1 = arith.constant 0 : i32
    return %arg0, %c0_i32, %c0_i32_0 : i32, i32, i32
  }
  func.func @transform_4(%arg0: i32) -> (i32, i32, i32) {
    %c0_i32 = arith.constant 0 : i32
    %c0_i32_0 = arith.constant 0 : i32
    %c0_i32_1 = arith.constant 0 : i32
    return %arg0, %c0_i32, %c0_i32_0 : i32, i32, i32
  }
  func.func @transform_5(%arg0: i32) -> (i32, i32, i32) {
    %c0_i32 = arith.constant 0 : i32
    %c0_i32_0 = arith.constant 0 : i32
    %c0_i32_1 = arith.constant 0 : i32
    return %arg0, %c0_i32, %c0_i32_0 : i32, i32, i32
  }
  func.func @transform_6(%arg0: i32) -> (i32, i32, i32) {
    %c0_i32 = arith.constant 0 : i32
    %c0_i32_0 = arith.constant 0 : i32
    %c0_i32_1 = arith.constant 0 : i32
    return %c0_i32, %c0_i32_0, %arg0 : i32, i32, i32
  }
}

</mosaic_0001>

<bundles_post_ra>
// kernel: _pyramid_pooling_forward.1
= control target key start
LH: loop header
LB: loop body
LE: loop exit
PB: predicated region body
PF: predicated region fallthrough
CT: control target
= control target key end

     0   :  { %s20177_s0 = inlined_call_operand.vmem [shape: bf16[2,256,4], index: 0, kind: input, shape index: {}]   ;;  %s20178_s1 = inlined_call_operand.hbm [shape: bf16[4,4,512], index: 1, kind: input, shape index: {}]   ;;  %s20179_s2 = inlined_call_operand.hbm [shape: bf16[4,16,16], index: 2, kind: input, shape index: {}]   ;;  %s20180_s3 = inlined_call_operand.hbm [shape: bf16[4,16,16], index: 3, kind: input, shape index: {}]   ;;  %s20181_s4 = inlined_call_operand.hbm [shape: f32[4,1,512], index: 4, kind: input, shape index: {}]   ;;  %s20182_s5 = inlined_call_operand.hbm [shape: f32[4,1,512], index: 5, kind: input, shape index: {}]   ;;  %s20183_s6 = inlined_call_operand.vmem [shape: f32[2,256,2048], index: 6, kind: output, shape index: {}]  }
   0x1   :  { %20388 = sst [smem:[#allocation80_spill]] %s20179_s2 }
   0x2   :  { %20389 = sst [smem:[#allocation81_spill]] %s20183_s6 }
   0x3   :  { %11 = vsyncpa [#allocation3], 0 }
   0x4   :  { %13 = vsyncpa [#allocation3 + $0x1], 0 }
   0x5   :  { %14 = vsyncpa [#allocation5], 0 }
   0x6   :  { %16 = vsyncpa [#allocation5 + $0x1], 0 }
   0x7   :  { %17 = vsyncpa [#allocation8], 0 }
   0x8   :  { %19 = vsyncpa [#allocation8 + $0x1], 0  ;;  %s12991_s21 = smov 0   ;;  %s12993_s22 = smov 0  }
   0x9   :  { %s12995_s23 = smov 0   ;;  %s12997_s24 = smov 0  }
   0xa LB: > { %20390 = sst [smem:[#allocation14_spill]] %s12946_s23  ;;  %s13010_s25 = sadd.s32 4294967295, %s12950_s24   ;;  %s12950_s24 = sphi %s12997_s24, %s21254_s24   ;;  %s12946_s23 = sphi %s12995_s23, %s21256_s23   ;;  %s12942_s22 = sphi %s12993_s22, %s21258_s22   ;;  %s12938_s21 = sphi %s12991_s21, %s21257_s21  }
   0xb   : > { %s13013_s26 = sadd.s32 1, %s12950_s24   ;;  %s53_s28 = sadd.s32 1, %s12946_s23 }
   0xc   : > { %20391 = sst [smem:[#allocation15_spill]] %s13013_s26  ;;  %s50_s27 = ssub.s32 %s12950_s24, %s13013_s26 }
   0xd   : > { %p51_p0 = scmp.eq.s32.totalorder %s50_s27, 0  ;;  %p60_p1 = scmp.ne.s32.totalorder %s12946_s23, %s12942_s22 }
   0xe   : > { %p61_p2 = scmp.eq.s32.totalorder %s12950_s24, 0  ;;  %p66_p3 = scmp.ne.s32.totalorder %s12942_s22, %s12938_s21 }
   0xf   : > { %s13023_s29 = scalar_select %p51_p0, %s12946_s23, %s53_s28  }
  0x10   : > { %p62_p4 = por %p61_p2, %p60_p1  ;;  %p67_p5 = scmp.eq.s32.totalorder %s13010_s25, 0 }
  0x11   : > { %20392 = sst [smem:[#allocation16_spill]] %s13023_s29  ;;  %p194_p6 = scmp.eq.s32.totalorder %s13010_s25, 3 }
  0x12   : > { %p13027_p7 = por %p67_p5, %p66_p3  ;;  %p12715_p8 = scmp.lt.s32.totalorder %s12950_s24, 4 }
  0x13   : > { %p13032_p9 = por %p194_p6, %p60_p1  ;;  %s13037_s8 = sand.u32 1, %s12946_s23  }
  0x14   : > { %s13040_s9 = sshll.u32 %s13037_s8, 3  ;;  %s13043_s10 = sshll.u32 %s12950_s24, 3 }
  0x15   : > { %s20394_s7 = scalar_select %p13032_p9, 1, 0 }
  0x16   : > { %p13045_p10 = pnand %p12715_p8, %p62_p4  ;;  %s20184_s12 = sand.u32 1, %s12950_s24  }
  0x17   : > { %20395 = sst [smem:[#allocation17_spill]] %s20394_s7  ;;  %s247_s17 = scalar_lea.vmem [#allocation4], %s13040_s9 }
  0x18   : > { %s20397_s2 = sld [smem:[#allocation80_spill]]  ;;  %s255_s18 = sshll.u32 %s247_s17, 4  ;;  %s256_s18 = int_to_ptr.vmem [resolvable:$true] %s255_s18 }
  0x19   : > { %s13057_s19 = scalar_lea.sflag [#allocation5], %s20184_s12  ;;  %p13061_p12 = pneg %p13045_p10 }
  0x1e   : > { %s252_s15 = scalar_lea.hbm %s20397_s2, %s13043_s10  ;;  %s12765_s14 = scalar_lea.hbm %s20397_s2, 32 }
  0x1f   : > { %s253_s16 = sshll.u32 %s252_s15, 4  ;;  %s254_s16 = int_to_ptr.hbm [resolvable:$true] %s253_s16 }
  0x20   : > { %s12758_s20 = sshra.s32 %s254_s16, 4  ;;  %s12759_s20 = int_to_ptr.hbm [resolvable:$true] %s12758_s20 }
  0x21   : > { %s12760_s21 = scalar_lea.hbm %s12759_s20, 8  ;;  %p12766_p1 = scmp.lt.s32.totalorder %s12759_s20, %s20397_s2 }
  0x22   : > { %p12761_p11 = scmp.ne.s32.totalorder %s12759_s20, %s12760_s21  ;;  %p12767_p2 = scmp.lt.s32.totalorder %s12765_s14, %s12760_s21 }
  0x24   : > { %p12763_p13 = pnand %p13061_p12, %p12761_p11  ;;  %p12768_p3 = por %p12767_p2, %p12766_p1 }
  0x26   : > { %p12764_p0 = pneg %p12763_p13 }
  0x28   : > { %p12769_p4 = pnand %p12768_p3, %p12764_p0 }
  0x2a   : > { %12772 = shalt.err (!%p12769_p4)
}
  0x2b   : > { %s20186_s12 = smov 64   ;;  %s20187_s29 = smov 4  }
  0x2c   : > { %12705 = dma.hbm_to_vmem [thread:$0]  (!%p13045_p10), %s254_s16, 128, %s256_s18, %s13057_s19, %s20186_s12, %s20186_s12, %s20187_s29  }
  0x2d   : > { %p11927_p5 = scmp.ge.s32.totalorder %s12950_s24, 1  ;;  %p323_p6 = scmp.lt.s32.totalorder %s12950_s24, 5 }
  0x2e   : > { %s20191_s20 = sshll.u32 %s13037_s8, 2  ;;  %s11924_s28 = sshll.u32 %s12950_s24, 2 }
  0x2f   : > { %p13082_p8 = pnand %p11927_p5, %p323_p6  ;;  %s291_s13 = scalar_lea.vmem [#allocation7], %s20191_s20 }
  0x30   : > { %s299_s14 = sshll.u32 %s291_s13, 4  ;;  %s295_s2 = scalar_lea.hbm %s20181_s4, %s11924_s28  ;;  %s300_s14 = int_to_ptr.vmem [resolvable:$true] %s299_s14 }
  0x31   : > { %s297_s23 = sshll.u32 %s295_s2, 4  ;;  %s13095_s12 = scalar_lea.hbm %s20182_s5, %s11924_s28  ;;  %s298_s23 = int_to_ptr.hbm [resolvable:$true] %s297_s23 }
  0x32   : > { %s20400_s29 = sand.u32 1, %s12950_s24   ;;  %s12788_s6 = sshra.s32 %s298_s23, 4  ;;  %s12789_s6 = int_to_ptr.hbm [resolvable:$true] %s12788_s6 }
  0x33   : > { %s13099_s26 = scalar_lea.sflag [#allocation8], %s20400_s29  ;;  %s12790_s7 = scalar_lea.hbm %s12789_s6, 4 }
  0x34   : > { %p12791_p11 = scmp.ne.s32.totalorder %s12789_s6, %s12790_s7  ;;  %s12795_s2 = scalar_lea.hbm %s20181_s4, 16 }
  0x35   : > { %p12796_p1 = scmp.lt.s32.totalorder %s12789_s6, %s20181_s4  ;;  %p12797_p2 = scmp.lt.s32.totalorder %s12795_s2, %s12790_s7 }
  0x36   : > { %p12793_p13 = pnand %p12791_p11, %p13061_p12 }
  0x37   : > { %p12798_p3 = por %p12797_p2, %p12796_p1 }
  0x38   : > { %p12794_p0 = pneg %p12793_p13 }
  0x3a   : > { %p12799_p4 = pnand %p12798_p3, %p12794_p0 }
  0x3c   : > { %12802 = shalt.err (!%p12799_p4)
}
  0x3d   : > { %12711 = dma.hbm_to_vmem [thread:$0]  (!%p13045_p10), %s298_s23, 64, %s300_s14, %s13099_s26  }
  0x3e   : > { %s232_s28 = scalar_lea.hbm %s20178_s1, %s13043_s10  ;;  %s227_s16 = scalar_lea.vmem [#allocation2], %s13040_s9 }
  0x3f   : > { %s236_s18 = sshll.u32 %s227_s16, 4  ;;  %s234_s20 = sshll.u32 %s232_s28, 4  ;;  %s237_s18 = int_to_ptr.vmem [resolvable:$true] %s236_s18  ;;  %s235_s20 = int_to_ptr.hbm [resolvable:$true] %s234_s20 }
  0x40   : > { %s224_s6 = scalar_lea.sflag [#allocation3], %s13037_s8  ;;  %s12818_s7 = sshra.s32 %s235_s20, 4  ;;  %s12819_s7 = int_to_ptr.hbm [resolvable:$true] %s12818_s7 }
  0x41   : > { %s12820_s13 = scalar_lea.hbm %s12819_s7, 8  ;;  %s12825_s23 = scalar_lea.hbm %s20178_s1, 32 }
  0x42   : > { %p12821_p5 = scmp.ne.s32.totalorder %s12819_s7, %s12820_s13  ;;  %p12826_p13 = scmp.lt.s32.totalorder %s12819_s7, %s20178_s1 }
  0x43   : > { %p12827_p0 = scmp.lt.s32.totalorder %s12825_s23, %s12820_s13 }
  0x44   : > { %p12823_p6 = pnand %p12821_p5, %p13061_p12 }
  0x45   : > { %p12828_p1 = por %p12827_p0, %p12826_p13 }
  0x46   : > { %p12824_p11 = pneg %p12823_p6 }
  0x48   : > { %p12829_p2 = pnand %p12828_p1, %p12824_p11 }
  0x4a   : > { %12832 = shalt.err (!%p12829_p2)
}
  0x4b   : > { %12702 = dma.hbm_to_vmem [thread:$0]  (!%p13045_p10), %s235_s20, 128, %s237_s18, %s224_s6  }
  0x4c   : > { %s274_s28 = scalar_lea.hbm %s20180_s3, %s13043_s10  ;;  %s269_s16 = scalar_lea.vmem [#allocation6], %s13040_s9 }
  0x4d   : > { %s277_s15 = sshll.u32 %s269_s16, 4  ;;  %s275_s2 = sshll.u32 %s274_s28, 4  ;;  %s278_s15 = int_to_ptr.vmem [resolvable:$true] %s277_s15  ;;  %s276_s2 = int_to_ptr.hbm [resolvable:$true] %s275_s2 }
  0x4e   : > { %s316_s7 = sshll.u32 %s13095_s12, 4  ;;  %s12848_s13 = sshra.s32 %s276_s2, 4  ;;  %s12849_s13 = int_to_ptr.hbm [resolvable:$true] %s12848_s13  ;;  %s317_s7 = int_to_ptr.hbm [resolvable:$true] %s316_s7 }
  0x4f   : > { %s12850_s23 = scalar_lea.hbm %s12849_s13, 8  ;;  %s12855_s18 = scalar_lea.hbm %s20180_s3, 32 }
  0x50   : > { %p12851_p3 = scmp.ne.s32.totalorder %s12849_s13, %s12850_s23  ;;  %p12856_p6 = scmp.lt.s32.totalorder %s12849_s13, %s20180_s3 }
  0x51   : > { %p12857_p11 = scmp.lt.s32.totalorder %s12855_s18, %s12850_s23 }
  0x52   : > { %p12853_p4 = pnand %p12851_p3, %p13061_p12 }
  0x53   : > { %p12858_p13 = por %p12857_p11, %p12856_p6 }
  0x54   : > { %p12854_p5 = pneg %p12853_p4 }
  0x56   : > { %p12859_p0 = pnand %p12858_p13, %p12854_p5 }
  0x58   : > { %12862 = shalt.err (!%p12859_p0)
}
  0x59   : > { %s20401_s9 = smov 4   ;;  %s20402_s10 = smov 64  }
  0x5a   : > { %12708 = dma.hbm_to_vmem [thread:$0]  (!%p13045_p10), %s276_s2, 128, %s278_s15, %s13057_s19, %s20402_s10, %s20402_s10, %s20401_s9  }
  0x5b   : > { %s20403_s12 = sshll.u32 %s13037_s8, 2  ;;  %s12878_s28 = sshra.s32 %s317_s7, 4  ;;  %s12879_s28 = int_to_ptr.hbm [resolvable:$true] %s12878_s28 }
  0x5c   : > { %s310_s24 = scalar_lea.vmem [#allocation9], %s20403_s12  ;;  %s12880_s16 = scalar_lea.hbm %s12879_s28, 4 }
  0x5d   : > { %s318_s29 = sshll.u32 %s310_s24, 4  ;;  %p12881_p1 = scmp.ne.s32.totalorder %s12879_s28, %s12880_s16  ;;  %s319_s29 = int_to_ptr.vmem [resolvable:$true] %s318_s29 }
  0x5e   : > { %s12885_s14 = scalar_lea.hbm %s20182_s5, 16  ;;  %p12886_p4 = scmp.lt.s32.totalorder %s12879_s28, %s20182_s5 }
  0x5f   : > { %p12883_p2 = pnand %p12881_p1, %p13061_p12  ;;  %p12887_p5 = scmp.lt.s32.totalorder %s12885_s14, %s12880_s16 }
  0x61   : > { %p12884_p3 = pneg %p12883_p2  ;;  %p12888_p6 = por %p12887_p5, %p12886_p4 }
  0x63   : > { %p12889_p11 = pnand %p12888_p6, %p12884_p3 }
  0x65   : > { %12892 = shalt.err (!%p12889_p11)
}
  0x66   : > { %12714 = dma.hbm_to_vmem [thread:$0]  (!%p13045_p10), %s317_s7, 64, %s319_s29, %s13099_s26  }
  0x67   : > { %327 = sbr.rel (%p13082_p8) target bundleno = 2131 (0x853), region = 44 }
  0x6c   : > { %s13164_s8 = sand.u32 1, %s12942_s22  }
  0x6d   : > { %s11928_s19 = sshll.u32 %s13164_s8, 3  ;;  %s330_s27 = scalar_lea.sflag [#allocation3], %s13164_s8 }
  0x6e   : > { %s333_s15 = scalar_lea.vmem [#allocation2], %s11928_s19 }
  0x6f   : > { %12925 = dma.done.wait (%p13027_p7), %s330_s27, 128  }
  0x70   : > { %12927 = vsyncadd (%p13027_p7), %s330_s27, 4294967168  ;;  %s339_s26 = sand.u32 1, %s13010_s25   ;;  %s13173_s21 = scalar_lea.vmem [#allocation4], %s11928_s19 }
  0x71   : > { %s340_s11 = scalar_lea.sflag [#allocation5], %s339_s26 }
  0x72   : > { %12929 = dma.done.wait (%p13027_p7), %s340_s11, 256  }
  0x73   : > { %12931 = vsyncadd (%p13027_p7), %s340_s11, 4294967040  ;;  %s11931_s2 = sshll.u32 %s13164_s8, 2  ;;  %s13180_s7 = scalar_lea.vmem [#allocation6], %s11928_s19 }
  0x74   : > { %s360_s20 = scalar_lea.sflag [#allocation8], %s339_s26  ;;  %s13184_s6 = scalar_lea.vmem [#allocation7], %s11931_s2 }
  0x75   : > { %12933 = dma.done.wait (%p13027_p7), %s360_s20, 128  }
  0x76   : > { %12935 = vsyncadd (%p13027_p7), %s360_s20, 4294967168  ;;  %v488_v0 = vld [vmem:[%s333_s15] sm:$0xff]  ;;  %vm756_vm0 = vcmask 1041408   ;;  %v12654_v6 = vld [vmem:[%s20177_s0] sm:$0xff]  ;;  %vm659_vm1 = vcmask 31744   ;;  %vm1899_vm2 = vcmask 1043458  }
  0x77   : > { %654 = vst [vmem:[#allocation1] ss:$4 sm:$0xff] %v488_v0  ;;  %v12655_v10 = vld [vmem:[%s20177_s0 + $0x8] sm:$0xff]  ;;  %v12656_v11 = vld [vmem:[%s20177_s0 + $0x10] sm:$0xff]  ;;  %v12657_v12 = vld [vmem:[%s20177_s0 + $0x18] sm:$0xff]  ;;  %vm1901_vm3 = vcmask 1045504  }
  0x78   : > { %v12658_v13 = vld [vmem:[%s20177_s0 + $0x20] sm:$0xff]  ;;  %v12659_v14 = vld [vmem:[%s20177_s0 + $0x28] sm:$0xff]  ;;  %v12660_v15 = vld [vmem:[%s20177_s0 + $0x30] sm:$0xff]  ;;  %vm1903_vm4 = vcmask 1045506   ;;  %vm1892_vm5 = vcmask 1045508   ;;  %vm1896_vm6 = vcmask 1043456  }
  0x79   : > { %v12661_v16 = vld [vmem:[%s20177_s0 + $0x38] sm:$0xff]  ;;  %v12662_v17 = vld [vmem:[%s20177_s0 + $0x40] sm:$0xff]  ;;  %v12663_v34 = vld [vmem:[%s20177_s0 + $0x48] sm:$0xff]  ;;  %vm3698_vm7 = vcmask 130048   ;;  %vm5950_vm8 = vcmask 1047556   ;;  %s21253_s23 = sld [smem:[#allocation81_spill]] (%p13032_p9) }
  0x7e   : > { %v655_v1 = vld.sshfl [vmem:[#allocation1] sm:$0xff pattern:$0x73625140]  ;;  %v656_v2 = vld.sshfl [vmem:[#allocation1 + $0x8] sm:$0xff pattern:$0x73625140] }
  0x7f   : > { %v757_v3 = vsel %vm756_vm0, %v655_v1, 0  ;;  %v759_v4 = vsel %vm756_vm0, %v656_v2, 0  ;;  %v657_v5 = vld.sshfl [vmem:[#allocation1 + $0x10] sm:$0xff pattern:$0x73625140] }
  0x80   : > { %772 = vmatpush.bf16.msra.mxu0 %v757_v3  ;;  %941 = vmatpush.bf16.msra.mxu1 %v759_v4  ;;  %v761_v7 = vsel %vm756_vm0, %v657_v5, 0  ;;  %v658_v8 = vld.sshfl [vmem:[#allocation1 + $0x18] sm:$0xff pattern:$0x73625140] }
  0x81   : > { %1110 = vmatpush.bf16.msra.mxu2 %v761_v7  ;;  %v763_v9 = vsel %vm756_vm0, %v658_v8, 0 }
  0x82   : > { %1279 = vmatpush.bf16.msra.mxu3 %v763_v9 }
  0x83   : > { %12062 = vmatmul.msk.bf16.vlgmr.msra.gmra.mxu0 %vm659_vm1, %v12654_v6  ;;  %12094 = vmatmul.msk.bf16.vlgmr.msra.gmra.mxu1 %vm659_vm1, %v12654_v6 }
  0x84   : > { %12126 = vmatmul.msk.bf16.vlgmr.msra.gmra.mxu2 %vm659_vm1, %v12654_v6 }
  0x85   : > { %12158 = vmatmul.msk.bf16.vlgmr.msra.gmra.mxu3 %vm659_vm1, %v12654_v6 }
  0x93   : > { %12063 = vmatmul.msk.bf16.gmra.mxu0 %vm659_vm1, %v12655_v10  ;;  %12095 = vmatmul.msk.bf16.gmra.mxu1 %vm659_vm1, %v12655_v10 }
  0x94   : > { %12127 = vmatmul.msk.bf16.gmra.mxu2 %vm659_vm1, %v12655_v10 }
  0x95   : > { %12159 = vmatmul.msk.bf16.gmra.mxu3 %vm659_vm1, %v12655_v10 }
  0xa3   : > { %12064 = vmatmul.msk.bf16.gmra.mxu0 %vm659_vm1, %v12656_v11  ;;  %12096 = vmatmul.msk.bf16.gmra.mxu1 %vm659_vm1, %v12656_v11 }
  0xa4   : > { %12128 = vmatmul.msk.bf16.gmra.mxu2 %vm659_vm1, %v12656_v11 }
  0xa5   : > { %12160 = vmatmul.msk.bf16.gmra.mxu3 %vm659_vm1, %v12656_v11  ;;  %v12664_v11 = vld [vmem:[%s20177_s0 + $0x50] sm:$0xff] }
  0xb3   : > { %12065 = vmatmul.msk.bf16.gmra.mxu0 %vm659_vm1, %v12657_v12  ;;  %12097 = vmatmul.msk.bf16.gmra.mxu1 %vm659_vm1, %v12657_v12 }
  0xb4   : > { %12129 = vmatmul.msk.bf16.gmra.mxu2 %vm659_vm1, %v12657_v12 }
  0xb5   : > { %12161 = vmatmul.msk.bf16.gmra.mxu3 %vm659_vm1, %v12657_v12 }
  0xc3   : > { %12066 = vmatmul.msk.bf16.gmra.mxu0 %vm659_vm1, %v12658_v13  ;;  %12098 = vmatmul.msk.bf16.gmra.mxu1 %vm659_vm1, %v12658_v13 }
  0xc4   : > { %12130 = vmatmul.msk.bf16.gmra.mxu2 %vm659_vm1, %v12658_v13 }
  0xc5   : > { %12162 = vmatmul.msk.bf16.gmra.mxu3 %vm659_vm1, %v12658_v13 }
  0xd3   : > { %12067 = vmatmul.msk.bf16.gmra.mxu0 %vm659_vm1, %v12659_v14  ;;  %12099 = vmatmul.msk.bf16.gmra.mxu1 %vm659_vm1, %v12659_v14 }
  0xd4   : > { %12131 = vmatmul.msk.bf16.gmra.mxu2 %vm659_vm1, %v12659_v14 }
  0xd5   : > { %12163 = vmatmul.msk.bf16.gmra.mxu3 %vm659_vm1, %v12659_v14 }
  0xe3   : > { %12068 = vmatmul.msk.bf16.gmra.mxu0 %vm659_vm1, %v12660_v15  ;;  %12100 = vmatmul.msk.bf16.gmra.mxu1 %vm659_vm1, %v12660_v15 }
  0xe4   : > { %12132 = vmatmul.msk.bf16.gmra.mxu2 %vm659_vm1, %v12660_v15 }
  0xe5   : > { %12164 = vmatmul.msk.bf16.gmra.mxu3 %vm659_vm1, %v12660_v15 }
  0xf3   : > { %12069 = vmatmul.msk.bf16.gmra.mxu0 %vm659_vm1, %v12661_v16  ;;  %12101 = vmatmul.msk.bf16.gmra.mxu1 %vm659_vm1, %v12661_v16 }
  0xf4   : > { %12133 = vmatmul.msk.bf16.gmra.mxu2 %vm659_vm1, %v12661_v16 }
  0xf5   : > { %12165 = vmatmul.msk.bf16.gmra.mxu3 %vm659_vm1, %v12661_v16 }
 0x100   : > { %v774_v18 = vpop.f32.mrf.mxu0  ;;  %v943_v19 = vpop.f32.mrf.mxu1 }
 0x101   : > { %v1441_v20 = vpack.c.bf16 %v943_v19, %v774_v18 }
 0x103   : > { %v1697_v21 = vrot.slane %v1441_v20, 2  ;;  %12070 = vmatmul.msk.bf16.gmra.mxu0 %vm659_vm1, %v12662_v17  ;;  %12102 = vmatmul.msk.bf16.gmra.mxu1 %vm659_vm1, %v12662_v17 }
 0x104   : > { %12134 = vmatmul.msk.bf16.gmra.mxu2 %vm659_vm1, %v12662_v17 }
 0x105   : > { %v1900_v22 = vsel %vm1899_vm2, %v1441_v20, %v1697_v21  ;;  %12166 = vmatmul.msk.bf16.gmra.mxu3 %vm659_vm1, %v12662_v17  ;;  %v1891_v43 = vsel %vm756_vm0, %v1441_v20, %v1697_v21 }
 0x107   : > { %v1112_v23 = vpop.f32.mrf.mxu2 }
 0x108   : > { %v1281_v24 = vpop.f32.mrf.mxu3  ;;  %v776_v25 = vpop.f32.mrf.mxu0 }
 0x109   : > { %v1442_v26 = vpack.c.bf16 %v1281_v24, %v1112_v23  ;;  %v945_v27 = vpop.f32.mrf.mxu1 }
 0x10a   : > { %v1443_v28 = vpack.c.bf16 %v945_v27, %v776_v25 }
 0x10b   : > { %v1698_v29 = vrot.slane %v1442_v26, 4  ;;  %v1699_v30 = vrot.slane %v1442_v26, 6 }
 0x10c   : > { %v1700_v37 = vrot.slane %v1443_v28, 2 }
 0x10d   : > { %v1902_v31 = vsel %vm1901_vm3, %v1699_v30, %v1698_v29  ;;  %v1895_v44 = vsel %vm1892_vm5, %v1698_v29, %v1699_v30 }
 0x10e   : > { %v1904_v32 = vsel %vm1903_vm4, %v1900_v22, %v1902_v31  ;;  %v1909_v46 = vsel %vm756_vm0, %v1443_v28, %v1700_v37  ;;  %v1915_v47 = vsel %vm1899_vm2, %v1443_v28, %v1700_v37  ;;  %v1897_v54 = vsel %vm1896_vm6, %v1891_v43, %v1895_v44 }
 0x10f   : > { %v1114_v33 = vpop.f32.mrf.mxu2  ;;  %v1906_v50 = vrot.slane %v1904_v32, 2  ;;  %v2727_v60 = vunpack.i.h.s16 %v1897_v54 }
 0x110   : > { %v1283_v35 = vpop.f32.mrf.mxu3  ;;  %v779_v36 = vpop.f32.mrf.mxu0 }
 0x111   : > { %v1444_v38 = vpack.c.bf16 %v1283_v35, %v1114_v33  ;;  %v948_v39 = vpop.f32.mrf.mxu1  ;;  %v2732_v61 = vunpack.i.h.s16 %v1906_v50  ;;  %v12190_v4 = vpack.c.b16 %v2727_v60, %v1897_v54 }
 0x112   : > { %v1445_v40 = vpack.c.bf16 %v948_v39, %v779_v36 }
 0x113   : > { %v1701_v41 = vrot.slane %v1444_v38, 4  ;;  %v1702_v42 = vrot.slane %v1444_v38, 6  ;;  %12071 = vmatmul.msk.bf16.gmra.mxu0 %vm659_vm1, %v12663_v34  ;;  %12103 = vmatmul.msk.bf16.gmra.mxu1 %vm659_vm1, %v12663_v34  ;;  %v13282_v5 = vpack.c.b16 %v2732_v61, %v1906_v50  ;;  %v2730_v20 = vunpack.i.h.s16 %v12190_v4 }
 0x114   : > { %v1703_v45 = vrot.slane %v1445_v40, 2  ;;  %12135 = vmatmul.msk.bf16.gmra.mxu2 %vm659_vm1, %v12663_v34 }
 0x115   : > { %v1912_v48 = vsel %vm1892_vm5, %v1701_v41, %v1702_v42  ;;  %v1916_v49 = vsel %vm1901_vm3, %v1702_v42, %v1701_v41  ;;  %12167 = vmatmul.msk.bf16.gmra.mxu3 %vm659_vm1, %v12663_v34  ;;  %v2735_v21 = vunpack.i.h.s16 %v13282_v5 }
 0x116   : > { %v1913_v51 = vsel %vm1896_vm6, %v1909_v46, %v1912_v48  ;;  %v13275_v52 = vsel %vm1903_vm4, %v1915_v47, %v1916_v49  ;;  %v1928_v53 = vsel %vm1899_vm2, %v1445_v40, %v1703_v45  ;;  %v1922_v1 = vsel %vm756_vm0, %v1445_v40, %v1703_v45 }
 0x117   : > { %v1117_v55 = vpop.f32.mrf.mxu2  ;;  %v1919_v12 = vrot.slane %v13275_v52, 2  ;;  %v2737_v27 = vunpack.i.h.s16 %v1913_v51 }
 0x118   : > { %v1286_v56 = vpop.f32.mrf.mxu3  ;;  %v781_v57 = vpop.f32.mrf.mxu0 }
 0x119   : > { %v1446_v58 = vpack.c.bf16 %v1286_v56, %v1117_v55  ;;  %v950_v59 = vpop.f32.mrf.mxu1  ;;  %v2742_v28 = vunpack.i.h.s16 %v1919_v12  ;;  %v13315_v43 = vpack.c.b16 %v2737_v27, %v1913_v51 }
 0x11a   : > { %v1447_v62 = vpack.c.bf16 %v950_v59, %v781_v57 }
 0x11b   : > { %v1704_v63 = vrot.slane %v1446_v58, 4  ;;  %v1705_v0 = vrot.slane %v1446_v58, 6  ;;  %20404 = vst [vmem:[#allocation18_spill] sm:$0xff] %v13315_v43  ;;  %v13317_v50 = vpack.c.b16 %v2742_v28, %v1919_v12  ;;  %v2740_v57 = vunpack.i.h.s16 %v13315_v43 }
 0x11c   : > { %v1706_v17 = vrot.slane %v1447_v62, 2 }
 0x11d   : > { %v1925_v2 = vsel %vm1892_vm5, %v1704_v63, %v1705_v0  ;;  %v1929_v3 = vsel %vm1901_vm3, %v1705_v0, %v1704_v63  ;;  %20405 = vst [vmem:[#allocation19_spill] sm:$0xff] %v13317_v50  ;;  %v2745_v61 = vunpack.i.h.s16 %v13317_v50 }
 0x11e   : > { %v1926_v6 = vsel %vm1896_vm6, %v1922_v1, %v1925_v2  ;;  %v1930_v7 = vsel %vm1903_vm4, %v1928_v53, %v1929_v3  ;;  %v1935_v34 = vsel %vm756_vm0, %v1447_v62, %v1706_v17  ;;  %v1941_v35 = vsel %vm1899_vm2, %v1447_v62, %v1706_v17  ;;  %v12665_v3 = vld [vmem:[%s20177_s0 + $0x58] sm:$0xff] }
 0x11f   : > { %v1932_v8 = vrot.slane %v1930_v7, 2  ;;  %v2747_v9 = vunpack.i.h.s16 %v1926_v6  ;;  %v1119_v10 = vpop.f32.mrf.mxu2 }
 0x120   : > { %v1288_v13 = vpop.f32.mrf.mxu3  ;;  %v784_v14 = vpop.f32.mrf.mxu0 }
 0x121   : > { %v12194_v15 = vpack.c.b16 %v2747_v9, %v1926_v6  ;;  %v2752_v16 = vunpack.i.h.s16 %v1932_v8  ;;  %v1448_v18 = vpack.c.bf16 %v1288_v13, %v1119_v10  ;;  %v953_v19 = vpop.f32.mrf.mxu1 }
 0x122   : > { %v13291_v22 = vpack.c.bf16 %v953_v19, %v784_v14 }
 0x123   : > { %v2750_v23 = vunpack.i.h.s16 %v12194_v15  ;;  %v13293_v24 = vpack.c.b16 %v2752_v16, %v1932_v8  ;;  %v12322_v25 = vpack.i.b16 %v12194_v15, %v12190_v4  ;;  %v1707_v26 = vrot.slane %v1448_v18, 4  ;;  %12072 = vmatmul.msk.bf16.gmra.mxu0 %vm659_vm1, %v12664_v11  ;;  %12104 = vmatmul.msk.bf16.gmra.mxu1 %vm659_vm1, %v12664_v11 }
 0x124   : > { %v1708_v29 = vrot.slane %v1448_v18, 6  ;;  %v1709_v30 = vrot.slane %v13291_v22, 2  ;;  %12136 = vmatmul.msk.bf16.gmra.mxu2 %vm659_vm1, %v12664_v11 }
 0x125   : > { %v2755_v31 = vunpack.i.h.s16 %v13293_v24  ;;  %v13300_v32 = vpack.i.b16 %v2750_v23, %v2730_v20  ;;  %3436 = vst [vmem:[#allocation1] ss:$9 sm:$0xff] %v12322_v25  ;;  %12168 = vmatmul.msk.bf16.gmra.mxu3 %vm659_vm1, %v12664_v11 }
 0x126   : > { %v1938_v36 = vsel %vm1892_vm5, %v1707_v26, %v1708_v29  ;;  %v1942_v37 = vsel %vm1901_vm3, %v1708_v29, %v1707_v26  ;;  %v1954_v38 = vsel %vm1899_vm2, %v13291_v22, %v1709_v30  ;;  %v1948_v20 = vsel %vm756_vm0, %v13291_v22, %v1709_v30 }
 0x127   : > { %v13311_v39 = vpack.i.b16 %v2755_v31, %v2735_v21  ;;  %v1939_v40 = vsel %vm1896_vm6, %v1935_v34, %v1938_v36  ;;  %v1943_v41 = vsel %vm1903_vm4, %v1941_v35, %v1942_v37  ;;  %v1122_v42 = vpop.f32.mrf.mxu2 }
 0x128   : > { %v1945_v44 = vrot.slane %v1943_v41, 2  ;;  %v2757_v45 = vunpack.i.h.s16 %v1939_v40  ;;  %v1291_v46 = vpop.f32.mrf.mxu3  ;;  %v786_v47 = vpop.f32.mrf.mxu0 }
 0x129   : > { %v1450_v48 = vpack.c.bf16 %v1291_v46, %v1122_v42  ;;  %v955_v49 = vpop.f32.mrf.mxu1 }
 0x12a   : > { %v13319_v52 = vpack.c.b16 %v2757_v45, %v1939_v40  ;;  %v2762_v53 = vunpack.i.h.s16 %v1945_v44  ;;  %v1451_v54 = vpack.c.bf16 %v955_v49, %v786_v47 }
 0x12b   : > { %v1710_v55 = vrot.slane %v1450_v48, 4  ;;  %v1711_v56 = vrot.slane %v1450_v48, 6 }
 0x12c   : > { %20406 = vst [vmem:[#allocation20_spill] sm:$0xff] %v13319_v52  ;;  %v2760_v58 = vunpack.i.h.s16 %v13319_v52  ;;  %v13323_v51 = vpack.c.b16 %v2762_v53, %v1945_v44  ;;  %v1712_v8 = vrot.slane %v1451_v54, 2 }
 0x12d   : > { %v1955_v60 = vsel %vm1901_vm3, %v1711_v56, %v1710_v55  ;;  %v1951_v14 = vsel %vm1892_vm5, %v1710_v55, %v1711_v56 }
 0x12e   : > { %20407 = vst [vmem:[#allocation21_spill] sm:$0xff] %v13323_v51  ;;  %v2765_v62 = vunpack.i.h.s16 %v13323_v51  ;;  %v13330_v63 = vpack.i.b16 %v2760_v58, %v2740_v57  ;;  %v1956_v1 = vsel %vm1903_vm4, %v1954_v38, %v1955_v60  ;;  %v1961_v16 = vsel %vm756_vm0, %v1451_v54, %v1712_v8 }
 0x12f   : > { %v1124_v2 = vpop.f32.mrf.mxu2  ;;  %v1967_v17 = vsel %vm1899_vm2, %v1451_v54, %v1712_v8  ;;  %v1958_v21 = vrot.slane %v1956_v1, 2  ;;  %v1952_v26 = vsel %vm1896_vm6, %v1948_v20, %v1951_v14  ;;  %v12666_v54 = vld [vmem:[%s20177_s0 + $0x60] sm:$0xff] }
 0x130   : > { %20408 = vst [vmem:[#allocation22_spill] sm:$0xff] %v13330_v63  ;;  %v13338_v4 = vpack.i.b16 %v2765_v62, %v2745_v61  ;;  %v1293_v6 = vpop.f32.mrf.mxu3  ;;  %v789_v7 = vpop.f32.mrf.mxu0  ;;  %v2767_v36 = vunpack.i.h.s16 %v1952_v26 }
 0x131   : > { %v1452_v9 = vpack.c.bf16 %v1293_v6, %v1124_v2  ;;  %v958_v10 = vpop.f32.mrf.mxu1  ;;  %v2772_v37 = vunpack.i.h.s16 %v1958_v21 }
 0x132   : > { %20409 = vst [vmem:[#allocation23_spill] sm:$0xff] %v13338_v4  ;;  %v1453_v11 = vpack.c.bf16 %v958_v10, %v789_v7  ;;  %v12198_v44 = vpack.c.b16 %v2767_v36, %v1952_v26 }
 0x133   : > { %v1713_v12 = vrot.slane %v1452_v9, 4  ;;  %v1714_v13 = vrot.slane %v1452_v9, 6  ;;  %12073 = vmatmul.msk.bf16.gmra.mxu0 %vm659_vm1, %v12665_v3  ;;  %12105 = vmatmul.msk.bf16.gmra.mxu1 %vm659_vm1, %v12665_v3  ;;  %v13360_v45 = vpack.c.b16 %v2772_v37, %v1958_v21 }
 0x134   : > { %v1715_v15 = vrot.slane %v1453_v11, 2  ;;  %12137 = vmatmul.msk.bf16.gmra.mxu2 %vm659_vm1, %v12665_v3  ;;  %v2770_v2 = vunpack.i.h.s16 %v12198_v44 }
 0x135   : > { %v1964_v18 = vsel %vm1892_vm5, %v1713_v12, %v1714_v13  ;;  %v1968_v19 = vsel %vm1901_vm3, %v1714_v13, %v1713_v12  ;;  %12169 = vmatmul.msk.bf16.gmra.mxu3 %vm659_vm1, %v12665_v3  ;;  %v2775_v3 = vunpack.i.h.s16 %v13360_v45 }
 0x136   : > { %v1965_v23 = vsel %vm1896_vm6, %v1961_v16, %v1964_v18  ;;  %v13353_v25 = vsel %vm1903_vm4, %v1967_v17, %v1968_v19  ;;  %v1980_v27 = vsel %vm1899_vm2, %v1453_v11, %v1715_v15  ;;  %v1974_v30 = vsel %vm756_vm0, %v1453_v11, %v1715_v15 }
 0x137   : > { %v1127_v28 = vpop.f32.mrf.mxu2  ;;  %v1971_v55 = vrot.slane %v13353_v25, 2  ;;  %v2777_v11 = vunpack.i.h.s16 %v1965_v23 }
 0x138   : > { %v1296_v29 = vpop.f32.mrf.mxu3  ;;  %v791_v31 = vpop.f32.mrf.mxu0 }
 0x139   : > { %v1454_v34 = vpack.c.bf16 %v1296_v29, %v1127_v28  ;;  %v960_v35 = vpop.f32.mrf.mxu1  ;;  %v2782_v12 = vunpack.i.h.s16 %v1971_v55 }
 0x13a   : > { %v1455_v38 = vpack.c.bf16 %v960_v35, %v791_v31  ;;  %v13393_v31 = vpack.c.b16 %v2777_v11, %v1965_v23 }
 0x13b   : > { %v1716_v40 = vrot.slane %v1454_v34, 4  ;;  %v1717_v22 = vrot.slane %v1454_v34, 6 }
 0x13c   : > { %v1718_v61 = vrot.slane %v1455_v38, 2  ;;  %20410 = vst [vmem:[#allocation24_spill] sm:$0xff] %v13393_v31 }
 0x13d   : > { %v1977_v41 = vsel %vm1892_vm5, %v1716_v40, %v1717_v22  ;;  %v1981_v42 = vsel %vm1901_vm3, %v1717_v22, %v1716_v40  ;;  %v13395_v22 = vpack.c.b16 %v2782_v12, %v1971_v55 }
 0x13e   : > { %v1978_v46 = vsel %vm1896_vm6, %v1974_v30, %v1977_v41  ;;  %v1982_v47 = vsel %vm1903_vm4, %v1980_v27, %v1981_v42  ;;  %v1987_v18 = vsel %vm756_vm0, %v1455_v38, %v1718_v61  ;;  %v1993_v19 = vsel %vm1899_vm2, %v1455_v38, %v1718_v61  ;;  %v12667_v61 = vld [vmem:[%s20177_s0 + $0x68] sm:$0xff] }
 0x13f   : > { %v1984_v48 = vrot.slane %v1982_v47, 2  ;;  %v2787_v49 = vunpack.i.h.s16 %v1978_v46  ;;  %v1129_v53 = vpop.f32.mrf.mxu2  ;;  %20411 = vst [vmem:[#allocation25_spill] sm:$0xff] %v13395_v22  ;;  %v2780_v47 = vunpack.i.h.s16 %v13393_v31 }
 0x140   : > { %v1298_v56 = vpop.f32.mrf.mxu3  ;;  %v794_v57 = vpop.f32.mrf.mxu0 }
 0x141   : > { %v12202_v58 = vpack.c.b16 %v2787_v49, %v1978_v46  ;;  %v2792_v60 = vunpack.i.h.s16 %v1984_v48  ;;  %v1456_v62 = vpack.c.bf16 %v1298_v56, %v1129_v53  ;;  %v963_v1 = vpop.f32.mrf.mxu1 }
 0x142   : > { %v13369_v6 = vpack.c.bf16 %v963_v1, %v794_v57 }
 0x143   : > { %v2790_v7 = vunpack.i.h.s16 %v12202_v58  ;;  %v13371_v8 = vpack.c.b16 %v2792_v60, %v1984_v48  ;;  %v12326_v9 = vpack.i.b16 %v12202_v58, %v12198_v44  ;;  %v1719_v10 = vrot.slane %v1456_v62, 4  ;;  %12074 = vmatmul.msk.bf16.gmra.mxu0 %vm659_vm1, %v12666_v54  ;;  %12106 = vmatmul.msk.bf16.gmra.mxu1 %vm659_vm1, %v12666_v54 }
 0x144   : > { %v1720_v13 = vrot.slane %v1456_v62, 6  ;;  %v1721_v14 = vrot.slane %v13369_v6, 2  ;;  %12138 = vmatmul.msk.bf16.gmra.mxu2 %vm659_vm1, %v12666_v54 }
 0x145   : > { %v2795_v15 = vunpack.i.h.s16 %v13371_v8  ;;  %v13378_v16 = vpack.i.b16 %v2790_v7, %v2770_v2  ;;  %3439 = vst [vmem:[#allocation1 + $0x1] ss:$9 sm:$0xff] %v12326_v9  ;;  %12170 = vmatmul.msk.bf16.gmra.mxu3 %vm659_vm1, %v12666_v54  ;;  %v2785_v54 = vunpack.i.h.s16 %v13395_v22 }
 0x146   : > { %v1990_v20 = vsel %vm1892_vm5, %v1719_v10, %v1720_v13  ;;  %v1994_v21 = vsel %vm1901_vm3, %v1720_v13, %v1719_v10  ;;  %v2006_v25 = vsel %vm1899_vm2, %v13369_v6, %v1721_v14 }
 0x147   : > { %v13389_v26 = vpack.i.b16 %v2795_v15, %v2775_v3  ;;  %v1991_v27 = vsel %vm1896_vm6, %v1987_v18, %v1990_v20  ;;  %v1995_v28 = vsel %vm1903_vm4, %v1993_v19, %v1994_v21  ;;  %v1132_v29 = vpop.f32.mrf.mxu2 }
 0x148   : > { %v1997_v34 = vrot.slane %v1995_v28, 2  ;;  %v2797_v35 = vunpack.i.h.s16 %v1991_v27  ;;  %v1301_v36 = vpop.f32.mrf.mxu3  ;;  %v796_v37 = vpop.f32.mrf.mxu0 }
 0x149   : > { %v1458_v38 = vpack.c.bf16 %v1301_v36, %v1132_v29  ;;  %v965_v40 = vpop.f32.mrf.mxu1 }
 0x14a   : > { %v13397_v30 = vpack.c.b16 %v2797_v35, %v1991_v27  ;;  %v2802_v41 = vunpack.i.h.s16 %v1997_v34  ;;  %v1459_v42 = vpack.c.bf16 %v965_v40, %v796_v37 }
 0x14b   : > { %v1722_v44 = vrot.slane %v1458_v38, 4  ;;  %v1723_v46 = vrot.slane %v1458_v38, 6 }
 0x14c   : > { %20412 = vst [vmem:[#allocation26_spill] sm:$0xff] %v13397_v30  ;;  %v2800_v48 = vunpack.i.h.s16 %v13397_v30  ;;  %v13401_v23 = vpack.c.b16 %v2802_v41, %v1997_v34  ;;  %v1724_v3 = vrot.slane %v1459_v42, 2 }
 0x14d   : > { %v2007_v53 = vsel %vm1901_vm3, %v1723_v46, %v1722_v44  ;;  %v2003_v13 = vsel %vm1892_vm5, %v1722_v44, %v1723_v46 }
 0x14e   : > { %20413 = vst [vmem:[#allocation27_spill] sm:$0xff] %v13401_v23  ;;  %v2805_v55 = vunpack.i.h.s16 %v13401_v23  ;;  %v13408_v56 = vpack.i.b16 %v2800_v48, %v2780_v47  ;;  %v2008_v58 = vsel %vm1903_vm4, %v2006_v25, %v2007_v53  ;;  %v2013_v18 = vsel %vm756_vm0, %v1459_v42, %v1724_v3 }
 0x14f   : > { %v1134_v60 = vpop.f32.mrf.mxu2  ;;  %v2019_v19 = vsel %vm1899_vm2, %v1459_v42, %v1724_v3  ;;  %v2000_v25 = vsel %vm756_vm0, %v13369_v6, %v1721_v14  ;;  %v2010_v27 = vrot.slane %v2008_v58, 2  ;;  %v12668_v3 = vld [vmem:[%s20177_s0 + $0x70] sm:$0xff] }
 0x150   : > { %20414 = vst [vmem:[#allocation28_spill] sm:$0xff] %v13408_v56  ;;  %v13416_v62 = vpack.i.b16 %v2805_v55, %v2785_v54  ;;  %v1303_v1 = vpop.f32.mrf.mxu3  ;;  %v799_v2 = vpop.f32.mrf.mxu0  ;;  %v2004_v34 = vsel %vm1896_vm6, %v2000_v25, %v2003_v13 }
 0x151   : > { %v1460_v7 = vpack.c.bf16 %v1303_v1, %v1134_v60  ;;  %v968_v9 = vpop.f32.mrf.mxu1  ;;  %v2807_v42 = vunpack.i.h.s16 %v2004_v34  ;;  %v2812_v44 = vunpack.i.h.s16 %v2010_v27 }
 0x152   : > { %20415 = vst [vmem:[#allocation29_spill] sm:$0xff] %v13416_v62  ;;  %v1461_v10 = vpack.c.bf16 %v968_v9, %v799_v2 }
 0x153   : > { %v1725_v11 = vrot.slane %v1460_v7, 4  ;;  %v1726_v12 = vrot.slane %v1460_v7, 6  ;;  %12075 = vmatmul.msk.bf16.gmra.mxu0 %vm659_vm1, %v12667_v61  ;;  %12107 = vmatmul.msk.bf16.gmra.mxu1 %vm659_vm1, %v12667_v61  ;;  %v12206_v54 = vpack.c.b16 %v2807_v42, %v2004_v34  ;;  %v13438_v55 = vpack.c.b16 %v2812_v44, %v2010_v27 }
 0x154   : > { %v1727_v15 = vrot.slane %v1461_v10, 2  ;;  %12139 = vmatmul.msk.bf16.gmra.mxu2 %vm659_vm1, %v12667_v61 }
 0x155   : > { %v2016_v20 = vsel %vm1892_vm5, %v1725_v11, %v1726_v12  ;;  %v2020_v21 = vsel %vm1901_vm3, %v1726_v12, %v1725_v11  ;;  %12171 = vmatmul.msk.bf16.gmra.mxu3 %vm659_vm1, %v12667_v61 }
 0x156   : > { %v2017_v28 = vsel %vm1896_vm6, %v2013_v18, %v2016_v20  ;;  %v13431_v29 = vsel %vm1903_vm4, %v2019_v19, %v2020_v21  ;;  %v2032_v35 = vsel %vm1899_vm2, %v1461_v10, %v1727_v15  ;;  %v2026_v14 = vsel %vm756_vm0, %v1461_v10, %v1727_v15 }
 0x157   : > { %v1137_v36 = vpop.f32.mrf.mxu2  ;;  %v2023_v7 = vrot.slane %v13431_v29, 2  ;;  %v2810_v19 = vunpack.i.h.s16 %v12206_v54  ;;  %v2815_v20 = vunpack.i.h.s16 %v13438_v55  ;;  %v2817_v29 = vunpack.i.h.s16 %v2017_v28 }
 0x158   : > { %v1306_v37 = vpop.f32.mrf.mxu3  ;;  %v801_v38 = vpop.f32.mrf.mxu0 }
 0x159   : > { %v1462_v40 = vpack.c.bf16 %v1306_v37, %v1137_v36  ;;  %v970_v41 = vpop.f32.mrf.mxu1  ;;  %v2822_v36 = vunpack.i.h.s16 %v2023_v7 }
 0x15a   : > { %v1463_v46 = vpack.c.bf16 %v970_v41, %v801_v38 }
 0x15b   : > { %v1728_v47 = vrot.slane %v1462_v40, 4  ;;  %v1729_v6 = vrot.slane %v1462_v40, 6 }
 0x15c   : > { %v1730_v13 = vrot.slane %v1463_v46, 2 }
 0x15d   : > { %v2029_v48 = vsel %vm1892_vm5, %v1728_v47, %v1729_v6  ;;  %v2033_v53 = vsel %vm1901_vm3, %v1729_v6, %v1728_v47 }
 0x15e   : > { %v2030_v58 = vsel %vm1896_vm6, %v2026_v14, %v2029_v48  ;;  %v2034_v60 = vsel %vm1903_vm4, %v2032_v35, %v2033_v53  ;;  %v2039_v44 = vsel %vm756_vm0, %v1463_v46, %v1730_v13  ;;  %v2045_v47 = vsel %vm1899_vm2, %v1463_v46, %v1730_v13 }
 0x15f   : > { %v2036_v61 = vrot.slane %v2034_v60, 2  ;;  %v2827_v1 = vunpack.i.h.s16 %v2030_v58  ;;  %v1139_v2 = vpop.f32.mrf.mxu2 }
 0x160   : > { %v1308_v9 = vpop.f32.mrf.mxu3  ;;  %v804_v10 = vpop.f32.mrf.mxu0 }
 0x161   : > { %v12210_v11 = vpack.c.b16 %v2827_v1, %v2030_v58  ;;  %v2832_v12 = vunpack.i.h.s16 %v2036_v61  ;;  %v1464_v15 = vpack.c.bf16 %v1308_v9, %v1139_v2  ;;  %v973_v18 = vpop.f32.mrf.mxu1 }
 0x162   : > { %v13447_v21 = vpack.c.bf16 %v973_v18, %v804_v10 }
 0x163   : > { %v2830_v25 = vunpack.i.h.s16 %v12210_v11  ;;  %v13449_v27 = vpack.c.b16 %v2832_v12, %v2036_v61  ;;  %v12330_v34 = vpack.i.b16 %v12210_v11, %v12206_v54  ;;  %v1731_v35 = vrot.slane %v1464_v15, 4  ;;  %12076 = vmatmul.msk.bf16.gmra.mxu0 %vm659_vm1, %v12668_v3  ;;  %12108 = vmatmul.msk.bf16.gmra.mxu1 %vm659_vm1, %v12668_v3 }
 0x164   : > { %v1732_v37 = vrot.slane %v1464_v15, 6  ;;  %v1733_v38 = vrot.slane %v13447_v21, 2  ;;  %12140 = vmatmul.msk.bf16.gmra.mxu2 %vm659_vm1, %v12668_v3  ;;  %v13471_v61 = vpack.c.b16 %v2817_v29, %v2017_v28  ;;  %v13473_v11 = vpack.c.b16 %v2822_v36, %v2023_v7 }
 0x165   : > { %v2835_v40 = vunpack.i.h.s16 %v13449_v27  ;;  %v13456_v41 = vpack.i.b16 %v2830_v25, %v2810_v19  ;;  %3442 = vst [vmem:[#allocation1 + $0x2] ss:$9 sm:$0xff] %v12330_v34  ;;  %12172 = vmatmul.msk.bf16.gmra.mxu3 %vm659_vm1, %v12668_v3 }
 0x166   : > { %v2042_v6 = vsel %vm1892_vm5, %v1731_v35, %v1732_v37  ;;  %v2046_v14 = vsel %vm1901_vm3, %v1732_v37, %v1731_v35  ;;  %v2058_v48 = vsel %vm1899_vm2, %v13447_v21, %v1733_v38  ;;  %20416 = vst [vmem:[#allocation30_spill] sm:$0xff] %v13471_v61  ;;  %v2825_v7 = vunpack.i.h.s16 %v13473_v11 }
 0x167   : > { %v13467_v53 = vpack.i.b16 %v2835_v40, %v2815_v20  ;;  %v2043_v54 = vsel %vm1896_vm6, %v2039_v44, %v2042_v6  ;;  %v2047_v58 = vsel %vm1903_vm4, %v2045_v47, %v2046_v14  ;;  %v1142_v60 = vpop.f32.mrf.mxu2  ;;  %20417 = vst [vmem:[#allocation31_spill] sm:$0xff] %v13473_v11  ;;  %v2820_v20 = vunpack.i.h.s16 %v13471_v61  ;;  %v12669_v47 = vld [vmem:[%s20177_s0 + $0x78] sm:$0xff] }
 0x168   : > { %v2049_v1 = vrot.slane %v2047_v58, 2  ;;  %v2837_v2 = vunpack.i.h.s16 %v2043_v54  ;;  %v1311_v3 = vpop.f32.mrf.mxu3  ;;  %v806_v46 = vpop.f32.mrf.mxu0 }
 0x169   : > { %v1466_v9 = vpack.c.bf16 %v1311_v3, %v1142_v60  ;;  %v975_v10 = vpop.f32.mrf.mxu1 }
 0x16a   : > { %v13475_v12 = vpack.c.b16 %v2837_v2, %v2043_v54  ;;  %v2842_v13 = vunpack.i.h.s16 %v2049_v1  ;;  %v1467_v15 = vpack.c.bf16 %v975_v10, %v806_v46 }
 0x16b   : > { %v1734_v18 = vrot.slane %v1466_v9, 4  ;;  %v1735_v19 = vrot.slane %v1466_v9, 6 }
 0x16c   : > { %20418 = vst [vmem:[#allocation32_spill] sm:$0xff] %v13475_v12  ;;  %v2840_v25 = vunpack.i.h.s16 %v13475_v12  ;;  %v13479_v28 = vpack.c.b16 %v2842_v13, %v2049_v1  ;;  %v1736_v58 = vrot.slane %v1467_v15, 2 }
 0x16d   : > { %v2059_v35 = vsel %vm1901_vm3, %v1735_v19, %v1734_v18 }
 0x16e   : > { %20419 = vst [vmem:[#allocation33_spill] sm:$0xff] %v13479_v28  ;;  %v2845_v29 = vunpack.i.h.s16 %v13479_v28  ;;  %v13486_v36 = vpack.i.b16 %v2840_v25, %v2820_v20  ;;  %v2060_v40 = vsel %vm1903_vm4, %v2058_v48, %v2059_v35  ;;  %v2055_v48 = vsel %vm1892_vm5, %v1734_v18, %v1735_v19 }
 0x16f   : > { %v1144_v44 = vpop.f32.mrf.mxu2  ;;  %v2065_v10 = vsel %vm756_vm0, %v1467_v15, %v1736_v58  ;;  %v2071_v13 = vsel %vm1899_vm2, %v1467_v15, %v1736_v58  ;;  %v2052_v35 = vsel %vm756_vm0, %v13447_v21, %v1733_v38 }
 0x170   : > { %20420 = vst [vmem:[#allocation34_spill] sm:$0xff] %v13486_v36  ;;  %v13494_v6 = vpack.i.b16 %v2845_v29, %v2825_v7  ;;  %v1313_v14 = vpop.f32.mrf.mxu3  ;;  %v809_v54 = vpop.f32.mrf.mxu0  ;;  %v2062_v7 = vrot.slane %v2060_v40, 2  ;;  %v2056_v19 = vsel %vm1896_vm6, %v2052_v35, %v2055_v48 }
 0x171   : > { %v1468_v60 = vpack.c.bf16 %v1313_v14, %v1144_v44  ;;  %v978_v1 = vpop.f32.mrf.mxu1 }
 0x172   : > { %20421 = vst [vmem:[#allocation35_spill] sm:$0xff] %v13494_v6  ;;  %v1469_v2 = vpack.c.bf16 %v978_v1, %v809_v54  ;;  %v2847_v1 = vunpack.i.h.s16 %v2056_v19 }
 0x173   : > { %v1737_v3 = vrot.slane %v1468_v60, 4  ;;  %v1738_v46 = vrot.slane %v1468_v60, 6  ;;  %12077 = vmatmul.msk.bf16.gmra.mxu0 %vm659_vm1, %v12669_v47  ;;  %12109 = vmatmul.msk.bf16.gmra.mxu1 %vm659_vm1, %v12669_v47 }
 0x174   : > { %v1739_v9 = vrot.slane %v1469_v2, 2  ;;  %12141 = vmatmul.msk.bf16.gmra.mxu2 %vm659_vm1, %v12669_v47 }
 0x175   : > { %v2068_v20 = vsel %vm1892_vm5, %v1737_v3, %v1738_v46  ;;  %v2072_v25 = vsel %vm1901_vm3, %v1738_v46, %v1737_v3  ;;  %12173 = vmatmul.msk.bf16.gmra.mxu3 %vm659_vm1, %v12669_v47  ;;  %v2852_v47 = vunpack.i.h.s16 %v2062_v7 }
 0x176   : > { %v2069_v29 = vsel %vm1896_vm6, %v2065_v10, %v2068_v20  ;;  %v13509_v18 = vsel %vm1903_vm4, %v2071_v13, %v2072_v25  ;;  %v2084_v44 = vsel %vm1899_vm2, %v1469_v2, %v1739_v9  ;;  %v2078_v38 = vsel %vm756_vm0, %v1469_v2, %v1739_v9 }
 0x177   : > { %v1147_v15 = vpop.f32.mrf.mxu2  ;;  %v12214_v13 = vpack.c.b16 %v2847_v1, %v2056_v19  ;;  %v13516_v48 = vpack.c.b16 %v2852_v47, %v2062_v7  ;;  %v2075_v2 = vrot.slane %v13509_v18, 2  ;;  %v2857_v18 = vunpack.i.h.s16 %v2069_v29 }
 0x178   : > { %v1316_v14 = vpop.f32.mrf.mxu3  ;;  %v811_v54 = vpop.f32.mrf.mxu0 }
 0x179   : > { %v1470_v58 = vpack.c.bf16 %v1316_v14, %v1147_v15  ;;  %v980_v60 = vpop.f32.mrf.mxu1  ;;  %v2850_v47 = vunpack.i.h.s16 %v12214_v13  ;;  %v13549_v57 = vpack.c.b16 %v2857_v18, %v2069_v29 }
 0x17a   : > { %v1471_v3 = vpack.c.bf16 %v980_v60, %v811_v54  ;;  %v12670_v54 = vld [vmem:[%s20177_s0 + $0x80] sm:$0xff] }
 0x17b   : > { %v1740_v46 = vrot.slane %v1470_v58, 4  ;;  %v1741_v21 = vrot.slane %v1470_v58, 6  ;;  %20423 = vst [vmem:[#allocation37_spill] sm:$0xff] %v13549_v57 }
 0x17c   : > { %v1742_v19 = vrot.slane %v1471_v3, 2 }
 0x17d   : > { %v2081_v40 = vsel %vm1892_vm5, %v1740_v46, %v1741_v21  ;;  %v2085_v10 = vsel %vm1901_vm3, %v1741_v21, %v1740_v46  ;;  %v2855_v21 = vunpack.i.h.s16 %v13516_v48 }
 0x17e   : > { %v2082_v20 = vsel %vm1896_vm6, %v2078_v38, %v2081_v40  ;;  %v2086_v25 = vsel %vm1903_vm4, %v2084_v44, %v2085_v10 }
 0x17f   : > { %v2088_v35 = vrot.slane %v2086_v25, 2  ;;  %v2867_v15 = vunpack.i.h.s16 %v2082_v20  ;;  %v1149_v14 = vpop.f32.mrf.mxu2 }
 0x180   : > { %v1318_v9 = vpop.f32.mrf.mxu3  ;;  %v814_v58 = vpop.f32.mrf.mxu0 }
 0x181   : > { %v12218_v60 = vpack.c.b16 %v2867_v15, %v2082_v20  ;;  %v2872_v46 = vunpack.i.h.s16 %v2088_v35  ;;  %v1472_v7 = vpack.c.bf16 %v1318_v9, %v1149_v14  ;;  %v983_v1 = vpop.f32.mrf.mxu1  ;;  %v2862_v20 = vunpack.i.h.s16 %v2075_v2 }
 0x182   : > { %v13525_v44 = vpack.c.bf16 %v983_v1, %v814_v58 }
 0x183   : > { %v2870_v38 = vunpack.i.h.s16 %v12218_v60  ;;  %v13527_v40 = vpack.c.b16 %v2872_v46, %v2088_v35  ;;  %v12334_v10 = vpack.i.b16 %v12218_v60, %v12214_v13  ;;  %v1743_v25 = vrot.slane %v1472_v7, 4  ;;  %12078 = vmatmul.msk.bf16.gmra.mxu0 %vm659_vm1, %v12670_v54  ;;  %12110 = vmatmul.msk.bf16.gmra.mxu1 %vm659_vm1, %v12670_v54 }
 0x184   : > { %v1744_v15 = vrot.slane %v1472_v7, 6  ;;  %v1745_v14 = vrot.slane %v13525_v44, 2  ;;  %12142 = vmatmul.msk.bf16.gmra.mxu2 %vm659_vm1, %v12670_v54  ;;  %v2091_v13 = vsel %vm756_vm0, %v1471_v3, %v1742_v19  ;;  %v2097_v60 = vsel %vm1899_vm2, %v1471_v3, %v1742_v19 }
 0x185   : > { %v2875_v9 = vunpack.i.h.s16 %v13527_v40  ;;  %v13534_v58 = vpack.i.b16 %v2870_v38, %v2850_v47  ;;  %3445 = vst [vmem:[#allocation1 + $0x3] ss:$9 sm:$0xff] %v12334_v10  ;;  %12174 = vmatmul.msk.bf16.gmra.mxu3 %vm659_vm1, %v12670_v54  ;;  %v13551_v59 = vpack.c.b16 %v2862_v20, %v2075_v2 }
 0x186   : > { %v2094_v46 = vsel %vm1892_vm5, %v1743_v25, %v1744_v15  ;;  %v2098_v7 = vsel %vm1901_vm3, %v1744_v15, %v1743_v25  ;;  %v2110_v1 = vsel %vm1899_vm2, %v13525_v44, %v1745_v14 }
 0x187   : > { %v13545_v37 = vpack.i.b16 %v2875_v9, %v2855_v21  ;;  %v2095_v47 = vsel %vm1896_vm6, %v2091_v13, %v2094_v46  ;;  %v2099_v38 = vsel %vm1903_vm4, %v2097_v60, %v2098_v7  ;;  %v1152_v10 = vpop.f32.mrf.mxu2  ;;  %20424 = vst [vmem:[#allocation38_spill] sm:$0xff] %v13551_v59  ;;  %v2860_v13 = vunpack.i.h.s16 %v13549_v57 }
 0x188   : > { %v2101_v0 = vrot.slane %v2099_v38, 2  ;;  %v2877_v54 = vunpack.i.h.s16 %v2095_v47  ;;  %v1321_v34 = vpop.f32.mrf.mxu3  ;;  %v816_v3 = vpop.f32.mrf.mxu0  ;;  %v2865_v2 = vunpack.i.h.s16 %v13551_v59 }
 0x189   : > { %20422 = vst [vmem:[#allocation36_spill] sm:$0xff] %v13545_v37  ;;  %v1474_v19 = vpack.c.bf16 %v1321_v34, %v1152_v10  ;;  %v985_v49 = vpop.f32.mrf.mxu1 }
 0x18a   : > { %v13553_v25 = vpack.c.b16 %v2877_v54, %v2095_v47  ;;  %v2882_v15 = vunpack.i.h.s16 %v2101_v0  ;;  %v1475_v21 = vpack.c.bf16 %v985_v49, %v816_v3 }
 0x18b   : > { %v1746_v9 = vrot.slane %v1474_v19, 4  ;;  %v1747_v35 = vrot.slane %v1474_v19, 6 }
 0x18c   : > { %20425 = vst [vmem:[#allocation39_spill] sm:$0xff] %v13553_v25  ;;  %v2880_v60 = vunpack.i.h.s16 %v13553_v25  ;;  %v13557_v29 = vpack.c.b16 %v2882_v15, %v2101_v0  ;;  %v12671_v0 = vld [vmem:[%s20177_s0 + $0x88] sm:$0xff]  ;;  %v1748_v3 = vrot.slane %v1475_v21, 2 }
 0x18d   : > { %v2111_v34 = vsel %vm1901_vm3, %v1747_v35, %v1746_v9 }
 0x18e   : > { %20426 = vst [vmem:[#allocation40_spill] sm:$0xff] %v13557_v29  ;;  %v2885_v20 = vunpack.i.h.s16 %v13557_v29  ;;  %v13564_v46 = vpack.i.b16 %v2880_v60, %v2860_v13  ;;  %v2112_v7 = vsel %vm1903_vm4, %v2110_v1, %v2111_v34  ;;  %v2107_v1 = vsel %vm1892_vm5, %v1746_v9, %v1747_v35 }
 0x18f   : > { %v1154_v47 = vpop.f32.mrf.mxu2 }
 0x190   : > { %20427 = vst [vmem:[#allocation41_spill] sm:$0xff] %v13564_v46  ;;  %v13572_v38 = vpack.i.b16 %v2885_v20, %v2865_v2  ;;  %v1323_v10 = vpop.f32.mrf.mxu3  ;;  %v819_v54 = vpop.f32.mrf.mxu0  ;;  %v2117_v2 = vsel %vm756_vm0, %v1475_v21, %v1748_v3  ;;  %v2123_v20 = vsel %vm1899_vm2, %v1475_v21, %v1748_v3 }
 0x191   : > { %v1476_v19 = vpack.c.bf16 %v1323_v10, %v1154_v47  ;;  %v988_v15 = vpop.f32.mrf.mxu1  ;;  %v2104_v10 = vsel %vm756_vm0, %v13525_v44, %v1745_v14 }
 0x192   : > { %20428 = vst [vmem:[#allocation42_spill] sm:$0xff] %v13572_v38  ;;  %v1477_v18 = vpack.c.bf16 %v988_v15, %v819_v54  ;;  %v2114_v54 = vrot.slane %v2112_v7, 2  ;;  %v2108_v9 = vsel %vm1896_vm6, %v2104_v10, %v2107_v1 }
 0x193   : > { %v1749_v13 = vrot.slane %v1476_v19, 4  ;;  %v1750_v60 = vrot.slane %v1476_v19, 6  ;;  %12079 = vmatmul.msk.bf16.gmra.mxu0 %vm659_vm1, %v12671_v0  ;;  %12111 = vmatmul.msk.bf16.gmra.mxu1 %vm659_vm1, %v12671_v0 }
 0x194   : > { %v1751_v34 = vrot.slane %v1477_v18, 2  ;;  %12143 = vmatmul.msk.bf16.gmra.mxu2 %vm659_vm1, %v12671_v0 }
 0x195   : > { %v2120_v49 = vsel %vm1892_vm5, %v1749_v13, %v1750_v60  ;;  %v2124_v47 = vsel %vm1901_vm3, %v1750_v60, %v1749_v13  ;;  %12175 = vmatmul.msk.bf16.gmra.mxu3 %vm659_vm1, %v12671_v0  ;;  %v2887_v60 = vunpack.i.h.s16 %v2108_v9  ;;  %v2892_v0 = vunpack.i.h.s16 %v2114_v54 }
 0x196   : > { %v2121_v19 = vsel %vm1896_vm6, %v2117_v2, %v2120_v49  ;;  %v13587_v35 = vsel %vm1903_vm4, %v2123_v20, %v2124_v47  ;;  %v2136_v15 = vsel %vm1899_vm2, %v1477_v18, %v1751_v34  ;;  %v2130_v14 = vsel %vm756_vm0, %v1477_v18, %v1751_v34 }
 0x197   : > { %v1157_v21 = vpop.f32.mrf.mxu2  ;;  %v12222_v2 = vpack.c.b16 %v2887_v60, %v2108_v9  ;;  %v13594_v1 = vpack.c.b16 %v2892_v0, %v2114_v54 }
 0x198   : > { %v1326_v3 = vpop.f32.mrf.mxu3  ;;  %v821_v42 = vpop.f32.mrf.mxu0 }
 0x199   : > { %v1478_v17 = vpack.c.bf16 %v1326_v3, %v1157_v21  ;;  %v990_v13 = vpop.f32.mrf.mxu1  ;;  %v2890_v0 = vunpack.i.h.s16 %v12222_v2 }
 0x19a   : > { %v1479_v33 = vpack.c.bf16 %v990_v13, %v821_v42  ;;  %v2127_v42 = vrot.slane %v13587_v35, 2  ;;  %v2897_v35 = vunpack.i.h.s16 %v2121_v19 }
 0x19b   : > { %v1752_v38 = vrot.slane %v1478_v17, 4  ;;  %v1753_v44 = vrot.slane %v1478_v17, 6  ;;  %v12672_v17 = vld [vmem:[%s20177_s0 + $0x90] sm:$0xff] }
 0x19c   : > { %v1754_v9 = vrot.slane %v1479_v33, 2 }
 0x19d   : > { %v2133_v49 = vsel %vm1892_vm5, %v1752_v38, %v1753_v44  ;;  %v2137_v7 = vsel %vm1901_vm3, %v1753_v44, %v1752_v38  ;;  %v2895_v44 = vunpack.i.h.s16 %v13594_v1 }
 0x19e   : > { %v2134_v20 = vsel %vm1896_vm6, %v2130_v14, %v2133_v49  ;;  %v2138_v47 = vsel %vm1903_vm4, %v2136_v15, %v2137_v7 }
 0x19f   : > { %v2140_v10 = vrot.slane %v2138_v47, 2  ;;  %v2907_v21 = vunpack.i.h.s16 %v2134_v20  ;;  %v1159_v3 = vpop.f32.mrf.mxu2 }
 0x1a0   : > { %v1328_v18 = vpop.f32.mrf.mxu3  ;;  %v824_v34 = vpop.f32.mrf.mxu0 }
 0x1a1   : > { %v12226_v13 = vpack.c.b16 %v2907_v21, %v2134_v20  ;;  %v2912_v38 = vunpack.i.h.s16 %v2140_v10  ;;  %v1480_v54 = vpack.c.bf16 %v1328_v18, %v1159_v3  ;;  %v993_v60 = vpop.f32.mrf.mxu1  ;;  %v2902_v20 = vunpack.i.h.s16 %v2127_v42 }
 0x1a2   : > { %v13603_v15 = vpack.c.bf16 %v993_v60, %v824_v34 }
 0x1a3   : > { %v2910_v14 = vunpack.i.h.s16 %v12226_v13  ;;  %v13605_v49 = vpack.c.b16 %v2912_v38, %v2140_v10  ;;  %v12338_v7 = vpack.i.b16 %v12226_v13, %v12222_v2  ;;  %v1755_v47 = vrot.slane %v1480_v54, 4  ;;  %12080 = vmatmul.msk.bf16.gmra.mxu0 %vm659_vm1, %v12672_v17  ;;  %12112 = vmatmul.msk.bf16.gmra.mxu1 %vm659_vm1, %v12672_v17 }
 0x1a4   : > { %v1756_v21 = vrot.slane %v1480_v54, 6  ;;  %v1757_v3 = vrot.slane %v13603_v15, 2  ;;  %12144 = vmatmul.msk.bf16.gmra.mxu2 %vm659_vm1, %v12672_v17  ;;  %v2143_v2 = vsel %vm756_vm0, %v1479_v33, %v1754_v9  ;;  %v2149_v13 = vsel %vm1899_vm2, %v1479_v33, %v1754_v9 }
 0x1a5   : > { %v2915_v18 = vunpack.i.h.s16 %v13605_v49  ;;  %v13612_v34 = vpack.i.b16 %v2910_v14, %v2890_v0  ;;  %3448 = vst [vmem:[#allocation1 + $0x4] ss:$9 sm:$0xff] %v12338_v7  ;;  %12176 = vmatmul.msk.bf16.gmra.mxu3 %vm659_vm1, %v12672_v17  ;;  %v13627_v10 = vpack.c.b16 %v2897_v35, %v2121_v19  ;;  %v13629_v29 = vpack.c.b16 %v2902_v20, %v2127_v42 }
 0x1a6   : > { %v2146_v38 = vsel %vm1892_vm5, %v1755_v47, %v1756_v21  ;;  %v2150_v54 = vsel %vm1901_vm3, %v1756_v21, %v1755_v47  ;;  %v2162_v60 = vsel %vm1899_vm2, %v13603_v15, %v1757_v3 }
 0x1a7   : > { %v13623_v6 = vpack.i.b16 %v2915_v18, %v2895_v44  ;;  %v2147_v0 = vsel %vm1896_vm6, %v2143_v2, %v2146_v38  ;;  %v2151_v14 = vsel %vm1903_vm4, %v2149_v13, %v2150_v54  ;;  %v1162_v7 = vpop.f32.mrf.mxu2  ;;  %20430 = vst [vmem:[#allocation44_spill] sm:$0xff] %v13627_v10  ;;  %v2900_v2 = vunpack.i.h.s16 %v13627_v10 }
 0x1a8   : > { %v2153_v62 = vrot.slane %v2151_v14, 2  ;;  %v2917_v17 = vunpack.i.h.s16 %v2147_v0  ;;  %v1331_v4 = vpop.f32.mrf.mxu3  ;;  %v826_v33 = vpop.f32.mrf.mxu0  ;;  %20431 = vst [vmem:[#allocation45_spill] sm:$0xff] %v13629_v29  ;;  %v2905_v42 = vunpack.i.h.s16 %v13629_v29 }
 0x1a9   : > { %20429 = vst [vmem:[#allocation43_spill] sm:$0xff] %v13623_v6  ;;  %v1482_v9 = vpack.c.bf16 %v1331_v4, %v1162_v7  ;;  %v995_v59 = vpop.f32.mrf.mxu1 }
 0x1aa   : > { %v13631_v47 = vpack.c.b16 %v2917_v17, %v2147_v0  ;;  %v2922_v21 = vunpack.i.h.s16 %v2153_v62  ;;  %v1483_v44 = vpack.c.bf16 %v995_v59, %v826_v33 }
 0x1ab   : > { %v1758_v18 = vrot.slane %v1482_v9, 4  ;;  %v1759_v11 = vrot.slane %v1482_v9, 6 }
 0x1ac   : > { %20432 = vst [vmem:[#allocation46_spill] sm:$0xff] %v13631_v47  ;;  %v2920_v13 = vunpack.i.h.s16 %v13631_v47  ;;  %v13635_v19 = vpack.c.b16 %v2922_v21, %v2153_v62  ;;  %v12673_v62 = vld [vmem:[%s20177_s0 + $0x98] sm:$0xff]  ;;  %v1760_v33 = vrot.slane %v1483_v44, 2 }
 0x1ad   : > { %v2163_v4 = vsel %vm1901_vm3, %v1759_v11, %v1758_v18 }
 0x1ae   : > { %20433 = vst [vmem:[#allocation47_spill] sm:$0xff] %v13635_v19  ;;  %v2925_v20 = vunpack.i.h.s16 %v13635_v19  ;;  %v13642_v38 = vpack.i.b16 %v2920_v13, %v2900_v2  ;;  %v2164_v54 = vsel %vm1903_vm4, %v2162_v60, %v2163_v4  ;;  %v2159_v60 = vsel %vm1892_vm5, %v1758_v18, %v1759_v11 }
 0x1af   : > { %v1164_v0 = vpop.f32.mrf.mxu2 }
 0x1b0   : > { %20434 = vst [vmem:[#allocation48_spill] sm:$0xff] %v13642_v38  ;;  %v13650_v14 = vpack.i.b16 %v2925_v20, %v2905_v42  ;;  %v1333_v7 = vpop.f32.mrf.mxu3  ;;  %v829_v17 = vpop.f32.mrf.mxu0  ;;  %v2169_v42 = vsel %vm756_vm0, %v1483_v44, %v1760_v33  ;;  %v2175_v20 = vsel %vm1899_vm2, %v1483_v44, %v1760_v33 }
 0x1b1   : > { %v1484_v9 = vpack.c.bf16 %v1333_v7, %v1164_v0  ;;  %v998_v21 = vpop.f32.mrf.mxu1  ;;  %v2156_v7 = vsel %vm756_vm0, %v13603_v15, %v1757_v3 }
 0x1b2   : > { %20435 = vst [vmem:[#allocation49_spill] sm:$0xff] %v13650_v14  ;;  %v1485_v35 = vpack.c.bf16 %v998_v21, %v829_v17  ;;  %v2166_v17 = vrot.slane %v2164_v54, 2  ;;  %v2160_v18 = vsel %vm1896_vm6, %v2156_v7, %v2159_v60 }
 0x1b3   : > { %v1761_v2 = vrot.slane %v1484_v9, 4  ;;  %v1762_v13 = vrot.slane %v1484_v9, 6  ;;  %12081 = vmatmul.msk.bf16.gmra.mxu0 %vm659_vm1, %v12673_v62  ;;  %12113 = vmatmul.msk.bf16.gmra.mxu1 %vm659_vm1, %v12673_v62 }
 0x1b4   : > { %v1763_v4 = vrot.slane %v1485_v35, 2  ;;  %12145 = vmatmul.msk.bf16.gmra.mxu2 %vm659_vm1, %v12673_v62 }
 0x1b5   : > { %v2172_v59 = vsel %vm1892_vm5, %v1761_v2, %v1762_v13  ;;  %v2176_v0 = vsel %vm1901_vm3, %v1762_v13, %v1761_v2  ;;  %12177 = vmatmul.msk.bf16.gmra.mxu3 %vm659_vm1, %v12673_v62  ;;  %v2927_v13 = vunpack.i.h.s16 %v2160_v18  ;;  %v2932_v62 = vunpack.i.h.s16 %v2166_v17 }
 0x1b6   : > { %v2173_v9 = vsel %vm1896_vm6, %v2169_v42, %v2172_v59  ;;  %v13665_v11 = vsel %vm1903_vm4, %v2175_v20, %v2176_v0  ;;  %v2188_v21 = vsel %vm1899_vm2, %v1485_v35, %v1763_v4  ;;  %v2182_v3 = vsel %vm756_vm0, %v1485_v35, %v1763_v4 }
 0x1b7   : > { %v1167_v44 = vpop.f32.mrf.mxu2  ;;  %v12230_v42 = vpack.c.b16 %v2927_v13, %v2160_v18  ;;  %v13672_v60 = vpack.c.b16 %v2932_v62, %v2166_v17  ;;  %v2179_v35 = vrot.slane %v13665_v11, 2  ;;  %v2937_v11 = vunpack.i.h.s16 %v2173_v9 }
 0x1b8   : > { %v1336_v33 = vpop.f32.mrf.mxu3  ;;  %v831_v14 = vpop.f32.mrf.mxu0 }
 0x1b9   : > { %v1486_v29 = vpack.c.bf16 %v1336_v33, %v1167_v44  ;;  %v1000_v2 = vpop.f32.mrf.mxu1  ;;  %v2930_v62 = vunpack.i.h.s16 %v12230_v42 }
 0x1ba   : > { %v1487_v19 = vpack.c.bf16 %v1000_v2, %v831_v14 }
 0x1bb   : > { %v1764_v28 = vrot.slane %v1486_v29, 4  ;;  %v1765_v15 = vrot.slane %v1486_v29, 6  ;;  %v12674_v29 = vld [vmem:[%s20177_s0 + $0xa0] sm:$0xff] }
 0x1bc   : > { %v1766_v18 = vrot.slane %v1487_v19, 2 }
 0x1bd   : > { %v2185_v59 = vsel %vm1892_vm5, %v1764_v28, %v1765_v15  ;;  %v2189_v54 = vsel %vm1901_vm3, %v1765_v15, %v1764_v28  ;;  %v2935_v15 = vunpack.i.h.s16 %v13672_v60 }
 0x1be   : > { %v2186_v20 = vsel %vm1896_vm6, %v2182_v3, %v2185_v59  ;;  %v2190_v0 = vsel %vm1903_vm4, %v2188_v21, %v2189_v54 }
 0x1bf   : > { %v2192_v7 = vrot.slane %v2190_v0, 2  ;;  %v2947_v44 = vunpack.i.h.s16 %v2186_v20  ;;  %v1169_v33 = vpop.f32.mrf.mxu2 }
 0x1c0   : > { %v1338_v14 = vpop.f32.mrf.mxu3  ;;  %v834_v4 = vpop.f32.mrf.mxu0 }
 0x1c1   : > { %v12234_v2 = vpack.c.b16 %v2947_v44, %v2186_v20  ;;  %v2952_v28 = vunpack.i.h.s16 %v2192_v7  ;;  %v1488_v17 = vpack.c.bf16 %v1338_v14, %v1169_v33  ;;  %v1003_v13 = vpop.f32.mrf.mxu1  ;;  %v2942_v20 = vunpack.i.h.s16 %v2179_v35 }
 0x1c2   : > { %v13681_v21 = vpack.c.bf16 %v1003_v13, %v834_v4 }
 0x1c3   : > { %v2950_v3 = vunpack.i.h.s16 %v12234_v2  ;;  %v13683_v59 = vpack.c.b16 %v2952_v28, %v2192_v7  ;;  %v12342_v54 = vpack.i.b16 %v12234_v2, %v12230_v42  ;;  %v1767_v0 = vrot.slane %v1488_v17, 4  ;;  %12082 = vmatmul.msk.bf16.gmra.mxu0 %vm659_vm1, %v12674_v29  ;;  %12114 = vmatmul.msk.bf16.gmra.mxu1 %vm659_vm1, %v12674_v29 }
 0x1c4   : > { %v1768_v44 = vrot.slane %v1488_v17, 6  ;;  %v1769_v33 = vrot.slane %v13681_v21, 2  ;;  %12146 = vmatmul.msk.bf16.gmra.mxu2 %vm659_vm1, %v12674_v29  ;;  %v2195_v42 = vsel %vm756_vm0, %v1487_v19, %v1766_v18  ;;  %v2201_v2 = vsel %vm1899_vm2, %v1487_v19, %v1766_v18 }
 0x1c5   : > { %v2955_v14 = vunpack.i.h.s16 %v13683_v59  ;;  %v13690_v4 = vpack.i.b16 %v2950_v3, %v2930_v62  ;;  %3451 = vst [vmem:[#allocation1 + $0x5] ss:$9 sm:$0xff] %v12342_v54  ;;  %12178 = vmatmul.msk.bf16.gmra.mxu3 %vm659_vm1, %v12674_v29  ;;  %v13705_v7 = vpack.c.b16 %v2937_v11, %v2173_v9 }
 0x1c6   : > { %v2198_v28 = vsel %vm1892_vm5, %v1767_v0, %v1768_v44  ;;  %v2202_v17 = vsel %vm1901_vm3, %v1768_v44, %v1767_v0  ;;  %v2214_v13 = vsel %vm1899_vm2, %v13681_v21, %v1769_v33  ;;  %v13711_v0 = vpack.c.b16 %v2942_v20, %v2179_v35 }
 0x1c7   : > { %v13701_v22 = vpack.i.b16 %v2955_v14, %v2935_v15  ;;  %v2199_v62 = vsel %vm1896_vm6, %v2195_v42, %v2198_v28  ;;  %v2203_v3 = vsel %vm1903_vm4, %v2201_v2, %v2202_v17  ;;  %v1172_v54 = vpop.f32.mrf.mxu2  ;;  %20437 = vst [vmem:[#allocation51_spill] sm:$0xff] %v13705_v7  ;;  %v2940_v2 = vunpack.i.h.s16 %v13705_v7 }
 0x1c8   : > { %v2205_v23 = vrot.slane %v2203_v3, 2  ;;  %v2957_v29 = vunpack.i.h.s16 %v2199_v62  ;;  %v1341_v50 = vpop.f32.mrf.mxu3  ;;  %v13707_v19 = vpop.f32.mrf.mxu0  ;;  %20438 = vst [vmem:[#allocation52_spill] sm:$0xff] %v13711_v0  ;;  %v2945_v17 = vunpack.i.h.s16 %v13711_v0 }
 0x1c9   : > { %20436 = vst [vmem:[#allocation50_spill] sm:$0xff] %v13701_v22  ;;  %v1490_v18 = vpack.c.bf16 %v1341_v50, %v1172_v54  ;;  %v13709_v51 = vpop.f32.mrf.mxu1 }
 0x1ca   : > { %v13713_v44 = vpack.c.b16 %v2957_v29, %v2199_v62  ;;  %v2962_v15 = vunpack.i.h.s16 %v2205_v23 }
 0x1cb   : > { %v1770_v14 = vrot.slane %v1490_v18, 4  ;;  %v1771_v42 = vrot.slane %v1490_v18, 6 }
 0x1cc   : > { %20439 = vst [vmem:[#allocation53_spill] sm:$0xff] %v13713_v44  ;;  %v2960_v9 = vunpack.i.h.s16 %v13713_v44  ;;  %v13717_v11 = vpack.c.b16 %v2962_v15, %v2205_v23  ;;  %v12675_v23 = vld [vmem:[%s20177_s0 + $0xa8] sm:$0xff] }
 0x1cd   : > { %v2215_v50 = vsel %vm1901_vm3, %v1771_v42, %v1770_v14 }
 0x1ce   : > { %20440 = vst [vmem:[#allocation54_spill] sm:$0xff] %v13717_v11  ;;  %v2965_v35 = vunpack.i.h.s16 %v13717_v11  ;;  %v13724_v20 = vpack.i.b16 %v2960_v9, %v2940_v2  ;;  %v2216_v3 = vsel %vm1903_vm4, %v2214_v13, %v2215_v50  ;;  %v2211_v13 = vsel %vm1892_vm5, %v1770_v14, %v1771_v42 }
 0x1cf   : > { %v13729_v54 = vpop.f32.mrf.mxu2 }
 0x1d0   : > { %20441 = vst [vmem:[#allocation55_spill] sm:$0xff] %v13724_v20  ;;  %v13734_v29 = vpack.i.b16 %v2965_v35, %v2945_v17  ;;  %v13736_v18 = vpop.f32.mrf.mxu3  ;;  %v839_v15 = vpop.f32.mrf.mxu0  ;;  %v2208_v17 = vsel %vm756_vm0, %v13681_v21, %v1769_v33 }
 0x1d1   : > { %v1008_v28 = vpop.f32.mrf.mxu1 }
 0x1d2   : > { %20442 = vst [vmem:[#allocation56_spill] sm:$0xff] %v13734_v29  ;;  %v1493_v38 = vpack.c.bf16 %v1008_v28, %v839_v15  ;;  %v2212_v28 = vsel %vm1896_vm6, %v2208_v17, %v2211_v13  ;;  %v2218_v15 = vrot.slane %v2216_v3, 2 }
 0x1d3   : > { %12083 = vmatmul.msk.bf16.gmra.mxu0 %vm659_vm1, %v12675_v23  ;;  %12115 = vmatmul.msk.bf16.gmra.mxu1 %vm659_vm1, %v12675_v23 }
 0x1d4   : > { %v1775_v2 = vrot.slane %v1493_v38, 2  ;;  %12147 = vmatmul.msk.bf16.gmra.mxu2 %vm659_vm1, %v12675_v23  ;;  %v2972_v46 = vunpack.i.h.s16 %v2218_v15 }
 0x1d5   : > { %12179 = vmatmul.msk.bf16.gmra.mxu3 %vm659_vm1, %v12675_v23  ;;  %v2967_v23 = vunpack.i.h.s16 %v2212_v28 }
 0x1d6   : > { %v2240_v9 = vsel %vm1899_vm2, %v1493_v38, %v1775_v2  ;;  %v2234_v14 = vsel %vm756_vm0, %v1493_v38, %v1775_v2  ;;  %v13765_v2 = vpack.c.b16 %v2972_v46, %v2218_v15 }
 0x1d7   : > { %v1177_v50 = vpop.f32.mrf.mxu2  ;;  %v13763_v38 = vpack.c.b16 %v2967_v23, %v2212_v28 }
 0x1d8   : > { %v1346_v35 = vpop.f32.mrf.mxu3  ;;  %v13746_v62 = vpop.f32.mrf.mxu0  ;;  %v2975_v28 = vunpack.i.h.s16 %v13765_v2 }
 0x1d9   : > { %v1494_v29 = vpack.c.bf16 %v1346_v35, %v1177_v50  ;;  %v13749_v0 = vpop.f32.mrf.mxu1 }
 0x1db   : > { %v1776_v11 = vrot.slane %v1494_v29, 4  ;;  %v1777_v20 = vrot.slane %v1494_v29, 6  ;;  %v12676_v29 = vld [vmem:[%s20177_s0 + $0xb0] sm:$0xff] }
 0x1dd   : > { %v2237_v42 = vsel %vm1892_vm5, %v1776_v11, %v1777_v20  ;;  %v2241_v36 = vsel %vm1901_vm3, %v1777_v20, %v1776_v11 }
 0x1de   : > { %v2238_v21 = vsel %vm1896_vm6, %v2234_v14, %v2237_v42  ;;  %v2242_v33 = vsel %vm1903_vm4, %v2240_v9, %v2241_v36 }
 0x1df   : > { %v2244_v56 = vrot.slane %v2242_v33, 2  ;;  %v2987_v13 = vunpack.i.h.s16 %v2238_v21  ;;  %v13756_v3 = vpop.f32.mrf.mxu2 }
 0x1e0   : > { %v13761_v50 = vpop.f32.mrf.mxu3  ;;  %v844_v17 = vpop.f32.mrf.mxu0 }
 0x1e1   : > { %v13767_v11 = vpack.c.b16 %v2987_v13, %v2238_v21  ;;  %v2992_v20 = vunpack.i.h.s16 %v2244_v56  ;;  %v1013_v35 = vpop.f32.mrf.mxu1 }
 0x1e3   : > { %v13769_v36 = vpack.c.b16 %v2992_v20, %v2244_v56  ;;  %v12346_v9 = vpack.i.b16 %v13767_v11, %v13763_v38  ;;  %12084 = vmatmul.msk.bf16.gmra.mxu0 %vm659_vm1, %v12676_v29  ;;  %12116 = vmatmul.msk.bf16.gmra.mxu1 %vm659_vm1, %v12676_v29  ;;  %v12677_v20 = vld [vmem:[%s20177_s0 + $0xb8] sm:$0xff] }
 0x1e4   : > { %12148 = vmatmul.msk.bf16.gmra.mxu2 %vm659_vm1, %v12676_v29 }
 0x1e5   : > { %v2995_v46 = vunpack.i.h.s16 %v13769_v36  ;;  %3454 = vst [vmem:[#allocation1 + $0x6] ss:$9 sm:$0xff] %v12346_v9  ;;  %12180 = vmatmul.msk.bf16.gmra.mxu3 %vm659_vm1, %v12676_v29  ;;  %v13796_v9 = vpack.c.bf16 %v1013_v35, %v844_v17 }
 0x1e7   : > { %v13781_v56 = vpack.i.b16 %v2995_v46, %v2975_v28  ;;  %v1182_v23 = vpop.f32.mrf.mxu2 }
 0x1e8   : > { %v1351_v14 = vpop.f32.mrf.mxu3  ;;  %v13783_v42 = vpop.f32.mrf.mxu0 }
 0x1e9   : > { %20443 = vst [vmem:[#allocation57_spill] sm:$0xff] %v13781_v56  ;;  %v13785_v21 = vpop.f32.mrf.mxu1  ;;  %v13787_v33 = vpack.c.bf16 %v1351_v14, %v1182_v23  ;;  %v1781_v14 = vrot.slane %v13796_v9, 2 }
 0x1eb   : > { %v1782_v29 = vrot.slane %v13787_v33, 4  ;;  %v1783_v28 = vrot.slane %v13787_v33, 6  ;;  %v2260_v33 = vsel %vm756_vm0, %v13796_v9, %v1781_v14 }
 0x1ed   : > { %v2263_v17 = vsel %vm1892_vm5, %v1782_v29, %v1783_v28 }
 0x1ee   : > { %v2264_v47 = vsel %vm1896_vm6, %v2260_v33, %v2263_v17 }
 0x1ef   : > { %v13789_v13 = vpop.f32.mrf.mxu2  ;;  %v3007_v61 = vunpack.i.h.s16 %v2264_v47 }
 0x1f0   : > { %v13794_v15 = vpop.f32.mrf.mxu3  ;;  %v849_v46 = vpop.f32.mrf.mxu0 }
 0x1f1   : > { %v1018_v23 = vpop.f32.mrf.mxu1  ;;  %v12246_v31 = vpack.c.b16 %v3007_v61, %v2264_v47  ;;  %v2990_v61 = vunpack.i.h.s16 %v13767_v11  ;;  %v2267_v11 = vsel %vm1901_vm3, %v1783_v28, %v1782_v29 }
 0x1f2   : > { %v1501_v63 = vpack.c.bf16 %v1018_v23, %v849_v46 }
 0x1f3   : > { %12085 = vmatmul.msk.bf16.gmra.mxu0 %vm659_vm1, %v12677_v20  ;;  %12117 = vmatmul.msk.bf16.gmra.mxu1 %vm659_vm1, %v12677_v20 }
 0x1f4   : > { %12149 = vmatmul.msk.bf16.gmra.mxu2 %vm659_vm1, %v12677_v20  ;;  %v1787_v44 = vrot.slane %v1501_v63, 2 }
 0x1f5   : > { %12181 = vmatmul.msk.bf16.gmra.mxu3 %vm659_vm1, %v12677_v20 }
 0x1f6   : > { %v2286_v12 = vsel %vm756_vm0, %v1501_v63, %v1787_v44 }
 0x1f7   : > { %v1187_v35 = vpop.f32.mrf.mxu2 }
 0x1f8   : > { %v1356_v7 = vpop.f32.mrf.mxu3  ;;  %v13812_v6 = vpop.f32.mrf.mxu0 }
 0x1f9   : > { %v1502_v10 = vpack.c.bf16 %v1356_v7, %v1187_v35  ;;  %v13814_v37 = vpop.f32.mrf.mxu1 }
 0x1fb   : > { %v1788_v57 = vrot.slane %v1502_v10, 4  ;;  %v1789_v25 = vrot.slane %v1502_v10, 6 }
 0x1fd   : > { %v2289_v46 = vsel %vm1892_vm5, %v1788_v57, %v1789_v25  ;;  %v2293_v47 = vsel %vm1901_vm3, %v1789_v25, %v1788_v57  ;;  %v2266_v57 = vsel %vm1899_vm2, %v13796_v9, %v1781_v14 }
 0x1fe   : > { %v2290_v20 = vsel %vm1896_vm6, %v2286_v12, %v2289_v46  ;;  %v3010_v12 = vunpack.i.h.s16 %v12246_v31 }
 0x1ff   : > { %v3027_v23 = vunpack.i.h.s16 %v2290_v20 }
 0x201   : > { %v12250_v30 = vpack.c.b16 %v3027_v23, %v2290_v20  ;;  %v1023_v25 = vpop.f32.mrf.mxu1 }
 0x203   : > { %v12350_v43 = vpack.i.b16 %v12250_v30, %v12246_v31 }
 0x205   : > { %3457 = vst [vmem:[#allocation1 + $0x7] ss:$9 sm:$0xff] %v12350_v43  ;;  %v3030_v43 = vunpack.i.h.s16 %v12250_v30  ;;  %v13825_v30 = vpop.f32.mrf.mxu2 }
 0x20c   : > { %v3458_v52 = vld [vmem:[#allocation1] sm:$0xff]  ;;  %v3459_v56 = vld [vmem:[#allocation1 + $0x9] sm:$0xff]  ;;  %v3460_v22 = vld [vmem:[#allocation1 + $0x12] sm:$0xff] }
 0x20d   : > { %v3461_v7 = vld [vmem:[#allocation1 + $0x1b] sm:$0xff]  ;;  %v3462_v35 = vld [vmem:[#allocation1 + $0x24] sm:$0xff]  ;;  %v3463_v17 = vld [vmem:[#allocation1 + $0x2d] sm:$0xff]  ;;  %3709 = vmatpush.bf16.msrb.mxu0 %v3458_v52  ;;  %3723 = vmatpush.bf16.msrb.mxu1 %v3459_v56  ;;  %v2970_v52 = vunpack.i.h.s16 %v13763_v38  ;;  %v2292_v38 = vsel %vm1899_vm2, %v1501_v63, %v1787_v44  ;;  %v1192_v23 = vpop.f32.mrf.mxu2 }
 0x20e   : > { %v3464_v10 = vld [vmem:[#allocation1 + $0x36] sm:$0xff]  ;;  %v3465_v33 = vld [vmem:[#allocation1 + $0x3f] sm:$0xff]  ;;  %3737 = vmatpush.bf16.msrb.mxu2 %v3460_v22  ;;  %3751 = vmatpush.bf16.msrb.mxu3 %v3461_v7  ;;  %v2294_v31 = vsel %vm1903_vm4, %v2292_v38, %v2293_v47 }
 0x20f   : > { %3467 = vst [vmem:[#allocation1] ss:$9 sm:$0xff] %v13300_v32  ;;  %v3420_v22 = vpack.i.b16 %v2990_v61, %v2970_v52  ;;  %v3428_v32 = vpack.i.b16 %v3030_v43, %v3010_v12  ;;  %v13860_v43 = vpack.c.bf16 %v13736_v18, %v13729_v54  ;;  %v20444_v52 = vpack.i.b16 %v13293_v24, %v13282_v5 }
 0x210   : > { %3469 = vst [vmem:[#allocation1 + $0x1] ss:$9 sm:$0xff] %v13378_v16  ;;  %v13827_v16 = vpop.f32.mrf.mxu3  ;;  %v13873_v54 = vpack.c.bf16 %v13761_v50, %v13756_v3  ;;  %v20446_v5 = vpack.i.b16 %v13449_v27, %v13438_v55  ;;  %v13888_v3 = vpack.c.bf16 %v13749_v0, %v13746_v62  ;;  %v20448_v55 = vpack.i.b16 %v13605_v49, %v13594_v1 }
 0x211   : > { %3765 = vmatpush.bf16.msra.mxu0 %v3462_v35  ;;  %3779 = vmatpush.bf16.msra.mxu1 %v3463_v17  ;;  %3471 = vst [vmem:[#allocation1 + $0x2] ss:$9 sm:$0xff] %v13456_v41  ;;  %v2268_v41 = vsel %vm1903_vm4, %v2266_v57, %v2267_v11  ;;  %v20447_v57 = vpack.i.b16 %v13527_v40, %v13516_v48  ;;  %v20226_v50 = vrot.slane %v13860_v43, 4 }
 0x212   : > { %3793 = vmatpush.bf16.msra.mxu2 %v3464_v10  ;;  %3807 = vmatpush.bf16.msra.mxu3 %v3465_v33  ;;  %3473 = vst [vmem:[#allocation1 + $0x3] ss:$9 sm:$0xff] %v13534_v58  ;;  %v854_v58 = vpop.f32.mrf.mxu0  ;;  %v2270_v56 = vrot.slane %v2268_v41, 2  ;;  %v13901_v40 = vpack.c.bf16 %v13709_v51, %v13707_v19  ;;  %v20449_v1 = vpack.i.b16 %v13683_v59, %v13672_v60  ;;  %v20224_v49 = vrot.slane %v13873_v54, 4 }
 0x213   : > { %3475 = vst [vmem:[#allocation1 + $0x4] ss:$9 sm:$0xff] %v13612_v34  ;;  %v2296_v34 = vrot.slane %v2294_v31, 2  ;;  %v1505_v28 = vpack.c.bf16 %v1023_v25, %v854_v58  ;;  %v20225_v58 = vrot.slane %v13860_v43, 6  ;;  %v20223_v62 = vrot.slane %v13873_v54, 6 }
 0x214   : > { %3477 = vst [vmem:[#allocation1 + $0x5] ss:$9 sm:$0xff] %v13690_v4  ;;  %v12678_v4 = vld [vmem:[%s20177_s0 + $0xc0] sm:$0xff]  ;;  %v3012_v35 = vunpack.i.h.s16 %v2270_v56  ;;  %v20450_v25 = vpack.i.b16 %v13769_v36, %v13765_v2  ;;  %v20227_v60 = vrot.slane %v13901_v40, 2  ;;  %v12679_v2 = vld [vmem:[%s20177_s0 + $0xc8] sm:$0xff] }
 0x215   : > { %3479 = vst [vmem:[#allocation1 + $0x6] ss:$9 sm:$0xff] %v3420_v22  ;;  %12086 = vmatmul.msk.bf16.gmra.mxu0 %vm659_vm1, %v12678_v4  ;;  %12118 = vmatmul.msk.bf16.gmra.mxu1 %vm659_vm1, %v12678_v4  ;;  %v3032_v63 = vunpack.i.h.s16 %v2296_v34  ;;  %v1793_v33 = vrot.slane %v1505_v28, 2  ;;  %v1025_v22 = vpop.f32.mrf.mxu1  ;;  %v1194_v19 = vpop.f32.mrf.mxu2  ;;  %v2224_v59 = vsel %vm1892_vm5, %v20226_v50, %v20225_v58 }
 0x216   : > { %3481 = vst [vmem:[#allocation1 + $0x7] ss:$9 sm:$0xff] %v3428_v32  ;;  %12150 = vmatmul.msk.bf16.gmra.mxu2 %vm659_vm1, %v12678_v4  ;;  %12182 = vmatmul.msk.bf16.gmra.mxu3 %vm659_vm1, %v12678_v4  ;;  %v20445_v32 = vpack.i.b16 %v13371_v8, %v13360_v45  ;;  %v13878_v18 = vpack.c.b16 %v3012_v35, %v2270_v56  ;;  %v20222_v56 = vrot.slane %v13888_v3, 2 }
 0x217   : > { %v13865_v47 = vpack.c.b16 %v3032_v63, %v2296_v34  ;;  %v2318_v11 = vsel %vm1899_vm2, %v1505_v28, %v1793_v33  ;;  %v2312_v45 = vsel %vm756_vm0, %v1505_v28, %v1793_v33  ;;  %v13932_v35 = vpack.c.bf16 %v13785_v21, %v13783_v42 }
 0x218   : > { %v1361_v7 = vpop.f32.mrf.mxu3  ;;  %v13936_v33 = vpack.c.bf16 %v13794_v15, %v13789_v13  ;;  %v2247_v42 = vsel %vm756_vm0, %v13888_v3, %v20222_v56 }
 0x219   : > { %v1506_v61 = vpack.c.bf16 %v1361_v7, %v1192_v23  ;;  %v12351_v0 = vpack.i.b16 %v13865_v47, %v13878_v18  ;;  %v2250_v7 = vsel %vm1892_vm5, %v20224_v49, %v20223_v62  ;;  %v20464_v49 = vld [vmem:[#allocation18_spill] sm:$0xff] }
 0x21a   : > { %v856_v12 = vpop.f32.mrf.mxu0  ;;  %v13957_v13 = vsel %vm1896_vm6, %v2247_v42, %v2250_v7  ;;  %v3035_v7 = vunpack.i.h.s16 %v13865_v47  ;;  %v20451_v47 = vld [vmem:[#allocation36_spill] sm:$0xff] }
 0x21b   : > { %v1794_v38 = vrot.slane %v1506_v61, 4  ;;  %v1795_v31 = vrot.slane %v1506_v61, 6  ;;  %v1507_v24 = vpack.c.bf16 %v1025_v22, %v856_v12 }
 0x21d   : > { %v13842_v44 = vld [vmem:[#allocation1] sm:$0xff]  ;;  %v13844_v9 = vld [vmem:[#allocation1 + $0x9] sm:$0xff]  ;;  %v13846_v29 = vld [vmem:[#allocation1 + $0x12] sm:$0xff]  ;;  %v2315_v8 = vsel %vm1892_vm5, %v1794_v38, %v1795_v31  ;;  %v2319_v41 = vsel %vm1901_vm3, %v1795_v31, %v1794_v38  ;;  %v1796_v51 = vrot.slane %v1507_v24, 2  ;;  %v1028_v28 = vpop.f32.mrf.mxu1  ;;  %v2221_v31 = vsel %vm756_vm0, %v13901_v40, %v20227_v60 }
 0x21e   : > { %v13848_v14 = vld [vmem:[#allocation1 + $0x1b] sm:$0xff]  ;;  %v13850_v46 = vld [vmem:[#allocation1 + $0x24] sm:$0xff]  ;;  %v13852_v20 = vld [vmem:[#allocation1 + $0x2d] sm:$0xff]  ;;  %v13894_v27 = vsel %vm1896_vm6, %v2312_v45, %v2315_v8  ;;  %v13897_v48 = vsel %vm1903_vm4, %v2318_v11, %v2319_v41  ;;  %v20216_v41 = vrot.slane %v13936_v33, 6 }
 0x21f   : > { %v13854_v17 = vld [vmem:[#allocation1 + $0x36] sm:$0xff]  ;;  %v13856_v10 = vld [vmem:[#allocation1 + $0x3f] sm:$0xff]  ;;  %v2325_v61 = vsel %vm756_vm0, %v1507_v24, %v1796_v51  ;;  %v2322_v11 = vrot.slane %v13897_v48, 2 }
 0x220   : > { %3491 = vst [vmem:[#allocation1] ss:$9 sm:$0xff] %v20444_v52  ;;  %v1363_v34 = vpop.f32.mrf.mxu3  ;;  %v2331_v52 = vsel %vm1899_vm2, %v1507_v24, %v1796_v51  ;;  %v20217_v24 = vrot.slane %v13936_v33, 4 }
 0x221   : > { %3493 = vst [vmem:[#allocation1 + $0x1] ss:$9 sm:$0xff] %v20445_v32  ;;  %v1508_v4 = vpack.c.bf16 %v1363_v34, %v1194_v19  ;;  %v13961_v32 = vpack.c.bf16 %v13827_v16, %v13825_v30  ;;  %v1197_v30 = vpop.f32.mrf.mxu2  ;;  %v13988_v19 = vsel %vm1896_vm6, %v2221_v31, %v2224_v59  ;;  %v2997_v34 = vunpack.i.h.s16 %v13957_v13 }
 0x222   : > { %3495 = vst [vmem:[#allocation1 + $0x2] ss:$9 sm:$0xff] %v20446_v5  ;;  %v859_v63 = vpop.f32.mrf.mxu0  ;;  %v20219_v5 = vrot.slane %v13932_v35, 2  ;;  %v2276_v42 = vsel %vm1892_vm5, %v20217_v24, %v20216_v41  ;;  %v20455_v24 = vld [vmem:[#allocation57_spill] sm:$0xff] }
 0x223   : > { %3497 = vst [vmem:[#allocation1 + $0x3] ss:$9 sm:$0xff] %v20447_v57  ;;  %v1797_v36 = vrot.slane %v1508_v4, 4  ;;  %v1798_v23 = vrot.slane %v1508_v4, 6  ;;  %v1509_v38 = vpack.c.bf16 %v1028_v28, %v859_v63  ;;  %v3047_v28 = vunpack.i.h.s16 %v13894_v27 }
 0x224   : > { %3499 = vst [vmem:[#allocation1 + $0x4] ss:$9 sm:$0xff] %v20448_v55 }
 0x225   : > { %3501 = vst [vmem:[#allocation1 + $0x5] ss:$9 sm:$0xff] %v20449_v1  ;;  %12087 = vmatmul.msk.bf16.gmra.mxu0 %vm659_vm1, %v12679_v2  ;;  %12119 = vmatmul.msk.bf16.gmra.mxu1 %vm659_vm1, %v12679_v2  ;;  %v2328_v12 = vsel %vm1892_vm5, %v1797_v36, %v1798_v23  ;;  %v2332_v22 = vsel %vm1901_vm3, %v1798_v23, %v1797_v36  ;;  %v1030_v36 = vpop.f32.mrf.mxu1  ;;  %v3052_v23 = vunpack.i.h.s16 %v2322_v11 }
 0x226   : > { %3503 = vst [vmem:[#allocation1 + $0x6] ss:$9 sm:$0xff] %v20450_v25  ;;  %12151 = vmatmul.msk.bf16.gmra.mxu2 %vm659_vm1, %v12679_v2  ;;  %12183 = vmatmul.msk.bf16.gmra.mxu3 %vm659_vm1, %v12679_v2  ;;  %v13951_v15 = vsel %vm1896_vm6, %v2325_v61, %v2328_v12  ;;  %v13954_v21 = vsel %vm1903_vm4, %v2331_v52, %v2332_v22  ;;  %v1799_v25 = vrot.slane %v1509_v38, 2  ;;  %v3015_v22 = vunpack.i.h.s16 %v13878_v18 }
 0x227   : > { %3505 = vst [vmem:[#allocation1 + $0x7] ss:$9 sm:$0xff] %v12351_v0  ;;  %v13985_v1 = vpack.c.bf16 %v13814_v37, %v13812_v6  ;;  %v20221_v37 = vrot.slane %v13961_v32, 4  ;;  %v20220_v6 = vrot.slane %v13961_v32, 6  ;;  %v14016_v31 = vpack.c.b16 %v3047_v28, %v13894_v27 }
 0x228   : > { %v1366_v16 = vpop.f32.mrf.mxu3  ;;  %v2344_v59 = vsel %vm1899_vm2, %v1509_v38, %v1799_v25  ;;  %v2338_v18 = vsel %vm756_vm0, %v1509_v38, %v1799_v25  ;;  %v3430_v28 = vpack.i.b16 %v3035_v7, %v3015_v22  ;;  %v20454_v38 = vld [vmem:[#allocation50_spill] sm:$0xff] }
 0x229   : > { %v1510_v51 = vpack.c.bf16 %v1366_v16, %v1197_v30  ;;  %v3050_v22 = vunpack.i.h.s16 %v14016_v31 }
 0x22a   : > { %v861_v2 = vpop.f32.mrf.mxu0 }
 0x22b   : > { %v1800_v61 = vrot.slane %v1510_v51, 4  ;;  %v1801_v52 = vrot.slane %v1510_v51, 6  ;;  %v1511_v12 = vpack.c.bf16 %v1030_v36, %v861_v2  ;;  %v20452_v51 = vld [vmem:[#allocation43_spill] sm:$0xff]  ;;  %v14027_v2 = vpack.c.b16 %v3052_v23, %v2322_v11 }
 0x22c   : > { %v2335_v23 = vrot.slane %v13954_v21, 2  ;;  %v3057_v21 = vunpack.i.h.s16 %v13951_v15 }
 0x22d   : > { %v2341_v30 = vsel %vm1892_vm5, %v1800_v61, %v1801_v52  ;;  %v2345_v16 = vsel %vm1901_vm3, %v1801_v52, %v1800_v61  ;;  %20453 = vst [vmem:[#allocation36_spill] sm:$0xff] %v14027_v2  ;;  %v1802_v61 = vrot.slane %v1511_v12, 2  ;;  %v1199_v52 = vpop.f32.mrf.mxu2 }
 0x22e   : > { %v13970_v57 = vld [vmem:[#allocation1] sm:$0xff]  ;;  %v13972_v45 = vld [vmem:[#allocation1 + $0x9] sm:$0xff]  ;;  %v13974_v8 = vld [vmem:[#allocation1 + $0x12] sm:$0xff]  ;;  %v2342_v36 = vsel %vm1896_vm6, %v2338_v18, %v2341_v30  ;;  %v2346_v27 = vsel %vm1903_vm4, %v2344_v59, %v2345_v16  ;;  %v1033_v30 = vpop.f32.mrf.mxu1  ;;  %v3055_v16 = vunpack.i.h.s16 %v14027_v2 }
 0x22f   : > { %v13977_v55 = vld [vmem:[#allocation1 + $0x1b] sm:$0xff]  ;;  %v13979_v48 = vld [vmem:[#allocation1 + $0x24] sm:$0xff]  ;;  %v13981_v0 = vld [vmem:[#allocation1 + $0x2d] sm:$0xff]  ;;  %v2348_v25 = vrot.slane %v2346_v27, 2 }
 0x230   : > { %v13991_v4 = vld [vmem:[#allocation1 + $0x36] sm:$0xff]  ;;  %v13993_v63 = vld [vmem:[#allocation1 + $0x3f] sm:$0xff] }
 0x231   : > { %3515 = vst [vmem:[#allocation1] ss:$9 sm:$0xff] %v13311_v39  ;;  %v2273_v39 = vsel %vm756_vm0, %v13932_v35, %v20219_v5  ;;  %v14072_v5 = vpack.c.b16 %v3057_v21, %v13951_v15 }
 0x232   : > { %3517 = vst [vmem:[#allocation1 + $0x1] ss:$9 sm:$0xff] %v13389_v26  ;;  %v20218_v26 = vrot.slane %v13985_v1, 2  ;;  %v14033_v41 = vsel %vm1896_vm6, %v2273_v39, %v2276_v42  ;;  %v3072_v39 = vunpack.i.h.s16 %v2348_v25  ;;  %v864_v42 = vpop.f32.mrf.mxu0 }
 0x233   : > { %3519 = vst [vmem:[#allocation1 + $0x2] ss:$9 sm:$0xff] %v13467_v53  ;;  %v2302_v53 = vsel %vm1892_vm5, %v20221_v37, %v20220_v6 }
 0x234   : > { %3521 = vst [vmem:[#allocation1 + $0x3] ss:$9 sm:$0xff] %v20451_v47  ;;  %v3067_v47 = vunpack.i.h.s16 %v2342_v36  ;;  %v2299_v11 = vsel %vm756_vm0, %v13985_v1, %v20218_v26 }
 0x235   : > { %3523 = vst [vmem:[#allocation1 + $0x4] ss:$9 sm:$0xff] %v20452_v51  ;;  %v1368_v51 = vpop.f32.mrf.mxu3  ;;  %v14042_v7 = vsel %vm1896_vm6, %v2299_v11, %v2302_v53 }
 0x236   : > { %3525 = vst [vmem:[#allocation1 + $0x5] ss:$9 sm:$0xff] %v20454_v38  ;;  %v1512_v59 = vpack.c.bf16 %v1368_v51, %v1199_v52  ;;  %v14045_v18 = vpack.c.b16 %v3067_v47, %v2342_v36  ;;  %v14053_v38 = vpack.c.b16 %v3072_v39, %v2348_v25  ;;  %v2351_v47 = vsel %vm756_vm0, %v1511_v12, %v1802_v61  ;;  %v1035_v56 = vpop.f32.mrf.mxu1 }
 0x237   : > { %3527 = vst [vmem:[#allocation1 + $0x6] ss:$9 sm:$0xff] %v20455_v24  ;;  %v12680_v24 = vld [vmem:[%s20177_s0 + $0xd0] sm:$0xff]  ;;  %v3062_v52 = vunpack.i.h.s16 %v2335_v23  ;;  %v2357_v51 = vsel %vm1899_vm2, %v1511_v12, %v1802_v61  ;;  %v3037_v15 = vunpack.i.h.s16 %v14042_v7 }
 0x238   : > { %3529 = vst [vmem:[#allocation1 + $0x7] ss:$9 sm:$0xff] %v3430_v28  ;;  %v1803_v27 = vrot.slane %v1512_v59, 4  ;;  %v1804_v28 = vrot.slane %v1512_v59, 6  ;;  %v3070_v53 = vunpack.i.h.s16 %v14045_v18  ;;  %12088 = vmatmul.msk.bf16.gmra.mxu0 %vm659_vm1, %v12680_v24  ;;  %12120 = vmatmul.msk.bf16.gmra.mxu1 %vm659_vm1, %v12680_v24  ;;  %v3075_v25 = vunpack.i.h.s16 %v14053_v38 }
 0x239   : > { %20456 = vst [vmem:[#allocation43_spill] sm:$0xff] %v14053_v38  ;;  %12152 = vmatmul.msk.bf16.gmra.mxu2 %vm659_vm1, %v12680_v24  ;;  %12184 = vmatmul.msk.bf16.gmra.mxu3 %vm659_vm1, %v12680_v24 }
 0x23a   : > { %v2354_v11 = vsel %vm1892_vm5, %v1803_v27, %v1804_v28  ;;  %v2358_v59 = vsel %vm1901_vm3, %v1804_v28, %v1803_v27  ;;  %v14066_v39 = vpack.i.b16 %v3070_v53, %v3050_v22  ;;  %20458 = vst [vmem:[#allocation57_spill] sm:$0xff] %v14072_v5  ;;  %v14075_v27 = vpack.c.bf16 %v1033_v30, %v864_v42  ;;  %v1202_v22 = vpop.f32.mrf.mxu2 }
 0x23b   : > { %v2355_v26 = vsel %vm1896_vm6, %v2351_v47, %v2354_v11  ;;  %v2359_v12 = vsel %vm1903_vm4, %v2357_v51, %v2358_v59  ;;  %v2977_v28 = vunpack.i.h.s16 %v13988_v19  ;;  %v14078_v24 = vpack.i.b16 %v3075_v25, %v3055_v16 }
 0x23c   : > { %20457 = vst [vmem:[#allocation50_spill] sm:$0xff] %v14066_v39  ;;  %v3077_v61 = vunpack.i.h.s16 %v2355_v26  ;;  %v2361_v6 = vrot.slane %v2359_v12, 2  ;;  %v20231_v42 = vrot.slane %v14075_v27, 2  ;;  %v14093_v16 = vpack.c.b16 %v2997_v34, %v13957_v13  ;;  %v20467_v39 = vld [vmem:[#allocation26_spill] sm:$0xff] }
 0x23d   : > { %20459 = vst [vmem:[#allocation58_spill] sm:$0xff] %v14078_v24  ;;  %v1371_v53 = vpop.f32.mrf.mxu3  ;;  %v3017_v51 = vunpack.i.h.s16 %v14033_v41  ;;  %v14102_v12 = vpack.c.b16 %v3062_v52, %v2335_v23  ;;  %v3060_v13 = vunpack.i.h.s16 %v14072_v5  ;;  %v20463_v52 = vld [vmem:[#allocation20_spill] sm:$0xff]  ;;  %v14122_v38 = vpack.c.b16 %v2977_v28, %v13988_v19 }
 0x23e   : > { %v14087_v21 = vpack.c.b16 %v3077_v61, %v2355_v26  ;;  %v1514_v30 = vpack.c.bf16 %v1371_v53, %v1202_v22  ;;  %v3082_v26 = vunpack.i.h.s16 %v2361_v6  ;;  %v866_v61 = vpop.f32.mrf.mxu0  ;;  %v2370_v23 = vsel %vm1899_vm2, %v14075_v27, %v20231_v42 }
 0x23f   : > { %v14080_v37 = vld [vmem:[#allocation1] sm:$0xff]  ;;  %v14082_v36 = vld [vmem:[#allocation1 + $0x9] sm:$0xff]  ;;  %v14084_v47 = vld [vmem:[#allocation1 + $0x12] sm:$0xff]  ;;  %20461 = vst [vmem:[#allocation60_spill] sm:$0xff] %v14102_v12  ;;  %v20465_v58 = vpack.i.b16 %v20463_v52, %v20464_v49  ;;  %v1515_v2 = vpack.c.bf16 %v1035_v56, %v866_v61  ;;  %v14128_v5 = vpack.c.b16 %v3037_v15, %v14042_v7 }
 0x240   : > { %20460 = vst [vmem:[#allocation59_spill] sm:$0xff] %v14087_v21  ;;  %v14096_v11 = vld [vmem:[#allocation1 + $0x1b] sm:$0xff]  ;;  %v14098_v59 = vld [vmem:[#allocation1 + $0x24] sm:$0xff]  ;;  %v14100_v25 = vld [vmem:[#allocation1 + $0x2d] sm:$0xff]  ;;  %v3080_v34 = vunpack.i.h.s16 %v14087_v21  ;;  %v14119_v50 = vpack.c.b16 %v3082_v26, %v2361_v6  ;;  %v1806_v60 = vrot.slane %v1514_v30, 4  ;;  %v1807_v24 = vrot.slane %v1514_v30, 6 }
 0x241   : > { %v14104_v62 = vld [vmem:[#allocation1 + $0x36] sm:$0xff]  ;;  %v14106_v22 = vld [vmem:[#allocation1 + $0x3f] sm:$0xff]  ;;  %v20472_v49 = vld [vmem:[#allocation30_spill] sm:$0xff]  ;;  %v3065_v6 = vunpack.i.h.s16 %v14102_v12  ;;  %v20498_v12 = vrot.slane %v13936_v33, 6 }
 0x242   : > { %20462 = vst [vmem:[#allocation61_spill] sm:$0xff] %v14106_v22  ;;  %v20468_v22 = vld [vmem:[#allocation24_spill] sm:$0xff]  ;;  %v14130_v42 = vpack.i.b16 %v3080_v34, %v3060_v13  ;;  %v3085_v56 = vunpack.i.h.s16 %v14119_v50  ;;  %v2371_v28 = vsel %vm1901_vm3, %v1807_v24, %v1806_v60  ;;  %v20474_v7 = vld [vmem:[#allocation39_spill] sm:$0xff]  ;;  %v20475_v15 = vld [vmem:[#allocation37_spill] sm:$0xff]  ;;  %v1204_v52 = vpop.f32.mrf.mxu2 }
 0x243   : > { %3539 = vst [vmem:[#allocation1] ss:$9 sm:$0xff] %v20465_v58  ;;  %v20469_v53 = vpack.i.b16 %v20467_v39, %v20468_v22  ;;  %v20471_v21 = vld [vmem:[#allocation32_spill] sm:$0xff]  ;;  %v14141_v39 = vpack.c.b16 %v3017_v51, %v14033_v41  ;;  %v20476_v30 = vpack.i.b16 %v20474_v7, %v20475_v15  ;;  %v14147_v26 = vsel %vm1903_vm4, %v2370_v23, %v2371_v28  ;;  %v20477_v61 = vld [vmem:[#allocation46_spill] sm:$0xff]  ;;  %v20481_v51 = vld [vmem:[#allocation53_spill] sm:$0xff]  ;;  %v1038_v15 = vpop.f32.mrf.mxu1 }
 0x244   : > { %20466 = vst [vmem:[#allocation20_spill] sm:$0xff] %v14119_v50  ;;  %v20473_v58 = vpack.i.b16 %v20471_v21, %v20472_v49  ;;  %v12348_v21 = vpack.i.b16 %v14093_v16, %v14122_v38  ;;  %v20478_v22 = vld [vmem:[#allocation44_spill] sm:$0xff]  ;;  %v14154_v34 = vpack.i.b16 %v3085_v56, %v3065_v6  ;;  %v20482_v49 = vld [vmem:[#allocation51_spill] sm:$0xff] }
 0x245   : > { %3541 = vst [vmem:[#allocation1 + $0x1] ss:$9 sm:$0xff] %v20469_v53  ;;  %v20479_v13 = vpack.i.b16 %v20477_v61, %v20478_v22  ;;  %v1808_v53 = vrot.slane %v1515_v2, 2  ;;  %v1373_v41 = vpop.f32.mrf.mxu3  ;;  %v12352_v23 = vpack.i.b16 %v14128_v5, %v14141_v39  ;;  %v12681_v56 = vld [vmem:[%s20177_s0 + $0xd8] sm:$0xff] }
 0x246   : > { %20470 = vst [vmem:[#allocation18_spill] sm:$0xff] %v14130_v42  ;;  %v1516_v28 = vpack.c.bf16 %v1373_v41, %v1204_v52  ;;  %v869_v7 = vpop.f32.mrf.mxu0  ;;  %v20487_v52 = vrot.slane %v13873_v54, 4  ;;  %v20488_v41 = vrot.slane %v13873_v54, 6  ;;  %v3020_v42 = vunpack.i.h.s16 %v14141_v39  ;;  %v20502_v39 = vld [vmem:[#allocation34_spill] sm:$0xff] }
 0x247   : > { %3543 = vst [vmem:[#allocation1 + $0x2] ss:$9 sm:$0xff] %v20473_v58  ;;  %v20483_v58 = vpack.i.b16 %v20481_v51, %v20482_v49  ;;  %v20486_v51 = vrot.slane %v13860_v43, 6 }
 0x248   : > { %3545 = vst [vmem:[#allocation1 + $0x3] ss:$9 sm:$0xff] %v20476_v30  ;;  %v20484_v30 = vrot.slane %v13901_v40, 2  ;;  %v1809_v61 = vrot.slane %v1516_v28, 4  ;;  %v1810_v22 = vrot.slane %v1516_v28, 6  ;;  %v2254_v49 = vsel %vm1901_vm3, %v20488_v41, %v20487_v52  ;;  %12089 = vmatmul.msk.bf16.gmra.mxu0 %vm659_vm1, %v12681_v56  ;;  %12121 = vmatmul.msk.bf16.gmra.mxu1 %vm659_vm1, %v12681_v56 }
 0x249   : > { %3547 = vst [vmem:[#allocation1 + $0x4] ss:$9 sm:$0xff] %v20479_v13  ;;  %v20485_v13 = vrot.slane %v13860_v43, 4  ;;  %12153 = vmatmul.msk.bf16.gmra.mxu2 %vm659_vm1, %v12681_v56  ;;  %12185 = vmatmul.msk.bf16.gmra.mxu3 %vm659_vm1, %v12681_v56 }
 0x24a   : > { %20480 = vst [vmem:[#allocation26_spill] sm:$0xff] %v14154_v34  ;;  %v2227_v6 = vsel %vm1899_vm2, %v13901_v40, %v20484_v30  ;;  %v2367_v40 = vsel %vm1892_vm5, %v1806_v60, %v1807_v24  ;;  %v2380_v43 = vsel %vm1892_vm5, %v1809_v61, %v1810_v22  ;;  %v2384_v28 = vsel %vm1901_vm3, %v1810_v22, %v1809_v61 }
 0x24b   : > { %3549 = vst [vmem:[#allocation1 + $0x5] ss:$9 sm:$0xff] %v20483_v58  ;;  %v2377_v58 = vsel %vm756_vm0, %v1515_v2, %v1808_v53  ;;  %v20489_v30 = vrot.slane %v13888_v3, 2  ;;  %v20490_v61 = vrot.slane %v14075_v27, 2  ;;  %v1517_v22 = vpack.c.bf16 %v1038_v15, %v869_v7  ;;  %v1040_v15 = vpop.f32.mrf.mxu1 }
 0x24c   : > { %3551 = vst [vmem:[#allocation1 + $0x6] ss:$9 sm:$0xff] %v12348_v21  ;;  %v2228_v21 = vsel %vm1901_vm3, %v20486_v51, %v20485_v13  ;;  %v14192_v60 = vsel %vm1896_vm6, %v2377_v58, %v2380_v43  ;;  %v2374_v13 = vrot.slane %v14147_v26, 2  ;;  %v1207_v51 = vpop.f32.mrf.mxu2  ;;  %v3000_v26 = vunpack.i.h.s16 %v14093_v16 }
 0x24d   : > { %3553 = vst [vmem:[#allocation1 + $0x7] ss:$9 sm:$0xff] %v12352_v23  ;;  %v2383_v23 = vsel %vm1899_vm2, %v1515_v2, %v1808_v53  ;;  %v2253_v54 = vsel %vm1899_vm2, %v13888_v3, %v20489_v30  ;;  %v14198_v2 = vsel %vm1903_vm4, %v2227_v6, %v2228_v21  ;;  %v2364_v3 = vsel %vm756_vm0, %v14075_v27, %v20490_v61  ;;  %v1376_v52 = vpop.f32.mrf.mxu3 }
 0x24e   : > { %v14195_v24 = vsel %vm1903_vm4, %v2383_v23, %v2384_v28  ;;  %v14201_v53 = vsel %vm1903_vm4, %v2253_v54, %v2254_v49  ;;  %v2368_v56 = vsel %vm1896_vm6, %v2364_v3, %v2367_v40  ;;  %v1811_v41 = vrot.slane %v1517_v22, 2  ;;  %v871_v7 = vpop.f32.mrf.mxu0 }
 0x24f   : > { %v1518_v58 = vpack.c.bf16 %v1376_v52, %v1207_v51  ;;  %v2980_v21 = vunpack.i.h.s16 %v14122_v38  ;;  %v20491_v40 = vrot.slane %v13961_v32, 4  ;;  %v20492_v28 = vrot.slane %v13961_v32, 6 }
 0x250   : > { %v3087_v3 = vunpack.i.h.s16 %v2368_v56  ;;  %v2396_v51 = vsel %vm1899_vm2, %v1517_v22, %v1811_v41  ;;  %v3092_v16 = vunpack.i.h.s16 %v2374_v13  ;;  %v1519_v34 = vpack.c.bf16 %v1040_v15, %v871_v7  ;;  %v20501_v15 = vld [vmem:[#allocation28_spill] sm:$0xff] }
 0x251   : > { %v2306_v30 = vsel %vm1901_vm3, %v20492_v28, %v20491_v40  ;;  %v1812_v6 = vrot.slane %v1518_v58, 4  ;;  %v1813_v49 = vrot.slane %v1518_v58, 6  ;;  %v20496_v32 = vrot.slane %v13932_v35, 2  ;;  %v20500_v58 = vld [vmem:[#allocation22_spill] sm:$0xff] }
 0x252   : > { %v20497_v28 = vrot.slane %v13936_v33, 4  ;;  %v3040_v7 = vunpack.i.h.s16 %v14128_v5  ;;  %v20503_v5 = vld [vmem:[#allocation41_spill] sm:$0xff] }
 0x253   : > { %v2279_v40 = vsel %vm1899_vm2, %v13932_v35, %v20496_v32  ;;  %v2390_v35 = vsel %vm756_vm0, %v1517_v22, %v1811_v41  ;;  %v2393_v32 = vsel %vm1892_vm5, %v1812_v6, %v1813_v49  ;;  %v2397_v33 = vsel %vm1901_vm3, %v1813_v49, %v1812_v6 }
 0x254   : > { %v14212_v23 = vld [vmem:[#allocation1] sm:$0xff]  ;;  %v14214_v43 = vld [vmem:[#allocation1 + $0x9] sm:$0xff]  ;;  %v14216_v27 = vld [vmem:[#allocation1 + $0x12] sm:$0xff]  ;;  %v2280_v50 = vsel %vm1901_vm3, %v20498_v12, %v20497_v28  ;;  %v14259_v28 = vpack.c.b16 %v3087_v3, %v2368_v56  ;;  %v3424_v49 = vpack.i.b16 %v3000_v26, %v2980_v21  ;;  %v2387_v3 = vrot.slane %v14195_v24, 2 }
 0x255   : > { %v14224_v54 = vld [vmem:[#allocation1 + $0x1b] sm:$0xff]  ;;  %v14226_v38 = vld [vmem:[#allocation1 + $0x24] sm:$0xff]  ;;  %v14228_v61 = vld [vmem:[#allocation1 + $0x2d] sm:$0xff]  ;;  %v1378_v6 = vpop.f32.mrf.mxu3 }
 0x256   : > { %20493 = vst [vmem:[#allocation24_spill] sm:$0xff] %v14228_v61  ;;  %v14231_v52 = vld [vmem:[#allocation1 + $0x36] sm:$0xff]  ;;  %v14233_v19 = vld [vmem:[#allocation1 + $0x3f] sm:$0xff]  ;;  %v1209_v61 = vpop.f32.mrf.mxu2  ;;  %v874_v26 = vpop.f32.mrf.mxu0 }
 0x257   : > { %20494 = vst [vmem:[#allocation32_spill] sm:$0xff] %v14231_v52  ;;  %v20499_v52 = vrot.slane %v13985_v1, 2  ;;  %v12682_v56 = vld [vmem:[%s20177_s0 + $0xe0] sm:$0xff] }
 0x258   : > { %20495 = vst [vmem:[#allocation30_spill] sm:$0xff] %v14233_v19  ;;  %12090 = vmatmul.msk.bf16.gmra.mxu0 %vm659_vm1, %v12682_v56  ;;  %12122 = vmatmul.msk.bf16.gmra.mxu1 %vm659_vm1, %v12682_v56 }
 0x259   : > { %v2305_v19 = vsel %vm1899_vm2, %v13985_v1, %v20499_v52  ;;  %3563 = vst [vmem:[#allocation1] ss:$9 sm:$0xff] %v20500_v58  ;;  %v2394_v1 = vsel %vm1896_vm6, %v2390_v35, %v2393_v32  ;;  %v2398_v52 = vsel %vm1903_vm4, %v2396_v51, %v2397_v33  ;;  %v14264_v58 = vpack.c.b16 %v3092_v16, %v2374_v13  ;;  %v20506_v35 = vld [vmem:[#allocation55_spill] sm:$0xff] }
 0x25a   : > { %3565 = vst [vmem:[#allocation1 + $0x1] ss:$9 sm:$0xff] %v20501_v15  ;;  %v14256_v12 = vsel %vm1903_vm4, %v2305_v19, %v2306_v30  ;;  %v2400_v22 = vrot.slane %v2398_v52, 2  ;;  %v3107_v41 = vunpack.i.h.s16 %v2394_v1  ;;  %v1814_v15 = vrot.slane %v1519_v34, 2  ;;  %v20505_v30 = vld [vmem:[#allocation48_spill] sm:$0xff]  ;;  %12154 = vmatmul.msk.bf16.gmra.mxu2 %vm659_vm1, %v12682_v56  ;;  %12186 = vmatmul.msk.bf16.gmra.mxu3 %vm659_vm1, %v12682_v56 }
 0x25b   : > { %3567 = vst [vmem:[#allocation1 + $0x2] ss:$9 sm:$0xff] %v20502_v39  ;;  %v14267_v19 = vsel %vm1903_vm4, %v2279_v40, %v2280_v50  ;;  %v1520_v51 = vpack.c.bf16 %v1378_v6, %v1209_v61  ;;  %v3432_v16 = vpack.i.b16 %v3040_v7, %v3020_v42  ;;  %v1043_v50 = vpop.f32.mrf.mxu1  ;;  %v3090_v40 = vunpack.i.h.s16 %v14259_v28 }
 0x25c   : > { %3569 = vst [vmem:[#allocation1 + $0x3] ss:$9 sm:$0xff] %v20503_v5  ;;  %v14276_v32 = vpack.c.b16 %v3107_v41, %v2394_v1  ;;  %v3112_v21 = vunpack.i.h.s16 %v2400_v22  ;;  %v3097_v33 = vunpack.i.h.s16 %v14192_v60  ;;  %v3095_v24 = vunpack.i.h.s16 %v14264_v58 }
 0x25d   : > { %20504 = vst [vmem:[#allocation39_spill] sm:$0xff] %v14264_v58  ;;  %v1815_v39 = vrot.slane %v1520_v51, 4  ;;  %v1816_v52 = vrot.slane %v1520_v51, 6  ;;  %v2403_v7 = vsel %vm756_vm0, %v1519_v34, %v1814_v15  ;;  %v3102_v1 = vunpack.i.h.s16 %v2387_v3 }
 0x25e   : > { %3571 = vst [vmem:[#allocation1 + $0x4] ss:$9 sm:$0xff] %v20505_v30  ;;  %v3110_v61 = vunpack.i.h.s16 %v14276_v32  ;;  %v14282_v42 = vpack.c.b16 %v3112_v21, %v2400_v22  ;;  %v2409_v5 = vsel %vm1899_vm2, %v1519_v34, %v1814_v15  ;;  %v20510_v21 = vrot.slane %v14201_v53, 2 }
 0x25f   : > { %3573 = vst [vmem:[#allocation1 + $0x5] ss:$9 sm:$0xff] %v20506_v35  ;;  %v2406_v41 = vsel %vm1892_vm5, %v1815_v39, %v1816_v52  ;;  %v2410_v6 = vsel %vm1901_vm3, %v1816_v52, %v1815_v39  ;;  %v14302_v35 = vpack.c.bf16 %v1043_v50, %v874_v26  ;;  %v1212_v52 = vpop.f32.mrf.mxu2  ;;  %v2283_v30 = vrot.slane %v14267_v19, 2 }
 0x260   : > { %3575 = vst [vmem:[#allocation1 + $0x6] ss:$9 sm:$0xff] %v3424_v49  ;;  %v3115_v22 = vunpack.i.h.s16 %v14282_v42  ;;  %v14293_v49 = vpack.i.b16 %v3110_v61, %v3090_v40  ;;  %v2407_v51 = vsel %vm1896_vm6, %v2403_v7, %v2406_v41  ;;  %v2411_v34 = vsel %vm1903_vm4, %v2409_v5, %v2410_v6  ;;  %v1381_v61 = vpop.f32.mrf.mxu3  ;;  %v876_v6 = vpop.f32.mrf.mxu0 }
 0x261   : > { %3577 = vst [vmem:[#allocation1 + $0x7] ss:$9 sm:$0xff] %v3432_v16  ;;  %v14299_v16 = vpack.c.b16 %v3097_v33, %v14192_v60  ;;  %v3117_v15 = vunpack.i.h.s16 %v2407_v51  ;;  %v3002_v56 = vunpack.i.h.s16 %v20510_v21  ;;  %v2413_v40 = vrot.slane %v2411_v34, 2 }
 0x262   : > { %20507 = vst [vmem:[#allocation37_spill] sm:$0xff] %v14282_v42  ;;  %v14306_v39 = vpack.i.b16 %v3115_v22, %v3095_v24  ;;  %v20239_v60 = vrot.slane %v14302_v35, 2  ;;  %v1522_v33 = vpack.c.bf16 %v1381_v61, %v1212_v52  ;;  %v20513_v7 = vrot.slane %v14198_v2, 2 }
 0x263   : > { %20508 = vst [vmem:[#allocation46_spill] sm:$0xff] %v14293_v49  ;;  %v14309_v13 = vpack.c.b16 %v3117_v15, %v2407_v51  ;;  %v20514_v26 = vrot.slane %v14256_v12, 2  ;;  %v14316_v41 = vpack.c.b16 %v3102_v1, %v2387_v3  ;;  %v3122_v24 = vunpack.i.h.s16 %v2413_v40  ;;  %v1045_v22 = vpop.f32.mrf.mxu1 }
 0x264   : > { %20509 = vst [vmem:[#allocation44_spill] sm:$0xff] %v14299_v16  ;;  %v2982_v5 = vunpack.i.h.s16 %v20513_v7  ;;  %v3100_v51 = vunpack.i.h.s16 %v14299_v16  ;;  %v2422_v3 = vsel %vm1899_vm2, %v14302_v35, %v20239_v60  ;;  %v1819_v58 = vrot.slane %v1522_v33, 6 }
 0x265   : > { %20511 = vst [vmem:[#allocation53_spill] sm:$0xff] %v14306_v39  ;;  %v3042_v50 = vunpack.i.h.s16 %v20514_v26  ;;  %v3120_v15 = vunpack.i.h.s16 %v14309_v13  ;;  %v14338_v26 = vpack.c.b16 %v3122_v24, %v2413_v40  ;;  %v1818_v39 = vrot.slane %v1522_v33, 4 }
 0x266   : > { %20512 = vst [vmem:[#allocation51_spill] sm:$0xff] %v14309_v13  ;;  %v1523_v42 = vpack.c.bf16 %v1045_v22, %v876_v6  ;;  %v20521_v49 = vrot.slane %v14201_v53, 2  ;;  %v3022_v52 = vunpack.i.h.s16 %v2283_v30  ;;  %v3105_v40 = vunpack.i.h.s16 %v14316_v41  ;;  %v20529_v6 = vld [vmem:[#allocation27_spill] sm:$0xff]  ;;  %v20530_v22 = vld [vmem:[#allocation25_spill] sm:$0xff] }
 0x267   : > { %20515 = vst [vmem:[#allocation22_spill] sm:$0xff] %v14316_v41  ;;  %v14348_v60 = vpack.i.b16 %v3120_v15, %v3100_v51  ;;  %v3125_v33 = vunpack.i.h.s16 %v14338_v26  ;;  %v20531_v51 = vpack.i.b16 %v20529_v6, %v20530_v22  ;;  %v20537_v6 = vld [vmem:[#allocation40_spill] sm:$0xff]  ;;  %v20538_v22 = vld [vmem:[#allocation38_spill] sm:$0xff] }
 0x268   : > { %v14318_v34 = vld [vmem:[#allocation1] sm:$0xff]  ;;  %v14320_v21 = vld [vmem:[#allocation1 + $0x9] sm:$0xff]  ;;  %v14322_v19 = vld [vmem:[#allocation1 + $0x12] sm:$0xff]  ;;  %20520 = vst [vmem:[#allocation55_spill] sm:$0xff] %v14338_v26  ;;  %v14377_v26 = vpack.c.b16 %v3022_v52, %v2283_v30 }
 0x269   : > { %20516 = vst [vmem:[#allocation28_spill] sm:$0xff] %v14320_v21  ;;  %v14332_v1 = vld [vmem:[#allocation1 + $0x1b] sm:$0xff]  ;;  %v14334_v61 = vld [vmem:[#allocation1 + $0x24] sm:$0xff]  ;;  %v14336_v7 = vld [vmem:[#allocation1 + $0x2d] sm:$0xff]  ;;  %v14375_v41 = vpack.i.b16 %v3125_v33, %v3105_v40 }
 0x26a   : > { %20517 = vst [vmem:[#allocation34_spill] sm:$0xff] %v14322_v19  ;;  %v14342_v19 = vpack.c.b16 %v3002_v56, %v20521_v49  ;;  %v14344_v16 = vld [vmem:[#allocation1 + $0x36] sm:$0xff]  ;;  %v14346_v13 = vld [vmem:[#allocation1 + $0x3f] sm:$0xff]  ;;  %v2423_v49 = vsel %vm1901_vm3, %v1819_v58, %v1818_v39  ;;  %v20528_v56 = vrot.slane %v14256_v12, 2  ;;  %v1820_v12 = vrot.slane %v1523_v42, 2  ;;  %v20543_v52 = vld [vmem:[#allocation54_spill] sm:$0xff] }
 0x26b   : > { %20518 = vst [vmem:[#allocation41_spill] sm:$0xff] %v14332_v1  ;;  %v20525_v1 = vld [vmem:[#allocation21_spill] sm:$0xff]  ;;  %v14366_v15 = vsel %vm1903_vm4, %v2422_v3, %v2423_v49  ;;  %v20540_v3 = vld [vmem:[#allocation47_spill] sm:$0xff]  ;;  %v1048_v49 = vpop.f32.mrf.mxu1 }
 0x26c   : > { %20519 = vst [vmem:[#allocation48_spill] sm:$0xff] %v14334_v61  ;;  %v20526_v61 = vld [vmem:[#allocation19_spill] sm:$0xff]  ;;  %v14360_v24 = vpack.c.b16 %v3042_v50, %v20528_v56  ;;  %v1214_v50 = vpop.f32.mrf.mxu2  ;;  %v1383_v56 = vpop.f32.mrf.mxu3  ;;  %v20541_v40 = vld [vmem:[#allocation45_spill] sm:$0xff] }
 0x26d   : > { %20522 = vst [vmem:[#allocation62_spill] sm:$0xff] %v14344_v16  ;;  %v20527_v21 = vpack.i.b16 %v20525_v1, %v20526_v61  ;;  %v20533_v61 = vld [vmem:[#allocation33_spill] sm:$0xff]  ;;  %v20542_v33 = vpack.i.b16 %v20540_v3, %v20541_v40 }
 0x26e   : > { %20523 = vst [vmem:[#allocation63_spill] sm:$0xff] %v14346_v13  ;;  %v12353_v30 = vpack.i.b16 %v14360_v24, %v14377_v26  ;;  %v20559_v13 = vld [vmem:[#allocation49_spill] sm:$0xff] }
 0x26f   : > { %20524 = vst [vmem:[#allocation64_spill] sm:$0xff] %v14348_v60  ;;  %v20534_v60 = vld [vmem:[#allocation31_spill] sm:$0xff] }
 0x270   : > { %3587 = vst [vmem:[#allocation1] ss:$9 sm:$0xff] %v20527_v21  ;;  %v20532_v21 = vrot.slane %v14198_v2, 2  ;;  %v20535_v53 = vpack.i.b16 %v20533_v61, %v20534_v60  ;;  %v12683_v2 = vld [vmem:[%s20177_s0 + $0xe8] sm:$0xff] }
 0x271   : > { %3589 = vst [vmem:[#allocation1 + $0x1] ss:$9 sm:$0xff] %v20531_v51  ;;  %v20539_v51 = vpack.i.b16 %v20537_v6, %v20538_v22  ;;  %12091 = vmatmul.msk.bf16.gmra.mxu0 %vm659_vm1, %v12683_v2  ;;  %12123 = vmatmul.msk.bf16.gmra.mxu1 %vm659_vm1, %v12683_v2 }
 0x272   : > { %v14370_v1 = vpack.c.b16 %v2982_v5, %v20532_v21  ;;  %3591 = vst [vmem:[#allocation1 + $0x2] ss:$9 sm:$0xff] %v20535_v53  ;;  %v1524_v5 = vpack.c.bf16 %v1383_v56, %v1214_v50  ;;  %v879_v53 = vpop.f32.mrf.mxu0  ;;  %v20544_v21 = vld [vmem:[#allocation52_spill] sm:$0xff]  ;;  %v2419_v50 = vsel %vm1892_vm5, %v1818_v39, %v1819_v58  ;;  %v2429_v56 = vsel %vm756_vm0, %v1523_v42, %v1820_v12 }
 0x273   : > { %20536 = vst [vmem:[#allocation21_spill] sm:$0xff] %v14375_v41  ;;  %v20545_v61 = vpack.i.b16 %v20543_v52, %v20544_v21  ;;  %12155 = vmatmul.msk.bf16.gmra.mxu2 %vm659_vm1, %v12683_v2  ;;  %12187 = vmatmul.msk.bf16.gmra.mxu3 %vm659_vm1, %v12683_v2 }
 0x274   : > { %3593 = vst [vmem:[#allocation1 + $0x3] ss:$9 sm:$0xff] %v20539_v51  ;;  %v12349_v60 = vpack.i.b16 %v14342_v19, %v14370_v1  ;;  %v1821_v6 = vrot.slane %v1524_v5, 4  ;;  %v1822_v22 = vrot.slane %v1524_v5, 6  ;;  %v2435_v51 = vsel %vm1899_vm2, %v1523_v42, %v1820_v12  ;;  %v1386_v52 = vpop.f32.mrf.mxu3 }
 0x275   : > { %3595 = vst [vmem:[#allocation1 + $0x4] ss:$9 sm:$0xff] %v20542_v33  ;;  %v20546_v5 = vrot.slane %v14302_v35, 2  ;;  %v2426_v12 = vrot.slane %v14366_v15, 2  ;;  %v1525_v33 = vpack.c.bf16 %v1048_v49, %v879_v53  ;;  %v2985_v15 = vunpack.i.h.s16 %v14370_v1 }
 0x276   : > { %3597 = vst [vmem:[#allocation1 + $0x5] ss:$9 sm:$0xff] %v20545_v61  ;;  %v2432_v3 = vsel %vm1892_vm5, %v1821_v6, %v1822_v22  ;;  %v2436_v40 = vsel %vm1901_vm3, %v1822_v22, %v1821_v6  ;;  %v1050_v22 = vpop.f32.mrf.mxu1  ;;  %v3005_v53 = vunpack.i.h.s16 %v14342_v19  ;;  %v3045_v49 = vunpack.i.h.s16 %v14360_v24 }
 0x277   : > { %3599 = vst [vmem:[#allocation1 + $0x6] ss:$9 sm:$0xff] %v12349_v60  ;;  %v2416_v58 = vsel %vm756_vm0, %v14302_v35, %v20546_v5  ;;  %v14409_v39 = vsel %vm1896_vm6, %v2429_v56, %v2432_v3  ;;  %v14412_v60 = vsel %vm1903_vm4, %v2435_v51, %v2436_v40  ;;  %v1823_v21 = vrot.slane %v1525_v33, 2 }
 0x278   : > { %3601 = vst [vmem:[#allocation1 + $0x7] ss:$9 sm:$0xff] %v12353_v30  ;;  %v2420_v42 = vsel %vm1896_vm6, %v2416_v58, %v2419_v50  ;;  %v1217_v30 = vpop.f32.mrf.mxu2  ;;  %v3132_v41 = vunpack.i.h.s16 %v2426_v12  ;;  %v3025_v19 = vunpack.i.h.s16 %v14377_v26 }
 0x279   : > { %v1526_v2 = vpack.c.bf16 %v1386_v52, %v1217_v30  ;;  %v3127_v61 = vunpack.i.h.s16 %v2420_v42  ;;  %v2448_v35 = vsel %vm1899_vm2, %v1525_v33, %v1823_v21 }
 0x27a   : > { %v881_v6 = vpop.f32.mrf.mxu0  ;;  %v14442_v24 = vpack.c.b16 %v3132_v41, %v2426_v12  ;;  %v12684_v41 = vld [vmem:[%s20177_s0 + $0xf0] sm:$0xff] }
 0x27b   : > { %v1824_v56 = vrot.slane %v1526_v2, 4  ;;  %v1825_v3 = vrot.slane %v1526_v2, 6  ;;  %v1527_v5 = vpack.c.bf16 %v1050_v22, %v881_v6  ;;  %v14432_v2 = vpack.c.b16 %v3127_v61, %v2420_v42  ;;  %v20555_v42 = vld [vmem:[#allocation23_spill] sm:$0xff] }
 0x27c   : > { %v2442_v6 = vsel %vm756_vm0, %v1525_v33, %v1823_v21  ;;  %v2439_v33 = vrot.slane %v14412_v60, 2  ;;  %v20557_v12 = vld [vmem:[#allocation35_spill] sm:$0xff] }
 0x27d   : > { %v2445_v22 = vsel %vm1892_vm5, %v1824_v56, %v1825_v3 }
 0x27f   : > { %v14417_v51 = vld [vmem:[#allocation1] sm:$0xff]  ;;  %v14419_v40 = vld [vmem:[#allocation1 + $0x9] sm:$0xff]  ;;  %v14421_v50 = vld [vmem:[#allocation1 + $0x12] sm:$0xff] }
 0x280   : > { %20547 = vst [vmem:[#allocation19_spill] sm:$0xff] %v14417_v51  ;;  %v14426_v58 = vld [vmem:[#allocation1 + $0x1b] sm:$0xff]  ;;  %v14428_v30 = vld [vmem:[#allocation1 + $0x24] sm:$0xff]  ;;  %v14430_v52 = vld [vmem:[#allocation1 + $0x2d] sm:$0xff] }
 0x281   : > { %20548 = vst [vmem:[#allocation27_spill] sm:$0xff] %v14419_v40  ;;  %v14437_v40 = vld [vmem:[#allocation1 + $0x36] sm:$0xff]  ;;  %v14439_v1 = vld [vmem:[#allocation1 + $0x3f] sm:$0xff]  ;;  %12092 = vmatmul.msk.bf16.gmra.mxu0 %vm659_vm1, %v12684_v41  ;;  %12124 = vmatmul.msk.bf16.gmra.mxu1 %vm659_vm1, %v12684_v41 }
 0x282   : > { %20549 = vst [vmem:[#allocation25_spill] sm:$0xff] %v14421_v50  ;;  %v2449_v50 = vsel %vm1901_vm3, %v1825_v3, %v1824_v56  ;;  %v1219_v56 = vpop.f32.mrf.mxu2  ;;  %v1388_v3 = vpop.f32.mrf.mxu3 }
 0x283   : > { %20550 = vst [vmem:[#allocation33_spill] sm:$0xff] %v14426_v58  ;;  %v1826_v58 = vrot.slane %v1527_v5, 2  ;;  %v1528_v26 = vpack.c.bf16 %v1388_v3, %v1219_v56  ;;  %v3142_v56 = vunpack.i.h.s16 %v2439_v33  ;;  %12156 = vmatmul.msk.bf16.gmra.mxu2 %vm659_vm1, %v12684_v41  ;;  %12188 = vmatmul.msk.bf16.gmra.mxu3 %vm659_vm1, %v12684_v41 }
 0x284   : > { %20551 = vst [vmem:[#allocation31_spill] sm:$0xff] %v14428_v30  ;;  %v2446_v30 = vsel %vm1896_vm6, %v2442_v6, %v2445_v22  ;;  %v1053_v22 = vpop.f32.mrf.mxu1 }
 0x285   : > { %20552 = vst [vmem:[#allocation40_spill] sm:$0xff] %v14430_v52  ;;  %v2450_v52 = vsel %vm1903_vm4, %v2448_v35, %v2449_v50  ;;  %v3147_v61 = vunpack.i.h.s16 %v2446_v30  ;;  %v3434_v35 = vpack.i.b16 %v3045_v49, %v3025_v19  ;;  %v3130_v50 = vunpack.i.h.s16 %v14432_v2 }
 0x286   : > { %20553 = vst [vmem:[#allocation38_spill] sm:$0xff] %v14437_v40  ;;  %v2452_v21 = vrot.slane %v2450_v52, 2  ;;  %v20556_v40 = vld [vmem:[#allocation29_spill] sm:$0xff]  ;;  %v884_v52 = vpop.f32.mrf.mxu0  ;;  %v1828_v51 = vrot.slane %v1528_v26, 6  ;;  %v2461_v3 = vsel %vm1899_vm2, %v1527_v5, %v1826_v58 }
 0x287   : > { %20554 = vst [vmem:[#allocation47_spill] sm:$0xff] %v14439_v1  ;;  %v3426_v1 = vpack.i.b16 %v3005_v53, %v2985_v15  ;;  %v14454_v6 = vpack.c.b16 %v3147_v61, %v2446_v30  ;;  %v3137_v15 = vunpack.i.h.s16 %v14409_v39  ;;  %v1827_v53 = vrot.slane %v1528_v26, 4  ;;  %v20560_v61 = vld [vmem:[#allocation56_spill] sm:$0xff] }
 0x288   : > { %3611 = vst [vmem:[#allocation1] ss:$9 sm:$0xff] %v20555_v42  ;;  %v3152_v60 = vunpack.i.h.s16 %v2452_v21  ;;  %v20558_v42 = vld [vmem:[#allocation42_spill] sm:$0xff]  ;;  %v2455_v30 = vsel %vm756_vm0, %v1527_v5, %v1826_v58 }
 0x289   : > { %3613 = vst [vmem:[#allocation1 + $0x1] ss:$9 sm:$0xff] %v20556_v40  ;;  %v3135_v40 = vunpack.i.h.s16 %v14442_v24  ;;  %v3150_v49 = vunpack.i.h.s16 %v14454_v6  ;;  %v2462_v26 = vsel %vm1901_vm3, %v1828_v51, %v1827_v53  ;;  %v14479_v5 = vpack.c.b16 %v3137_v15, %v14409_v39 }
 0x28a   : > { %3615 = vst [vmem:[#allocation1 + $0x2] ss:$9 sm:$0xff] %v20557_v12  ;;  %v14461_v19 = vpack.c.b16 %v3152_v60, %v2452_v21  ;;  %v2458_v12 = vsel %vm1892_vm5, %v1827_v53, %v1828_v51  ;;  %v2463_v58 = vsel %vm1903_vm4, %v2461_v3, %v2462_v26  ;;  %v1391_v16 = vpop.f32.mrf.mxu3  ;;  %v14486_v60 = vpack.c.b16 %v3142_v56, %v2439_v33 }
 0x28b   : > { %3617 = vst [vmem:[#allocation1 + $0x3] ss:$9 sm:$0xff] %v20558_v42  ;;  %v14473_v21 = vpack.i.b16 %v3150_v49, %v3130_v50  ;;  %v2459_v42 = vsel %vm1896_vm6, %v2455_v30, %v2458_v12  ;;  %v2465_v41 = vrot.slane %v2463_v58, 2  ;;  %v3140_v15 = vunpack.i.h.s16 %v14479_v5 }
 0x28c   : > { %3619 = vst [vmem:[#allocation1 + $0x4] ss:$9 sm:$0xff] %v20559_v13  ;;  %v3155_v13 = vunpack.i.h.s16 %v14461_v19  ;;  %v3157_v51 = vunpack.i.h.s16 %v2459_v42  ;;  %v1055_v39 = vpop.f32.mrf.mxu1  ;;  %v3145_v56 = vunpack.i.h.s16 %v14486_v60 }
 0x28d   : > { %3621 = vst [vmem:[#allocation1 + $0x5] ss:$9 sm:$0xff] %v20560_v61  ;;  %v1222_v61 = vpop.f32.mrf.mxu2  ;;  %v3162_v30 = vunpack.i.h.s16 %v2465_v41 }
 0x28e   : > { %3623 = vst [vmem:[#allocation1 + $0x6] ss:$9 sm:$0xff] %v3426_v1  ;;  %v1529_v1 = vpack.c.bf16 %v1053_v22, %v884_v52  ;;  %v14482_v53 = vpack.i.b16 %v3155_v13, %v3135_v40  ;;  %v14484_v50 = vpack.c.b16 %v3157_v51, %v2459_v42  ;;  %v886_v12 = vpop.f32.mrf.mxu0 }
 0x28f   : > { %20561 = vst [vmem:[#allocation45_spill] sm:$0xff] %v14473_v21  ;;  %v1530_v21 = vpack.c.bf16 %v1391_v16, %v1222_v61  ;;  %v14493_v22 = vpack.c.b16 %v3162_v30, %v2465_v41  ;;  %v1531_v13 = vpack.c.bf16 %v1055_v39, %v886_v12  ;;  %v12422_v16 = vpack.i.b16 %v14276_v32, %v14259_v28 }
 0x290   : > { %20562 = vst [vmem:[#allocation54_spill] sm:$0xff] %v14479_v5  ;;  %v1829_v49 = vrot.slane %v1529_v1, 2  ;;  %v3160_v3 = vunpack.i.h.s16 %v14484_v50  ;;  %v12426_v28 = vpack.i.b16 %v14454_v6, %v14432_v2  ;;  %v12685_v2 = vld [vmem:[%s20177_s0 + $0xf8] sm:$0xff] }
 0x291   : > { %3625 = vst [vmem:[#allocation1 + $0x7] ss:$9 sm:$0xff] %v3434_v35  ;;  %v1830_v40 = vrot.slane %v1530_v21, 4  ;;  %v1831_v26 = vrot.slane %v1530_v21, 6  ;;  %v3165_v42 = vunpack.i.h.s16 %v14493_v22  ;;  %12093 = vmatmul.msk.bf16.gmra.mxu0 %vm659_vm1, %v12685_v2  ;;  %12125 = vmatmul.msk.bf16.gmra.mxu1 %vm659_vm1, %v12685_v2 }
 0x292   : > { %20563 = vst [vmem:[#allocation52_spill] sm:$0xff] %v14484_v50  ;;  %v2474_v52 = vsel %vm1899_vm2, %v1529_v1, %v1829_v49  ;;  %v14497_v33 = vpack.i.b16 %v3160_v3, %v3140_v15  ;;  %v1832_v3 = vrot.slane %v1531_v13, 2  ;;  %v1393_v35 = vpop.f32.mrf.mxu3 }
 0x293   : > { %20564 = vst [vmem:[#allocation23_spill] sm:$0xff] %v14486_v60  ;;  %v2475_v51 = vsel %vm1901_vm3, %v1831_v26, %v1830_v40  ;;  %v14519_v15 = vpack.i.b16 %v3165_v42, %v3145_v56  ;;  %12157 = vmatmul.msk.bf16.gmra.mxu2 %vm659_vm1, %v12685_v2  ;;  %12189 = vmatmul.msk.bf16.gmra.mxu3 %vm659_vm1, %v12685_v2 }
 0x294   : > { %20565 = vst [vmem:[#allocation29_spill] sm:$0xff] %v14493_v22  ;;  %v2476_v32 = vsel %vm1903_vm4, %v2474_v52, %v2475_v51  ;;  %v20573_v52 = vpack.i.b16 %v14045_v18, %v14016_v31  ;;  %v2468_v18 = vsel %vm756_vm0, %v1529_v1, %v1829_v49 }
 0x295   : > { %20566 = vst [vmem:[#allocation35_spill] sm:$0xff] %v14497_v33  ;;  %v1224_v58 = vpop.f32.mrf.mxu2  ;;  %v1058_v33 = vpop.f32.mrf.mxu1 }
 0x296   : > { %20570 = vst [vmem:[#allocation65_spill] sm:$0xff] %v14519_v15  ;;  %v1532_v6 = vpack.c.bf16 %v1393_v35, %v1224_v58  ;;  %v889_v51 = vpop.f32.mrf.mxu0  ;;  %v2471_v15 = vsel %vm1892_vm5, %v1830_v40, %v1831_v26  ;;  %v2487_v35 = vsel %vm1899_vm2, %v1531_v13, %v1832_v3 }
 0x298   : > { %v14504_v61 = vld [vmem:[#allocation1] sm:$0xff]  ;;  %v14506_v41 = vld [vmem:[#allocation1 + $0x9] sm:$0xff]  ;;  %v14508_v21 = vld [vmem:[#allocation1 + $0x12] sm:$0xff]  ;;  %v1833_v56 = vrot.slane %v1532_v6, 4  ;;  %v1834_v42 = vrot.slane %v1532_v6, 6  ;;  %v1533_v6 = vpack.c.bf16 %v1058_v33, %v889_v51 }
 0x299   : > { %v14513_v30 = vld [vmem:[#allocation1 + $0x1b] sm:$0xff]  ;;  %v14515_v12 = vld [vmem:[#allocation1 + $0x24] sm:$0xff]  ;;  %v14517_v39 = vld [vmem:[#allocation1 + $0x2d] sm:$0xff] }
 0x29a   : > { %20567 = vst [vmem:[#allocation42_spill] sm:$0xff] %v14513_v30  ;;  %v14521_v60 = vld [vmem:[#allocation1 + $0x36] sm:$0xff]  ;;  %v14523_v22 = vld [vmem:[#allocation1 + $0x3f] sm:$0xff]  ;;  %v2484_v58 = vsel %vm1892_vm5, %v1833_v56, %v1834_v42  ;;  %v2488_v31 = vsel %vm1901_vm3, %v1834_v42, %v1833_v56 }
 0x29b   : > { %20568 = vst [vmem:[#allocation49_spill] sm:$0xff] %v14515_v12  ;;  %v14543_v26 = vsel %vm1903_vm4, %v2487_v35, %v2488_v31 }
 0x29c   : > { %20569 = vst [vmem:[#allocation56_spill] sm:$0xff] %v14517_v39 }
 0x29d   : > { %20571 = vst [vmem:[#allocation66_spill] sm:$0xff] %v14521_v60  ;;  %v2481_v60 = vsel %vm756_vm0, %v1531_v13, %v1832_v3  ;;  %v1227_v13 = vpop.f32.mrf.mxu2  ;;  %v1396_v3 = vpop.f32.mrf.mxu3 }
 0x29e   : > { %20572 = vst [vmem:[#allocation67_spill] sm:$0xff] %v14523_v22  ;;  %v2485_v40 = vsel %vm1896_vm6, %v2481_v60, %v2484_v58  ;;  %v1534_v22 = vpack.c.bf16 %v1396_v3, %v1227_v13  ;;  %v891_v42 = vpop.f32.mrf.mxu0  ;;  %v1060_v39 = vpop.f32.mrf.mxu1 }
 0x29f   : > { %4663 = vst [vmem:[#allocation1] ss:$9 sm:$0xff] %v20573_v52  ;;  %v1835_v52 = vrot.slane %v1533_v6, 2  ;;  %v1535_v49 = vpack.c.bf16 %v1060_v39, %v891_v42  ;;  %v3177_v51 = vunpack.i.h.s16 %v2485_v40  ;;  %v14555_v39 = vld [vmem:[%s13173_s21] sm:$0xff] }
 0x2a0   : > { %4666 = vst [vmem:[#allocation1 + $0x1] ss:$9 sm:$0xff] %v12422_v16  ;;  %v2472_v16 = vsel %vm1896_vm6, %v2468_v18, %v2471_v15  ;;  %v1836_v1 = vrot.slane %v1534_v22, 4  ;;  %v1837_v60 = vrot.slane %v1534_v22, 6 }
 0x2a1   : > { %4669 = vst [vmem:[#allocation1 + $0x2] ss:$9 sm:$0xff] %v12426_v28  ;;  %v2478_v28 = vrot.slane %v2476_v32, 2  ;;  %v3167_v56 = vunpack.i.h.s16 %v2472_v16  ;;  %v2500_v2 = vsel %vm1899_vm2, %v1533_v6, %v1835_v52  ;;  %v2494_v58 = vsel %vm756_vm0, %v1533_v6, %v1835_v52  ;;  %12354 = vmatmul.msk.bf16.vlgmr.msrb.gmra.mxu0 %vm3698_vm7, %v14555_v39  ;;  %12355 = vmatmul.msk.bf16.vlgmr.msrb.gmra.mxu1 %vm3698_vm7, %v14555_v39 }
 0x2a2   : > { %v2497_v32 = vsel %vm1892_vm5, %v1836_v1, %v1837_v60  ;;  %v2501_v33 = vsel %vm1901_vm3, %v1837_v60, %v1836_v1  ;;  %v1838_v5 = vrot.slane %v1535_v49, 2  ;;  %v14559_v60 = vpack.c.b16 %v3177_v51, %v2485_v40  ;;  %3821 = vmatpush.bf16.msrb.mxu0 %v13842_v44  ;;  %3835 = vmatpush.bf16.msrb.mxu1 %v13844_v9 }
 0x2a3   : > { %v3172_v12 = vunpack.i.h.s16 %v2478_v28  ;;  %v12278_v35 = vpack.c.b16 %v3167_v56, %v2472_v16  ;;  %v2498_v31 = vsel %vm1896_vm6, %v2494_v58, %v2497_v32  ;;  %v2502_v18 = vsel %vm1903_vm4, %v2500_v2, %v2501_v33  ;;  %12356 = vmatmul.msk.bf16.vlgmr.msrb.gmra.mxu2 %vm3698_vm7, %v14555_v39  ;;  %12357 = vmatmul.msk.bf16.vlgmr.msrb.gmra.mxu3 %vm3698_vm7, %v14555_v39 }
 0x2a4   : > { %v2504_v13 = vrot.slane %v2502_v18, 2  ;;  %v3187_v3 = vunpack.i.h.s16 %v2498_v31  ;;  %v2491_v16 = vrot.slane %v14543_v26, 2  ;;  %v2507_v30 = vsel %vm756_vm0, %v1535_v49, %v1838_v5  ;;  %3849 = vmatpush.bf16.msrb.mxu2 %v13846_v29  ;;  %3863 = vmatpush.bf16.msrb.mxu3 %v13848_v14 }
 0x2a5   : > { %v14550_v15 = vpack.c.b16 %v3172_v12, %v2478_v28  ;;  %v1229_v50 = vpop.f32.mrf.mxu2  ;;  %v1398_v22 = vpop.f32.mrf.mxu3  ;;  %v3170_v52 = vunpack.i.h.s16 %v12278_v35  ;;  %v2513_v26 = vsel %vm1899_vm2, %v1535_v49, %v1838_v5 }
 0x2a6   : > { %v1536_v6 = vpack.c.bf16 %v1398_v22, %v1229_v50  ;;  %v12282_v56 = vpack.c.b16 %v3187_v3, %v2498_v31  ;;  %v3192_v12 = vunpack.i.h.s16 %v2504_v13  ;;  %v894_v28 = vpop.f32.mrf.mxu0  ;;  %v1063_v42 = vpop.f32.mrf.mxu1  ;;  %v3182_v50 = vunpack.i.h.s16 %v2491_v16 }
 0x2a7   : > { %v3175_v1 = vunpack.i.h.s16 %v14550_v15  ;;  %v1537_v22 = vpack.c.bf16 %v1063_v42, %v894_v28  ;;  %v3180_v28 = vunpack.i.h.s16 %v14559_v60 }
 0x2a8   : > { %v1839_v2 = vrot.slane %v1536_v6, 4  ;;  %v1840_v58 = vrot.slane %v1536_v6, 6  ;;  %v3190_v32 = vunpack.i.h.s16 %v12282_v56  ;;  %v14561_v33 = vpack.c.b16 %v3192_v12, %v2504_v13 }
 0x2a9   : > { %v12430_v18 = vpack.i.b16 %v12282_v56, %v12278_v35  ;;  %v1841_v12 = vrot.slane %v1537_v22, 2  ;;  %v14590_v44 = vpack.c.b16 %v3182_v50, %v2491_v16 }
 0x2aa   : > { %v2510_v40 = vsel %vm1892_vm5, %v1839_v2, %v1840_v58  ;;  %v2514_v51 = vsel %vm1901_vm3, %v1840_v58, %v1839_v2  ;;  %v3195_v35 = vunpack.i.h.s16 %v14561_v33  ;;  %v14576_v31 = vpack.i.b16 %v3190_v32, %v3170_v52 }
 0x2ab   : > { %v2511_v3 = vsel %vm1896_vm6, %v2507_v30, %v2510_v40  ;;  %v2515_v5 = vsel %vm1903_vm4, %v2513_v26, %v2514_v51  ;;  %4672 = vst [vmem:[#allocation1 + $0x3] ss:$9 sm:$0xff] %v12430_v18  ;;  %v2526_v42 = vsel %vm1899_vm2, %v1537_v22, %v1841_v12  ;;  %v3185_v50 = vunpack.i.h.s16 %v14590_v44 }
 0x2ac   : > { %v3197_v49 = vunpack.i.h.s16 %v2511_v3  ;;  %v14586_v6 = vpack.i.b16 %v3195_v35, %v3175_v1  ;;  %v2517_v52 = vrot.slane %v2515_v5, 2  ;;  %20574 = vst [vmem:[#allocation68_spill] sm:$0xff] %v14590_v44 }
 0x2ad   : > { %v1232_v30 = vpop.f32.mrf.mxu2  ;;  %v1401_v2 = vpop.f32.mrf.mxu3 }
 0x2ae   : > { %v14588_v56 = vpack.c.b16 %v3197_v49, %v2511_v3  ;;  %v3202_v9 = vunpack.i.h.s16 %v2517_v52  ;;  %v1538_v58 = vpack.c.bf16 %v1401_v2, %v1232_v30  ;;  %v896_v32 = vpop.f32.mrf.mxu0  ;;  %v1065_v26 = vpop.f32.mrf.mxu1  ;;  %v2520_v3 = vsel %vm756_vm0, %v1537_v22, %v1841_v12 }
 0x2af   : > { %v1539_v51 = vpack.c.bf16 %v1065_v26, %v896_v32 }
 0x2b0   : > { %v3200_v29 = vunpack.i.h.s16 %v14588_v56  ;;  %v14597_v1 = vpack.c.b16 %v3202_v9, %v2517_v52  ;;  %v1842_v18 = vrot.slane %v1538_v58, 4  ;;  %v1843_v40 = vrot.slane %v1538_v58, 6 }
 0x2b1   : > { %v1844_v52 = vrot.slane %v1539_v51, 2  ;;  %12358 = vmatmul.msk.bf16.vlgmr.msra.gmra.mxu0 %vm3698_vm7, %v14555_v39  ;;  %12359 = vmatmul.msk.bf16.vlgmr.msra.gmra.mxu1 %vm3698_vm7, %v14555_v39 }
 0x2b2   : > { %20575 = vst [vmem:[#allocation69_spill] sm:$0xff] %v14597_v1  ;;  %v14599_v16 = vpack.i.b16 %v3200_v29, %v3180_v28  ;;  %v3205_v35 = vunpack.i.h.s16 %v14597_v1  ;;  %v2527_v5 = vsel %vm1901_vm3, %v1843_v40, %v1842_v18  ;;  %3877 = vmatpush.bf16.msra.mxu0 %v13850_v46  ;;  %3891 = vmatpush.bf16.msra.mxu1 %v13852_v20 }
 0x2b3   : > { %v2528_v49 = vsel %vm1903_vm4, %v2526_v42, %v2527_v5  ;;  %v2523_v42 = vsel %vm1892_vm5, %v1842_v18, %v1843_v40  ;;  %12360 = vmatmul.msk.bf16.vlgmr.msra.gmra.mxu2 %vm3698_vm7, %v14555_v39  ;;  %12361 = vmatmul.msk.bf16.vlgmr.msra.gmra.mxu3 %vm3698_vm7, %v14555_v39 }
 0x2b4   : > { %v14607_v30 = vpack.i.b16 %v3205_v35, %v3185_v50  ;;  %v2533_v50 = vsel %vm756_vm0, %v1539_v51, %v1844_v52  ;;  %v2539_v35 = vsel %vm1899_vm2, %v1539_v51, %v1844_v52  ;;  %3905 = vmatpush.bf16.msra.mxu2 %v13854_v17  ;;  %3919 = vmatpush.bf16.msra.mxu3 %v13856_v10 }
 0x2b5   : > { %v1234_v2 = vpop.f32.mrf.mxu2  ;;  %v1403_v9 = vpop.f32.mrf.mxu3  ;;  %v2524_v40 = vsel %vm1896_vm6, %v2520_v3, %v2523_v42 }
 0x2b6   : > { %20576 = vst [vmem:[#allocation70_spill] sm:$0xff] %v14607_v30  ;;  %v1540_v58 = vpack.c.bf16 %v1403_v9, %v1234_v2  ;;  %v899_v32 = vpop.f32.mrf.mxu0  ;;  %v1068_v26 = vpop.f32.mrf.mxu1 }
 0x2b7   : > { %v1541_v18 = vpack.c.bf16 %v1068_v26, %v899_v32 }
 0x2b8   : > { %v1845_v28 = vrot.slane %v1540_v58, 4  ;;  %v1846_v29 = vrot.slane %v1540_v58, 6  ;;  %v2530_v58 = vrot.slane %v2528_v49, 2 }
 0x2b9   : > { %v1847_v51 = vrot.slane %v1541_v18, 2 }
 0x2ba   : > { %v2536_v5 = vsel %vm1892_vm5, %v1845_v28, %v1846_v29  ;;  %v2540_v2 = vsel %vm1901_vm3, %v1846_v29, %v1845_v28  ;;  %v3207_v29 = vunpack.i.h.s16 %v2524_v40  ;;  %v3212_v32 = vunpack.i.h.s16 %v2530_v58 }
 0x2bb   : > { %v14626_v22 = vsel %vm1896_vm6, %v2533_v50, %v2536_v5  ;;  %v14629_v12 = vsel %vm1903_vm4, %v2539_v35, %v2540_v2  ;;  %v2552_v50 = vsel %vm1899_vm2, %v1541_v18, %v1847_v51  ;;  %v2546_v17 = vsel %vm756_vm0, %v1541_v18, %v1847_v51 }
 0x2bc   : > { %v12286_v26 = vpack.c.b16 %v3207_v29, %v2524_v40 }
 0x2bd   : > { %v1237_v52 = vpop.f32.mrf.mxu2  ;;  %v1406_v9 = vpop.f32.mrf.mxu3 }
 0x2be   : > { %v1542_v46 = vpack.c.bf16 %v1406_v9, %v1237_v52  ;;  %v901_v28 = vpop.f32.mrf.mxu0  ;;  %v1070_v20 = vpop.f32.mrf.mxu1  ;;  %v3210_v1 = vunpack.i.h.s16 %v12286_v26 }
 0x2bf   : > { %v1543_v5 = vpack.c.bf16 %v1070_v20, %v901_v28  ;;  %v14640_v28 = vpack.c.b16 %v3212_v32, %v2530_v58  ;;  %v3217_v58 = vunpack.i.h.s16 %v14626_v22 }
 0x2c0   : > { %v1848_v35 = vrot.slane %v1542_v46, 4  ;;  %v1849_v2 = vrot.slane %v1542_v46, 6 }
 0x2c1   : > { %v1850_v14 = vrot.slane %v1543_v5, 2  ;;  %12362 = vmatmul.msk.bf16.vlgmr.msrb.gmra.mxu0 %vm3698_vm7, %v14555_v39  ;;  %12363 = vmatmul.msk.bf16.vlgmr.msrb.gmra.mxu1 %vm3698_vm7, %v14555_v39 }
 0x2c2   : > { %v2549_v10 = vsel %vm1892_vm5, %v1848_v35, %v1849_v2  ;;  %v2553_v3 = vsel %vm1901_vm3, %v1849_v2, %v1848_v35  ;;  %v2543_v35 = vrot.slane %v14629_v12, 2  ;;  %v3215_v12 = vunpack.i.h.s16 %v14640_v28  ;;  %3933 = vmatpush.bf16.msrb.mxu0 %v13970_v57  ;;  %3947 = vmatpush.bf16.msrb.mxu1 %v13972_v45 }
 0x2c3   : > { %v2550_v42 = vsel %vm1896_vm6, %v2546_v17, %v2549_v10  ;;  %v2554_v49 = vsel %vm1903_vm4, %v2552_v50, %v2553_v3  ;;  %12364 = vmatmul.msk.bf16.vlgmr.msrb.gmra.mxu2 %vm3698_vm7, %v14555_v39  ;;  %12365 = vmatmul.msk.bf16.vlgmr.msrb.gmra.mxu3 %vm3698_vm7, %v14555_v39  ;;  %v14673_v57 = vpack.c.b16 %v3217_v58, %v14626_v22 }
 0x2c4   : > { %v2556_v52 = vrot.slane %v2554_v49, 2  ;;  %v3227_v9 = vunpack.i.h.s16 %v2550_v42  ;;  %3961 = vmatpush.bf16.msrb.mxu2 %v13974_v8  ;;  %3975 = vmatpush.bf16.msrb.mxu3 %v13977_v55 }
 0x2c5   : > { %v1239_v13 = vpop.f32.mrf.mxu2  ;;  %v1408_v30 = vpop.f32.mrf.mxu3  ;;  %v3220_v22 = vunpack.i.h.s16 %v14673_v57 }
 0x2c6   : > { %v12290_v46 = vpack.c.b16 %v3227_v9, %v2550_v42  ;;  %v3232_v20 = vunpack.i.h.s16 %v2556_v52  ;;  %v1544_v44 = vpack.c.bf16 %v1408_v30, %v1239_v13  ;;  %v904_v18 = vpop.f32.mrf.mxu0  ;;  %v1073_v51 = vpop.f32.mrf.mxu1  ;;  %v2559_v13 = vsel %vm756_vm0, %v1543_v5, %v1850_v14 }
 0x2c7   : > { %v2565_v30 = vsel %vm1899_vm2, %v1543_v5, %v1850_v14 }
 0x2c8   : > { %v3230_v40 = vunpack.i.h.s16 %v12290_v46  ;;  %v14643_v29 = vpack.c.b16 %v3232_v20, %v2556_v52  ;;  %v12434_v2 = vpack.i.b16 %v12290_v46, %v12286_v26  ;;  %v1851_v50 = vrot.slane %v1544_v44, 4 }
 0x2c9   : > { %v1852_v32 = vrot.slane %v1544_v44, 6  ;;  %v3222_v44 = vunpack.i.h.s16 %v2543_v35  ;;  %v1545_v26 = vpack.c.bf16 %v1073_v51, %v904_v18 }
 0x2ca   : > { %v3235_v17 = vunpack.i.h.s16 %v14643_v29  ;;  %v14658_v10 = vpack.i.b16 %v3230_v40, %v3210_v1  ;;  %4675 = vst [vmem:[#allocation1 + $0x4] ss:$9 sm:$0xff] %v12434_v2 }
 0x2cb   : > { %v2562_v14 = vsel %vm1892_vm5, %v1851_v50, %v1852_v32  ;;  %v2566_v5 = vsel %vm1901_vm3, %v1852_v32, %v1851_v50  ;;  %v1853_v9 = vrot.slane %v1545_v26, 2  ;;  %v14675_v8 = vpack.c.b16 %v3222_v44, %v2543_v35 }
 0x2cc   : > { %v14668_v1 = vpack.i.b16 %v3235_v17, %v3215_v12  ;;  %v2563_v42 = vsel %vm1896_vm6, %v2559_v13, %v2562_v14  ;;  %v2567_v49 = vsel %vm1903_vm4, %v2565_v30, %v2566_v5 }
 0x2cd   : > { %v2569_v45 = vrot.slane %v2567_v49, 2  ;;  %v3237_v52 = vunpack.i.h.s16 %v2563_v42  ;;  %v1242_v46 = vpop.f32.mrf.mxu2  ;;  %v1411_v20 = vpop.f32.mrf.mxu3  ;;  %20577 = vst [vmem:[#allocation71_spill] sm:$0xff] %v14675_v8  ;;  %v2578_v50 = vsel %vm1899_vm2, %v1545_v26, %v1853_v9  ;;  %v3225_v44 = vunpack.i.h.s16 %v14675_v8 }
 0x2ce   : > { %v1546_v40 = vpack.c.bf16 %v1411_v20, %v1242_v46  ;;  %v906_v18 = vpop.f32.mrf.mxu0  ;;  %v1075_v51 = vpop.f32.mrf.mxu1 }
 0x2cf   : > { %v14677_v55 = vpack.c.b16 %v3237_v52, %v2563_v42  ;;  %v3242_v2 = vunpack.i.h.s16 %v2569_v45  ;;  %v1547_v32 = vpack.c.bf16 %v1075_v51, %v906_v18 }
 0x2d0   : > { %v1854_v13 = vrot.slane %v1546_v40, 4  ;;  %v1855_v30 = vrot.slane %v1546_v40, 6 }
 0x2d1   : > { %v3240_v58 = vunpack.i.h.s16 %v14677_v55  ;;  %v14682_v12 = vpack.c.b16 %v3242_v2, %v2569_v45  ;;  %v1856_v45 = vrot.slane %v1547_v32, 2  ;;  %12366 = vmatmul.msk.bf16.vlgmr.msra.gmra.mxu0 %vm3698_vm7, %v14555_v39  ;;  %12367 = vmatmul.msk.bf16.vlgmr.msra.gmra.mxu1 %vm3698_vm7, %v14555_v39 }
 0x2d2   : > { %v2579_v35 = vsel %vm1901_vm3, %v1855_v30, %v1854_v13  ;;  %3989 = vmatpush.bf16.msra.mxu0 %v13979_v48  ;;  %4003 = vmatpush.bf16.msra.mxu1 %v13981_v0 }
 0x2d3   : > { %20578 = vst [vmem:[#allocation72_spill] sm:$0xff] %v14682_v12  ;;  %v3245_v14 = vunpack.i.h.s16 %v14682_v12  ;;  %v14689_v5 = vpack.i.b16 %v3240_v58, %v3220_v22  ;;  %v2580_v49 = vsel %vm1903_vm4, %v2578_v50, %v2579_v35  ;;  %v2572_v22 = vsel %vm756_vm0, %v1545_v26, %v1853_v9  ;;  %12368 = vmatmul.msk.bf16.vlgmr.msra.gmra.mxu2 %vm3698_vm7, %v14555_v39 }
 0x2d4   : > { %v2575_v50 = vsel %vm1892_vm5, %v1854_v13, %v1855_v30  ;;  %v2585_v58 = vsel %vm756_vm0, %v1547_v32, %v1856_v45  ;;  %12369 = vmatmul.msk.bf16.vlgmr.msra.gmra.mxu3 %vm3698_vm7, %v14555_v39  ;;  %v2591_v35 = vsel %vm1899_vm2, %v1547_v32, %v1856_v45  ;;  %4017 = vmatpush.bf16.msra.mxu2 %v13991_v4 }
 0x2d5   : > { %v14694_v52 = vpack.i.b16 %v3245_v14, %v3225_v44  ;;  %v1244_v46 = vpop.f32.mrf.mxu2  ;;  %v1413_v20 = vpop.f32.mrf.mxu3  ;;  %4031 = vmatpush.bf16.msra.mxu3 %v13993_v63  ;;  %v2576_v30 = vsel %vm1896_vm6, %v2572_v22, %v2575_v50 }
 0x2d6   : > { %v1548_v40 = vpack.c.bf16 %v1413_v20, %v1244_v46  ;;  %v909_v18 = vpop.f32.mrf.mxu0  ;;  %v1078_v51 = vpop.f32.mrf.mxu1  ;;  %v2582_v46 = vrot.slane %v2580_v49, 2 }
 0x2d7   : > { %20579 = vst [vmem:[#allocation73_spill] sm:$0xff] %v14694_v52  ;;  %v1549_v13 = vpack.c.bf16 %v1078_v51, %v909_v18 }
 0x2d8   : > { %v1857_v2 = vrot.slane %v1548_v40, 4  ;;  %v1858_v17 = vrot.slane %v1548_v40, 6  ;;  %v3247_v40 = vunpack.i.h.s16 %v2576_v30  ;;  %v3252_v18 = vunpack.i.h.s16 %v2582_v46 }
 0x2d9   : > { %v1859_v32 = vrot.slane %v1549_v13, 2 }
 0x2da   : > { %v2588_v44 = vsel %vm1892_vm5, %v1857_v2, %v1858_v17  ;;  %v2592_v14 = vsel %vm1901_vm3, %v1858_v17, %v1857_v2  ;;  %v12294_v22 = vpack.c.b16 %v3247_v40, %v2576_v30 }
 0x2db   : > { %v14713_v26 = vsel %vm1896_vm6, %v2585_v58, %v2588_v44  ;;  %v14716_v9 = vsel %vm1903_vm4, %v2591_v35, %v2592_v14  ;;  %v2604_v2 = vsel %vm1899_vm2, %v1549_v13, %v1859_v32  ;;  %v2598_v4 = vsel %vm756_vm0, %v1549_v13, %v1859_v32 }
 0x2dc   : > { %v3250_v8 = vunpack.i.h.s16 %v12294_v22 }
 0x2dd   : > { %v1247_v45 = vpop.f32.mrf.mxu2  ;;  %v1416_v17 = vpop.f32.mrf.mxu3 }
 0x2de   : > { %v1550_v48 = vpack.c.bf16 %v1416_v17, %v1247_v45  ;;  %v911_v20 = vpop.f32.mrf.mxu0  ;;  %v1080_v0 = vpop.f32.mrf.mxu1 }
 0x2df   : > { %v1551_v58 = vpack.c.bf16 %v1080_v0, %v911_v20  ;;  %v14727_v20 = vpack.c.b16 %v3252_v18, %v2582_v46  ;;  %v3257_v46 = vunpack.i.h.s16 %v14713_v26 }
 0x2e0   : > { %v1860_v35 = vrot.slane %v1550_v48, 4  ;;  %v1861_v44 = vrot.slane %v1550_v48, 6 }
 0x2e1   : > { %v1862_v17 = vrot.slane %v1551_v58, 2  ;;  %12370 = vmatmul.msk.bf16.vlgmr.msrb.gmra.mxu0 %vm3698_vm7, %v14555_v39  ;;  %12371 = vmatmul.msk.bf16.vlgmr.msrb.gmra.mxu1 %vm3698_vm7, %v14555_v39 }
 0x2e2   : > { %v2601_v63 = vsel %vm1892_vm5, %v1860_v35, %v1861_v44  ;;  %v2605_v51 = vsel %vm1901_vm3, %v1861_v44, %v1860_v35  ;;  %v2595_v35 = vrot.slane %v14716_v9, 2  ;;  %v3255_v9 = vunpack.i.h.s16 %v14727_v20  ;;  %4045 = vmatpush.bf16.msrb.mxu0 %v14080_v37  ;;  %4059 = vmatpush.bf16.msrb.mxu1 %v14082_v36 }
 0x2e3   : > { %v2602_v50 = vsel %vm1896_vm6, %v2598_v4, %v2601_v63  ;;  %v2606_v49 = vsel %vm1903_vm4, %v2604_v2, %v2605_v51  ;;  %12372 = vmatmul.msk.bf16.vlgmr.msrb.gmra.mxu2 %vm3698_vm7, %v14555_v39  ;;  %v14760_v37 = vpack.c.b16 %v3257_v46, %v14713_v26 }
 0x2e4   : > { %v2608_v14 = vrot.slane %v2606_v49, 2  ;;  %v3267_v45 = vunpack.i.h.s16 %v2602_v50  ;;  %12373 = vmatmul.msk.bf16.vlgmr.msrb.gmra.mxu3 %vm3698_vm7, %v14555_v39  ;;  %4073 = vmatpush.bf16.msrb.mxu2 %v14084_v47 }
 0x2e5   : > { %v1249_v42 = vpop.f32.mrf.mxu2  ;;  %v1418_v3 = vpop.f32.mrf.mxu3  ;;  %4087 = vmatpush.bf16.msrb.mxu3 %v14096_v11  ;;  %v3260_v26 = vunpack.i.h.s16 %v14760_v37 }
 0x2e6   : > { %v12298_v48 = vpack.c.b16 %v3267_v45, %v2602_v50  ;;  %v3272_v0 = vunpack.i.h.s16 %v2608_v14  ;;  %v1552_v52 = vpack.c.bf16 %v1418_v3, %v1249_v42  ;;  %v914_v13 = vpop.f32.mrf.mxu0  ;;  %v1083_v32 = vpop.f32.mrf.mxu1  ;;  %v2611_v3 = vsel %vm756_vm0, %v1551_v58, %v1862_v17 }
 0x2e7   : > { %v2617_v42 = vsel %vm1899_vm2, %v1551_v58, %v1862_v17  ;;  %v1553_v50 = vpack.c.bf16 %v1083_v32, %v914_v13 }
 0x2e8   : > { %v3270_v30 = vunpack.i.h.s16 %v12298_v48  ;;  %v14730_v40 = vpack.c.b16 %v3272_v0, %v2608_v14  ;;  %v12438_v44 = vpack.i.b16 %v12298_v48, %v12294_v22  ;;  %v1863_v2 = vrot.slane %v1552_v52, 4 }
 0x2e9   : > { %v1864_v18 = vrot.slane %v1552_v52, 6  ;;  %v3262_v52 = vunpack.i.h.s16 %v2595_v35  ;;  %v1865_v17 = vrot.slane %v1553_v50, 2 }
 0x2ea   : > { %v3275_v4 = vunpack.i.h.s16 %v14730_v40  ;;  %v14745_v63 = vpack.i.b16 %v3270_v30, %v3250_v8  ;;  %4678 = vst [vmem:[#allocation1 + $0x5] ss:$9 sm:$0xff] %v12438_v44 }
 0x2eb   : > { %v2614_v58 = vsel %vm1892_vm5, %v1863_v2, %v1864_v18  ;;  %v2618_v22 = vsel %vm1901_vm3, %v1864_v18, %v1863_v2  ;;  %v14762_v47 = vpack.c.b16 %v3262_v52, %v2595_v35  ;;  %v2630_v2 = vsel %vm1899_vm2, %v1553_v50, %v1865_v17 }
 0x2ec   : > { %v14755_v8 = vpack.i.b16 %v3275_v4, %v3255_v9  ;;  %v2615_v49 = vsel %vm1896_vm6, %v2611_v3, %v2614_v58  ;;  %v2619_v14 = vsel %vm1903_vm4, %v2617_v42, %v2618_v22 }
 0x2ed   : > { %v2621_v36 = vrot.slane %v2619_v14, 2  ;;  %v3277_v45 = vunpack.i.h.s16 %v2615_v49  ;;  %v1252_v48 = vpop.f32.mrf.mxu2  ;;  %v1421_v0 = vpop.f32.mrf.mxu3  ;;  %20580 = vst [vmem:[#allocation74_spill] sm:$0xff] %v14762_v47  ;;  %v3265_v52 = vunpack.i.h.s16 %v14762_v47 }
 0x2ee   : > { %v1554_v30 = vpack.c.bf16 %v1421_v0, %v1252_v48  ;;  %v916_v13 = vpop.f32.mrf.mxu0  ;;  %v1085_v32 = vpop.f32.mrf.mxu1 }
 0x2ef   : > { %v14764_v11 = vpack.c.b16 %v3277_v45, %v2615_v49  ;;  %v3282_v44 = vunpack.i.h.s16 %v2621_v36  ;;  %v1555_v18 = vpack.c.bf16 %v1085_v32, %v916_v13 }
 0x2f0   : > { %v1866_v3 = vrot.slane %v1554_v30, 4  ;;  %v1867_v42 = vrot.slane %v1554_v30, 6 }
 0x2f1   : > { %v3280_v46 = vunpack.i.h.s16 %v14764_v11  ;;  %v14769_v9 = vpack.c.b16 %v3282_v44, %v2621_v36  ;;  %v1868_v36 = vrot.slane %v1555_v18, 2  ;;  %12374 = vmatmul.msk.bf16.vlgmr.msra.gmra.mxu0 %vm3698_vm7, %v14555_v39  ;;  %12375 = vmatmul.msk.bf16.vlgmr.msra.gmra.mxu1 %vm3698_vm7, %v14555_v39 }
 0x2f2   : > { %v2631_v35 = vsel %vm1901_vm3, %v1867_v42, %v1866_v3  ;;  %4101 = vmatpush.bf16.msra.mxu0 %v14098_v59  ;;  %4115 = vmatpush.bf16.msra.mxu1 %v14100_v25 }
 0x2f3   : > { %20581 = vst [vmem:[#allocation75_spill] sm:$0xff] %v14769_v9  ;;  %v3285_v58 = vunpack.i.h.s16 %v14769_v9  ;;  %v14776_v22 = vpack.i.b16 %v3280_v46, %v3260_v26  ;;  %v2632_v14 = vsel %vm1903_vm4, %v2630_v2, %v2631_v35  ;;  %v2627_v26 = vsel %vm1892_vm5, %v1866_v3, %v1867_v42  ;;  %12376 = vmatmul.msk.bf16.vlgmr.msra.gmra.mxu2 %vm3698_vm7, %v14555_v39 }
 0x2f4   : > { %v2637_v2 = vsel %vm756_vm0, %v1555_v18, %v1868_v36  ;;  %12377 = vmatmul.msk.bf16.vlgmr.msra.gmra.mxu3 %vm3698_vm7, %v14555_v39  ;;  %v2643_v46 = vsel %vm1899_vm2, %v1555_v18, %v1868_v36  ;;  %4129 = vmatpush.bf16.msra.mxu2 %v14104_v62  ;;  %v2624_v18 = vsel %vm756_vm0, %v1553_v50, %v1865_v17  ;;  %v2634_v36 = vrot.slane %v2632_v14, 2 }
 0x2f5   : > { %v14781_v45 = vpack.i.b16 %v3285_v58, %v3265_v52  ;;  %v1254_v48 = vpop.f32.mrf.mxu2  ;;  %v1423_v0 = vpop.f32.mrf.mxu3  ;;  %v2628_v59 = vsel %vm1896_vm6, %v2624_v18, %v2627_v26 }
 0x2f6   : > { %v1556_v30 = vpack.c.bf16 %v1423_v0, %v1254_v48  ;;  %v919_v13 = vpop.f32.mrf.mxu0  ;;  %v1088_v32 = vpop.f32.mrf.mxu1  ;;  %v20583_v48 = vld [vmem:[#allocation61_spill] sm:$0xff]  ;;  %v3292_v62 = vunpack.i.h.s16 %v2634_v36 }
 0x2f7   : > { %20582 = vst [vmem:[#allocation76_spill] sm:$0xff] %v14781_v45  ;;  %v1557_v58 = vpack.c.bf16 %v1088_v32, %v919_v13  ;;  %4143 = vmatpush.bf16.msra.mxu3 %v20583_v48  ;;  %v3287_v32 = vunpack.i.h.s16 %v2628_v59 }
 0x2f8   : > { %v1869_v44 = vrot.slane %v1556_v30, 4  ;;  %v1870_v4 = vrot.slane %v1556_v30, 6  ;;  %v14816_v49 = vpack.c.b16 %v3292_v62, %v2634_v36 }
 0x2f9   : > { %v1871_v0 = vrot.slane %v1557_v58, 2 }
 0x2fa   : > { %v2640_v35 = vsel %vm1892_vm5, %v1869_v44, %v1870_v4  ;;  %v2644_v52 = vsel %vm1901_vm3, %v1870_v4, %v1869_v44 }
 0x2fb   : > { %v14799_v3 = vsel %vm1896_vm6, %v2637_v2, %v2640_v35  ;;  %v14802_v42 = vsel %vm1903_vm4, %v2643_v46, %v2644_v52  ;;  %v2656_v35 = vsel %vm1899_vm2, %v1557_v58, %v1871_v0  ;;  %v2650_v48 = vsel %vm756_vm0, %v1557_v58, %v1871_v0 }
 0x2fc   : > { %v3297_v36 = vunpack.i.h.s16 %v14799_v3 }
 0x2fd   : > { %v1257_v4 = vpop.f32.mrf.mxu2  ;;  %v1426_v30 = vpop.f32.mrf.mxu3 }
 0x2fe   : > { %v1558_v25 = vpack.c.bf16 %v1426_v30, %v1257_v4  ;;  %v921_v44 = vpop.f32.mrf.mxu0  ;;  %v1090_v2 = vpop.f32.mrf.mxu1  ;;  %v14814_v30 = vpack.c.b16 %v3287_v32, %v2628_v59 }
 0x2ff   : > { %v1559_v46 = vpack.c.bf16 %v1090_v2, %v921_v44 }
 0x300   : > { %v1872_v52 = vrot.slane %v1558_v25, 4  ;;  %v1873_v13 = vrot.slane %v1558_v25, 6 }
 0x301   : > { %v1874_v58 = vrot.slane %v1559_v46, 2  ;;  %12378 = vmatmul.msk.bf16.vlgmr.msrb.gmra.mxu0 %vm3698_vm7, %v14555_v39  ;;  %12379 = vmatmul.msk.bf16.vlgmr.msrb.gmra.mxu1 %vm3698_vm7, %v14555_v39 }
 0x302   : > { %v2653_v50 = vsel %vm1892_vm5, %v1872_v52, %v1873_v13  ;;  %v2657_v17 = vsel %vm1901_vm3, %v1873_v13, %v1872_v52  ;;  %v2647_v52 = vrot.slane %v14802_v42, 2  ;;  %4157 = vmatpush.bf16.msrb.mxu0 %v14212_v23  ;;  %4171 = vmatpush.bf16.msrb.mxu1 %v14214_v43  ;;  %v14851_v23 = vpack.c.b16 %v3297_v36, %v14799_v3  ;;  %v20590_v3 = vld [vmem:[#allocation32_spill] sm:$0xff] }
 0x303   : > { %v2654_v14 = vsel %vm1896_vm6, %v2650_v48, %v2653_v50  ;;  %v2658_v26 = vsel %vm1903_vm4, %v2656_v35, %v2657_v17  ;;  %12380 = vmatmul.msk.bf16.vlgmr.msrb.gmra.mxu2 %vm3698_vm7, %v14555_v39  ;;  %v2663_v48 = vsel %vm756_vm0, %v1559_v46, %v1874_v58  ;;  %v2669_v17 = vsel %vm1899_vm2, %v1559_v46, %v1874_v58 }
 0x304   : > { %v2660_v18 = vrot.slane %v2658_v26, 2  ;;  %v3307_v4 = vunpack.i.h.s16 %v2654_v14  ;;  %12381 = vmatmul.msk.bf16.vlgmr.msrb.gmra.mxu3 %vm3698_vm7, %v14555_v39  ;;  %v3302_v50 = vunpack.i.h.s16 %v2647_v52  ;;  %4185 = vmatpush.bf16.msrb.mxu2 %v14216_v27 }
 0x305   : > { %v1259_v44 = vpop.f32.mrf.mxu2  ;;  %v1428_v25 = vpop.f32.mrf.mxu3  ;;  %4199 = vmatpush.bf16.msrb.mxu3 %v14224_v54 }
 0x306   : > { %v14818_v2 = vpack.c.b16 %v3307_v4, %v2654_v14  ;;  %v3312_v51 = vunpack.i.h.s16 %v2660_v18  ;;  %v1560_v0 = vpack.c.bf16 %v1428_v25, %v1259_v44  ;;  %v924_v45 = vpop.f32.mrf.mxu0  ;;  %v1093_v47 = vpop.f32.mrf.mxu1 }
 0x308   : > { %v14821_v13 = vpack.c.b16 %v3312_v51, %v2660_v18  ;;  %v12442_v35 = vpack.i.b16 %v14818_v2, %v14814_v30  ;;  %v1875_v59 = vrot.slane %v1560_v0, 4  ;;  %v1876_v32 = vrot.slane %v1560_v0, 6 }
 0x309   : > { %v3295_v51 = vunpack.i.h.s16 %v14816_v49 }
 0x30a   : > { %v3315_v42 = vunpack.i.h.s16 %v14821_v13  ;;  %4681 = vst [vmem:[#allocation1 + $0x6] ss:$9 sm:$0xff] %v12442_v35  ;;  %v2666_v14 = vsel %vm1892_vm5, %v1875_v59, %v1876_v32  ;;  %v2670_v26 = vsel %vm1901_vm3, %v1876_v32, %v1875_v59  ;;  %v14853_v59 = vpack.c.b16 %v3302_v50, %v2647_v52 }
 0x30b   : > { %v2667_v4 = vsel %vm1896_vm6, %v2663_v48, %v2666_v14  ;;  %v2671_v44 = vsel %vm1903_vm4, %v2669_v17, %v2670_v26 }
 0x30c   : > { %v14846_v18 = vpack.i.b16 %v3315_v42, %v3295_v51  ;;  %v2673_v43 = vrot.slane %v2671_v44, 2  ;;  %v3317_v25 = vunpack.i.h.s16 %v2667_v4  ;;  %20584 = vst [vmem:[#allocation61_spill] sm:$0xff] %v14853_v59  ;;  %v3300_v51 = vunpack.i.h.s16 %v14851_v23 }
 0x30d   : > { %v1262_v46 = vpop.f32.mrf.mxu2  ;;  %v1431_v58 = vpop.f32.mrf.mxu3  ;;  %v3305_v36 = vunpack.i.h.s16 %v14853_v59 }
 0x30e   : > { %v926_v0 = vpop.f32.mrf.mxu0  ;;  %v1095_v35 = vpop.f32.mrf.mxu1  ;;  %v14855_v27 = vpack.c.b16 %v3317_v25, %v2667_v4  ;;  %v3322_v54 = vunpack.i.h.s16 %v2673_v43  ;;  %v14871_v26 = vpack.c.bf16 %v1431_v58, %v1262_v46 }
 0x30f   : > { %v1563_v32 = vpack.c.bf16 %v1095_v35, %v926_v0  ;;  %v14873_v0 = vpack.c.bf16 %v1093_v47, %v924_v45 }
 0x310   : > { %v3320_v42 = vunpack.i.h.s16 %v14855_v27  ;;  %v14859_v48 = vpack.c.b16 %v3322_v54, %v2673_v43 }
 0x311   : > { %v1880_v4 = vrot.slane %v1563_v32, 2  ;;  %12382 = vmatmul.msk.bf16.vlgmr.msra.gmra.mxu0 %vm3698_vm7, %v14555_v39  ;;  %12383 = vmatmul.msk.bf16.vlgmr.msra.gmra.mxu1 %vm3698_vm7, %v14555_v39 }
 0x312   : > { %20585 = vst [vmem:[#allocation77_spill] sm:$0xff] %v14859_v48  ;;  %v3325_v17 = vunpack.i.h.s16 %v14859_v48  ;;  %v14865_v14 = vpack.i.b16 %v3320_v42, %v3300_v51  ;;  %v20253_v51 = vrot.slane %v14871_v26, 4  ;;  %v20252_v42 = vrot.slane %v14871_v26, 6  ;;  %4213 = vmatpush.bf16.msra.mxu0 %v14226_v38 }
 0x313   : > { %v2689_v46 = vsel %vm756_vm0, %v1563_v32, %v1880_v4  ;;  %12384 = vmatmul.msk.bf16.vlgmr.msra.gmra.mxu2 %vm3698_vm7, %v14555_v39  ;;  %v2695_v47 = vsel %vm1899_vm2, %v1563_v32, %v1880_v4  ;;  %v20591_v32 = vld [vmem:[#allocation30_spill] sm:$0xff] }
 0x314   : > { %20586 = vst [vmem:[#allocation78_spill] sm:$0xff] %v14865_v14  ;;  %v14869_v50 = vpack.i.b16 %v3325_v17, %v3305_v36  ;;  %12385 = vmatmul.msk.bf16.vlgmr.msra.gmra.mxu3 %vm3698_vm7, %v14555_v39  ;;  %v20588_v36 = vld [vmem:[#allocation24_spill] sm:$0xff]  ;;  %v20250_v17 = vrot.slane %v14873_v0, 2  ;;  %4241 = vmatpush.bf16.msra.mxu2 %v20590_v3  ;;  %v2679_v38 = vsel %vm1892_vm5, %v20253_v51, %v20252_v42  ;;  %v20606_v14 = vld [vmem:[#allocation46_spill] sm:$0xff] }
 0x315   : > { %v1264_v44 = vpop.f32.mrf.mxu2  ;;  %v1433_v43 = vpop.f32.mrf.mxu3  ;;  %4227 = vmatpush.bf16.msra.mxu1 %v20588_v36  ;;  %4255 = vmatpush.bf16.msra.mxu3 %v20591_v32 }
 0x316   : > { %20587 = vst [vmem:[#allocation79_spill] sm:$0xff] %v14869_v50  ;;  %v1564_v25 = vpack.c.bf16 %v1433_v43, %v1264_v44  ;;  %v1098_v52 = vpop.f32.mrf.mxu1 }
 0x318   : > { %v1881_v35 = vrot.slane %v1564_v25, 4  ;;  %v1882_v54 = vrot.slane %v1564_v25, 6  ;;  %v929_v25 = vpop.f32.mrf.mxu0 }
 0x319   : > { %v14900_v4 = vpack.c.bf16 %v1098_v52, %v929_v25 }
 0x31a   : > { %v2692_v45 = vsel %vm1892_vm5, %v1881_v35, %v1882_v54  ;;  %v2696_v58 = vsel %vm1901_vm3, %v1882_v54, %v1881_v35 }
 0x31b   : > { %v14893_v44 = vsel %vm1896_vm6, %v2689_v46, %v2692_v45  ;;  %v14896_v43 = vsel %vm1903_vm4, %v2695_v47, %v2696_v58  ;;  %v2676_v47 = vsel %vm756_vm0, %v14873_v0, %v20250_v17  ;;  %v20251_v3 = vrot.slane %v14900_v4, 2 }
 0x31c   : > { %20589 = vst [vmem:[#allocation24_spill] sm:$0xff] %v14896_v43  ;;  %v2680_v52 = vsel %vm1896_vm6, %v2676_v47, %v2679_v38  ;;  %v20605_v43 = vld [vmem:[#allocation50_spill] sm:$0xff] }
 0x31d   : > { %v1267_v35 = vpop.f32.mrf.mxu2  ;;  %v1436_v54 = vpop.f32.mrf.mxu3  ;;  %v3327_v36 = vunpack.i.h.s16 %v2680_v52  ;;  %v2702_v25 = vsel %vm756_vm0, %v14900_v4, %v20251_v3 }
 0x31e   : > { %v14907_v46 = vpack.c.bf16 %v1436_v54, %v1267_v35  ;;  %v14927_v38 = vpop.f32.mrf.mxu1 }
 0x31f   : > { %v12310_v47 = vpack.c.b16 %v3327_v36, %v2680_v52  ;;  %v20594_v52 = vld [vmem:[#allocation41_spill] sm:$0xff] }
 0x320   : > { %v20254_v45 = vrot.slane %v14907_v46, 4  ;;  %v1885_v58 = vrot.slane %v14907_v46, 6  ;;  %v14925_v62 = vpop.f32.mrf.mxu0 }
 0x321   : > { %12386 = vmatmul.msk.bf16.vlgmr.msrb.gmra.mxu0 %vm3698_vm7, %v14555_v39  ;;  %12387 = vmatmul.msk.bf16.vlgmr.msrb.gmra.mxu1 %vm3698_vm7, %v14555_v39 }
 0x322   : > { %v2705_v32 = vsel %vm1892_vm5, %v20254_v45, %v1885_v58  ;;  %4269 = vmatpush.bf16.msrb.mxu0 %v14318_v34 }
 0x323   : > { %v2706_v35 = vsel %vm1896_vm6, %v2702_v25, %v2705_v32  ;;  %12388 = vmatmul.msk.bf16.vlgmr.msrb.gmra.mxu2 %vm3698_vm7, %v14555_v39  ;;  %v20592_v25 = vld [vmem:[#allocation28_spill] sm:$0xff]  ;;  %v20593_v32 = vld [vmem:[#allocation34_spill] sm:$0xff] }
 0x324   : > { %v3347_v54 = vunpack.i.h.s16 %v2706_v35  ;;  %12389 = vmatmul.msk.bf16.vlgmr.msrb.gmra.mxu3 %vm3698_vm7, %v14555_v39  ;;  %4283 = vmatpush.bf16.msrb.mxu1 %v20592_v25 }
 0x325   : > { %4297 = vmatpush.bf16.msrb.mxu2 %v20593_v32  ;;  %4311 = vmatpush.bf16.msrb.mxu3 %v20594_v52  ;;  %v14941_v36 = vpop.f32.mrf.mxu2 }
 0x326   : > { %v12314_v17 = vpack.c.b16 %v3347_v54, %v2706_v35  ;;  %v14943_v35 = vpop.f32.mrf.mxu3  ;;  %v3725_v42 = vpop.f32.mrf.mxu1 }
 0x328   : > { %v12446_v3 = vpack.i.b16 %v12314_v17, %v12310_v47  ;;  %v3711_v54 = vpop.f32.mrf.mxu0 }
 0x329   : > { %v14945_v50 = vpack.c.bf16 %v3725_v42, %v3711_v54  ;;  %v20595_v42 = vld [vmem:[#allocation48_spill] sm:$0xff] }
 0x32a   : > { %4684 = vst [vmem:[#allocation1 + $0x7] ss:$9 sm:$0xff] %v12446_v3  ;;  %v20597_v3 = vld [vmem:[#allocation63_spill] sm:$0xff] }
 0x32d   : > { %v3739_v51 = vpop.f32.mrf.mxu2 }
 0x32e   : > { %v3753_v45 = vpop.f32.mrf.mxu3  ;;  %v3727_v48 = vpop.f32.mrf.mxu1 }
 0x32f   : > { %v14947_v59 = vpack.c.bf16 %v3753_v45, %v3739_v51  ;;  %v20596_v51 = vld [vmem:[#allocation62_spill] sm:$0xff] }
 0x330   : > { %v3713_v34 = vpop.f32.mrf.mxu0 }
 0x331   : > { %12390 = vmatmul.msk.bf16.vlgmr.msra.gmra.mxu0 %vm3698_vm7, %v14555_v39  ;;  %12391 = vmatmul.msk.bf16.vlgmr.msra.gmra.mxu1 %vm3698_vm7, %v14555_v39  ;;  %v14953_v25 = vpack.c.bf16 %v3727_v48, %v3713_v34  ;;  %v14963_v45 = vld [vmem:[#allocation1] sm:$0xff]  ;;  %v14965_v32 = vld [vmem:[#allocation1 + $0x9] sm:$0xff]  ;;  %v14967_v48 = vld [vmem:[#allocation1 + $0x12] sm:$0xff] }
 0x332   : > { %4325 = vmatpush.bf16.msra.mxu0 %v20595_v42  ;;  %4339 = vmatpush.bf16.msra.mxu1 %v14336_v7  ;;  %20598 = vst [vmem:[#allocation32_spill] sm:$0xff] %v14963_v45  ;;  %v14969_v34 = vld [vmem:[#allocation1 + $0x1b] sm:$0xff]  ;;  %v14971_v9 = vld [vmem:[#allocation1 + $0x24] sm:$0xff]  ;;  %v14973_v12 = vld [vmem:[#allocation1 + $0x2d] sm:$0xff] }
 0x333   : > { %12392 = vmatmul.msk.bf16.vlgmr.msra.gmra.mxu2 %vm3698_vm7, %v14555_v39  ;;  %20599 = vst [vmem:[#allocation30_spill] sm:$0xff] %v14965_v32  ;;  %v14977_v7 = vld [vmem:[#allocation1 + $0x36] sm:$0xff]  ;;  %v3350_v32 = vunpack.i.h.s16 %v12314_v17  ;;  %v20609_v17 = vrot.slane %v14871_v26, 4 }
 0x334   : > { %12393 = vmatmul.msk.bf16.vlgmr.msra.gmra.mxu3 %vm3698_vm7, %v14555_v39  ;;  %4353 = vmatpush.bf16.msra.mxu2 %v20596_v51  ;;  %20600 = vst [vmem:[#allocation28_spill] sm:$0xff] %v14967_v48  ;;  %v14979_v51 = vld [vmem:[#allocation1 + $0x3f] sm:$0xff] }
 0x335   : > { %4367 = vmatpush.bf16.msra.mxu3 %v20597_v3  ;;  %v3741_v52 = vpop.f32.mrf.mxu2  ;;  %20601 = vst [vmem:[#allocation34_spill] sm:$0xff] %v14969_v34  ;;  %v3310_v3 = vunpack.i.h.s16 %v14818_v2  ;;  %v3290_v34 = vunpack.i.h.s16 %v14814_v30 }
 0x336   : > { %v3755_v54 = vpop.f32.mrf.mxu3  ;;  %20602 = vst [vmem:[#allocation41_spill] sm:$0xff] %v14971_v9  ;;  %v3781_v45 = vpop.f32.mrf.mxu1  ;;  %v20607_v9 = vld [vmem:[#allocation45_spill] sm:$0xff] }
 0x337   : > { %20603 = vst [vmem:[#allocation48_spill] sm:$0xff] %v14973_v12  ;;  %v14975_v42 = vpack.c.bf16 %v3755_v54, %v3741_v52  ;;  %v3330_v12 = vunpack.i.h.s16 %v12310_v47  ;;  %v4647_v52 = vpack.i.b16 %v3310_v3, %v3290_v34  ;;  %v20608_v54 = vrot.slane %v14907_v46, 4  ;;  %v20614_v34 = vld [vmem:[#allocation27_spill] sm:$0xff]  ;;  %v20615_v3 = vld [vmem:[#allocation25_spill] sm:$0xff] }
 0x338   : > { %20604 = vst [vmem:[#allocation62_spill] sm:$0xff] %v14979_v51  ;;  %v3767_v48 = vpop.f32.mrf.mxu0 }
 0x339   : > { %4694 = vst [vmem:[#allocation1] ss:$9 sm:$0xff] %v20605_v43  ;;  %v2709_v51 = vsel %vm1901_vm3, %v1885_v58, %v20608_v54  ;;  %v4655_v2 = vpack.i.b16 %v3350_v32, %v3330_v12 }
 0x33a   : > { %4696 = vst [vmem:[#allocation1 + $0x1] ss:$9 sm:$0xff] %v20606_v14  ;;  %v20610_v14 = vrot.slane %v14871_v26, 6 }
 0x33b   : > { %4698 = vst [vmem:[#allocation1 + $0x2] ss:$9 sm:$0xff] %v20607_v9  ;;  %v20611_v9 = vrot.slane %v14900_v4, 2 }
 0x33c   : > { %4700 = vst [vmem:[#allocation1 + $0x3] ss:$9 sm:$0xff] %v14576_v31  ;;  %v2683_v30 = vsel %vm1901_vm3, %v20610_v14, %v20609_v17 }
 0x33d   : > { %4702 = vst [vmem:[#allocation1 + $0x4] ss:$9 sm:$0xff] %v14658_v10  ;;  %v2708_v31 = vsel %vm1899_vm2, %v14900_v4, %v20611_v9  ;;  %v3795_v46 = vpop.f32.mrf.mxu2  ;;  %v20612_v10 = vrot.slane %v14873_v0, 2 }
 0x33e   : > { %4704 = vst [vmem:[#allocation1 + $0x5] ss:$9 sm:$0xff] %v14745_v63  ;;  %v2710_v43 = vsel %vm1903_vm4, %v2708_v31, %v2709_v51  ;;  %v3809_v58 = vpop.f32.mrf.mxu3  ;;  %v15006_v63 = vpack.c.bf16 %v3781_v45, %v3767_v48  ;;  %v3783_v32 = vpop.f32.mrf.mxu1  ;;  %v20613_v48 = vld [vmem:[#allocation19_spill] sm:$0xff] }
 0x33f   : > { %4706 = vst [vmem:[#allocation1 + $0x6] ss:$9 sm:$0xff] %v4647_v52  ;;  %v2682_v12 = vsel %vm1899_vm2, %v14873_v0, %v20612_v10  ;;  %v15008_v26 = vpack.c.bf16 %v3809_v58, %v3795_v46  ;;  %v2712_v0 = vrot.slane %v2710_v43, 2  ;;  %v20616_v52 = vld [vmem:[#allocation33_spill] sm:$0xff] }
 0x340   : > { %4708 = vst [vmem:[#allocation1 + $0x7] ss:$9 sm:$0xff] %v4655_v2  ;;  %v2684_v47 = vsel %vm1903_vm4, %v2682_v12, %v2683_v30  ;;  %v3769_v4 = vpop.f32.mrf.mxu0 }
 0x341   : > { %12394 = vmatmul.msk.bf16.vlgmr.msrb.gmra.mxu0 %vm3698_vm7, %v14555_v39  ;;  %12395 = vmatmul.msk.bf16.vlgmr.msrb.gmra.mxu1 %vm3698_vm7, %v14555_v39  ;;  %v15019_v45 = vpack.c.bf16 %v3783_v32, %v3769_v4  ;;  %v2686_v51 = vrot.slane %v2684_v47, 2  ;;  %v3352_v54 = vunpack.i.h.s16 %v2712_v0  ;;  %v20620_v47 = vld [vmem:[#allocation43_spill] sm:$0xff]  ;;  %v20621_v4 = vld [vmem:[#allocation36_spill] sm:$0xff] }
 0x342   : > { %4381 = vmatpush.bf16.msrb.mxu0 %v20613_v48  ;;  %4395 = vmatpush.bf16.msrb.mxu1 %v20614_v34  ;;  %v20622_v32 = vpack.i.b16 %v20620_v47, %v20621_v4  ;;  %v20623_v34 = vld [vmem:[#allocation37_spill] sm:$0xff]  ;;  %v20628_v47 = vpack.i.b16 %v14643_v29, %v14640_v28  ;;  %v20630_v4 = vpack.i.b16 %v14821_v13, %v14816_v49  ;;  %v20631_v29 = vld [vmem:[#allocation31_spill] sm:$0xff]  ;;  %v20633_v13 = vld [vmem:[#allocation38_spill] sm:$0xff] }
 0x343   : > { %12396 = vmatmul.msk.bf16.vlgmr.msrb.gmra.mxu2 %vm3698_vm7, %v14555_v39  ;;  %v3332_v46 = vunpack.i.h.s16 %v2686_v51  ;;  %v12315_v48 = vpack.c.b16 %v3352_v54, %v2712_v0  ;;  %v20629_v54 = vpack.i.b16 %v14730_v40, %v14727_v20  ;;  %v20632_v20 = vld [vmem:[#allocation40_spill] sm:$0xff] }
 0x344   : > { %12397 = vmatmul.msk.bf16.vlgmr.msrb.gmra.mxu3 %vm3698_vm7, %v14555_v39  ;;  %4409 = vmatpush.bf16.msrb.mxu2 %v20615_v3  ;;  %v20624_v3 = vld [vmem:[#allocation39_spill] sm:$0xff] }
 0x345   : > { %4423 = vmatpush.bf16.msrb.mxu3 %v20616_v52  ;;  %v3797_v39 = vpop.f32.mrf.mxu2  ;;  %v20625_v52 = vpack.i.b16 %v20623_v34, %v20624_v3 }
 0x346   : > { %v3811_v30 = vpop.f32.mrf.mxu3 }
 0x347   : > { %v15025_v2 = vld [vmem:[#allocation1] sm:$0xff]  ;;  %v15027_v17 = vld [vmem:[#allocation1 + $0x9] sm:$0xff]  ;;  %v15029_v14 = vld [vmem:[#allocation1 + $0x12] sm:$0xff]  ;;  %v15037_v58 = vpack.c.bf16 %v3811_v30, %v3797_v39  ;;  %v20626_v39 = vpack.i.b16 %v14461_v19, %v14442_v24  ;;  %v12311_v30 = vpack.c.b16 %v3332_v46, %v2686_v51 }
 0x348   : > { %v15031_v9 = vld [vmem:[#allocation1 + $0x1b] sm:$0xff]  ;;  %v15033_v31 = vld [vmem:[#allocation1 + $0x24] sm:$0xff]  ;;  %v15035_v43 = vld [vmem:[#allocation1 + $0x2d] sm:$0xff] }
 0x349   : > { %20617 = vst [vmem:[#allocation63_spill] sm:$0xff] %v15031_v9  ;;  %v15039_v10 = vld [vmem:[#allocation1 + $0x36] sm:$0xff]  ;;  %v15041_v12 = vld [vmem:[#allocation1 + $0x3f] sm:$0xff]  ;;  %v3837_v9 = vpop.f32.mrf.mxu1  ;;  %v12447_v0 = vpack.i.b16 %v12315_v48, %v12311_v30 }
 0x34a   : > { %20618 = vst [vmem:[#allocation50_spill] sm:$0xff] %v15033_v31  ;;  %v3823_v31 = vpop.f32.mrf.mxu0  ;;  %v15065_v24 = vld [vmem:[%s13173_s21] sm:$0xff]  ;;  %v20634_v51 = vld [vmem:[#allocation47_spill] sm:$0xff] }
 0x34b   : > { %20619 = vst [vmem:[#allocation46_spill] sm:$0xff] %v15039_v10  ;;  %v20627_v10 = vpack.i.b16 %v14561_v33, %v14550_v15  ;;  %v15075_v33 = vpack.c.bf16 %v3837_v9, %v3823_v31 }
 0x34c   : > { %4718 = vst [vmem:[#allocation1] ss:$9 sm:$0xff] %v20622_v32 }
 0x34d   : > { %4720 = vst [vmem:[#allocation1 + $0x1] ss:$9 sm:$0xff] %v20625_v52  ;;  %v3851_v19 = vpop.f32.mrf.mxu2 }
 0x34e   : > { %4722 = vst [vmem:[#allocation1 + $0x2] ss:$9 sm:$0xff] %v20626_v39  ;;  %v3865_v15 = vpop.f32.mrf.mxu3 }
 0x34f   : > { %4724 = vst [vmem:[#allocation1 + $0x3] ss:$9 sm:$0xff] %v20627_v10  ;;  %v15077_v28 = vpack.c.bf16 %v3865_v15, %v3851_v19  ;;  %v20636_v19 = vld [vmem:[#allocation58_spill] sm:$0xff]  ;;  %v3355_v15 = vunpack.i.h.s16 %v12315_v48 }
 0x350   : > { %4726 = vst [vmem:[#allocation1 + $0x4] ss:$9 sm:$0xff] %v20628_v47 }
 0x351   : > { %4728 = vst [vmem:[#allocation1 + $0x5] ss:$9 sm:$0xff] %v20629_v54  ;;  %12398 = vmatmul.msk.bf16.vlgmr.msra.gmra.mxu0 %vm3698_vm7, %v15065_v24  ;;  %12399 = vmatmul.msk.bf16.vlgmr.msra.gmra.mxu1 %vm3698_vm7, %v15065_v24  ;;  %v3839_v49 = vpop.f32.mrf.mxu1  ;;  %v15103_v54 = vpack.c.bf16 %v14943_v35, %v14941_v36 }
 0x352   : > { %4730 = vst [vmem:[#allocation1 + $0x6] ss:$9 sm:$0xff] %v20630_v4  ;;  %4437 = vmatpush.bf16.msra.mxu0 %v20631_v29  ;;  %4451 = vmatpush.bf16.msra.mxu1 %v20632_v20  ;;  %v3825_v40 = vpop.f32.mrf.mxu0 }
 0x353   : > { %4732 = vst [vmem:[#allocation1 + $0x7] ss:$9 sm:$0xff] %v12447_v0  ;;  %12400 = vmatmul.msk.bf16.vlgmr.msra.gmra.mxu2 %vm3698_vm7, %v15065_v24  ;;  %v15083_v46 = vpack.c.bf16 %v3839_v49, %v3825_v40  ;;  %v20637_v40 = vld [vmem:[#allocation53_spill] sm:$0xff]  ;;  %v15111_v49 = vpack.c.bf16 %v14927_v38, %v14925_v62  ;;  %v20261_v36 = vrot.slane %v15103_v54, 4  ;;  %v20260_v35 = vrot.slane %v15103_v54, 6 }
 0x354   : > { %12401 = vmatmul.msk.bf16.vlgmr.msra.gmra.mxu3 %vm3698_vm7, %v15065_v24  ;;  %4465 = vmatpush.bf16.msra.mxu2 %v20633_v13  ;;  %v3335_v13 = vunpack.i.h.s16 %v12311_v30 }
 0x355   : > { %4479 = vmatpush.bf16.msra.mxu3 %v20634_v51  ;;  %v3853_v52 = vpop.f32.mrf.mxu2  ;;  %v20259_v51 = vrot.slane %v15111_v49, 2 }
 0x356   : > { %v3867_v39 = vpop.f32.mrf.mxu3  ;;  %v4657_v48 = vpack.i.b16 %v3355_v15, %v3335_v13 }
 0x357   : > { %v15105_v4 = vpack.c.bf16 %v3867_v39, %v3853_v52  ;;  %v2715_v30 = vsel %vm756_vm0, %v15111_v49, %v20259_v51  ;;  %v20638_v52 = vld [vmem:[#allocation42_spill] sm:$0xff]  ;;  %v20648_v51 = vld [vmem:[#allocation57_spill] sm:$0xff] }
 0x359   : > { %v3893_v20 = vpop.f32.mrf.mxu1 }
 0x35a   : > { %v15085_v10 = vld [vmem:[#allocation1] sm:$0xff]  ;;  %v15087_v32 = vld [vmem:[#allocation1 + $0x9] sm:$0xff]  ;;  %v15089_v9 = vld [vmem:[#allocation1 + $0x12] sm:$0xff]  ;;  %v3879_v29 = vpop.f32.mrf.mxu0 }
 0x35b   : > { %v15091_v31 = vld [vmem:[#allocation1 + $0x1b] sm:$0xff]  ;;  %v15093_v34 = vld [vmem:[#allocation1 + $0x24] sm:$0xff]  ;;  %v15095_v3 = vld [vmem:[#allocation1 + $0x2d] sm:$0xff] }
 0x35c   : > { %v15097_v47 = vld [vmem:[#allocation1 + $0x36] sm:$0xff]  ;;  %v15099_v0 = vld [vmem:[#allocation1 + $0x3f] sm:$0xff] }
 0x35d   : > { %20635 = vst [vmem:[#allocation45_spill] sm:$0xff] %v15099_v0 }
 0x35e   : > { %4742 = vst [vmem:[#allocation1] ss:$9 sm:$0xff] %v20636_v19 }
 0x35f   : > { %4744 = vst [vmem:[#allocation1 + $0x1] ss:$9 sm:$0xff] %v20637_v40 }
 0x360   : > { %4746 = vst [vmem:[#allocation1 + $0x2] ss:$9 sm:$0xff] %v14482_v53  ;;  %v3907_v53 = vpop.f32.mrf.mxu2 }
 0x361   : > { %4748 = vst [vmem:[#allocation1 + $0x3] ss:$9 sm:$0xff] %v14586_v6  ;;  %12402 = vmatmul.msk.bf16.vlgmr.msrb.gmra.mxu0 %vm3698_vm7, %v15065_v24  ;;  %12403 = vmatmul.msk.bf16.vlgmr.msrb.gmra.mxu1 %vm3698_vm7, %v15065_v24  ;;  %v3921_v6 = vpop.f32.mrf.mxu3  ;;  %v3895_v38 = vpop.f32.mrf.mxu1 }
 0x362   : > { %4750 = vst [vmem:[#allocation1 + $0x4] ss:$9 sm:$0xff] %v14668_v1  ;;  %v2718_v1 = vsel %vm1892_vm5, %v20261_v36, %v20260_v35  ;;  %v15136_v62 = vpack.c.bf16 %v3921_v6, %v3907_v53  ;;  %4493 = vmatpush.bf16.msrb.mxu0 %v14504_v61  ;;  %4507 = vmatpush.bf16.msrb.mxu1 %v14506_v41  ;;  %v3337_v53 = vunpack.i.h.s16 %v14893_v44 }
 0x363   : > { %4752 = vst [vmem:[#allocation1 + $0x5] ss:$9 sm:$0xff] %v14755_v8  ;;  %12404 = vmatmul.msk.bf16.vlgmr.msrb.gmra.mxu2 %vm3698_vm7, %v15065_v24  ;;  %v15134_v8 = vpack.c.bf16 %v3893_v20, %v3879_v29  ;;  %v2719_v19 = vsel %vm1896_vm6, %v2715_v30, %v2718_v1 }
 0x364   : > { %4754 = vst [vmem:[#allocation1 + $0x6] ss:$9 sm:$0xff] %v14846_v18  ;;  %12405 = vmatmul.msk.bf16.vlgmr.msrb.gmra.mxu3 %vm3698_vm7, %v15065_v24  ;;  %v3881_v18 = vpop.f32.mrf.mxu0  ;;  %4521 = vmatpush.bf16.msrb.mxu2 %v14508_v21  ;;  %v3357_v15 = vunpack.i.h.s16 %v2719_v19 }
 0x365   : > { %4756 = vst [vmem:[#allocation1 + $0x7] ss:$9 sm:$0xff] %v4657_v48  ;;  %4535 = vmatpush.bf16.msrb.mxu3 %v20638_v52  ;;  %v15146_v39 = vpack.c.bf16 %v3895_v38, %v3881_v18  ;;  %v20647_v52 = vld [vmem:[#allocation59_spill] sm:$0xff] }
 0x366   : > { %v20649_v35 = vpack.i.b16 %v20647_v52, %v20648_v51  ;;  %v15171_v36 = vpack.c.b16 %v3357_v15, %v2719_v19  ;;  %v20656_v51 = vpack.i.b16 %v14588_v56, %v14559_v60  ;;  %v20657_v19 = vpack.i.b16 %v14677_v55, %v14673_v57 }
 0x367   : > { %v20659_v57 = vpack.i.b16 %v14855_v27, %v14851_v23  ;;  %v6400_v55 = vrot.slane %v14947_v59, 4  ;;  %v20662_v23 = vld [vmem:[#allocation66_spill] sm:$0xff]  ;;  %v20663_v27 = vld [vmem:[#allocation67_spill] sm:$0xff] }
 0x368   : > { %v3909_v20 = vpop.f32.mrf.mxu2 }
 0x369   : > { %v3923_v40 = vpop.f32.mrf.mxu3  ;;  %v3949_v30 = vpop.f32.mrf.mxu1 }
 0x36a   : > { %v15162_v6 = vpack.c.bf16 %v3923_v40, %v3909_v20  ;;  %v20653_v20 = vld [vmem:[#allocation52_spill] sm:$0xff]  ;;  %v20654_v40 = vld [vmem:[#allocation54_spill] sm:$0xff] }
 0x36c   : > { %v15149_v29 = vld [vmem:[#allocation1] sm:$0xff]  ;;  %v15151_v61 = vld [vmem:[#allocation1 + $0x9] sm:$0xff]  ;;  %v15153_v41 = vld [vmem:[#allocation1 + $0x12] sm:$0xff]  ;;  %v3935_v38 = vpop.f32.mrf.mxu0 }
 0x36d   : > { %20639 = vst [vmem:[#allocation19_spill] sm:$0xff] %v15149_v29  ;;  %v15155_v13 = vld [vmem:[#allocation1 + $0x1b] sm:$0xff]  ;;  %v15157_v48 = vld [vmem:[#allocation1 + $0x24] sm:$0xff]  ;;  %v15159_v21 = vld [vmem:[#allocation1 + $0x2d] sm:$0xff] }
 0x36e   : > { %20640 = vst [vmem:[#allocation27_spill] sm:$0xff] %v15151_v61  ;;  %v15164_v1 = vld [vmem:[#allocation1 + $0x36] sm:$0xff]  ;;  %v15166_v18 = vld [vmem:[#allocation1 + $0x3f] sm:$0xff] }
 0x36f   : > { %20641 = vst [vmem:[#allocation25_spill] sm:$0xff] %v15153_v41  ;;  %v20651_v41 = vld [vmem:[#allocation44_spill] sm:$0xff] }
 0x370   : > { %20642 = vst [vmem:[#allocation33_spill] sm:$0xff] %v15155_v13  ;;  %v5829_v13 = vpack.c.bf16 %v3949_v30, %v3935_v38  ;;  %v3963_v60 = vpop.f32.mrf.mxu2 }
 0x371   : > { %20643 = vst [vmem:[#allocation43_spill] sm:$0xff] %v15157_v48  ;;  %v5952_v48 = vrot.slane %v14945_v50, 4  ;;  %12406 = vmatmul.msk.bf16.vlgmr.msra.gmra.mxu0 %vm3698_vm7, %v15065_v24  ;;  %12407 = vmatmul.msk.bf16.vlgmr.msra.gmra.mxu1 %vm3698_vm7, %v15065_v24  ;;  %v3977_v56 = vpop.f32.mrf.mxu3 }
 0x372   : > { %20644 = vst [vmem:[#allocation36_spill] sm:$0xff] %v15159_v21  ;;  %v20650_v21 = vld [vmem:[#allocation51_spill] sm:$0xff]  ;;  %v5949_v29 = vrot.slane %v5829_v13, 4 }
 0x373   : > { %20645 = vst [vmem:[#allocation37_spill] sm:$0xff] %v15164_v1  ;;  %v20652_v61 = vpack.i.b16 %v20650_v21, %v20651_v41  ;;  %v20655_v1 = vpack.i.b16 %v20653_v20, %v20654_v40  ;;  %12408 = vmatmul.msk.bf16.vlgmr.msra.gmra.mxu2 %vm3698_vm7, %v15065_v24  ;;  %v3951_v41 = vpop.f32.mrf.mxu1 }
 0x374   : > { %20646 = vst [vmem:[#allocation39_spill] sm:$0xff] %v15166_v18  ;;  %v15181_v18 = vpack.c.b16 %v3337_v53, %v14893_v44  ;;  %v20658_v44 = vpack.i.b16 %v14764_v11, %v14760_v37  ;;  %12409 = vmatmul.msk.bf16.vlgmr.msra.gmra.mxu3 %vm3698_vm7, %v15065_v24  ;;  %v5830_v37 = vpack.c.bf16 %v3977_v56, %v3963_v60  ;;  %v20660_v11 = vld [vmem:[#allocation49_spill] sm:$0xff] }
 0x375   : > { %4766 = vst [vmem:[#allocation1] ss:$9 sm:$0xff] %v20649_v35  ;;  %v15184_v35 = vsel %vm5950_vm8, %v5829_v13, %v5952_v48  ;;  %4549 = vmatpush.bf16.msra.mxu0 %v20660_v11  ;;  %v6176_v13 = vrot.slane %v14953_v25, 4  ;;  %4577 = vmatpush.bf16.msra.mxu2 %v20662_v23  ;;  %v20672_v23 = vld [vmem:[#allocation18_spill] sm:$0xff] }
 0x376   : > { %4768 = vst [vmem:[#allocation1 + $0x1] ss:$9 sm:$0xff] %v20652_v61  ;;  %v12448_v15 = vpack.i.b16 %v15171_v36, %v15181_v18  ;;  %v15196_v61 = vsel %vm5950_vm8, %v5949_v29, %v14945_v50  ;;  %v20661_v50 = vld [vmem:[#allocation56_spill] sm:$0xff]  ;;  %v3937_v29 = vpop.f32.mrf.mxu0  ;;  %4591 = vmatpush.bf16.msra.mxu3 %v20663_v27  ;;  %v6398_v48 = vrot.slane %v5830_v37, 4  ;;  %v15219_v21 = vsel %vm5950_vm8, %v5830_v37, %v6400_v55 }
 0x377   : > { %4770 = vst [vmem:[#allocation1 + $0x2] ss:$9 sm:$0xff] %v20655_v1  ;;  %4563 = vmatpush.bf16.msra.mxu1 %v20661_v50  ;;  %v5861_v53 = vpack.c.bf16 %v3951_v41, %v3937_v29  ;;  %v6008_v50 = vrot.slane %v15006_v63, 4  ;;  %v20673_v27 = vrot.slane %v15103_v54, 4 }
 0x378   : > { %4772 = vst [vmem:[#allocation1 + $0x3] ss:$9 sm:$0xff] %v20656_v51  ;;  %v15223_v1 = vsel %vm5950_vm8, %v6398_v48, %v14947_v59  ;;  %v3965_v20 = vpop.f32.mrf.mxu2  ;;  %v20674_v48 = vrot.slane %v15103_v54, 6  ;;  %v20677_v54 = vrot.slane %v15111_v49, 2 }
 0x379   : > { %4774 = vst [vmem:[#allocation1 + $0x4] ss:$9 sm:$0xff] %v20657_v19  ;;  %v6174_v38 = vrot.slane %v5861_v53, 4  ;;  %v15226_v30 = vsel %vm5950_vm8, %v5861_v53, %v6176_v13  ;;  %v3979_v40 = vpop.f32.mrf.mxu3 }
 0x37a   : > { %4776 = vst [vmem:[#allocation1 + $0x5] ss:$9 sm:$0xff] %v20658_v44  ;;  %v6624_v44 = vrot.slane %v14975_v42, 4  ;;  %v5862_v59 = vpack.c.bf16 %v3979_v40, %v3965_v20  ;;  %v2722_v53 = vsel %vm1901_vm3, %v20674_v48, %v20673_v27  ;;  %v20675_v20 = vld [vmem:[#allocation64_spill] sm:$0xff]  ;;  %v20680_v27 = vld [vmem:[#allocation30_spill] sm:$0xff] }
 0x37b   : > { %4778 = vst [vmem:[#allocation1 + $0x6] ss:$9 sm:$0xff] %v20659_v57  ;;  %v15230_v52 = vsel %vm5950_vm8, %v6174_v38, %v14953_v25  ;;  %v4005_v25 = vpop.f32.mrf.mxu1  ;;  %v3360_v38 = vunpack.i.h.s16 %v15171_v36 }
 0x37c   : > { %4780 = vst [vmem:[#allocation1 + $0x7] ss:$9 sm:$0xff] %v12448_v15  ;;  %v6622_v29 = vrot.slane %v5862_v59, 4  ;;  %v15251_v41 = vsel %vm5950_vm8, %v5862_v59, %v6624_v44  ;;  %v20676_v59 = vld [vmem:[#allocation35_spill] sm:$0xff] }
 0x37e   : > { %v3991_v55 = vpop.f32.mrf.mxu0  ;;  %v15263_v40 = vsel %vm5950_vm8, %v6622_v29, %v14975_v42 }
 0x37f   : > { %v5831_v13 = vpack.c.bf16 %v4005_v25, %v3991_v55  ;;  %v3340_v55 = vunpack.i.h.s16 %v15181_v18  ;;  %v2721_v25 = vsel %vm1899_vm2, %v15111_v49, %v20677_v54 }
 0x380   : > { %v2723_v36 = vsel %vm1903_vm4, %v2721_v25, %v2722_v53  ;;  %v4019_v18 = vpop.f32.mrf.mxu2  ;;  %v6232_v53 = vrot.slane %v15019_v45, 4  ;;  %v20683_v25 = vld [vmem:[#allocation24_spill] sm:$0xff] }
 0x381   : > { %v15266_v44 = vsel %vm5950_vm8, %v5831_v13, %v6008_v50  ;;  %v4659_v50 = vpack.i.b16 %v3360_v38, %v3340_v55  ;;  %12410 = vmatmul.msk.bf16.vlgmr.msrb.gmra.mxu0 %vm3698_vm7, %v15065_v24  ;;  %12411 = vmatmul.msk.bf16.vlgmr.msrb.gmra.mxu1 %vm3698_vm7, %v15065_v24  ;;  %v4033_v29 = vpop.f32.mrf.mxu3  ;;  %v2725_v49 = vrot.slane %v2723_v36, 2  ;;  %v20681_v38 = vld [vmem:[#allocation28_spill] sm:$0xff]  ;;  %v2699_v36 = vrot.slane %v20683_v25, 2 }
 0x382   : > { %4946 = vmatpush.bf16.msrb.mxu1 %v20680_v27 }
 0x383   : > { %v15232_v51 = vld [vmem:[#allocation1] sm:$0xff]  ;;  %v15234_v19 = vld [vmem:[#allocation1 + $0x9] sm:$0xff]  ;;  %v15236_v15 = vld [vmem:[#allocation1 + $0x12] sm:$0xff]  ;;  %12412 = vmatmul.msk.bf16.vlgmr.msrb.gmra.mxu2 %vm3698_vm7, %v15065_v24  ;;  %v3342_v27 = vunpack.i.h.s16 %v2699_v36 }
 0x384   : > { %20664 = vst [vmem:[#allocation31_spill] sm:$0xff] %v15232_v51  ;;  %v15239_v60 = vld [vmem:[#allocation1 + $0x1b] sm:$0xff]  ;;  %v15241_v56 = vld [vmem:[#allocation1 + $0x24] sm:$0xff]  ;;  %v15243_v57 = vld [vmem:[#allocation1 + $0x2d] sm:$0xff]  ;;  %12413 = vmatmul.msk.bf16.vlgmr.msrb.gmra.mxu3 %vm3698_vm7, %v15065_v24  ;;  %4960 = vmatpush.bf16.msrb.mxu2 %v20681_v38 }
 0x385   : > { %20665 = vst [vmem:[#allocation40_spill] sm:$0xff] %v15234_v19  ;;  %v15245_v37 = vld [vmem:[#allocation1 + $0x36] sm:$0xff]  ;;  %v15247_v11 = vld [vmem:[#allocation1 + $0x3f] sm:$0xff] }
 0x386   : > { %20666 = vst [vmem:[#allocation38_spill] sm:$0xff] %v15236_v15  ;;  %v3993_v48 = vpop.f32.mrf.mxu0  ;;  %v20730_v19 = vld [vmem:[#allocation76_spill] sm:$0xff] }
 0x387   : > { %20667 = vst [vmem:[#allocation47_spill] sm:$0xff] %v15239_v60 }
 0x388   : > { %20668 = vst [vmem:[#allocation58_spill] sm:$0xff] %v15241_v56  ;;  %v20700_v56 = vld [vmem:[#allocation23_spill] sm:$0xff] }
 0x389   : > { %20669 = vst [vmem:[#allocation53_spill] sm:$0xff] %v15243_v57  ;;  %v20699_v57 = vld [vmem:[#allocation29_spill] sm:$0xff] }
 0x38a   : > { %20670 = vst [vmem:[#allocation42_spill] sm:$0xff] %v15245_v37 }
 0x38b   : > { %20671 = vst [vmem:[#allocation59_spill] sm:$0xff] %v15247_v11  ;;  %v6006_v11 = vrot.slane %v5831_v13, 4 }
 0x38c   : > { %4790 = vst [vmem:[#allocation1] ss:$9 sm:$0xff] %v20672_v23  ;;  %v20679_v23 = vld [vmem:[#allocation32_spill] sm:$0xff] }
 0x38d   : > { %4792 = vst [vmem:[#allocation1 + $0x1] ss:$9 sm:$0xff] %v20675_v20  ;;  %v15278_v42 = vsel %vm5950_vm8, %v6006_v11, %v15006_v63  ;;  %v20678_v63 = vld [vmem:[#allocation78_spill] sm:$0xff]  ;;  %v12954_v11 = vmov 1983009808   ;;  %4932 = vmatpush.bf16.msrb.mxu0 %v20679_v23 }
 0x38e   : > { %4794 = vst [vmem:[#allocation1 + $0x2] ss:$9 sm:$0xff] %v20676_v59  ;;  %v5955_v13 = vunpack.c.l.s4 %v12954_v11  ;;  %v20682_v20 = vld [vmem:[#allocation34_spill] sm:$0xff] }
 0x38f   : > { %4796 = vst [vmem:[#allocation1 + $0x3] ss:$9 sm:$0xff] %v14599_v16  ;;  %v6456_v16 = vrot.slane %v15008_v26, 4  ;;  %4974 = vmatpush.bf16.msrb.mxu3 %v20682_v20 }
 0x390   : > { %4798 = vst [vmem:[#allocation1 + $0x4] ss:$9 sm:$0xff] %v14689_v5  ;;  %v5832_v5 = vpack.c.bf16 %v4033_v29, %v4019_v18  ;;  %v15308_v11 = vunpack.c.0.s8 %v5955_v13 }
 0x391   : > { %4800 = vst [vmem:[#allocation1 + $0x5] ss:$9 sm:$0xff] %v14776_v22  ;;  %v4007_v22 = vpop.f32.mrf.mxu1  ;;  %12414 = vmatmul.msk.bf16.vlgmr.msra.gmra.mxu0 %vm3698_vm7, %v15065_v24  ;;  %12415 = vmatmul.msk.bf16.vlgmr.msra.gmra.mxu1 %vm3698_vm7, %v15065_v24 }
 0x392   : > { %4802 = vst [vmem:[#allocation1 + $0x6] ss:$9 sm:$0xff] %v20678_v63  ;;  %v6454_v59 = vrot.slane %v5832_v5, 4  ;;  %v15298_v55 = vsel %vm5950_vm8, %v5832_v5, %v6456_v16  ;;  %v5863_v54 = vpack.c.bf16 %v4007_v22, %v3993_v48  ;;  %v3362_v63 = vunpack.i.h.s16 %v2725_v49  ;;  %v4021_v16 = vpop.f32.mrf.mxu2  ;;  %v4035_v5 = vpop.f32.mrf.mxu3 }
 0x393   : > { %4804 = vst [vmem:[#allocation1 + $0x7] ss:$9 sm:$0xff] %v4659_v50  ;;  %v6680_v48 = vrot.slane %v15037_v58, 4  ;;  %v5864_v22 = vpack.c.bf16 %v4035_v5, %v4021_v16  ;;  %v5961_v13 = vperm.slane %v15184_v35, %v15308_v11  ;;  %v5964_v16 = vrot.slane %v15075_v33, 4  ;;  %12416 = vmatmul.msk.bf16.vlgmr.msra.gmra.mxu2 %vm3698_vm7, %v15065_v24 }
 0x394   : > { %v15303_v18 = vsel %vm5950_vm8, %v6454_v59, %v15008_v26  ;;  %v6230_v29 = vrot.slane %v5863_v54, 4  ;;  %v15306_v50 = vsel %vm5950_vm8, %v5863_v54, %v6232_v53  ;;  %20684 = vst [vmem:[#allocation57_spill] sm:$0xff] %v15308_v11  ;;  %v15321_v53 = vpack.c.b16 %v3362_v63, %v2725_v49  ;;  %v4047_v59 = vpop.f32.mrf.mxu0  ;;  %12417 = vmatmul.msk.bf16.vlgmr.msra.gmra.mxu3 %vm3698_vm7, %v15065_v24 }
 0x395   : > { %v6678_v5 = vrot.slane %v5864_v22, 4  ;;  %v5957_v35 = vperm.slane %v15196_v61, %v15308_v11  ;;  %5016 = vmatpush.bf16.msra.mxu2 %v14977_v7 }
 0x396   : > { %v15312_v23 = vsel %vm5950_vm8, %v6230_v29, %v15019_v45 }
 0x399   : > { %v4061_v45 = vpop.f32.mrf.mxu1 }
 0x39a   : > { %v15315_v38 = vld [vmem:[#allocation1] sm:$0xff]  ;;  %v15317_v26 = vld [vmem:[#allocation1 + $0x9] sm:$0xff]  ;;  %v15319_v20 = vld [vmem:[#allocation1 + $0x12] sm:$0xff] }
 0x39b   : > { %20685 = vst [vmem:[#allocation51_spill] sm:$0xff] %v15315_v38  ;;  %v15325_v54 = vld [vmem:[#allocation1 + $0x1b] sm:$0xff]  ;;  %v15327_v25 = vld [vmem:[#allocation1 + $0x24] sm:$0xff]  ;;  %v15329_v29 = vld [vmem:[#allocation1 + $0x2d] sm:$0xff] }
 0x39c   : > { %20686 = vst [vmem:[#allocation44_spill] sm:$0xff] %v15317_v26  ;;  %v15333_v26 = vsel %vm5950_vm8, %v5864_v22, %v6680_v48  ;;  %v15335_v49 = vld [vmem:[#allocation1 + $0x36] sm:$0xff]  ;;  %v15337_v63 = vld [vmem:[#allocation1 + $0x3f] sm:$0xff] }
 0x39d   : > { %20687 = vst [vmem:[#allocation52_spill] sm:$0xff] %v15319_v20  ;;  %v5833_v20 = vpack.c.bf16 %v4061_v45, %v4047_v59  ;;  %v20693_v38 = vld [vmem:[#allocation20_spill] sm:$0xff]  ;;  %v20696_v59 = vld [vmem:[#allocation55_spill] sm:$0xff]  ;;  %v20697_v45 = vld [vmem:[#allocation22_spill] sm:$0xff] }
 0x39e   : > { %20688 = vst [vmem:[#allocation54_spill] sm:$0xff] %v15325_v54  ;;  %v20694_v54 = vld [vmem:[#allocation60_spill] sm:$0xff] }
 0x39f   : > { %20689 = vst [vmem:[#allocation49_spill] sm:$0xff] %v15327_v25  ;;  %v20695_v37 = vpack.i.b16 %v20693_v38, %v20694_v54  ;;  %v15344_v25 = vpack.c.b16 %v3342_v27, %v2699_v36  ;;  %v5962_v48 = vrot.slane %v5833_v20, 4  ;;  %v5965_v22 = vsel %vm5950_vm8, %v5833_v20, %v5964_v16  ;;  %v20702_v36 = vld [vmem:[#allocation69_spill] sm:$0xff]  ;;  %v20703_v27 = vld [vmem:[#allocation68_spill] sm:$0xff] }
 0x3a0   : > { %20690 = vst [vmem:[#allocation56_spill] sm:$0xff] %v15329_v29  ;;  %v15348_v29 = vsel %vm5950_vm8, %v6678_v5, %v15037_v58  ;;  %v5973_v61 = vperm.slane %v5965_v22, %v15308_v11  ;;  %v20701_v38 = vpack.i.b16 %v20699_v57, %v20700_v56  ;;  %v20704_v20 = vpack.i.b16 %v20702_v36, %v20703_v27  ;;  %v4075_v5 = vpop.f32.mrf.mxu2  ;;  %v20711_v27 = vld [vmem:[#allocation41_spill] sm:$0xff] }
 0x3a1   : > { %20691 = vst [vmem:[#allocation66_spill] sm:$0xff] %v15335_v49  ;;  %v20698_v49 = vpack.i.b16 %v20696_v59, %v20697_v45  ;;  %v5963_v58 = vsel %vm5950_vm8, %v5962_v48, %v15075_v33  ;;  %v5976_v54 = vrot.slane %v5957_v35, 4  ;;  %v20705_v33 = vld [vmem:[#allocation72_spill] sm:$0xff]  ;;  %v20706_v48 = vld [vmem:[#allocation71_spill] sm:$0xff]  ;;  %v6405_v59 = vperm.slane %v15223_v1, %v15308_v11  ;;  %4988 = vmatpush.bf16.msra.mxu0 %v20711_v27 }
 0x3a2   : > { %20692 = vst [vmem:[#allocation67_spill] sm:$0xff] %v15337_v63  ;;  %v5988_v63 = vrot.slane %v5961_v13, 4  ;;  %v5969_v56 = vperm.slane %v5963_v58, %v15308_v11  ;;  %v5986_v57 = vrot.slane %v5973_v61, 4  ;;  %v20707_v22 = vpack.i.b16 %v20705_v33, %v20706_v48  ;;  %12450 = vmatmul.msk.bf16.vlgmr.msrb.gmra.mxu0 %vm3698_vm7, %v15065_v24  ;;  %12451 = vmatmul.msk.bf16.vlgmr.msrb.gmra.mxu1 %vm3698_vm7, %v15065_v24 }
 0x3a3   : > { %4814 = vst [vmem:[#allocation1] ss:$9 sm:$0xff] %v20695_v37  ;;  %v12449_v37 = vpack.i.b16 %v15321_v53, %v15344_v25  ;;  %v6409_v45 = vperm.slane %v15219_v21, %v15308_v11  ;;  %v6412_v36 = vrot.slane %v15077_v28, 4  ;;  %v4063_v21 = vpop.f32.mrf.mxu1  ;;  %v6424_v27 = vrot.slane %v6405_v59, 4  ;;  %12452 = vmatmul.msk.bf16.vlgmr.msrb.gmra.mxu2 %vm3698_vm7, %v15065_v24 }
 0x3a4   : > { %4816 = vst [vmem:[#allocation1 + $0x1] ss:$9 sm:$0xff] %v20698_v49  ;;  %v15371_v16 = vsel %vm5950_vm8, %v5973_v61, %v5988_v63  ;;  %v4089_v49 = vpop.f32.mrf.mxu3  ;;  %v20708_v61 = vld [vmem:[#allocation75_spill] sm:$0xff]  ;;  %v5974_v33 = vrot.slane %v5969_v56, 4  ;;  %v15391_v48 = vsel %vm5950_vm8, %v5969_v56, %v5976_v54  ;;  %v15394_v1 = vsel %vm5950_vm8, %v5986_v57, %v5961_v13  ;;  %12453 = vmatmul.msk.bf16.vlgmr.msrb.gmra.mxu3 %vm3698_vm7, %v15065_v24 }
 0x3a5   : > { %4818 = vst [vmem:[#allocation1 + $0x2] ss:$9 sm:$0xff] %v20701_v38  ;;  %v5834_v63 = vpack.c.bf16 %v4089_v49, %v4075_v5  ;;  %v20709_v38 = vld [vmem:[#allocation74_spill] sm:$0xff]  ;;  %v20713_v5 = vld [vmem:[#allocation77_spill] sm:$0xff]  ;;  %v6188_v54 = vrot.slane %v15083_v46, 4  ;;  %5044 = vmatpush.bf16.msrb.mxu0 %v15025_v2  ;;  %5072 = vmatpush.bf16.msrb.mxu2 %v15029_v14  ;;  %v6461_v14 = vperm.slane %v15303_v18, %v15308_v11  ;;  %v6468_v18 = vrot.slane %v15136_v62, 4 }
 0x3a6   : > { %4820 = vst [vmem:[#allocation1 + $0x3] ss:$9 sm:$0xff] %v20704_v20  ;;  %v20710_v58 = vpack.i.b16 %v20708_v61, %v20709_v38  ;;  %v20712_v20 = vld [vmem:[#allocation48_spill] sm:$0xff]  ;;  %v20714_v49 = vld [vmem:[#allocation61_spill] sm:$0xff]  ;;  %v6185_v61 = vperm.slane %v15226_v30, %v15308_v11  ;;  %v20716_v38 = vld [vmem:[#allocation62_spill] sm:$0xff]  ;;  %v15405_v13 = vsel %vm5950_vm8, %v5974_v33, %v5957_v35  ;;  %v3365_v35 = vunpack.i.h.s16 %v15321_v53 }
 0x3a7   : > { %4822 = vst [vmem:[#allocation1 + $0x4] ss:$9 sm:$0xff] %v20707_v22  ;;  %5002 = vmatpush.bf16.msra.mxu1 %v20712_v20  ;;  %v4049_v22 = vpop.f32.mrf.mxu0  ;;  %v20715_v60 = vpack.i.b16 %v20713_v5, %v20714_v49  ;;  %5030 = vmatpush.bf16.msra.mxu3 %v20716_v38  ;;  %v6413_v56 = vsel %vm5950_vm8, %v5834_v63, %v6412_v36  ;;  %v6436_v20 = vrot.slane %v6409_v45, 4 }
 0x3a8   : > { %4824 = vst [vmem:[#allocation1 + $0x5] ss:$9 sm:$0xff] %v20710_v58  ;;  %v6410_v58 = vrot.slane %v5834_v63, 4  ;;  %v5865_v57 = vpack.c.bf16 %v4063_v21, %v4049_v22  ;;  %v6212_v33 = vrot.slane %v6185_v61, 4 }
 0x3a9   : > { %4826 = vst [vmem:[#allocation1 + $0x6] ss:$9 sm:$0xff] %v20715_v60  ;;  %v6181_v60 = vperm.slane %v15230_v52, %v15308_v11 }
 0x3aa   : > { %4828 = vst [vmem:[#allocation1 + $0x7] ss:$9 sm:$0xff] %v12449_v37  ;;  %v6411_v7 = vsel %vm5950_vm8, %v6410_v58, %v15077_v28  ;;  %v6421_v37 = vperm.slane %v6413_v56, %v15308_v11  ;;  %v6186_v5 = vrot.slane %v5865_v57, 4  ;;  %v6189_v49 = vsel %vm5950_vm8, %v5865_v57, %v6188_v54  ;;  %v4077_v28 = vpop.f32.mrf.mxu2 }
 0x3ab   : > { %v6417_v30 = vperm.slane %v6411_v7, %v15308_v11  ;;  %v6197_v63 = vperm.slane %v6189_v49, %v15308_v11  ;;  %v6200_v58 = vrot.slane %v6181_v60, 4  ;;  %v15425_v56 = vperm.slane %v15251_v41, %v15308_v11  ;;  %5058 = vmatpush.bf16.msrb.mxu1 %v15027_v17 }
 0x3ac   : > { %v6434_v52 = vrot.slane %v6421_v37, 4  ;;  %v15421_v21 = vsel %vm5950_vm8, %v6421_v37, %v6436_v20  ;;  %v4091_v38 = vpop.f32.mrf.mxu3  ;;  %v6187_v53 = vsel %vm5950_vm8, %v6186_v5, %v15083_v46  ;;  %v4117_v37 = vpop.f32.mrf.mxu1  ;;  %v3345_v46 = vunpack.i.h.s16 %v15344_v25 }
 0x3ad   : > { %v6422_v36 = vrot.slane %v6417_v30, 4  ;;  %v15418_v22 = vsel %vm5950_vm8, %v6417_v30, %v6424_v27  ;;  %v6210_v54 = vrot.slane %v6197_v63, 4  ;;  %v6193_v20 = vperm.slane %v6187_v53, %v15308_v11 }
 0x3ae   : > { %v15433_v27 = vsel %vm5950_vm8, %v6434_v52, %v6409_v45  ;;  %v15437_v7 = vsel %vm5950_vm8, %v6197_v63, %v6212_v33  ;;  %v15452_v45 = vperm.slane %v15266_v44, %v15308_v11 }
 0x3af   : > { %v15430_v57 = vsel %vm5950_vm8, %v6422_v36, %v6405_v59  ;;  %v4103_v30 = vpop.f32.mrf.mxu0  ;;  %v15448_v59 = vperm.slane %v15263_v40, %v15308_v11  ;;  %v15462_v36 = vperm.slane %v15278_v42, %v15308_v11  ;;  %v6198_v52 = vrot.slane %v6193_v20, 4 }
 0x3b0   : > { %v15465_v25 = vsel %vm5950_vm8, %v6193_v20, %v6200_v58  ;;  %v15468_v40 = vsel %vm5950_vm8, %v6210_v54, %v6185_v61  ;;  %v6020_v42 = vrot.slane %v15134_v8, 4  ;;  %v5835_v20 = vpack.c.bf16 %v4117_v37, %v4103_v30  ;;  %v20726_v61 = vld [vmem:[#allocation21_spill] sm:$0xff] }
 0x3b1   : > { %v15439_v49 = vld [vmem:[#allocation1] sm:$0xff]  ;;  %v15441_v41 = vld [vmem:[#allocation1 + $0x9] sm:$0xff]  ;;  %v15443_v15 = vld [vmem:[#allocation1 + $0x12] sm:$0xff]  ;;  %v15479_v58 = vsel %vm5950_vm8, %v6198_v52, %v6181_v60  ;;  %v6648_v54 = vrot.slane %v15448_v59, 4  ;;  %v6032_v60 = vrot.slane %v15462_v36, 4 }
 0x3b2   : > { %20717 = vst [vmem:[#allocation18_spill] sm:$0xff] %v15439_v49  ;;  %v15454_v5 = vld [vmem:[#allocation1 + $0x1b] sm:$0xff]  ;;  %v15456_v33 = vld [vmem:[#allocation1 + $0x24] sm:$0xff]  ;;  %v15458_v63 = vld [vmem:[#allocation1 + $0x2d] sm:$0xff]  ;;  %v6018_v37 = vrot.slane %v5835_v20, 4  ;;  %12454 = vmatmul.msk.bf16.vlgmr.msra.gmra.mxu0 %vm3698_vm7, %v15065_v24  ;;  %12455 = vmatmul.msk.bf16.vlgmr.msra.gmra.mxu1 %vm3698_vm7, %v15065_v24 }
 0x3b3   : > { %20718 = vst [vmem:[#allocation64_spill] sm:$0xff] %v15441_v41  ;;  %v15470_v53 = vld [vmem:[#allocation1 + $0x36] sm:$0xff]  ;;  %v15472_v44 = vld [vmem:[#allocation1 + $0x3f] sm:$0xff]  ;;  %v6660_v41 = vrot.slane %v15425_v56, 4  ;;  %12456 = vmatmul.msk.bf16.vlgmr.msra.gmra.mxu2 %vm3698_vm7, %v15065_v24  ;;  %5114 = vmatpush.bf16.msra.mxu1 %v15035_v43 }
 0x3b4   : > { %20719 = vst [vmem:[#allocation35_spill] sm:$0xff] %v15443_v15  ;;  %v5866_v15 = vpack.c.bf16 %v4091_v38, %v4077_v28  ;;  %v20727_v38 = vld [vmem:[#allocation65_spill] sm:$0xff]  ;;  %v4145_v52 = vpop.f32.mrf.mxu3  ;;  %v4119_v49 = vpop.f32.mrf.mxu1  ;;  %12457 = vmatmul.msk.bf16.vlgmr.msra.gmra.mxu3 %vm3698_vm7, %v15065_v24 }
 0x3b5   : > { %20720 = vst [vmem:[#allocation78_spill] sm:$0xff] %v15454_v5  ;;  %v4661_v5 = vpack.i.b16 %v3365_v35, %v3345_v46  ;;  %v15486_v35 = vperm.slane %v15298_v55, %v15308_v11  ;;  %v6021_v46 = vsel %vm5950_vm8, %v5835_v20, %v6020_v42  ;;  %v20728_v55 = vld [vmem:[#allocation70_spill] sm:$0xff]  ;;  %v6019_v20 = vsel %vm5950_vm8, %v6018_v37, %v15134_v8 }
 0x3b6   : > { %20721 = vst [vmem:[#allocation32_spill] sm:$0xff] %v15456_v33  ;;  %v6636_v33 = vrot.slane %v15105_v4, 4  ;;  %v6634_v28 = vrot.slane %v5866_v15, 4  ;;  %v6025_v2 = vperm.slane %v6019_v20, %v15308_v11 }
 0x3b7   : > { %20722 = vst [vmem:[#allocation30_spill] sm:$0xff] %v15458_v63  ;;  %v20725_v63 = vld [vmem:[#allocation26_spill] sm:$0xff] }
 0x3b8   : > { %20723 = vst [vmem:[#allocation28_spill] sm:$0xff] %v15470_v53  ;;  %v6637_v30 = vsel %vm5950_vm8, %v5866_v15, %v6636_v33  ;;  %v6029_v15 = vperm.slane %v6021_v46, %v15308_v11  ;;  %v20729_v33 = vld [vmem:[#allocation73_spill] sm:$0xff]  ;;  %v4105_v53 = vpop.f32.mrf.mxu0  ;;  %v20733_v46 = vld [vmem:[#allocation79_spill] sm:$0xff] }
 0x3b9   : > { %20724 = vst [vmem:[#allocation34_spill] sm:$0xff] %v15472_v44  ;;  %v6044_v44 = vrot.slane %v15452_v45, 4 }
 0x3ba   : > { %4838 = vst [vmem:[#allocation1] ss:$9 sm:$0xff] %v20725_v63  ;;  %v4131_v63 = vpop.f32.mrf.mxu2  ;;  %v6042_v17 = vrot.slane %v6029_v15, 4 }
 0x3bb   : > { %4840 = vst [vmem:[#allocation1 + $0x1] ss:$9 sm:$0xff] %v20726_v61  ;;  %v6635_v61 = vsel %vm5950_vm8, %v6634_v28, %v15105_v4  ;;  %v20731_v4 = vld [vmem:[#allocation63_spill] sm:$0xff]  ;;  %v15523_v37 = vsel %vm5950_vm8, %v6029_v15, %v6044_v44  ;;  %v12955_v44 = vmov 1934713408   ;;  %v6492_v15 = vrot.slane %v15486_v35, 4 }
 0x3bc   : > { %4842 = vst [vmem:[#allocation1 + $0x2] ss:$9 sm:$0xff] %v20727_v38  ;;  %v6645_v38 = vperm.slane %v6637_v30, %v15308_v11  ;;  %v6641_v42 = vperm.slane %v6635_v61, %v15308_v11  ;;  %5086 = vmatpush.bf16.msrb.mxu3 %v20731_v4 }
 0x3bd   : > { %4844 = vst [vmem:[#allocation1 + $0x3] ss:$9 sm:$0xff] %v20728_v55  ;;  %v5836_v55 = vpack.c.bf16 %v4145_v52, %v4131_v63  ;;  %v15532_v63 = vsel %vm5950_vm8, %v6025_v2, %v6032_v60  ;;  %v6237_v52 = vperm.slane %v15312_v23, %v15308_v11  ;;  %v15549_v60 = vsel %vm5950_vm8, %v6042_v17, %v15452_v45  ;;  %v4173_v17 = vpop.f32.mrf.mxu1 }
 0x3be   : > { %4846 = vst [vmem:[#allocation1 + $0x4] ss:$9 sm:$0xff] %v20729_v33  ;;  %v6658_v28 = vrot.slane %v6645_v38, 4  ;;  %v15515_v30 = vsel %vm5950_vm8, %v6645_v38, %v6660_v41  ;;  %v6646_v61 = vrot.slane %v6641_v42, 4  ;;  %v15520_v8 = vsel %vm5950_vm8, %v6641_v42, %v6648_v54  ;;  %v4147_v33 = vpop.f32.mrf.mxu3 }
 0x3bf   : > { %4848 = vst [vmem:[#allocation1 + $0x5] ss:$9 sm:$0xff] %v20730_v19  ;;  %v6030_v41 = vrot.slane %v6025_v2, 4  ;;  %v6241_v54 = vperm.slane %v15306_v50, %v15308_v11  ;;  %v5979_v38 = vunpack.c.l.s4 %v12955_v44  ;;  %v6244_v23 = vrot.slane %v15146_v39, 4 }
 0x3c0   : > { %20732 = vst [vmem:[#allocation24_spill] sm:$0xff] %v15515_v30  ;;  %v15529_v19 = vsel %vm5950_vm8, %v6658_v28, %v15425_v56  ;;  %v6692_v50 = vrot.slane %v15162_v6, 4  ;;  %v6480_v42 = vrot.slane %v6461_v14, 4  ;;  %v6466_v20 = vrot.slane %v5836_v55, 4  ;;  %v4159_v45 = vpop.f32.mrf.mxu0  ;;  %5142 = vmatpush.bf16.msra.mxu3 %v15041_v12 }
 0x3c1   : > { %4850 = vst [vmem:[#allocation1 + $0x6] ss:$9 sm:$0xff] %v20733_v46  ;;  %v15545_v56 = vsel %vm5950_vm8, %v6030_v41, %v15462_v36  ;;  %v6469_v4 = vsel %vm5950_vm8, %v5836_v55, %v6468_v18  ;;  %v5867_v28 = vpack.c.bf16 %v4119_v49, %v4105_v53  ;;  %v6256_v2 = vrot.slane %v6237_v52, 4 }
 0x3c2   : > { %20734 = vst [vmem:[#allocation20_spill] sm:$0xff] %v15520_v8  ;;  %v6268_v36 = vrot.slane %v6241_v54, 4  ;;  %v6477_v46 = vperm.slane %v6469_v4, %v15308_v11  ;;  %v15556_v41 = vunpack.c.0.s8 %v5979_v38  ;;  %v6467_v44 = vsel %vm5950_vm8, %v6466_v20, %v15136_v62  ;;  %v20736_v20 = vld [vmem:[#allocation50_spill] sm:$0xff]  ;;  %12458 = vmatmul.msk.bf16.vlgmr.msrb.gmra.mxu0 %vm3698_vm7, %v15065_v24  ;;  %12459 = vmatmul.msk.bf16.vlgmr.msrb.gmra.mxu1 %vm3698_vm7, %v15065_v24 }
 0x3c3   : > { %4852 = vst [vmem:[#allocation1 + $0x7] ss:$9 sm:$0xff] %v4661_v5  ;;  %v15540_v5 = vsel %vm5950_vm8, %v6646_v61, %v15448_v59  ;;  %v4133_v59 = vpop.f32.mrf.mxu2  ;;  %v6242_v51 = vrot.slane %v5867_v28, 4  ;;  %v6245_v8 = vsel %vm5950_vm8, %v5867_v28, %v6244_v23  ;;  %v6473_v30 = vperm.slane %v6467_v44, %v15308_v11  ;;  %5100 = vmatpush.bf16.msra.mxu0 %v20736_v20 }
 0x3c4   : > { %v5868_v61 = vpack.c.bf16 %v4147_v33, %v4133_v59  ;;  %20735 = vst [vmem:[#allocation60_spill] sm:$0xff] %v15556_v41  ;;  %v6490_v0 = vrot.slane %v6477_v46, 4  ;;  %v15563_v49 = vsel %vm5950_vm8, %v6477_v46, %v6492_v15  ;;  %v6253_v53 = vperm.slane %v6245_v8, %v15308_v11  ;;  %12460 = vmatmul.msk.bf16.vlgmr.msrb.gmra.mxu2 %vm3698_vm7, %v15065_v24 }
 0x3c5   : > { %v6685_v55 = vperm.slane %v15348_v29, %v15308_v11  ;;  %v6689_v18 = vperm.slane %v15333_v26, %v15308_v11  ;;  %v6243_v62 = vsel %vm5950_vm8, %v6242_v51, %v15146_v39  ;;  %v6478_v23 = vrot.slane %v6473_v30, 4  ;;  %12461 = vmatmul.msk.bf16.vlgmr.msrb.gmra.mxu3 %vm3698_vm7, %v15065_v24  ;;  %5170 = vmatpush.bf16.msrb.mxu1 %v15087_v32 }
 0x3c6   : > { %v6693_v38 = vsel %vm5950_vm8, %v5868_v61, %v6692_v50  ;;  %v15574_v59 = vsel %vm5950_vm8, %v6473_v30, %v6480_v42  ;;  %v15578_v15 = vsel %vm5950_vm8, %v6490_v0, %v15486_v35  ;;  %v6249_v8 = vperm.slane %v6243_v62, %v15308_v11  ;;  %5198 = vmatpush.bf16.msrb.mxu3 %v15091_v31 }
 0x3c7   : > { %v5993_v29 = vperm.slane %v15394_v1, %v15556_v41  ;;  %v5997_v26 = vperm.slane %v15371_v16, %v15556_v41  ;;  %v6266_v33 = vrot.slane %v6253_v53, 4  ;;  %v6690_v39 = vrot.slane %v5868_v61, 4  ;;  %v4201_v16 = vpop.f32.mrf.mxu3  ;;  %5156 = vmatpush.bf16.msrb.mxu0 %v15085_v10 }
 0x3c8   : > { %v15590_v51 = vsel %vm5950_vm8, %v6478_v23, %v6461_v14  ;;  %v6254_v0 = vrot.slane %v6249_v8, 4  ;;  %v15593_v35 = vsel %vm5950_vm8, %v6249_v8, %v6256_v2  ;;  %v15596_v1 = vsel %vm5950_vm8, %v6253_v53, %v6268_v36  ;;  %v4161_v2 = vpop.f32.mrf.mxu0  ;;  %v4175_v36 = vpop.f32.mrf.mxu1 }
 0x3c9   : > { %v6716_v50 = vrot.slane %v6689_v18, 4  ;;  %v6704_v42 = vrot.slane %v6685_v55, 4  ;;  %v5985_v14 = vperm.slane %v15391_v48, %v15556_v41  ;;  %v15610_v28 = vsel %vm5950_vm8, %v6266_v33, %v6241_v54  ;;  %v20737_v48 = vld [vmem:[#allocation46_spill] sm:$0xff] }
 0x3ca   : > { %v15607_v4 = vsel %vm5950_vm8, %v6254_v0, %v6237_v52  ;;  %v5981_v46 = vperm.slane %v15405_v13, %v15556_v41  ;;  %v6002_v61 = vrot.slane %v5997_v26, 4  ;;  %v6445_v44 = vperm.slane %v15421_v21, %v15556_v41  ;;  %5128 = vmatpush.bf16.msra.mxu2 %v20737_v48 }
 0x3cb   : > { %v4187_v30 = vpop.f32.mrf.mxu2  ;;  %v6691_v43 = vsel %vm5950_vm8, %v6690_v39, %v15162_v6  ;;  %v5998_v52 = vrot.slane %v5993_v29, 4  ;;  %v6701_v53 = vperm.slane %v6693_v38, %v15308_v11  ;;  %v15622_v62 = vpack.c.bf16 %v4173_v17, %v4159_v45 }
 0x3cc   : > { %v6697_v54 = vperm.slane %v6691_v43, %v15308_v11  ;;  %v6433_v13 = vperm.slane %v15418_v22, %v15556_v41  ;;  %v6441_v21 = vperm.slane %v15433_v27, %v15556_v41  ;;  %v15628_v23 = vpack.c.bf16 %v4201_v16, %v4187_v30 }
 0x3cd   : > { %v15630_v8 = vpack.c.bf16 %v4175_v36, %v4161_v2  ;;  %v6714_v33 = vrot.slane %v6701_v53, 4  ;;  %v15636_v39 = vsel %vm5950_vm8, %v6701_v53, %v6716_v50  ;;  %v6004_v45 = vrot.slane %v5985_v14, 4 }
 0x3ce   : > { %v6702_v12 = vrot.slane %v6697_v54, 4  ;;  %v15633_v6 = vsel %vm5950_vm8, %v6697_v54, %v6704_v42  ;;  %v6450_v17 = vrot.slane %v6445_v44, 4  ;;  %v6217_v22 = vperm.slane %v15468_v40, %v15556_v41  ;;  %5184 = vmatpush.bf16.msrb.mxu2 %v15089_v9 }
 0x3cf   : > { %v15644_v27 = vsel %vm5950_vm8, %v6714_v33, %v6689_v18  ;;  %v4203_v30 = vpop.f32.mrf.mxu3  ;;  %v15647_v16 = vsel %vm5950_vm8, %v5998_v52, %v5981_v46  ;;  %v6429_v50 = vperm.slane %v15430_v57, %v15556_v41  ;;  %v6452_v42 = vrot.slane %v6433_v13, 4 }
 0x3d0   : > { %v15641_v38 = vsel %vm5950_vm8, %v6702_v12, %v6685_v55  ;;  %v6446_v20 = vrot.slane %v6441_v21, 4  ;;  %v4215_v36 = vpop.f32.mrf.mxu0  ;;  %v4229_v40 = vpop.f32.mrf.mxu1  ;;  %v6000_v48 = vrot.slane %v5981_v46, 4  ;;  %v15654_v55 = vsel %vm5950_vm8, %v6002_v61, %v5985_v14 }
 0x3d1   : > { %v15657_v18 = vsel %vm5950_vm8, %v5997_v26, %v6004_v45  ;;  %v6205_v43 = vperm.slane %v15479_v58, %v15556_v41  ;;  %v6222_v52 = vrot.slane %v6217_v22, 4  ;;  %v15665_v57 = vsel %vm5950_vm8, %v6450_v17, %v6433_v13 }
 0x3d2   : > { %v15662_v54 = vsel %vm5950_vm8, %v5993_v29, %v6000_v48  ;;  %v15669_v53 = vperm.slane %v15437_v7, %v15556_v41  ;;  %v15673_v14 = vperm.slane %v15529_v19, %v15556_v41  ;;  %v6053_v26 = vperm.slane %v15523_v37, %v15556_v41 }
 0x3d3   : > { %v4189_v0 = vpop.f32.mrf.mxu2  ;;  %v15678_v58 = vsel %vm5950_vm8, %v6446_v20, %v6429_v50  ;;  %v6448_v46 = vrot.slane %v6429_v50, 4  ;;  %v15681_v29 = vsel %vm5950_vm8, %v6445_v44, %v6452_v42  ;;  %v6041_v61 = vperm.slane %v15532_v63, %v15556_v41 }
 0x3d4   : > { %v15651_v2 = vpack.c.bf16 %v4203_v30, %v4189_v0  ;;  %v6049_v7 = vperm.slane %v15549_v60, %v15556_v41  ;;  %v15695_v44 = vsel %vm5950_vm8, %v6222_v52, %v6205_v43  ;;  %v6224_v12 = vrot.slane %v6205_v43, 4 }
 0x3d5   : > { %v15692_v13 = vsel %vm5950_vm8, %v6441_v21, %v6448_v46  ;;  %v15699_v63 = vperm.slane %v15465_v25, %v15556_v41  ;;  %v6226_v33 = vrot.slane %v15669_v53, 4  ;;  %v15706_v60 = vpack.c.bf16 %v4229_v40, %v4215_v36 }
 0x3d6   : > { %v15712_v45 = vperm.slane %v15540_v5, %v15556_v41  ;;  %v6670_v17 = vrot.slane %v15673_v14, 4  ;;  %v6058_v25 = vrot.slane %v6053_v26, 4  ;;  %v15718_v50 = vsel %vm5950_vm8, %v6217_v22, %v6224_v12 }
 0x3d7   : > { %v4257_v19 = vpop.f32.mrf.mxu3  ;;  %v15724_v24 = vperm.slane %v15563_v49, %v15556_v41  ;;  %v6037_v10 = vperm.slane %v15545_v56, %v15556_v41  ;;  %v6054_v32 = vrot.slane %v6049_v7, 4  ;;  %v6060_v42 = vrot.slane %v6041_v61, 4 }
 0x3d8   : > { %v4217_v0 = vpop.f32.mrf.mxu0  ;;  %v4231_v30 = vpop.f32.mrf.mxu1  ;;  %v15732_v20 = vperm.slane %v15574_v59, %v15556_v41  ;;  %v6497_v9 = vperm.slane %v15578_v15, %v15556_v41  ;;  %v6059_v31 = vsel %vm5950_vm8, %v6058_v25, %v6041_v61  ;;  %v15739_v49 = vsel %vm5950_vm8, %v6670_v17, %v15712_v45 }
 0x3d9   : > { %v15726_v5 = vpack.c.bf16 %v4231_v30, %v4217_v0  ;;  %v15743_v22 = vsel %vm5950_vm8, %v6226_v33, %v15699_v63  ;;  %v6485_v56 = vperm.slane %v15590_v51, %v15556_v41  ;;  %v6506_v36 = vrot.slane %v15724_v24, 4 }
 0x3da   : > { %v15749_v59 = vpack.i.b16 %v6059_v31, %v15654_v55  ;;  %v7758_v40 = vshrl.u32 %v6059_v31, 16  ;;  %v6055_v43 = vsel %vm5950_vm8, %v6054_v32, %v6037_v10  ;;  %v6056_v52 = vrot.slane %v6037_v10, 4 }
 0x3db   : > { %v4243_v37 = vpop.f32.mrf.mxu2  ;;  %v7757_v46 = vshrl.u32 %v15654_v55, 16  ;;  %v15754_v61 = vsel %vm5950_vm8, %v6053_v26, %v6060_v42  ;;  %v15759_v51 = vpack.i.b16 %v6055_v43, %v15647_v16  ;;  %v7746_v12 = vshrl.u32 %v6055_v43, 16 }
 0x3dc   : > { %v15708_v21 = vpack.c.bf16 %v4257_v19, %v4243_v37  ;;  %v7745_v19 = vshrl.u32 %v15647_v16, 16  ;;  %v6502_v33 = vrot.slane %v6497_v9, 4  ;;  %v6057_v17 = vsel %vm5950_vm8, %v6049_v7, %v6056_v52 }
 0x3dd   : > { %v15763_v25 = vpack.i.b16 %v7758_v40, %v7757_v46  ;;  %v15767_v0 = vpack.i.b16 %v15754_v61, %v15657_v18  ;;  %v15772_v26 = vpack.i.b16 %v6057_v17, %v15662_v54  ;;  %v7752_v30 = vshrl.u32 %v6057_v17, 16  ;;  %v15796_v46 = vld [vmem:[%s13173_s21] sm:$0xff] }
 0x3de   : > { %v15769_v55 = vpack.i.b16 %v7746_v12, %v7745_v19  ;;  %v6507_v16 = vsel %vm5950_vm8, %v6506_v36, %v15732_v20  ;;  %v7751_v10 = vshrl.u32 %v15662_v54, 16  ;;  %v15782_v32 = vperm.slane %v15610_v28, %v15556_v41  ;;  %12462 = vmatmul.msk.bf16.vlgmr.msra.gmra.mxu0 %vm3698_vm7, %v15796_v46  ;;  %12463 = vmatmul.msk.bf16.vlgmr.msra.gmra.mxu1 %vm3698_vm7, %v15796_v46 }
 0x3df   : > { %v4259_v48 = vpop.f32.mrf.mxu3  ;;  %20738 = vst [vmem:[#allocation55_spill] sm:$0xff] %v15767_v0  ;;  %v15778_v7 = vpack.i.b16 %v6507_v16, %v15665_v57  ;;  %v6503_v40 = vsel %vm5950_vm8, %v6502_v33, %v6485_v56  ;;  %v7841_v43 = vshrl.u32 %v15678_v58, 16  ;;  %v15793_v54 = vperm.slane %v15644_v27, %v15556_v41  ;;  %12464 = vmatmul.msk.bf16.vlgmr.msra.gmra.mxu2 %vm3698_vm7, %v15796_v46 }
 0x3e0   : > { %v4271_v42 = vpop.f32.mrf.mxu0  ;;  %v4285_v31 = vpop.f32.mrf.mxu1  ;;  %v7842_v36 = vshrl.u32 %v6503_v40, 16  ;;  %v15789_v52 = vpack.i.b16 %v7752_v30, %v7751_v10  ;;  %v6508_v19 = vrot.slane %v15732_v20, 4  ;;  %12465 = vmatmul.msk.bf16.vlgmr.msra.gmra.mxu3 %vm3698_vm7, %v15796_v46  ;;  %5212 = vmatpush.bf16.msra.mxu0 %v15093_v34  ;;  %v6261_v20 = vperm.slane %v15607_v4, %v15556_v41  ;;  %v20741_v30 = vld [vmem:[#allocation45_spill] sm:$0xff] }
 0x3e1   : > { %20739 = vst [vmem:[#allocation22_spill] sm:$0xff] %v15778_v7  ;;  %5226 = vmatpush.bf16.msra.mxu1 %v15095_v3  ;;  %v6278_v17 = vrot.slane %v15782_v32, 4  ;;  %5240 = vmatpush.bf16.msra.mxu2 %v15097_v47  ;;  %v6709_v3 = vperm.slane %v15641_v38, %v15556_v41  ;;  %v7764_v38 = vshrl.u32 %v15754_v61, 16 }
 0x3e2   : > { %v15809_v27 = vpack.i.b16 %v7842_v36, %v7841_v43  ;;  %5254 = vmatpush.bf16.msra.mxu3 %v20741_v30  ;;  %v6509_v4 = vsel %vm5950_vm8, %v15724_v24, %v6508_v19 }
 0x3e3   : > { %v4245_v15 = vpop.f32.mrf.mxu2  ;;  %v15836_v36 = vpack.i.b16 %v6509_v4, %v15681_v29 }
 0x3e4   : > { %v15756_v37 = vpack.c.bf16 %v4259_v48, %v4245_v15  ;;  %v6504_v15 = vrot.slane %v6485_v56, 4  ;;  %v15786_v48 = vpack.i.b16 %v6503_v40, %v15678_v58  ;;  %v7853_v56 = vshrl.u32 %v15665_v57, 16 }
 0x3e5   : > { %v7854_v58 = vshrl.u32 %v6507_v16, 16  ;;  %v7847_v57 = vshrl.u32 %v15692_v13, 16  ;;  %v15824_v16 = vpack.c.bf16 %v4285_v31, %v4271_v42  ;;  %20742 = vst [vmem:[#allocation23_spill] sm:$0xff] %v15836_v36  ;;  %v7763_v42 = vshrl.u32 %v15657_v18, 16 }
 0x3e6   : > { %v6505_v28 = vsel %vm5950_vm8, %v6497_v9, %v6504_v15  ;;  %v7859_v31 = vshrl.u32 %v15681_v29, 16  ;;  %v15854_v18 = vperm.slane %v15596_v1, %v15556_v41 }
 0x3e7   : > { %v15812_v12 = vpack.i.b16 %v6505_v28, %v15692_v13  ;;  %v7848_v9 = vshrl.u32 %v6505_v28, 16  ;;  %v15817_v33 = vpack.i.b16 %v7854_v58, %v7853_v56  ;;  %v4313_v34 = vpop.f32.mrf.mxu3  ;;  %v6726_v13 = vrot.slane %v15793_v54, 4 }
 0x3e8   : > { %v4273_v43 = vpop.f32.mrf.mxu0  ;;  %v4287_v47 = vpop.f32.mrf.mxu1  ;;  %v7860_v56 = vshrl.u32 %v6509_v4, 16  ;;  %v6279_v58 = vsel %vm5950_vm8, %v6278_v17, %v6261_v20  ;;  %v15856_v29 = vpack.i.b16 %v7764_v38, %v7763_v42  ;;  %v7769_v17 = vshrl.u32 %v15695_v44, 16  ;;  %v20748_v4 = vld [vmem:[#allocation20_spill] sm:$0xff] }
 0x3e9   : > { %20740 = vst [vmem:[#allocation29_spill] sm:$0xff] %v15817_v33  ;;  %v15831_v15 = vpack.i.b16 %v7848_v9, %v7847_v57  ;;  %v15840_v28 = vpack.c.bf16 %v4287_v47, %v4273_v43  ;;  %v20743_v57 = vld [vmem:[#allocation24_spill] sm:$0xff]  ;;  %v15849_v24 = vpack.i.b16 %v6279_v58, %v15695_v44  ;;  %v6727_v19 = vsel %vm5950_vm8, %v6726_v13, %v6709_v3 }
 0x3ea   : > { %v15846_v9 = vperm.slane %v20743_v57, %v15556_v41  ;;  %20745 = vst [vmem:[#allocation68_spill] sm:$0xff] %v15856_v29  ;;  %v15858_v30 = vpack.i.b16 %v7860_v56, %v7859_v31  ;;  %v15861_v61 = vpack.i.b16 %v6727_v19, %v15739_v49  ;;  %v6657_v43 = vperm.slane %v20748_v4, %v15556_v41 }
 0x3eb   : > { %v4299_v10 = vpop.f32.mrf.mxu2  ;;  %20744 = vst [vmem:[#allocation69_spill] sm:$0xff] %v15849_v24  ;;  %v7865_v57 = vshrl.u32 %v15739_v49, 16  ;;  %v6265_v42 = vperm.slane %v15593_v35, %v15556_v41  ;;  %v6282_v44 = vrot.slane %v15854_v18, 4  ;;  %v6725_v4 = vperm.slane %v15636_v39, %v15556_v41 }
 0x3ec   : > { %v15829_v40 = vpack.c.bf16 %v4313_v34, %v4299_v10  ;;  %20746 = vst [vmem:[#allocation72_spill] sm:$0xff] %v15858_v30  ;;  %v7770_v10 = vshrl.u32 %v6279_v58, 16  ;;  %v7866_v34 = vshrl.u32 %v6727_v19, 16  ;;  %v6674_v1 = vrot.slane %v15846_v9, 4 }
 0x3ed   : > { %20747 = vst [vmem:[#allocation71_spill] sm:$0xff] %v15861_v61  ;;  %v6280_v58 = vrot.slane %v6261_v20, 4  ;;  %v6672_v19 = vrot.slane %v15712_v45, 4  ;;  %v6728_v49 = vrot.slane %v6709_v3, 4 }
 0x3ee   : > { %v15872_v38 = vpack.i.b16 %v7770_v10, %v7769_v17  ;;  %v15875_v56 = vpack.i.b16 %v7866_v34, %v7865_v57  ;;  %v7775_v10 = vshrl.u32 %v15718_v50, 16  ;;  %12466 = vmatmul.msk.bf16.vlgmr.msrb.gmra.mxu0 %vm3698_vm7, %v15796_v46  ;;  %12467 = vmatmul.msk.bf16.vlgmr.msrb.gmra.mxu1 %vm3698_vm7, %v15796_v46  ;;  %v6283_v34 = vsel %vm5950_vm8, %v6282_v44, %v6265_v42  ;;  %v20754_v57 = vld [vmem:[#allocation27_spill] sm:$0xff]  ;;  %v20758_v44 = vld [vmem:[#allocation33_spill] sm:$0xff] }
 0x3ef   : > { %v4315_v13 = vpop.f32.mrf.mxu3  ;;  %v6281_v35 = vsel %vm5950_vm8, %v15782_v32, %v6280_v58  ;;  %v6673_v17 = vsel %vm5950_vm8, %v15673_v14, %v6672_v19  ;;  %v6729_v39 = vsel %vm5950_vm8, %v15793_v54, %v6728_v49  ;;  %12468 = vmatmul.msk.bf16.vlgmr.msrb.gmra.mxu2 %vm3698_vm7, %v15796_v46  ;;  %v20753_v54 = vld [vmem:[#allocation19_spill] sm:$0xff]  ;;  %5282 = vmatpush.bf16.msrb.mxu1 %v20754_v57  ;;  %v6228_v49 = vrot.slane %v15699_v63, 4 }
 0x3f0   : > { %20749 = vst [vmem:[#allocation75_spill] sm:$0xff] %v15872_v38  ;;  %v4327_v11 = vpop.f32.mrf.mxu0  ;;  %v4341_v61 = vpop.f32.mrf.mxu1  ;;  %v15890_v45 = vpack.i.b16 %v6281_v35, %v15718_v50  ;;  %v7776_v20 = vshrl.u32 %v6281_v35, 16  ;;  %v7871_v3 = vshrl.u32 %v6673_v17, 16  ;;  %12469 = vmatmul.msk.bf16.vlgmr.msrb.gmra.mxu3 %vm3698_vm7, %v15796_v46  ;;  %v15898_v14 = vpack.i.b16 %v6729_v39, %v6673_v17  ;;  %5268 = vmatpush.bf16.msrb.mxu0 %v20753_v54  ;;  %v20757_v35 = vld [vmem:[#allocation25_spill] sm:$0xff] }
 0x3f1   : > { %20750 = vst [vmem:[#allocation74_spill] sm:$0xff] %v15875_v56  ;;  %v7872_v32 = vshrl.u32 %v6729_v39, 16  ;;  %v6713_v50 = vperm.slane %v15633_v6, %v15556_v41  ;;  %v15909_v19 = vpack.i.b16 %v6283_v34, %v15743_v22  ;;  %5296 = vmatpush.bf16.msrb.mxu2 %v20757_v35  ;;  %5310 = vmatpush.bf16.msrb.mxu3 %v20758_v44  ;;  %v6676_v54 = vrot.slane %v6657_v43, 4 }
 0x3f2   : > { %20751 = vst [vmem:[#allocation41_spill] sm:$0xff] %v15890_v45  ;;  %v15906_v58 = vpack.i.b16 %v7776_v20, %v7775_v10  ;;  %v6284_v41 = vrot.slane %v6265_v42, 4  ;;  %v7782_v63 = vshrl.u32 %v6283_v34, 16  ;;  %v20784_v56 = vrot.slane %v15824_v16, 4 }
 0x3f3   : > { %v4301_v47 = vpop.f32.mrf.mxu2  ;;  %20752 = vst [vmem:[#allocation48_spill] sm:$0xff] %v15898_v14  ;;  %v15916_v39 = vpack.i.b16 %v7872_v32, %v7871_v3  ;;  %v6732_v10 = vrot.slane %v6713_v50, 4  ;;  %v6229_v3 = vsel %vm5950_vm8, %v15669_v53, %v6228_v49 }
 0x3f4   : > { %v15870_v31 = vpack.c.bf16 %v4315_v13, %v4301_v47  ;;  %v6675_v47 = vsel %vm5950_vm8, %v6674_v1, %v6657_v43  ;;  %v6730_v13 = vrot.slane %v6725_v4, 4  ;;  %20755 = vst [vmem:[#allocation77_spill] sm:$0xff] %v15906_v58  ;;  %v15914_v1 = vpack.c.bf16 %v4341_v61, %v4327_v11 }
 0x3f5   : > { %20756 = vst [vmem:[#allocation61_spill] sm:$0xff] %v15909_v19  ;;  %v7781_v19 = vshrl.u32 %v15743_v22, 16  ;;  %v7877_v11 = vshrl.u32 %v6675_v47, 16  ;;  %v6285_v42 = vsel %vm5950_vm8, %v15854_v18, %v6284_v41  ;;  %v6677_v22 = vsel %vm5950_vm8, %v15846_v9, %v6676_v54  ;;  %v20766_v41 = vld [vmem:[#allocation43_spill] sm:$0xff]  ;;  %v20767_v9 = vld [vmem:[#allocation36_spill] sm:$0xff]  ;;  %v20768_v18 = vld [vmem:[#allocation37_spill] sm:$0xff] }
 0x3f6   : > { %20759 = vst [vmem:[#allocation62_spill] sm:$0xff] %v15916_v39  ;;  %v6731_v20 = vsel %vm5950_vm8, %v6730_v13, %v6713_v50  ;;  %v15936_v50 = vpack.i.b16 %v6285_v42, %v6229_v3  ;;  %v7787_v53 = vshrl.u32 %v6229_v3, 16 }
 0x3f7   : > { %v4369_v6 = vpop.f32.mrf.mxu3  ;;  %v15922_v14 = vpack.i.b16 %v6731_v20, %v6675_v47  ;;  %v7878_v61 = vshrl.u32 %v6731_v20, 16  ;;  %v15928_v43 = vpack.i.b16 %v7782_v63, %v7781_v19  ;;  %v6733_v47 = vsel %vm5950_vm8, %v6725_v4, %v6732_v10  ;;  %v20769_v4 = vld [vmem:[#allocation39_spill] sm:$0xff] }
 0x3f8   : > { %v4329_v58 = vpop.f32.mrf.mxu0  ;;  %v4343_v35 = vpop.f32.mrf.mxu1  ;;  %20763 = vst [vmem:[#allocation70_spill] sm:$0xff] %v15936_v50  ;;  %v15943_v49 = vpack.i.b16 %v6733_v47, %v6677_v22  ;;  %v6064_v10 = vrot.slane %v15622_v62, 4 }
 0x3f9   : > { %20760 = vst [vmem:[#allocation26_spill] sm:$0xff] %v15922_v14  ;;  %v15926_v32 = vpack.c.bf16 %v4343_v35, %v4329_v58  ;;  %v15934_v34 = vpack.i.b16 %v7878_v61, %v7877_v11  ;;  %v7788_v58 = vshrl.u32 %v6285_v42, 16  ;;  %v6512_v11 = vrot.slane %v15628_v23, 4  ;;  %v20790_v14 = vld [vmem:[#allocation52_spill] sm:$0xff] }
 0x3fa   : > { %20761 = vst [vmem:[#allocation21_spill] sm:$0xff] %v15928_v43  ;;  %v20791_v43 = vld [vmem:[#allocation54_spill] sm:$0xff] }
 0x3fb   : > { %v4355_v17 = vpop.f32.mrf.mxu2  ;;  %20762 = vst [vmem:[#allocation65_spill] sm:$0xff] %v15934_v34  ;;  %v15941_v19 = vpack.i.b16 %v7788_v58, %v7787_v53 }
 0x3fc   : > { %v15918_v57 = vpack.c.bf16 %v4369_v6, %v4355_v17  ;;  %20765 = vst [vmem:[#allocation76_spill] sm:$0xff] %v15943_v49 }
 0x3fd   : > { %20764 = vst [vmem:[#allocation73_spill] sm:$0xff] %v15941_v19 }
 0x3fe   : > { %12470 = vmatmul.msk.bf16.vlgmr.msra.gmra.mxu0 %vm3698_vm7, %v15796_v46  ;;  %12471 = vmatmul.msk.bf16.vlgmr.msra.gmra.mxu1 %vm3698_vm7, %v15796_v46 }
 0x3ff   : > { %v4371_v44 = vpop.f32.mrf.mxu3  ;;  %12472 = vmatmul.msk.bf16.vlgmr.msra.gmra.mxu2 %vm3698_vm7, %v15796_v46  ;;  %5324 = vmatpush.bf16.msra.mxu0 %v20766_v41  ;;  %v7883_v41 = vshrl.u32 %v6677_v22, 16 }
 0x400   : > { %12473 = vmatmul.msk.bf16.vlgmr.msra.gmra.mxu3 %vm3698_vm7, %v15796_v46  ;;  %5338 = vmatpush.bf16.msra.mxu1 %v20767_v9  ;;  %v4383_v6 = vpop.f32.mrf.mxu0  ;;  %v4397_v54 = vpop.f32.mrf.mxu1  ;;  %v7884_v9 = vshrl.u32 %v6733_v47, 16 }
 0x401   : > { %5352 = vmatpush.bf16.msra.mxu2 %v20768_v18  ;;  %5366 = vmatpush.bf16.msra.mxu3 %v20769_v4  ;;  %v5845_v20 = vpack.c.bf16 %v4397_v54, %v4383_v6  ;;  %v6288_v6 = vrot.slane %v15630_v8, 4 }
 0x403   : > { %v4357_v13 = vpop.f32.mrf.mxu2  ;;  %v6062_v3 = vrot.slane %v5845_v20, 4  ;;  %v15960_v42 = vsel %vm5950_vm8, %v5845_v20, %v6064_v10 }
 0x404   : > { %v15939_v17 = vpack.c.bf16 %v4371_v44, %v4357_v13 }
 0x405   : > { %v15967_v53 = vsel %vm5950_vm8, %v6062_v3, %v15622_v62  ;;  %v6120_v3 = vrot.slane %v15706_v60, 4 }
 0x407   : > { %v4425_v35 = vpop.f32.mrf.mxu3 }
 0x408   : > { %v4385_v18 = vpop.f32.mrf.mxu0  ;;  %v4399_v4 = vpop.f32.mrf.mxu1 }
 0x409   : > { %v5877_v54 = vpack.c.bf16 %v4399_v4, %v4385_v18  ;;  %v20771_v18 = vld [vmem:[#allocation31_spill] sm:$0xff] }
 0x40b   : > { %v4411_v63 = vpop.f32.mrf.mxu2  ;;  %v6286_v62 = vrot.slane %v5877_v54, 4 }
 0x40c   : > { %v5846_v61 = vpack.c.bf16 %v4425_v35, %v4411_v63  ;;  %v15974_v63 = vpack.i.b16 %v7884_v9, %v7883_v41  ;;  %v6736_v35 = vrot.slane %v15651_v2, 4  ;;  %v6568_v41 = vrot.slane %v15708_v21, 4 }
 0x40d   : > { %v15989_v47 = vsel %vm5950_vm8, %v6286_v62, %v15630_v8  ;;  %v6344_v9 = vrot.slane %v15726_v5, 4  ;;  %v20772_v8 = vld [vmem:[#allocation40_spill] sm:$0xff] }
 0x40e   : > { %v6510_v13 = vrot.slane %v5846_v61, 4  ;;  %v15963_v44 = vsel %vm5950_vm8, %v5846_v61, %v6512_v11  ;;  %20770 = vst [vmem:[#allocation63_spill] sm:$0xff] %v15974_v63  ;;  %v15978_v61 = vsel %vm5950_vm8, %v5877_v54, %v6288_v6  ;;  %12474 = vmatmul.msk.bf16.vlgmr.msrb.gmra.mxu0 %vm3698_vm7, %v15796_v46  ;;  %12475 = vmatmul.msk.bf16.vlgmr.msrb.gmra.mxu1 %vm3698_vm7, %v15796_v46  ;;  %v6792_v54 = vrot.slane %v15756_v37, 4 }
 0x40f   : > { %v4427_v20 = vpop.f32.mrf.mxu3  ;;  %12476 = vmatmul.msk.bf16.vlgmr.msrb.gmra.mxu2 %vm3698_vm7, %v15796_v46  ;;  %5380 = vmatpush.bf16.msrb.mxu0 %v20771_v18 }
 0x410   : > { %v15971_v58 = vsel %vm5950_vm8, %v6510_v13, %v15628_v23  ;;  %12477 = vmatmul.msk.bf16.vlgmr.msrb.gmra.mxu3 %vm3698_vm7, %v15796_v46  ;;  %5394 = vmatpush.bf16.msrb.mxu1 %v20772_v8 }
 0x413   : > { %v4413_v10 = vpop.f32.mrf.mxu2 }
 0x414   : > { %v5878_v11 = vpack.c.bf16 %v4427_v20, %v4413_v10  ;;  %v20773_v10 = vld [vmem:[#allocation38_spill] sm:$0xff]  ;;  %v20774_v20 = vld [vmem:[#allocation47_spill] sm:$0xff] }
 0x415   : > { %5408 = vmatpush.bf16.msrb.mxu2 %v20773_v10  ;;  %5422 = vmatpush.bf16.msrb.mxu3 %v20774_v20 }
 0x416   : > { %v6734_v23 = vrot.slane %v5878_v11, 4  ;;  %v15981_v22 = vsel %vm5950_vm8, %v5878_v11, %v6736_v35  ;;  %v4453_v35 = vpop.f32.mrf.mxu1 }
 0x417   : > { %v4481_v63 = vpop.f32.mrf.mxu3 }
 0x418   : > { %v15998_v13 = vsel %vm5950_vm8, %v6734_v23, %v15651_v2  ;;  %v4439_v2 = vpop.f32.mrf.mxu0 }
 0x419   : > { %v5847_v18 = vpack.c.bf16 %v4453_v35, %v4439_v2 }
 0x41b   : > { %v4467_v8 = vpop.f32.mrf.mxu2  ;;  %v6118_v50 = vrot.slane %v5847_v18, 4  ;;  %v16019_v62 = vsel %vm5950_vm8, %v5847_v18, %v6120_v3 }
 0x41c   : > { %v5848_v10 = vpack.c.bf16 %v4481_v63, %v4467_v8 }
 0x41d   : > { %v16030_v19 = vsel %vm5950_vm8, %v6118_v50, %v15706_v60 }
 0x41e   : > { %v6566_v23 = vrot.slane %v5848_v10, 4  ;;  %v16024_v6 = vsel %vm5950_vm8, %v5848_v10, %v6568_v41  ;;  %v4455_v63 = vpop.f32.mrf.mxu1  ;;  %12478 = vmatmul.msk.bf16.vlgmr.msra.gmra.mxu0 %vm3698_vm7, %v15796_v46  ;;  %12479 = vmatmul.msk.bf16.vlgmr.msra.gmra.mxu1 %vm3698_vm7, %v15796_v46 }
 0x41f   : > { %v4483_v20 = vpop.f32.mrf.mxu3  ;;  %12480 = vmatmul.msk.bf16.vlgmr.msra.gmra.mxu2 %vm3698_vm7, %v15796_v46 }
 0x420   : > { %v16037_v35 = vsel %vm5950_vm8, %v6566_v23, %v15708_v21  ;;  %v4441_v11 = vpop.f32.mrf.mxu0  ;;  %12481 = vmatmul.msk.bf16.vlgmr.msra.gmra.mxu3 %vm3698_vm7, %v15796_v46 }
 0x421   : > { %v5879_v41 = vpack.c.bf16 %v4455_v63, %v4441_v11 }
 0x423   : > { %v4469_v49 = vpop.f32.mrf.mxu2  ;;  %v6342_v8 = vrot.slane %v5879_v41, 4  ;;  %v16057_v23 = vsel %vm5950_vm8, %v5879_v41, %v6344_v9  ;;  %v20777_v41 = vld [vmem:[#allocation53_spill] sm:$0xff] }
 0x424   : > { %v5880_v3 = vpack.c.bf16 %v4483_v20, %v4469_v49  ;;  %5450 = vmatpush.bf16.msra.mxu1 %v20777_v41  ;;  %v20781_v20 = vld [vmem:[#allocation59_spill] sm:$0xff] }
 0x425   : > { %v16073_v9 = vsel %vm5950_vm8, %v6342_v8, %v15726_v5  ;;  %v20776_v8 = vld [vmem:[#allocation58_spill] sm:$0xff]  ;;  %5478 = vmatpush.bf16.msra.mxu3 %v20781_v20 }
 0x426   : > { %v6790_v63 = vrot.slane %v5880_v3, 4  ;;  %v16062_v60 = vsel %vm5950_vm8, %v5880_v3, %v6792_v54  ;;  %5436 = vmatpush.bf16.msra.mxu0 %v20776_v8  ;;  %v20778_v54 = vld [vmem:[#allocation57_spill] sm:$0xff]  ;;  %v4509_v8 = vpop.f32.mrf.mxu1 }
 0x427   : > { %v6073_v21 = vperm.slane %v15960_v42, %v20778_v54  ;;  %v6521_v5 = vperm.slane %v15963_v44, %v20778_v54  ;;  %v4537_v10 = vpop.f32.mrf.mxu3 }
 0x428   : > { %v16083_v3 = vsel %vm5950_vm8, %v6790_v63, %v15756_v37  ;;  %v20780_v63 = vld [vmem:[#allocation42_spill] sm:$0xff]  ;;  %v4495_v49 = vpop.f32.mrf.mxu0  ;;  %v6069_v37 = vperm.slane %v15967_v53, %v20778_v54 }
 0x429   : > { %5464 = vmatpush.bf16.msra.mxu2 %v20780_v63  ;;  %v6517_v63 = vperm.slane %v15971_v58, %v20778_v54  ;;  %v5849_v20 = vpack.c.bf16 %v4509_v8, %v4495_v49  ;;  %v6100_v18 = vrot.slane %v6073_v21, 4  ;;  %v6548_v50 = vrot.slane %v6521_v5, 4 }
 0x42a   : > { %v6088_v8 = vrot.slane %v6069_v37, 4 }
 0x42b   : > { %v4523_v4 = vpop.f32.mrf.mxu2  ;;  %v6074_v11 = vrot.slane %v5849_v20, 4  ;;  %v6077_v53 = vsel %vm5950_vm8, %v5849_v20, %v20784_v56  ;;  %v6536_v41 = vrot.slane %v6517_v63, 4 }
 0x42c   : > { %v5850_v44 = vpack.c.bf16 %v4537_v10, %v4523_v4  ;;  %v6085_v58 = vperm.slane %v6077_v53, %v20778_v54  ;;  %v20785_v4 = vrot.slane %v15829_v40, 4  ;;  %v16129_v53 = vperm.slane %v15978_v61, %v20778_v54 }
 0x42d   : > { %v6075_v2 = vsel %vm5950_vm8, %v6074_v11, %v15824_v16 }
 0x42e   : > { %v6522_v49 = vrot.slane %v5850_v44, 4  ;;  %v6525_v10 = vsel %vm5950_vm8, %v5850_v44, %v20785_v4  ;;  %v6081_v34 = vperm.slane %v6075_v2, %v20778_v54  ;;  %v6098_v42 = vrot.slane %v6085_v58, 4  ;;  %v4511_v61 = vpop.f32.mrf.mxu1  ;;  %12482 = vmatmul.msk.bf16.vlgmr.msrb.gmra.mxu0 %vm3698_vm7, %v15796_v46  ;;  %12483 = vmatmul.msk.bf16.vlgmr.msrb.gmra.mxu1 %vm3698_vm7, %v15796_v46 }
 0x42f   : > { %v6533_v45 = vperm.slane %v6525_v10, %v20778_v54  ;;  %v16123_v56 = vsel %vm5950_vm8, %v6085_v58, %v6100_v18  ;;  %v16137_v2 = vperm.slane %v15981_v22, %v20778_v54  ;;  %v4539_v10 = vpop.f32.mrf.mxu3  ;;  %12484 = vmatmul.msk.bf16.vlgmr.msrb.gmra.mxu2 %vm3698_vm7, %v15796_v46 }
 0x430   : > { %v6523_v20 = vsel %vm5950_vm8, %v6522_v49, %v15829_v40  ;;  %v6086_v11 = vrot.slane %v6081_v34, 4  ;;  %v16140_v18 = vsel %vm5950_vm8, %v6081_v34, %v6088_v8  ;;  %v16143_v40 = vsel %vm5950_vm8, %v6098_v42, %v6073_v21  ;;  %v4497_v58 = vpop.f32.mrf.mxu0  ;;  %12485 = vmatmul.msk.bf16.vlgmr.msrb.gmra.mxu3 %vm3698_vm7, %v15796_v46  ;;  %5520 = vmatpush.bf16.msrb.mxu2 %v20790_v14 }
 0x431   : > { %v6529_v44 = vperm.slane %v6523_v20, %v20778_v54  ;;  %v6546_v4 = vrot.slane %v6533_v45, 4  ;;  %v16133_v16 = vsel %vm5950_vm8, %v6533_v45, %v6548_v50  ;;  %v16147_v49 = vperm.slane %v15989_v47, %v20778_v54  ;;  %5534 = vmatpush.bf16.msrb.mxu3 %v20791_v43 }
 0x432   : > { %v16151_v45 = vperm.slane %v15998_v13, %v20778_v54  ;;  %v16155_v34 = vsel %vm5950_vm8, %v6086_v11, %v6069_v37  ;;  %v6324_v37 = vrot.slane %v16129_v53, 4  ;;  %v6772_v11 = vrot.slane %v16137_v2, 4 }
 0x433   : > { %v6534_v50 = vrot.slane %v6529_v44, 4  ;;  %v4525_v22 = vpop.f32.mrf.mxu2  ;;  %v16158_v21 = vsel %vm5950_vm8, %v6529_v44, %v6536_v41  ;;  %v16161_v42 = vsel %vm5950_vm8, %v6546_v4, %v6521_v5  ;;  %v16174_v41 = vperm.slane %v16019_v62, %v20778_v54 }
 0x434   : > { %v5881_v5 = vpack.c.bf16 %v4511_v61, %v4497_v58  ;;  %v6312_v44 = vrot.slane %v16147_v49, 4  ;;  %v6760_v4 = vrot.slane %v16151_v45, 4  ;;  %v16192_v62 = vperm.slane %v16030_v19, %v20778_v54 }
 0x435   : > { %v16167_v39 = vsel %vm5950_vm8, %v6534_v50, %v6517_v63  ;;  %v16184_v63 = vperm.slane %v16024_v6, %v20778_v54  ;;  %v5882_v50 = vpack.c.bf16 %v4539_v10, %v4525_v22  ;;  %v16196_v58 = vperm.slane %v16037_v35, %v20778_v54  ;;  %v20787_v22 = vld [vmem:[#allocation51_spill] sm:$0xff]  ;;  %v20788_v10 = vld [vmem:[#allocation44_spill] sm:$0xff] }
 0x436   : > { %v6298_v61 = vrot.slane %v5881_v5, 4  ;;  %v20786_v20 = vrot.slane %v15840_v28, 4  ;;  %5492 = vmatpush.bf16.msrb.mxu0 %v20787_v22  ;;  %5506 = vmatpush.bf16.msrb.mxu1 %v20788_v10  ;;  %v16205_v47 = vperm.slane %v16057_v23, %v20778_v54  ;;  %v20789_v8 = vrot.slane %v15870_v31, 4  ;;  %v4565_v10 = vpop.f32.mrf.mxu1 }
 0x437   : > { %v6746_v13 = vrot.slane %v5882_v50, 4  ;;  %v4593_v24 = vpop.f32.mrf.mxu3 }
 0x438   : > { %v6301_v6 = vsel %vm5950_vm8, %v5881_v5, %v20786_v20  ;;  %v6749_v35 = vsel %vm5950_vm8, %v5882_v50, %v20789_v8  ;;  %v6156_v20 = vrot.slane %v16174_v41, 4  ;;  %v16216_v5 = vperm.slane %v16062_v60, %v20778_v54  ;;  %v4551_v22 = vpop.f32.mrf.mxu0 }
 0x439   : > { %v6309_v19 = vperm.slane %v6301_v6, %v20778_v54  ;;  %v6299_v23 = vsel %vm5950_vm8, %v6298_v61, %v15840_v28  ;;  %v6757_v6 = vperm.slane %v6749_v35, %v20778_v54  ;;  %v6747_v43 = vsel %vm5950_vm8, %v6746_v13, %v15870_v31 }
 0x43a   : > { %v6305_v38 = vperm.slane %v6299_v23, %v20778_v54  ;;  %v16227_v60 = vperm.slane %v16073_v9, %v20778_v54  ;;  %v6753_v28 = vperm.slane %v6747_v43, %v20778_v54  ;;  %v16233_v23 = vperm.slane %v16083_v3, %v20778_v54  ;;  %v20792_v9 = vld [vmem:[#allocation60_spill] sm:$0xff] }
 0x43b   : > { %v6322_v8 = vrot.slane %v6309_v19, 4  ;;  %v6325_v14 = vsel %vm5950_vm8, %v6309_v19, %v6324_v37  ;;  %v4579_v50 = vpop.f32.mrf.mxu2  ;;  %v6770_v61 = vrot.slane %v6757_v6, 4  ;;  %v6773_v35 = vsel %vm5950_vm8, %v6757_v6, %v6772_v11 }
 0x43c   : > { %v6310_v30 = vrot.slane %v6305_v38, 4  ;;  %v16236_v37 = vsel %vm5950_vm8, %v6305_v38, %v6312_v44  ;;  %v6604_v13 = vrot.slane %v16184_v63, 4  ;;  %v16243_v19 = vperm.slane %v16123_v56, %v20792_v9 }
 0x43d   : > { %v6323_v31 = vsel %vm5950_vm8, %v6322_v8, %v16129_v53  ;;  %v16247_v11 = vperm.slane %v16133_v16, %v20792_v9  ;;  %v6758_v6 = vrot.slane %v6753_v28, 4  ;;  %v6144_v3 = vrot.slane %v16192_v62, 4 }
 0x43e   : > { %v16252_v38 = vsel %vm5950_vm8, %v6310_v30, %v16147_v49  ;;  %v16255_v44 = vsel %vm5950_vm8, %v6753_v28, %v6760_v4  ;;  %v16259_v53 = vsel %vm5950_vm8, %v6770_v61, %v16137_v2  ;;  %v6592_v56 = vrot.slane %v16196_v58, 4  ;;  %12486 = vmatmul.msk.bf16.vlgmr.msra.gmra.mxu0 %vm3698_vm7, %v15796_v46  ;;  %12487 = vmatmul.msk.bf16.vlgmr.msra.gmra.mxu1 %vm3698_vm7, %v15796_v46 }
 0x43f   : > { %v16266_v43 = vsel %vm5950_vm8, %v6758_v6, %v16151_v45  ;;  %v16272_v4 = vperm.slane %v16140_v18, %v20792_v9  ;;  %v5851_v2 = vpack.c.bf16 %v4565_v10, %v4551_v22  ;;  %v16276_v28 = vperm.slane %v16143_v40, %v20792_v9  ;;  %v4567_v6 = vpop.f32.mrf.mxu1  ;;  %v4595_v61 = vpop.f32.mrf.mxu3  ;;  %12488 = vmatmul.msk.bf16.vlgmr.msra.gmra.mxu2 %vm3698_vm7, %v15796_v46 }
 0x440   : > { %v5852_v8 = vpack.c.bf16 %v4593_v24, %v4579_v50  ;;  %v4553_v45 = vpop.f32.mrf.mxu0  ;;  %v16282_v30 = vperm.slane %v16155_v34, %v20792_v9  ;;  %v16286_v18 = vperm.slane %v16158_v21, %v20792_v9  ;;  %v20793_v10 = vrot.slane %v15914_v1, 4  ;;  %12489 = vmatmul.msk.bf16.vlgmr.msra.gmra.mxu3 %vm3698_vm7, %v15796_v46 }
 0x441   : > { %v6130_v22 = vrot.slane %v5851_v2, 4  ;;  %v20794_v50 = vrot.slane %v15918_v57, 4  ;;  %v5883_v34 = vpack.c.bf16 %v4567_v6, %v4553_v45  ;;  %v16297_v29 = vperm.slane %v16161_v42, %v20792_v9  ;;  %v20798_v45 = vld [vmem:[#allocation66_spill] sm:$0xff] }
 0x442   : > { %v6133_v40 = vsel %vm5950_vm8, %v5851_v2, %v20793_v10  ;;  %v6578_v24 = vrot.slane %v5852_v8, 4  ;;  %v16311_v42 = vperm.slane %v6325_v14, %v20792_v9  ;;  %5576 = vmatpush.bf16.msra.mxu2 %v20798_v45  ;;  %v20801_v45 = vrot.slane %v15939_v17, 4 }
 0x443   : > { %v4581_v49 = vpop.f32.mrf.mxu2  ;;  %v6141_v16 = vperm.slane %v6133_v40, %v20778_v54  ;;  %v6581_v36 = vsel %vm5950_vm8, %v5852_v8, %v20794_v50  ;;  %v6131_v21 = vsel %vm5950_vm8, %v6130_v22, %v15914_v1 }
 0x444   : > { %v6589_v33 = vperm.slane %v6581_v36, %v20778_v54  ;;  %v5884_v2 = vpack.c.bf16 %v4595_v61, %v4581_v49  ;;  %v6137_v10 = vperm.slane %v6131_v21, %v20778_v54  ;;  %v6579_v7 = vsel %vm5950_vm8, %v6578_v24, %v15918_v57  ;;  %v20796_v49 = vld [vmem:[#allocation49_spill] sm:$0xff] }
 0x445   : > { %v6154_v0 = vrot.slane %v6141_v16, 4  ;;  %v6157_v40 = vsel %vm5950_vm8, %v6141_v16, %v6156_v20  ;;  %v6585_v36 = vperm.slane %v6579_v7, %v20778_v54  ;;  %v16320_v57 = vperm.slane %v6773_v35, %v20792_v9  ;;  %5548 = vmatpush.bf16.msra.mxu0 %v20796_v49  ;;  %v20797_v7 = vld [vmem:[#allocation56_spill] sm:$0xff] }
 0x446   : > { %v6602_v1 = vrot.slane %v6589_v33, 4  ;;  %v6605_v8 = vsel %vm5950_vm8, %v6589_v33, %v6604_v13  ;;  %v6142_v20 = vrot.slane %v6137_v10, 4  ;;  %v6145_v16 = vsel %vm5950_vm8, %v6137_v10, %v6144_v3  ;;  %5562 = vmatpush.bf16.msra.mxu1 %v20797_v7  ;;  %v20799_v3 = vld [vmem:[#allocation67_spill] sm:$0xff] }
 0x447   : > { %20795 = vst [vmem:[#allocation79_spill] sm:$0xff] %v16320_v57  ;;  %v6155_v14 = vsel %vm5950_vm8, %v6154_v0, %v16174_v41  ;;  %v6110_v33 = vrot.slane %v16276_v28, 4  ;;  %v16330_v13 = vperm.slane %v16167_v39, %v20792_v9  ;;  %v16333_v61 = vperm.slane %v6323_v31, %v20792_v9  ;;  %5590 = vmatpush.bf16.msra.mxu3 %v20799_v3  ;;  %v4948_v24 = vpop.f32.mrf.mxu1 }
 0x448   : > { %v6590_v35 = vrot.slane %v6585_v36, 4  ;;  %v6143_v41 = vsel %vm5950_vm8, %v6142_v20, %v16192_v62  ;;  %v6593_v6 = vsel %vm5950_vm8, %v6585_v36, %v6592_v56  ;;  %v6603_v22 = vsel %vm5950_vm8, %v6602_v1, %v16184_v63  ;;  %v4934_v39 = vpop.f32.mrf.mxu0  ;;  %v4976_v62 = vpop.f32.mrf.mxu3 }
 0x449   : > { %v6558_v31 = vrot.slane %v16297_v29, 4  ;;  %v16347_v21 = vperm.slane %v16236_v37, %v20792_v9  ;;  %v16353_v56 = vperm.slane %v16252_v38, %v20792_v9  ;;  %v6354_v1 = vrot.slane %v5883_v34, 4 }
 0x44a   : > { %v6591_v10 = vsel %vm5950_vm8, %v6590_v35, %v16196_v58  ;;  %v20800_v20 = vrot.slane %v15926_v32, 4  ;;  %v6802_v37 = vrot.slane %v5884_v2, 4  ;;  %v6805_v58 = vsel %vm5950_vm8, %v5884_v2, %v20801_v45 }
 0x44b   : > { %v4962_v49 = vpop.f32.mrf.mxu2  ;;  %v16363_v35 = vpack.c.bf16 %v4948_v24, %v4934_v39  ;;  %v16368_v38 = vperm.slane %v16259_v53, %v20792_v9  ;;  %v6355_v36 = vsel %vm5950_vm8, %v6354_v1, %v15926_v32  ;;  %v6813_v39 = vperm.slane %v6805_v58, %v20778_v54 }
 0x44c   : > { %v6357_v7 = vsel %vm5950_vm8, %v5883_v34, %v20800_v20  ;;  %v16374_v34 = vperm.slane %v6157_v40, %v20792_v9  ;;  %v6361_v20 = vperm.slane %v6355_v36, %v20778_v54  ;;  %v6803_v2 = vsel %vm5950_vm8, %v6802_v37, %v15939_v17 }
 0x44d   : > { %v6365_v63 = vperm.slane %v6357_v7, %v20778_v54  ;;  %v20802_v45 = vrot.slane %v16205_v47, 4  ;;  %v6809_v3 = vperm.slane %v6803_v2, %v20778_v54  ;;  %v16384_v32 = vpack.c.bf16 %v4976_v62, %v4962_v49 }
 0x44e   : > { %v16387_v1 = vperm.slane %v6605_v8, %v20792_v9  ;;  %v6366_v40 = vrot.slane %v6361_v20, 4  ;;  %v20804_v36 = vrot.slane %v16227_v60, 4  ;;  %v6826_v17 = vrot.slane %v6813_v39, 4  ;;  %12490 = vmatmul.msk.bf16.vlgmr.msrb.gmra.mxu0 %vm3698_vm7, %v15796_v46  ;;  %12491 = vmatmul.msk.bf16.vlgmr.msrb.gmra.mxu1 %vm3698_vm7, %v15796_v46 }
 0x44f   : > { %v6378_v24 = vrot.slane %v6365_v63, 4  ;;  %v6381_v53 = vsel %vm5950_vm8, %v6365_v63, %v20802_v45  ;;  %20803 = vst [vmem:[#allocation50_spill] sm:$0xff] %v16384_v32  ;;  %v16393_v37 = vperm.slane %v6155_v14, %v20792_v9  ;;  %v6814_v63 = vrot.slane %v6809_v3, 4  ;;  %v4950_v62 = vpop.f32.mrf.mxu1  ;;  %12492 = vmatmul.msk.bf16.vlgmr.msrb.gmra.mxu2 %vm3698_vm7, %v15796_v46 }
 0x450   : > { %v6369_v7 = vsel %vm5950_vm8, %v6361_v20, %v20804_v36  ;;  %v20805_v2 = vrot.slane %v16233_v23, 4  ;;  %v4936_v8 = vpop.f32.mrf.mxu0  ;;  %v16405_v20 = vperm.slane %v16266_v43, %v20792_v9  ;;  %v16408_v14 = vperm.slane %v6145_v16, %v20792_v9  ;;  %v4978_v36 = vpop.f32.mrf.mxu3  ;;  %12493 = vmatmul.msk.bf16.vlgmr.msrb.gmra.mxu3 %vm3698_vm7, %v15796_v46 }
 0x451   : > { %v6379_v58 = vsel %vm5950_vm8, %v6378_v24, %v16205_v47  ;;  %v6367_v47 = vsel %vm5950_vm8, %v6366_v40, %v16227_v60  ;;  %v6815_v45 = vsel %vm5950_vm8, %v6814_v63, %v16233_v23  ;;  %v6827_v43 = vsel %vm5950_vm8, %v6826_v17, %v16216_v5  ;;  %v20812_v60 = vld [vmem:[#allocation35_spill] sm:$0xff] }
 0x452   : > { %v16400_v49 = vsel %vm5950_vm8, %v6809_v3, %v20805_v2  ;;  %v16414_v3 = vperm.slane %v16255_v44, %v20792_v9  ;;  %v16417_v2 = vperm.slane %v6603_v22, %v20792_v9  ;;  %v6782_v16 = vrot.slane %v16368_v38, 4  ;;  %5632 = vmatpush.bf16.msrb.mxu2 %v20812_v60 }
 0x453   : > { %v4964_v24 = vpop.f32.mrf.mxu2  ;;  %v6170_v50 = vrot.slane %v16374_v34, 4  ;;  %v20806_v40 = vrot.slane %v16216_v5, 4  ;;  %v6149_v22 = vperm.slane %v6143_v41, %v20792_v9  ;;  %v6166_v0 = vrot.slane %v16393_v37, 4 }
 0x454   : > { %v16434_v23 = vperm.slane %v6593_v6, %v20792_v9  ;;  %v16436_v63 = vpack.c.bf16 %v4950_v62, %v4936_v8  ;;  %v6172_v5 = vrot.slane %v16408_v14, 4  ;;  %v16443_v17 = vpack.c.bf16 %v4978_v36, %v4964_v24  ;;  %v20809_v24 = vld [vmem:[#allocation18_spill] sm:$0xff] }
 0x455   : > { %v16429_v44 = vsel %vm5950_vm8, %v6813_v39, %v20806_v40  ;;  %v6111_v41 = vsel %vm5950_vm8, %v6110_v33, %v16282_v30  ;;  %v16451_v6 = vsel %vm5950_vm8, %v6558_v31, %v16330_v13  ;;  %v16458_v39 = vperm.slane %v6591_v10, %v20792_v9  ;;  %5604 = vmatpush.bf16.msrb.mxu0 %v20809_v24  ;;  %v20810_v31 = vld [vmem:[#allocation64_spill] sm:$0xff] }
 0x456   : > { %20807 = vst [vmem:[#allocation46_spill] sm:$0xff] %v16436_v63  ;;  %v16462_v62 = vperm.slane %v6379_v58, %v20792_v9  ;;  %v16465_v33 = vperm.slane %v6381_v53, %v20792_v9  ;;  %5618 = vmatpush.bf16.msrb.mxu1 %v20810_v31  ;;  %v16470_v36 = vperm.slane %v6827_v43, %v20792_v9  ;;  %v6112_v46 = vrot.slane %v16282_v30, 4  ;;  %v20813_v53 = vld [vmem:[#allocation78_spill] sm:$0xff] }
 0x457   : > { %20808 = vst [vmem:[#allocation45_spill] sm:$0xff] %v16443_v17  ;;  %v6560_v10 = vrot.slane %v16330_v13, 4  ;;  %v20811_v40 = vrot.slane %v16243_v19, 4  ;;  %5646 = vmatpush.bf16.msrb.mxu3 %v20813_v53  ;;  %v5004_v31 = vpop.f32.mrf.mxu1  ;;  %v20814_v43 = vrot.slane %v16247_v11, 4  ;;  %v20815_v13 = vrot.slane %v16272_v4, 4 }
 0x458   : > { %v4990_v8 = vpop.f32.mrf.mxu0  ;;  %v20816_v60 = vrot.slane %v16286_v18, 4  ;;  %v16500_v53 = vperm.slane %v6369_v7, %v20792_v9  ;;  %v16517_v7 = vperm.slane %v6815_v45, %v20792_v9  ;;  %v16533_v45 = vsel %vm5950_vm8, %v6782_v16, %v16405_v20 }
 0x459   : > { %v6115_v58 = vsel %vm5950_vm8, %v20811_v40, %v16272_v4  ;;  %v16485_v30 = vsel %vm5950_vm8, %v20814_v43, %v16286_v18  ;;  %v16491_v54 = vsel %vm5950_vm8, %v16243_v19, %v20815_v13  ;;  %v16502_v24 = vpack.c.bf16 %v5004_v31, %v4990_v8  ;;  %v5032_v43 = vpop.f32.mrf.mxu3 }
 0x45a   : > { %v16497_v40 = vsel %vm5950_vm8, %v16247_v11, %v20816_v60  ;;  %v16506_v4 = vsel %vm5950_vm8, %v16276_v28, %v6112_v46  ;;  %v16510_v19 = vsel %vm5950_vm8, %v16297_v29, %v6560_v10  ;;  %v16513_v18 = vperm.slane %v6367_v47, %v20792_v9 }
 0x45b   : > { %20817 = vst [vmem:[#allocation24_spill] sm:$0xff] %v16502_v24  ;;  %v5018_v17 = vpop.f32.mrf.mxu2  ;;  %v7793_v13 = vshrl.u32 %v6111_v41, 16  ;;  %v6171_v28 = vsel %vm5950_vm8, %v6170_v50, %v16408_v14  ;;  %v20819_v29 = vrot.slane %v16333_v61, 4  ;;  %v7889_v47 = vshrl.u32 %v16451_v6, 16 }
 0x45c   : > { %v16519_v8 = vpack.c.bf16 %v5032_v43, %v5018_v17  ;;  %v7804_v10 = vpack.i.b16 %v6171_v28, %v6115_v58  ;;  %v7806_v60 = vshrl.u32 %v6171_v28, 16  ;;  %v6167_v17 = vsel %vm5950_vm8, %v6166_v0, %v6149_v22 }
 0x45d   : > { %v16528_v46 = vsel %vm5950_vm8, %v20819_v29, %v16353_v56  ;;  %v6168_v43 = vrot.slane %v6149_v22, 4  ;;  %v7805_v31 = vshrl.u32 %v6115_v58, 16  ;;  %v16538_v50 = vsel %vm5950_vm8, %v16374_v34, %v6172_v5 }
 0x45e   : > { %20818 = vst [vmem:[#allocation20_spill] sm:$0xff] %v16519_v8  ;;  %v7792_v14 = vpack.i.b16 %v6167_v17, %v6111_v41  ;;  %v7794_v11 = vshrl.u32 %v6167_v17, 16  ;;  %v8426_v29 = vunpack.c.l.b16 %v7804_v10  ;;  %v8427_v8 = vunpack.c.h.b16 %v7804_v10 }
 0x45f   : > { %v6169_v24 = vsel %vm5950_vm8, %v16393_v37, %v6168_v43  ;;  %v16542_v28 = vpack.i.b16 %v7806_v60, %v7805_v31  ;;  %v16547_v0 = vpack.i.b16 %v16538_v50, %v16491_v54  ;;  %v5006_v58 = vpop.f32.mrf.mxu1  ;;  %v20820_v31 = vunpack.c.l.b16 %v15749_v59 }
 0x460   : > { %v4992_v22 = vpop.f32.mrf.mxu0  ;;  %v8135_v63 = vunpack.c.l.b16 %v7792_v14  ;;  %v8136_v34 = vunpack.c.h.b16 %v7792_v14  ;;  %v7795_v5 = vpack.i.b16 %v7794_v11, %v7793_v13  ;;  %v7798_v41 = vpack.i.b16 %v6169_v24, %v16506_v4 }
 0x461   : > { %v16550_v17 = vpack.c.bf16 %v5006_v58, %v4992_v22  ;;  %v5034_v32 = vpop.f32.mrf.mxu3  ;;  %v7800_v37 = vshrl.u32 %v6169_v24, 16  ;;  %v16554_v60 = vpack.c.b16 %v8426_v29, %v20820_v31  ;;  %v20822_v43 = vunpack.c.h.b16 %v15749_v59 }
 0x462   : > { %v20824_v11 = vunpack.c.l.b16 %v15759_v51  ;;  %v20825_v14 = vunpack.c.h.b16 %v15759_v51  ;;  %v8210_v58 = vunpack.c.l.b16 %v7795_v5  ;;  %v20826_v24 = vrot.slane %v16417_v2, 4 }
 0x463   : > { %v5020_v10 = vpop.f32.mrf.mxu2  ;;  %20821 = vst [vmem:[#allocation19_spill] sm:$0xff] %v16554_v60  ;;  %v16558_v16 = vpack.c.b16 %v8427_v8, %v20822_v43  ;;  %v8211_v31 = vunpack.c.h.b16 %v7795_v5  ;;  %v8282_v59 = vunpack.c.l.b16 %v7798_v41  ;;  %v7799_v8 = vshrl.u32 %v16506_v4, 16 }
 0x464   : > { %v16560_v57 = vpack.c.bf16 %v5034_v32, %v5020_v10  ;;  %v16564_v13 = vpack.c.b16 %v8135_v63, %v20824_v11  ;;  %v16568_v22 = vpack.c.b16 %v8136_v34, %v20825_v14  ;;  %v6615_v29 = vsel %vm5950_vm8, %v20826_v24, %v16458_v39  ;;  %v16582_v34 = vld [vmem:[%s13173_s21] sm:$0xff]  ;;  %s373_s21 = scalar_lea.vmem [#allocation9], %s11931_s2  ;;  %s11933_s2 = sshll.u32 %s13164_s8, 11 }
 0x465   : > { %20823 = vst [vmem:[#allocation27_spill] sm:$0xff] %v16558_v16  ;;  %v7888_v32 = vpack.i.b16 %v6615_v29, %v16451_v6  ;;  %v20827_v10 = vunpack.c.l.b16 %v15769_v55  ;;  %v7890_v43 = vshrl.u32 %v6615_v29, 16  ;;  %v7895_v51 = vshrl.u32 %v16510_v19, 16  ;;  %12494 = vmatmul.msk.bf16.vlgmr.msra.gmra.mxu0 %vm3698_vm7, %v16582_v34  ;;  %12495 = vmatmul.msk.bf16.vlgmr.msra.gmra.mxu1 %vm3698_vm7, %v16582_v34  ;;  %s17967_s8 = scalar_lea.vmem [#allocation10], %s11933_s2 }
 0x466   : > { %v20828_v5 = vunpack.c.h.b16 %v15769_v55  ;;  %v20830_v6 = vunpack.c.l.b16 %v15772_v26  ;;  %v8283_v14 = vunpack.c.h.b16 %v7798_v41  ;;  %12496 = vmatmul.msk.bf16.vlgmr.msra.gmra.mxu2 %vm3698_vm7, %v16582_v34  ;;  %12497 = vmatmul.msk.bf16.vlgmr.msra.gmra.mxu3 %vm3698_vm7, %v16582_v34  ;;  %v7801_v16 = vpack.i.b16 %v7800_v37, %v7799_v8  ;;  %v20832_v55 = vld [vmem:[#allocation32_spill] sm:$0xff]  ;;  %v20838_v37 = vld [vmem:[#allocation34_spill] sm:$0xff] }
 0x467   : > { %v16578_v63 = vpack.c.b16 %v8210_v58, %v20827_v10  ;;  %v6616_v58 = vrot.slane %v16458_v39, 4  ;;  %v8137_v24 = vunpack.c.l.b16 %v7888_v32  ;;  %v8138_v29 = vunpack.c.h.b16 %v7888_v32  ;;  %5660 = vmatpush.bf16.msra.mxu0 %v20832_v55  ;;  %5702 = vmatpush.bf16.msra.mxu3 %v20838_v37 }
 0x468   : > { %v16590_v4 = vpack.c.b16 %v8211_v31, %v20828_v5  ;;  %v16594_v11 = vpack.c.b16 %v8282_v59, %v20830_v6  ;;  %v7891_v10 = vpack.i.b16 %v7890_v43, %v7889_v47  ;;  %v20833_v31 = vld [vmem:[#allocation30_spill] sm:$0xff]  ;;  %v20834_v59 = vunpack.c.h.b16 %v15772_v26  ;;  %v20837_v47 = vld [vmem:[#allocation28_spill] sm:$0xff]  ;;  %v5046_v8 = vpop.f32.mrf.mxu0  ;;  %v5060_v43 = vpop.f32.mrf.mxu1 }
 0x469   : > { %5674 = vmatpush.bf16.msra.mxu1 %v20833_v31  ;;  %v6617_v39 = vsel %vm5950_vm8, %v16417_v2, %v6616_v58  ;;  %v20836_v41 = vrot.slane %v16387_v1, 4  ;;  %v8498_v32 = vunpack.c.l.b16 %v16542_v28  ;;  %5688 = vmatpush.bf16.msra.mxu2 %v20837_v47  ;;  %v20839_v26 = vunpack.c.l.b16 %v15786_v48  ;;  %v5088_v60 = vpop.f32.mrf.mxu3 }
 0x46a   : > { %20829 = vst [vmem:[#allocation25_spill] sm:$0xff] %v16590_v4  ;;  %v16605_v5 = vpack.c.b16 %v8283_v14, %v20834_v59  ;;  %v20840_v55 = vunpack.c.h.b16 %v15786_v48  ;;  %v8212_v58 = vunpack.c.l.b16 %v7891_v10  ;;  %v8213_v31 = vunpack.c.h.b16 %v7891_v10 }
 0x46b   : > { %20831 = vst [vmem:[#allocation33_spill] sm:$0xff] %v16594_v11  ;;  %v6619_v6 = vsel %vm5950_vm8, %v20836_v41, %v16434_v23  ;;  %v16618_v14 = vpack.c.b16 %v8137_v24, %v20839_v26  ;;  %v16624_v59 = vpack.c.bf16 %v5060_v43, %v5046_v8  ;;  %v5074_v41 = vpop.f32.mrf.mxu2  ;;  %v7894_v47 = vpack.i.b16 %v6617_v39, %v16510_v19 }
 0x46c   : > { %20835 = vst [vmem:[#allocation43_spill] sm:$0xff] %v16605_v5  ;;  %v16622_v2 = vpack.c.b16 %v8138_v29, %v20840_v55  ;;  %v8354_v5 = vunpack.c.l.b16 %v7801_v16  ;;  %v8355_v37 = vunpack.c.h.b16 %v7801_v16  ;;  %v16627_v11 = vpack.c.bf16 %v5088_v60, %v5074_v41 }
 0x46d   : > { %v20841_v4 = vunpack.c.l.b16 %v15809_v27  ;;  %v20842_v48 = vunpack.c.h.b16 %v15809_v27  ;;  %v7896_v26 = vshrl.u32 %v6617_v39, 16  ;;  %v8284_v10 = vunpack.c.l.b16 %v7894_v47 }
 0x46e   : > { %v8285_v8 = vunpack.c.h.b16 %v7894_v47  ;;  %v20843_v43 = vunpack.c.l.b16 %v15789_v52  ;;  %v7811_v19 = vshrl.u32 %v16491_v54, 16  ;;  %v20844_v16 = vunpack.c.h.b16 %v15789_v52 }
 0x46f   : > { %v16631_v24 = vpack.c.b16 %v8212_v58, %v20841_v4  ;;  %v16635_v29 = vpack.c.b16 %v8213_v31, %v20842_v48  ;;  %v7897_v41 = vpack.i.b16 %v7896_v26, %v7895_v51  ;;  %v7900_v4 = vpack.i.b16 %v6619_v6, %v16485_v30 }
 0x470   : > { %v16639_v55 = vpack.c.b16 %v8354_v5, %v20843_v43  ;;  %v16644_v60 = vpack.c.b16 %v8355_v37, %v20844_v16  ;;  %v7812_v27 = vshrl.u32 %v16538_v50, 16  ;;  %v20845_v58 = vunpack.c.l.b16 %v15812_v12 }
 0x471   : > { %v20846_v31 = vunpack.c.h.b16 %v15812_v12  ;;  %v20847_v5 = vunpack.c.l.b16 %v15763_v25  ;;  %v8499_v52 = vunpack.c.h.b16 %v16542_v28  ;;  %v8356_v37 = vunpack.c.l.b16 %v7897_v41 }
 0x472   : > { %v16650_v39 = vpack.c.b16 %v8284_v10, %v20845_v58  ;;  %v8357_v51 = vunpack.c.h.b16 %v7897_v41  ;;  %v8428_v48 = vunpack.c.l.b16 %v7900_v4  ;;  %v8429_v26 = vunpack.c.h.b16 %v7900_v4  ;;  %v5062_v58 = vpop.f32.mrf.mxu1  ;;  %v20854_v4 = vld [vmem:[#allocation22_spill] sm:$0xff] }
 0x473   : > { %v16654_v47 = vpack.c.b16 %v8285_v8, %v20846_v31  ;;  %v16658_v54 = vpack.c.b16 %v8498_v32, %v20847_v5  ;;  %v20849_v50 = vunpack.c.h.b16 %v15763_v25  ;;  %v7902_v10 = vshrl.u32 %v6619_v6, 16  ;;  %v5048_v8 = vpop.f32.mrf.mxu0 }
 0x474   : > { %v8570_v16 = vunpack.c.l.b16 %v16547_v0  ;;  %v8571_v12 = vunpack.c.h.b16 %v16547_v0  ;;  %v20851_v32 = vunpack.c.l.b16 %v15831_v15  ;;  %v20853_v28 = vunpack.c.h.b16 %v15831_v15  ;;  %v5076_v0 = vpop.f32.mrf.mxu2 }
 0x475   : > { %20848 = vst [vmem:[#allocation36_spill] sm:$0xff] %v16658_v54  ;;  %v16663_v43 = vpack.c.b16 %v8499_v52, %v20849_v50  ;;  %v20855_v5 = vunpack.c.l.b16 %v20854_v4  ;;  %v20857_v6 = vunpack.c.h.b16 %v20854_v4  ;;  %v16683_v50 = vpack.c.bf16 %v5062_v58, %v5048_v8  ;;  %12498 = vmatmul.msk.bf16.vlgmr.msrb.gmra.mxu0 %vm3698_vm7, %v16582_v34  ;;  %12499 = vmatmul.msk.bf16.vlgmr.msrb.gmra.mxu1 %vm3698_vm7, %v16582_v34 }
 0x476   : > { %v16669_v31 = vpack.c.b16 %v8356_v37, %v20851_v32  ;;  %v16673_v41 = vpack.c.b16 %v8357_v51, %v20853_v28  ;;  %v20859_v54 = vshrl.u32 %v16485_v30, 16  ;;  %v20860_v32 = vld [vmem:[#allocation55_spill] sm:$0xff]  ;;  %v7813_v58 = vpack.i.b16 %v7812_v27, %v7811_v19  ;;  %12500 = vmatmul.msk.bf16.vlgmr.msrb.gmra.mxu2 %vm3698_vm7, %v16582_v34  ;;  %12501 = vmatmul.msk.bf16.vlgmr.msrb.gmra.mxu3 %vm3698_vm7, %v16582_v34 }
 0x477   : > { %20850 = vst [vmem:[#allocation37_spill] sm:$0xff] %v16663_v43  ;;  %v16677_v25 = vpack.c.b16 %v8428_v48, %v20855_v5  ;;  %v16681_v52 = vpack.c.b16 %v8429_v26, %v20857_v6  ;;  %v5090_v43 = vpop.f32.mrf.mxu3  ;;  %v20863_v51 = vunpack.c.h.b16 %v20860_v32  ;;  %v20865_v26 = vrot.slane %v16434_v23, 4 }
 0x478   : > { %20852 = vst [vmem:[#allocation39_spill] sm:$0xff] %v16669_v31  ;;  %v7903_v37 = vpack.i.b16 %v7902_v10, %v20859_v54  ;;  %v20861_v31 = vunpack.c.l.b16 %v20860_v32  ;;  %v16695_v48 = vpack.c.bf16 %v5090_v43, %v5076_v0  ;;  %v20866_v30 = vrot.slane %v16462_v62, 4  ;;  %v4853_v32 = vld [vmem:[#allocation1] sm:$0xff] }
 0x479   : > { %20856 = vst [vmem:[#allocation31_spill] sm:$0xff] %v16677_v25  ;;  %v16693_v28 = vpack.c.b16 %v8571_v12, %v20863_v51  ;;  %v6621_v8 = vsel %vm5950_vm8, %v16387_v1, %v20865_v26  ;;  %v7907_v12 = vshrl.u32 %v16497_v40, 16  ;;  %v8642_v4 = vunpack.c.l.b16 %v7813_v58  ;;  %v20867_v1 = vld [vmem:[#allocation29_spill] sm:$0xff]  ;;  %v4854_v51 = vld [vmem:[#allocation1 + $0x9] sm:$0xff]  ;;  %v20872_v26 = vld [vmem:[#allocation68_spill] sm:$0xff]  ;;  %5716 = vmatpush.bf16.msrb.mxu0 %v4853_v32 }
 0x47a   : > { %20858 = vst [vmem:[#allocation40_spill] sm:$0xff] %v16681_v52  ;;  %v16689_v15 = vpack.c.b16 %v8570_v16, %v20861_v31  ;;  %v6391_v54 = vsel %vm5950_vm8, %v20866_v30, %v16513_v18  ;;  %v8500_v10 = vunpack.c.l.b16 %v7903_v37  ;;  %v8501_v16 = vunpack.c.h.b16 %v7903_v37  ;;  %5730 = vmatpush.bf16.msrb.mxu1 %v4854_v51 }
 0x47b   : > { %20864 = vst [vmem:[#allocation47_spill] sm:$0xff] %v16693_v28  ;;  %v7906_v31 = vpack.i.b16 %v6621_v8, %v16497_v40  ;;  %v8643_v43 = vunpack.c.h.b16 %v7813_v58  ;;  %v7908_v5 = vshrl.u32 %v6621_v8, 16  ;;  %v7817_v23 = vshrl.u32 %v16528_v46, 16  ;;  %v20877_v28 = vld [vmem:[#allocation23_spill] sm:$0xff] }
 0x47c   : > { %20862 = vst [vmem:[#allocation38_spill] sm:$0xff] %v16689_v15  ;;  %v20868_v19 = vunpack.c.l.b16 %v20867_v1  ;;  %v20870_v6 = vunpack.c.h.b16 %v20867_v1  ;;  %v20873_v8 = vunpack.c.l.b16 %v20872_v26  ;;  %v20875_v30 = vunpack.c.h.b16 %v20872_v26 }
 0x47d   : > { %v8572_v40 = vunpack.c.l.b16 %v7906_v31  ;;  %v8573_v37 = vunpack.c.h.b16 %v7906_v31  ;;  %v7818_v1 = vshrl.u32 %v6391_v54, 16  ;;  %v20878_v15 = vunpack.c.l.b16 %v20877_v28 }
 0x47e   : > { %v16714_v27 = vpack.c.b16 %v8500_v10, %v20868_v19  ;;  %v16718_v0 = vpack.c.b16 %v8501_v16, %v20870_v6  ;;  %v16726_v58 = vpack.c.b16 %v8642_v4, %v20873_v8  ;;  %v16730_v10 = vpack.c.b16 %v8643_v43, %v20875_v30  ;;  %v4855_v19 = vld [vmem:[#allocation1 + $0x12] sm:$0xff]  ;;  %v4856_v6 = vld [vmem:[#allocation1 + $0x1b] sm:$0xff]  ;;  %v5116_v43 = vpop.f32.mrf.mxu1 }
 0x47f   : > { %v7909_v16 = vpack.i.b16 %v7908_v5, %v7907_v12  ;;  %v7816_v26 = vpack.i.b16 %v6391_v54, %v16528_v46  ;;  %5744 = vmatpush.bf16.msrb.mxu2 %v4855_v19  ;;  %5758 = vmatpush.bf16.msrb.mxu3 %v4856_v6  ;;  %v5102_v12 = vpop.f32.mrf.mxu0  ;;  %v20882_v32 = vrot.slane %v16470_v36, 4  ;;  %v7819_v30 = vpack.i.b16 %v7818_v1, %v7817_v23  ;;  %v20883_v19 = vld [vmem:[#allocation72_spill] sm:$0xff]  ;;  %v20888_v1 = vld [vmem:[#allocation69_spill] sm:$0xff] }
 0x480   : > { %20869 = vst [vmem:[#allocation58_spill] sm:$0xff] %v16714_v27  ;;  %v20880_v27 = vunpack.c.h.b16 %v20877_v28  ;;  %v5144_v28 = vpop.f32.mrf.mxu3  ;;  %v20884_v6 = vunpack.c.l.b16 %v20883_v19  ;;  %v16761_v23 = vperm.slane %v16400_v49, %v20792_v9 }
 0x481   : > { %20871 = vst [vmem:[#allocation53_spill] sm:$0xff] %v16718_v0  ;;  %v16735_v0 = vpack.c.b16 %v8572_v40, %v20878_v15  ;;  %v8644_v5 = vunpack.c.l.b16 %v7909_v16  ;;  %v8645_v8 = vunpack.c.h.b16 %v7909_v16  ;;  %v6839_v51 = vsel %vm5950_vm8, %v20882_v32, %v16517_v7  ;;  %v5130_v40 = vpop.f32.mrf.mxu2 }
 0x482   : > { %20874 = vst [vmem:[#allocation42_spill] sm:$0xff] %v16726_v58  ;;  %v16739_v4 = vpack.c.b16 %v8573_v37, %v20880_v27  ;;  %v16746_v15 = vpack.c.bf16 %v5116_v43, %v5102_v12  ;;  %v8714_v27 = vunpack.c.l.b16 %v7816_v26  ;;  %v8715_v37 = vunpack.c.h.b16 %v7816_v26 }
 0x483   : > { %20876 = vst [vmem:[#allocation59_spill] sm:$0xff] %v16730_v10  ;;  %v7912_v46 = vpack.i.b16 %v6839_v51, %v16533_v45  ;;  %v16749_v54 = vpack.c.bf16 %v5144_v28, %v5130_v40  ;;  %v16753_v31 = vpack.c.b16 %v8644_v5, %v20884_v6  ;;  %v20886_v16 = vunpack.c.h.b16 %v20883_v19  ;;  %v20893_v6 = vld [vmem:[#allocation75_spill] sm:$0xff] }
 0x484   : > { %20879 = vst [vmem:[#allocation51_spill] sm:$0xff] %v16735_v0  ;;  %v8786_v32 = vunpack.c.l.b16 %v7819_v30  ;;  %v20889_v12 = vunpack.c.l.b16 %v20888_v1  ;;  %v20891_v43 = vunpack.c.h.b16 %v20888_v1  ;;  %v6392_v1 = vrot.slane %v16513_v18, 4 }
 0x485   : > { %20881 = vst [vmem:[#allocation44_spill] sm:$0xff] %v16739_v4  ;;  %v16757_v10 = vpack.c.b16 %v8645_v8, %v20886_v16  ;;  %v8716_v28 = vunpack.c.l.b16 %v7912_v46  ;;  %v8717_v5 = vunpack.c.h.b16 %v7912_v46  ;;  %v8787_v8 = vunpack.c.h.b16 %v7819_v30  ;;  %12502 = vmatmul.msk.bf16.vlgmr.msra.gmra.mxu0 %vm3698_vm7, %v16582_v34  ;;  %12503 = vmatmul.msk.bf16.vlgmr.msra.gmra.mxu1 %vm3698_vm7, %v16582_v34 }
 0x486   : > { %20885 = vst [vmem:[#allocation52_spill] sm:$0xff] %v16753_v31  ;;  %v16765_v26 = vpack.c.b16 %v8714_v27, %v20889_v12  ;;  %v16769_v40 = vpack.c.b16 %v8715_v37, %v20891_v43  ;;  %v20894_v31 = vunpack.c.l.b16 %v20893_v6  ;;  %v7913_v16 = vshrl.u32 %v16533_v45, 16  ;;  %12504 = vmatmul.msk.bf16.vlgmr.msra.gmra.mxu2 %vm3698_vm7, %v16582_v34  ;;  %12505 = vmatmul.msk.bf16.vlgmr.msra.gmra.mxu3 %vm3698_vm7, %v16582_v34 }
 0x487   : > { %20887 = vst [vmem:[#allocation54_spill] sm:$0xff] %v16757_v10  ;;  %v20896_v10 = vld [vmem:[#allocation71_spill] sm:$0xff]  ;;  %v7914_v4 = vshrl.u32 %v6839_v51, 16  ;;  %v6336_v27 = vrot.slane %v16353_v56, 4  ;;  %v20901_v46 = vunpack.c.h.b16 %v20893_v6  ;;  %v6784_v30 = vrot.slane %v16405_v20, 4  ;;  %v5104_v20 = vpop.f32.mrf.mxu0 }
 0x488   : > { %20890 = vst [vmem:[#allocation49_spill] sm:$0xff] %v16765_v26  ;;  %v16773_v19 = vpack.c.b16 %v8786_v32, %v20894_v31  ;;  %v20897_v49 = vunpack.c.l.b16 %v20896_v10  ;;  %v20899_v37 = vunpack.c.h.b16 %v20896_v10  ;;  %v6840_v45 = vrot.slane %v16517_v7, 4  ;;  %v5146_v6 = vpop.f32.mrf.mxu3 }
 0x489   : > { %20892 = vst [vmem:[#allocation56_spill] sm:$0xff] %v16769_v40  ;;  %v16788_v31 = vpack.c.b16 %v8787_v8, %v20901_v46  ;;  %v7915_v32 = vpack.i.b16 %v7914_v4, %v7913_v16  ;;  %v6337_v51 = vsel %vm5950_vm8, %v16333_v61, %v6336_v27  ;;  %v6393_v56 = vsel %vm5950_vm8, %v16462_v62, %v6392_v1  ;;  %v20904_v46 = vld [vmem:[#allocation74_spill] sm:$0xff] }
 0x48a   : > { %20895 = vst [vmem:[#allocation66_spill] sm:$0xff] %v16773_v19  ;;  %v16778_v58 = vpack.c.b16 %v8716_v28, %v20897_v49  ;;  %v16784_v12 = vpack.c.b16 %v8717_v5, %v20899_v37  ;;  %v20903_v18 = vrot.slane %v16311_v42, 4  ;;  %v16804_v43 = vperm.slane %v16429_v44, %v20792_v9  ;;  %v5118_v28 = vpop.f32.mrf.mxu1  ;;  %v5132_v5 = vpop.f32.mrf.mxu2 }
 0x48b   : > { %20902 = vst [vmem:[#allocation64_spill] sm:$0xff] %v16788_v31  ;;  %v7822_v7 = vpack.i.b16 %v6393_v56, %v6337_v51  ;;  %v6785_v4 = vsel %vm5950_vm8, %v16368_v38, %v6784_v30  ;;  %v6841_v61 = vsel %vm5950_vm8, %v16470_v36, %v6840_v45  ;;  %v16810_v62 = vpack.c.bf16 %v5118_v28, %v5104_v20  ;;  %v20909_v28 = vld [vmem:[#allocation41_spill] sm:$0xff] }
 0x48c   : > { %20898 = vst [vmem:[#allocation67_spill] sm:$0xff] %v16778_v58  ;;  %v16800_v10 = vsel %vm5950_vm8, %v20903_v18, %v16347_v21  ;;  %v8788_v8 = vunpack.c.l.b16 %v7915_v32  ;;  %v8789_v16 = vunpack.c.h.b16 %v7915_v32  ;;  %v7918_v49 = vpack.i.b16 %v6841_v61, %v6785_v4 }
 0x48d   : > { %20900 = vst [vmem:[#allocation18_spill] sm:$0xff] %v16784_v12  ;;  %v16812_v27 = vpack.c.bf16 %v5146_v6, %v5132_v5  ;;  %v8858_v44 = vunpack.c.l.b16 %v7822_v7  ;;  %v8859_v1 = vunpack.c.h.b16 %v7822_v7  ;;  %v7824_v37 = vshrl.u32 %v6393_v56, 16  ;;  %v20914_v6 = vld [vmem:[#allocation48_spill] sm:$0xff] }
 0x48e   : > { %v20905_v18 = vunpack.c.l.b16 %v20904_v46  ;;  %v20907_v38 = vunpack.c.h.b16 %v20904_v46  ;;  %v8860_v36 = vunpack.c.l.b16 %v7918_v49  ;;  %v7823_v45 = vshrl.u32 %v6337_v51, 16 }
 0x48f   : > { %v6842_v20 = vrot.slane %v16804_v43, 4  ;;  %v20910_v32 = vunpack.c.l.b16 %v20909_v28  ;;  %v20912_v5 = vunpack.c.h.b16 %v20909_v28  ;;  %v8861_v56 = vunpack.c.h.b16 %v7918_v49  ;;  %v4857_v49 = vld [vmem:[#allocation1 + $0x24] sm:$0xff] }
 0x490   : > { %v16816_v31 = vpack.c.b16 %v8788_v8, %v20905_v18  ;;  %v16820_v30 = vpack.c.b16 %v8789_v16, %v20907_v38  ;;  %v20915_v8 = vunpack.c.l.b16 %v20914_v6  ;;  %v7825_v16 = vpack.i.b16 %v7824_v37, %v7823_v45  ;;  %5772 = vmatpush.bf16.msra.mxu0 %v4857_v49 }
 0x491   : > { %v16825_v19 = vpack.c.b16 %v8858_v44, %v20910_v32  ;;  %v16829_v7 = vpack.c.b16 %v8859_v1, %v20912_v5  ;;  %v7919_v46 = vshrl.u32 %v6785_v4, 16  ;;  %v7920_v18 = vshrl.u32 %v6841_v61, 16  ;;  %v4858_v1 = vld [vmem:[#allocation1 + $0x2d] sm:$0xff]  ;;  %v4859_v32 = vld [vmem:[#allocation1 + $0x36] sm:$0xff]  ;;  %v4860_v5 = vld [vmem:[#allocation1 + $0x3f] sm:$0xff] }
 0x492   : > { %20906 = vst [vmem:[#allocation35_spill] sm:$0xff] %v16816_v31  ;;  %v16837_v51 = vpack.c.b16 %v8860_v36, %v20915_v8  ;;  %v6848_v44 = vrot.slane %v16363_v35, 4  ;;  %v20917_v38 = vunpack.c.h.b16 %v20914_v6  ;;  %v20919_v36 = vrot.slane %v16465_v33, 4  ;;  %v20920_v61 = vld [vmem:[#allocation79_spill] sm:$0xff]  ;;  %5786 = vmatpush.bf16.msra.mxu1 %v4858_v1  ;;  %v20922_v6 = vld [vmem:[#allocation50_spill] sm:$0xff]  ;;  %5800 = vmatpush.bf16.msra.mxu2 %v4859_v32 }
 0x493   : > { %20908 = vst [vmem:[#allocation78_spill] sm:$0xff] %v16820_v30  ;;  %v20921_v37 = vrot.slane %v20920_v61, 4  ;;  %v8930_v8 = vunpack.c.l.b16 %v7825_v16  ;;  %5814 = vmatpush.bf16.msra.mxu3 %v4860_v5  ;;  %v20923_v49 = vrot.slane %v16347_v21, 4 }
 0x494   : > { %20911 = vst [vmem:[#allocation32_spill] sm:$0xff] %v16825_v19  ;;  %v16846_v28 = vpack.c.b16 %v8861_v56, %v20917_v38  ;;  %v6395_v4 = vsel %vm5950_vm8, %v20919_v36, %v16500_v53  ;;  %v7296_v38 = vrot.slane %v20922_v6, 4  ;;  %v5172_v36 = vpop.f32.mrf.mxu1  ;;  %v6843_v19 = vsel %vm5950_vm8, %v6842_v20, %v16761_v23 }
 0x495   : > { %20913 = vst [vmem:[#allocation30_spill] sm:$0xff] %v16829_v7  ;;  %v6787_v45 = vsel %vm5950_vm8, %v20921_v37, %v16414_v3  ;;  %v7921_v7 = vpack.i.b16 %v7920_v18, %v7919_v46  ;;  %v7828_v56 = vpack.i.b16 %v6395_v4, %v16800_v10  ;;  %v7830_v30 = vshrl.u32 %v6395_v4, 16  ;;  %v5186_v46 = vpop.f32.mrf.mxu2  ;;  %v5200_v18 = vpop.f32.mrf.mxu3  ;;  %v20924_v37 = vld [vmem:[#allocation77_spill] sm:$0xff]  ;;  %12506 = vmatmul.msk.bf16.vlgmr.msrb.gmra.mxu0 %vm3698_vm7, %v16582_v34 }
 0x496   : > { %20916 = vst [vmem:[#allocation28_spill] sm:$0xff] %v16837_v51  ;;  %v8931_v51 = vunpack.c.h.b16 %v7825_v16  ;;  %v16864_v1 = vsel %vm5950_vm8, %v16311_v42, %v20923_v49  ;;  %v20925_v31 = vunpack.c.l.b16 %v20924_v37  ;;  %v20927_v32 = vunpack.c.h.b16 %v20924_v37  ;;  %12507 = vmatmul.msk.bf16.vlgmr.msrb.gmra.mxu1 %vm3698_vm7, %v16582_v34  ;;  %12508 = vmatmul.msk.bf16.vlgmr.msrb.gmra.mxu2 %vm3698_vm7, %v16582_v34 }
 0x497   : > { %20918 = vst [vmem:[#allocation34_spill] sm:$0xff] %v16846_v28  ;;  %v5158_v28 = vpop.f32.mrf.mxu0  ;;  %v8932_v58 = vunpack.c.l.b16 %v7921_v7  ;;  %v5894_v20 = vpack.c.bf16 %v5200_v18, %v5186_v46  ;;  %v8933_v4 = vunpack.c.h.b16 %v7921_v7  ;;  %v9002_v40 = vunpack.c.l.b16 %v7828_v56  ;;  %12509 = vmatmul.msk.bf16.vlgmr.msrb.gmra.mxu3 %vm3698_vm7, %v16582_v34  ;;  %8157 = vmatpush.bf16.msrb.mxu0 %v16564_v13 }
 0x498   : > { %v5893_v16 = vpack.c.bf16 %v5172_v36, %v5158_v28  ;;  %v16868_v12 = vpack.c.b16 %v8930_v8, %v20925_v31  ;;  %v16872_v5 = vpack.c.b16 %v8931_v51, %v20927_v32  ;;  %v9003_v21 = vunpack.c.h.b16 %v7828_v56  ;;  %v20929_v28 = vld [vmem:[#allocation62_spill] sm:$0xff]  ;;  %8171 = vmatpush.bf16.msrb.mxu1 %v16568_v22  ;;  %8185 = vmatpush.bf16.msrb.mxu2 %v16618_v14 }
 0x499   : > { %v20930_v36 = vunpack.c.l.b16 %v20929_v28  ;;  %v7924_v0 = vpack.i.b16 %v6843_v19, %v6787_v45  ;;  %v6396_v31 = vrot.slane %v16500_v53, 4  ;;  %v7294_v8 = vrot.slane %v5894_v20, 4  ;;  %8199 = vmatpush.bf16.msrb.mxu3 %v16622_v2 }
 0x49a   : > { %20926 = vst [vmem:[#allocation22_spill] sm:$0xff] %v16868_v12  ;;  %v6846_v26 = vrot.slane %v5893_v16, 4  ;;  %v16875_v42 = vsel %vm5950_vm8, %v5893_v16, %v6848_v44  ;;  %v16883_v51 = vsel %vm5950_vm8, %v5894_v20, %v7296_v38  ;;  %v20932_v46 = vunpack.c.h.b16 %v20929_v28  ;;  %v20934_v44 = vld [vmem:[#allocation61_spill] sm:$0xff] }
 0x49b   : > { %20928 = vst [vmem:[#allocation55_spill] sm:$0xff] %v16872_v5  ;;  %v16879_v49 = vpack.c.b16 %v8932_v58, %v20930_v36  ;;  %v20935_v16 = vunpack.c.l.b16 %v20934_v44  ;;  %v20937_v58 = vunpack.c.h.b16 %v20934_v44  ;;  %v7829_v53 = vshrl.u32 %v16800_v10, 16  ;;  %v20939_v20 = vld [vmem:[#allocation21_spill] sm:$0xff]  ;;  %v20941_v36 = vld [vmem:[#allocation46_spill] sm:$0xff] }
 0x49c   : > { %v16887_v7 = vpack.c.b16 %v8933_v4, %v20932_v46  ;;  %v16891_v56 = vsel %vm5950_vm8, %v6846_v26, %v16363_v35  ;;  %v16904_v38 = vsel %vm5950_vm8, %v7294_v8, %v20922_v6  ;;  %v9004_v32 = vunpack.c.l.b16 %v7924_v0  ;;  %v20940_v28 = vld [vmem:[#allocation65_spill] sm:$0xff] }
 0x49d   : > { %20931 = vst [vmem:[#allocation29_spill] sm:$0xff] %v16879_v49  ;;  %v16895_v18 = vpack.c.b16 %v9002_v40, %v20935_v16  ;;  %v16899_v37 = vpack.c.b16 %v9003_v21, %v20937_v58  ;;  %v9071_v4 = vunpack.c.h.b16 %v20939_v20  ;;  %v9072_v35 = vunpack.c.l.b16 %v20940_v28  ;;  %v5174_v21 = vpop.f32.mrf.mxu1  ;;  %v20942_v58 = vld [vmem:[#allocation26_spill] sm:$0xff]  ;;  %v5188_v12 = vpop.f32.mrf.mxu2 }
 0x49e   : > { %20933 = vst [vmem:[#allocation68_spill] sm:$0xff] %v16887_v7  ;;  %v6788_v26 = vrot.slane %v16414_v3, 4  ;;  %v7072_v40 = vrot.slane %v20941_v36, 4  ;;  %v9005_v46 = vunpack.c.h.b16 %v7924_v0  ;;  %v7831_v16 = vpack.i.b16 %v7830_v30, %v7829_v53  ;;  %v20945_v7 = vld [vmem:[#allocation45_spill] sm:$0xff]  ;;  %v5202_v3 = vpop.f32.mrf.mxu3 }
 0x49f   : > { %20936 = vst [vmem:[#allocation23_spill] sm:$0xff] %v16895_v18  ;;  %v5160_v44 = vpop.f32.mrf.mxu0  ;;  %v7925_v18 = vshrl.u32 %v6787_v45, 16  ;;  %v7926_v6 = vshrl.u32 %v6843_v19, 16  ;;  %v6397_v8 = vsel %vm5950_vm8, %v16465_v33, %v6396_v31  ;;  %v7520_v49 = vrot.slane %v20945_v7, 4 }
 0x4a0   : > { %20938 = vst [vmem:[#allocation72_spill] sm:$0xff] %v16899_v37  ;;  %v20943_v37 = vunpack.c.l.b16 %v20942_v58  ;;  %v5925_v5 = vpack.c.bf16 %v5174_v21, %v5160_v44  ;;  %v20946_v9 = vunpack.c.h.b16 %v20942_v58  ;;  %v9074_v30 = vunpack.c.l.b16 %v7831_v16 }
 0x4a1   : > { %v5926_v53 = vpack.c.bf16 %v5202_v3, %v5188_v12  ;;  %v9075_v52 = vunpack.c.h.b16 %v7831_v16  ;;  %v7927_v25 = vpack.i.b16 %v7926_v6, %v7925_v18  ;;  %v20948_v33 = vunpack.c.l.b16 %v20939_v20  ;;  %v20957_v3 = vld [vmem:[#allocation20_spill] sm:$0xff] }
 0x4a2   : > { %v16912_v10 = vpack.c.b16 %v9004_v32, %v20943_v37  ;;  %v16919_v0 = vpack.c.b16 %v9005_v46, %v20946_v9  ;;  %v7834_v37 = vpack.i.b16 %v6397_v8, %v16864_v1  ;;  %v7070_v45 = vrot.slane %v5925_v5, 4 }
 0x4a3   : > { %v16923_v19 = vsel %vm5950_vm8, %v5925_v5, %v7072_v40  ;;  %v16927_v31 = vpack.c.b16 %v9074_v30, %v20948_v33  ;;  %v16931_v32 = vsel %vm5950_vm8, %v20920_v61, %v6788_v26  ;;  %v6844_v9 = vrot.slane %v16761_v23, 4  ;;  %v20954_v40 = vld [vmem:[#allocation76_spill] sm:$0xff] }
 0x4a4   : > { %20944 = vst [vmem:[#allocation69_spill] sm:$0xff] %v16912_v10  ;;  %v7518_v46 = vrot.slane %v5926_v53, 4  ;;  %v16935_v12 = vsel %vm5950_vm8, %v5926_v53, %v7520_v49  ;;  %v16937_v18 = vpack.c.b16 %v9075_v52, %v9071_v4  ;;  %v16945_v5 = vsel %vm5950_vm8, %v7070_v45, %v20941_v36  ;;  %v20951_v49 = vld [vmem:[#allocation70_spill] sm:$0xff] }
 0x4a5   : > { %20947 = vst [vmem:[#allocation75_spill] sm:$0xff] %v16919_v0  ;;  %v9076_v61 = vunpack.c.l.b16 %v7927_v25  ;;  %v9073_v20 = vunpack.c.h.b16 %v20940_v28  ;;  %v9077_v23 = vunpack.c.h.b16 %v7927_v25  ;;  %v9142_v4 = vunpack.c.l.b16 %v20951_v49  ;;  %v5228_v44 = vpop.f32.mrf.mxu1  ;;  %v5242_v45 = vpop.f32.mrf.mxu2  ;;  %12510 = vmatmul.msk.bf16.vlgmr.msra.gmra.mxu0 %vm3698_vm7, %v16582_v34 }
 0x4a6   : > { %20949 = vst [vmem:[#allocation71_spill] sm:$0xff] %v16927_v31  ;;  %v16954_v52 = vsel %vm5950_vm8, %v7518_v46, %v20945_v7  ;;  %v9146_v26 = vunpack.c.l.b16 %v7834_v37  ;;  %v9143_v28 = vunpack.c.h.b16 %v20951_v49  ;;  %v9144_v16 = vunpack.c.l.b16 %v20954_v40  ;;  %v5256_v33 = vpop.f32.mrf.mxu3  ;;  %12511 = vmatmul.msk.bf16.vlgmr.msra.gmra.mxu1 %vm3698_vm7, %v16582_v34  ;;  %12512 = vmatmul.msk.bf16.vlgmr.msra.gmra.mxu2 %vm3698_vm7, %v16582_v34 }
 0x4a7   : > { %20950 = vst [vmem:[#allocation74_spill] sm:$0xff] %v16937_v18  ;;  %v16959_v36 = vpack.c.b16 %v9076_v61, %v9072_v35  ;;  %v16961_v25 = vpack.c.b16 %v9077_v23, %v9073_v20  ;;  %v5214_v7 = vpop.f32.mrf.mxu0  ;;  %v9147_v58 = vunpack.c.h.b16 %v7834_v37  ;;  %v6845_v13 = vsel %vm5950_vm8, %v16804_v43, %v6844_v9  ;;  %v20956_v35 = vld [vmem:[#allocation24_spill] sm:$0xff]  ;;  %12513 = vmatmul.msk.bf16.vlgmr.msra.gmra.mxu3 %vm3698_vm7, %v16582_v34 }
 0x4a8   : > { %v16967_v21 = vpack.c.b16 %v9146_v26, %v9142_v4  ;;  %v9145_v22 = vunpack.c.h.b16 %v20954_v40  ;;  %v6904_v6 = vrot.slane %v20956_v35, 4  ;;  %v7352_v30 = vrot.slane %v20957_v3, 4  ;;  %8229 = vmatpush.bf16.msra.mxu0 %v16578_v63  ;;  %8257 = vmatpush.bf16.msra.mxu2 %v16631_v24 }
 0x4a9   : > { %20952 = vst [vmem:[#allocation41_spill] sm:$0xff] %v16959_v36  ;;  %v5895_v53 = vpack.c.bf16 %v5228_v44, %v5214_v7  ;;  %v7930_v14 = vpack.i.b16 %v6845_v13, %v16931_v32  ;;  %v5896_v2 = vpack.c.bf16 %v5256_v33, %v5242_v45  ;;  %v16975_v46 = vpack.c.b16 %v9147_v58, %v9143_v28 }
 0x4aa   : > { %20953 = vst [vmem:[#allocation48_spill] sm:$0xff] %v16961_v25  ;;  %v7835_v61 = vshrl.u32 %v16864_v1, 16  ;;  %v7836_v37 = vshrl.u32 %v6397_v8, 16  ;;  %v20961_v8 = vld [vmem:[#allocation73_spill] sm:$0xff]  ;;  %v7932_v45 = vshrl.u32 %v6845_v13, 16  ;;  %8271 = vmatpush.bf16.msra.mxu3 %v16635_v29  ;;  %v6860_v34 = vrot.slane %v16624_v59, 4 }
 0x4ab   : > { %20955 = vst [vmem:[#allocation79_spill] sm:$0xff] %v16967_v21  ;;  %v6902_v20 = vrot.slane %v5895_v53, 4  ;;  %v16979_v43 = vsel %vm5950_vm8, %v5895_v53, %v6904_v6  ;;  %v9148_v9 = vunpack.c.l.b16 %v7930_v14  ;;  %v9149_v23 = vunpack.c.h.b16 %v7930_v14 }
 0x4ac   : > { %20958 = vst [vmem:[#allocation50_spill] sm:$0xff] %v16975_v46  ;;  %v7350_v49 = vrot.slane %v5896_v2, 4  ;;  %v16982_v4 = vsel %vm5950_vm8, %v5896_v2, %v7352_v30  ;;  %v7837_v26 = vpack.i.b16 %v7836_v37, %v7835_v61  ;;  %v9214_v44 = vunpack.c.l.b16 %v20961_v8 }
 0x4ad   : > { %v16986_v40 = vsel %vm5950_vm8, %v6902_v20, %v20956_v35  ;;  %v16988_v28 = vpack.c.b16 %v9148_v9, %v9144_v16  ;;  %v16990_v7 = vpack.c.b16 %v9149_v23, %v9145_v22  ;;  %v9215_v6 = vunpack.c.h.b16 %v20961_v8  ;;  %v5230_v35 = vpop.f32.mrf.mxu1  ;;  %v5244_v2 = vpop.f32.mrf.mxu2  ;;  %v20964_v23 = vld [vmem:[#allocation63_spill] sm:$0xff] }
 0x4ae   : > { %v16994_v1 = vsel %vm5950_vm8, %v7350_v49, %v20957_v3  ;;  %v9218_v58 = vunpack.c.l.b16 %v7837_v26  ;;  %v9219_v30 = vunpack.c.h.b16 %v7837_v26  ;;  %v7931_v53 = vshrl.u32 %v16931_v32, 16  ;;  %v5258_v61 = vpop.f32.mrf.mxu3 }
 0x4af   : > { %20959 = vst [vmem:[#allocation77_spill] sm:$0xff] %v16988_v28  ;;  %v5216_v33 = vpop.f32.mrf.mxu0  ;;  %v7128_v16 = vrot.slane %v16550_v17, 4  ;;  %v7576_v20 = vrot.slane %v16560_v57, 4  ;;  %v5928_v9 = vpack.c.bf16 %v5258_v61, %v5244_v2  ;;  %v9216_v49 = vunpack.c.l.b16 %v20964_v23 }
 0x4b0   : > { %20960 = vst [vmem:[#allocation62_spill] sm:$0xff] %v16990_v7  ;;  %v16999_v14 = vpack.c.b16 %v9218_v58, %v9214_v44  ;;  %v5927_v22 = vpack.c.bf16 %v5230_v35, %v5216_v33  ;;  %v17002_v3 = vpack.c.b16 %v9219_v30, %v9215_v6  ;;  %v7933_v37 = vpack.i.b16 %v7932_v45, %v7931_v53  ;;  %v20967_v35 = vld [vmem:[#allocation57_spill] sm:$0xff] }
 0x4b1   : > { %v7574_v44 = vrot.slane %v5928_v9, 4  ;;  %v17010_v58 = vsel %vm5950_vm8, %v5928_v9, %v7576_v20  ;;  %v9217_v33 = vunpack.c.h.b16 %v20964_v23  ;;  %v7305_v61 = vperm.slane %v16883_v51, %v20967_v35 }
 0x4b2   : > { %20962 = vst [vmem:[#allocation61_spill] sm:$0xff] %v16999_v14  ;;  %v7126_v26 = vrot.slane %v5927_v22, 4  ;;  %v17007_v32 = vsel %vm5950_vm8, %v5927_v22, %v7128_v16  ;;  %v9220_v13 = vunpack.c.l.b16 %v7933_v37  ;;  %v9221_v8 = vunpack.c.h.b16 %v7933_v37 }
 0x4b3   : > { %20963 = vst [vmem:[#allocation21_spill] sm:$0xff] %v17002_v3  ;;  %v17029_v53 = vsel %vm5950_vm8, %v7574_v44, %v16560_v57  ;;  %v6857_v16 = vperm.slane %v16875_v42, %v20967_v35  ;;  %v6853_v57 = vperm.slane %v16891_v56, %v20967_v35  ;;  %v7308_v63 = vrot.slane %v16627_v11, 4 }
 0x4b4   : > { %v17019_v6 = vsel %vm5950_vm8, %v7126_v26, %v16550_v17  ;;  %v17021_v30 = vpack.c.b16 %v9220_v13, %v9216_v49  ;;  %v17031_v45 = vpack.c.b16 %v9221_v8, %v9217_v33  ;;  %v20968_v17 = vld [vmem:[#allocation25_spill] sm:$0xff]  ;;  %v7301_v49 = vperm.slane %v16904_v38, %v20967_v35 }
 0x4b5   : > { %8243 = vmatpush.bf16.msra.mxu1 %v20968_v17  ;;  %v5284_v2 = vpop.f32.mrf.mxu1  ;;  %v5298_v42 = vpop.f32.mrf.mxu2  ;;  %v6884_v23 = vrot.slane %v6857_v16, 4  ;;  %v6872_v8 = vrot.slane %v6853_v57, 4  ;;  %v7332_v51 = vrot.slane %v7305_v61, 4 }
 0x4b6   : > { %20965 = vst [vmem:[#allocation65_spill] sm:$0xff] %v17021_v30  ;;  %v5312_v20 = vpop.f32.mrf.mxu3 }
 0x4b7   : > { %20966 = vst [vmem:[#allocation46_spill] sm:$0xff] %v17031_v45  ;;  %v5270_v22 = vpop.f32.mrf.mxu0  ;;  %v5898_v9 = vpack.c.bf16 %v5312_v20, %v5298_v42  ;;  %v7320_v20 = vrot.slane %v7301_v49, 4 }
 0x4b8   : > { %v5897_v37 = vpack.c.bf16 %v5284_v2, %v5270_v22 }
 0x4b9   : > { %v7306_v13 = vrot.slane %v5898_v9, 4  ;;  %v7309_v56 = vsel %vm5950_vm8, %v5898_v9, %v7308_v63 }
 0x4ba   : > { %v6858_v24 = vrot.slane %v5897_v37, 4  ;;  %v6861_v29 = vsel %vm5950_vm8, %v5897_v37, %v6860_v34  ;;  %v7317_v33 = vperm.slane %v7309_v56, %v20967_v35  ;;  %v7081_v56 = vperm.slane %v16923_v19, %v20967_v35 }
 0x4bb   : > { %v6869_v26 = vperm.slane %v6861_v29, %v20967_v35  ;;  %v7307_v38 = vsel %vm5950_vm8, %v7306_v13, %v16627_v11  ;;  %v17070_v29 = vld [vmem:[%s13180_s7] sm:$0xff]  ;;  %v7529_v19 = vperm.slane %v16935_v12, %v20967_v35 }
 0x4bc   : > { %v6859_v44 = vsel %vm5950_vm8, %v6858_v24, %v16624_v59  ;;  %v7313_v34 = vperm.slane %v7307_v38, %v20967_v35  ;;  %v7330_v37 = vrot.slane %v7317_v33, 4  ;;  %v17061_v42 = vsel %vm5950_vm8, %v7317_v33, %v7332_v51  ;;  %12518 = vmatmul.msk.bf16.vlgmr.msrb.gmra.mxu0 %vm3698_vm7, %v17070_v29  ;;  %12519 = vmatmul.msk.bf16.vlgmr.msrb.gmra.mxu1 %vm3698_vm7, %v17070_v29 }
 0x4bd   : > { %v6865_v17 = vperm.slane %v6859_v44, %v20967_v35  ;;  %v6882_v22 = vrot.slane %v6869_v26, 4  ;;  %v17055_v2 = vsel %vm5950_vm8, %v6869_v26, %v6884_v23  ;;  %v5286_v23 = vpop.f32.mrf.mxu1  ;;  %v5300_v11 = vpop.f32.mrf.mxu2  ;;  %v7084_v33 = vrot.slane %v16683_v50, 4  ;;  %12520 = vmatmul.msk.bf16.vlgmr.msrb.gmra.mxu2 %vm3698_vm7, %v17070_v29  ;;  %12521 = vmatmul.msk.bf16.vlgmr.msrb.gmra.mxu3 %vm3698_vm7, %v17070_v29 }
 0x4be   : > { %v7318_v26 = vrot.slane %v7313_v34, 4  ;;  %v5314_v13 = vpop.f32.mrf.mxu3  ;;  %v17078_v44 = vsel %vm5950_vm8, %v7313_v34, %v7320_v20  ;;  %v7525_v38 = vperm.slane %v16954_v52, %v20967_v35  ;;  %v20969_v34 = vld [vmem:[#allocation33_spill] sm:$0xff]  ;;  %8329 = vmatpush.bf16.msrb.mxu2 %v16650_v39  ;;  %8343 = vmatpush.bf16.msrb.mxu3 %v16654_v47 }
 0x4bf   : > { %v6870_v63 = vrot.slane %v6865_v17, 4  ;;  %v17064_v59 = vsel %vm5950_vm8, %v6865_v17, %v6872_v8  ;;  %v17067_v9 = vsel %vm5950_vm8, %v6882_v22, %v6857_v16  ;;  %v5272_v24 = vpop.f32.mrf.mxu0  ;;  %v17081_v8 = vsel %vm5950_vm8, %v7330_v37, %v7305_v61  ;;  %8301 = vmatpush.bf16.msrb.mxu0 %v20969_v34  ;;  %v20970_v37 = vld [vmem:[#allocation43_spill] sm:$0xff] }
 0x4c0   : > { %v17084_v16 = vsel %vm5950_vm8, %v7318_v26, %v7301_v49  ;;  %v7077_v17 = vperm.slane %v16945_v5, %v20967_v35  ;;  %v5929_v22 = vpack.c.bf16 %v5286_v23, %v5272_v24  ;;  %v5930_v61 = vpack.c.bf16 %v5314_v13, %v5300_v11  ;;  %8315 = vmatpush.bf16.msrb.mxu1 %v20970_v37 }
 0x4c1   : > { %v17075_v51 = vsel %vm5950_vm8, %v6870_v63, %v6853_v57  ;;  %v7532_v57 = vrot.slane %v16695_v48, 4  ;;  %v7108_v49 = vrot.slane %v7081_v56, 4  ;;  %v7556_v26 = vrot.slane %v7529_v19, 4 }
 0x4c2   : > { %v7082_v5 = vrot.slane %v5929_v22, 4  ;;  %v7085_v12 = vsel %vm5950_vm8, %v5929_v22, %v7084_v33  ;;  %v7530_v63 = vrot.slane %v5930_v61, 4  ;;  %v7096_v23 = vrot.slane %v7077_v17, 4 }
 0x4c3   : > { %v7093_v20 = vperm.slane %v7085_v12, %v20967_v35  ;;  %v7533_v24 = vsel %vm5950_vm8, %v5930_v61, %v7532_v57 }
 0x4c4   : > { %v7083_v11 = vsel %vm5950_vm8, %v7082_v5, %v16683_v50  ;;  %v7541_v52 = vperm.slane %v7533_v24, %v20967_v35  ;;  %v7531_v57 = vsel %vm5950_vm8, %v7530_v63, %v16695_v48  ;;  %v7544_v5 = vrot.slane %v7525_v38, 4 }
 0x4c5   : > { %v5340_v33 = vpop.f32.mrf.mxu1  ;;  %v7089_v22 = vperm.slane %v7083_v11, %v20967_v35  ;;  %v7106_v34 = vrot.slane %v7093_v20, 4  ;;  %v17114_v12 = vsel %vm5950_vm8, %v7093_v20, %v7108_v49  ;;  %v5354_v61 = vpop.f32.mrf.mxu2  ;;  %v7537_v47 = vperm.slane %v7531_v57, %v20967_v35 }
 0x4c6   : > { %v5368_v39 = vpop.f32.mrf.mxu3  ;;  %v7554_v37 = vrot.slane %v7541_v52, 4  ;;  %v17120_v50 = vsel %vm5950_vm8, %v7541_v52, %v7556_v26  ;;  %v6913_v49 = vperm.slane %v16979_v43, %v20967_v35  ;;  %v7361_v20 = vperm.slane %v16982_v4, %v20967_v35 }
 0x4c7   : > { %v5326_v13 = vpop.f32.mrf.mxu0  ;;  %v7094_v24 = vrot.slane %v7089_v22, 4  ;;  %v17123_v45 = vsel %vm5950_vm8, %v7089_v22, %v7096_v23  ;;  %v17126_v11 = vsel %vm5950_vm8, %v7106_v34, %v7081_v56  ;;  %v7542_v48 = vrot.slane %v7537_v47, 4 }
 0x4c8   : > { %v17136_v26 = vsel %vm5950_vm8, %v7537_v47, %v7544_v5  ;;  %v17139_v52 = vsel %vm5950_vm8, %v7554_v37, %v7529_v19  ;;  %v6916_v56 = vrot.slane %v16746_v15, 4  ;;  %v6909_v43 = vperm.slane %v16986_v40, %v20967_v35 }
 0x4c9   : > { %v17133_v63 = vsel %vm5950_vm8, %v7094_v24, %v7077_v17  ;;  %v17142_v23 = vsel %vm5950_vm8, %v7542_v48, %v7525_v38  ;;  %v5899_v22 = vpack.c.bf16 %v5340_v33, %v5326_v13  ;;  %v7364_v4 = vrot.slane %v16749_v54, 4 }
 0x4ca   : > { %v6940_v34 = vrot.slane %v6913_v49, 4  ;;  %v5900_v17 = vpack.c.bf16 %v5368_v39, %v5354_v61  ;;  %v7357_v47 = vperm.slane %v16994_v1, %v20967_v35  ;;  %v7388_v19 = vrot.slane %v7361_v20, 4 }
 0x4cb   : > { %v6914_v37 = vrot.slane %v5899_v22, 4  ;;  %v6917_v38 = vsel %vm5950_vm8, %v5899_v22, %v6916_v56  ;;  %v6928_v33 = vrot.slane %v6909_v43, 4 }
 0x4cc   : > { %v6925_v30 = vperm.slane %v6917_v38, %v20967_v35  ;;  %v7362_v3 = vrot.slane %v5900_v17, 4  ;;  %v7365_v40 = vsel %vm5950_vm8, %v5900_v17, %v7364_v4  ;;  %12522 = vmatmul.msk.bf16.vlgmr.msra.gmra.mxu0 %vm3698_vm7, %v17070_v29  ;;  %12523 = vmatmul.msk.bf16.vlgmr.msra.gmra.mxu1 %vm3698_vm7, %v17070_v29 }
 0x4cd   : > { %v5342_v24 = vpop.f32.mrf.mxu1  ;;  %v5356_v5 = vpop.f32.mrf.mxu2  ;;  %v6915_v61 = vsel %vm5950_vm8, %v6914_v37, %v16746_v15  ;;  %v7373_v39 = vperm.slane %v7365_v40, %v20967_v35  ;;  %12524 = vmatmul.msk.bf16.vlgmr.msra.gmra.mxu2 %vm3698_vm7, %v17070_v29  ;;  %12525 = vmatmul.msk.bf16.vlgmr.msra.gmra.mxu3 %vm3698_vm7, %v17070_v29  ;;  %v20971_v37 = vld [vmem:[#allocation39_spill] sm:$0xff]  ;;  %v7585_v40 = vperm.slane %v17010_v58, %v20967_v35 }
 0x4ce   : > { %v5370_v48 = vpop.f32.mrf.mxu3  ;;  %v6921_v1 = vperm.slane %v6915_v61, %v20967_v35  ;;  %v6938_v7 = vrot.slane %v6925_v30, 4  ;;  %v17158_v56 = vsel %vm5950_vm8, %v6925_v30, %v6940_v34  ;;  %v7363_v22 = vsel %vm5950_vm8, %v7362_v3, %v16749_v54  ;;  %8373 = vmatpush.bf16.msra.mxu0 %v16639_v55  ;;  %8387 = vmatpush.bf16.msra.mxu1 %v16644_v60 }
 0x4cf   : > { %v5328_v57 = vpop.f32.mrf.mxu0  ;;  %v5932_v14 = vpack.c.bf16 %v5370_v48, %v5356_v5  ;;  %v7369_v15 = vperm.slane %v7363_v22, %v20967_v35  ;;  %v7386_v4 = vrot.slane %v7373_v39, 4  ;;  %v17168_v17 = vsel %vm5950_vm8, %v7373_v39, %v7388_v19  ;;  %8401 = vmatpush.bf16.msra.mxu2 %v20971_v37  ;;  %8415 = vmatpush.bf16.msra.mxu3 %v16673_v41 }
 0x4d0   : > { %v5931_v13 = vpack.c.bf16 %v5342_v24, %v5328_v57  ;;  %v7376_v57 = vrot.slane %v7357_v47, 4  ;;  %v6926_v54 = vrot.slane %v6921_v1, 4  ;;  %v17175_v3 = vsel %vm5950_vm8, %v6921_v1, %v6928_v33 }
 0x4d1   : > { %v17178_v30 = vsel %vm5950_vm8, %v6938_v7, %v6913_v49  ;;  %v7133_v34 = vperm.slane %v17019_v6, %v20967_v35  ;;  %v7137_v24 = vperm.slane %v17007_v32, %v20967_v35  ;;  %v7374_v19 = vrot.slane %v7369_v15, 4 }
 0x4d2   : > { %v17189_v38 = vsel %vm5950_vm8, %v6926_v54, %v6909_v43  ;;  %v17192_v7 = vsel %vm5950_vm8, %v7369_v15, %v7376_v57  ;;  %v17195_v6 = vsel %vm5950_vm8, %v7386_v4, %v7361_v20  ;;  %v7140_v55 = vrot.slane %v16810_v62, 4 }
 0x4d3   : > { %v7588_v60 = vrot.slane %v16812_v27, 4  ;;  %v7581_v5 = vperm.slane %v17029_v53, %v20967_v35  ;;  %v17202_v41 = vsel %vm5950_vm8, %v7374_v19, %v7357_v47  ;;  %v7138_v33 = vrot.slane %v5931_v13, 4 }
 0x4d4   : > { %v7141_v20 = vsel %vm5950_vm8, %v5931_v13, %v7140_v55  ;;  %v7586_v61 = vrot.slane %v5932_v14, 4  ;;  %v7152_v22 = vrot.slane %v7133_v34, 4  ;;  %v7164_v15 = vrot.slane %v7137_v24, 4 }
 0x4d5   : > { %v5396_v32 = vpop.f32.mrf.mxu1  ;;  %v5410_v43 = vpop.f32.mrf.mxu2  ;;  %v7589_v39 = vsel %vm5950_vm8, %v5932_v14, %v7588_v60  ;;  %v7139_v53 = vsel %vm5950_vm8, %v7138_v33, %v16810_v62  ;;  %v7149_v47 = vperm.slane %v7141_v20, %v20967_v35  ;;  %v7600_v4 = vrot.slane %v7581_v5, 4 }
 0x4d6   : > { %v5424_v48 = vpop.f32.mrf.mxu3  ;;  %v7145_v57 = vperm.slane %v7139_v53, %v20967_v35  ;;  %v7587_v58 = vsel %vm5950_vm8, %v7586_v61, %v16812_v27  ;;  %v7597_v13 = vperm.slane %v7589_v39, %v20967_v35  ;;  %v7612_v61 = vrot.slane %v7585_v40, 4 }
 0x4d7   : > { %v5382_v49 = vpop.f32.mrf.mxu0  ;;  %v7162_v54 = vrot.slane %v7149_v47, 4  ;;  %v17218_v14 = vsel %vm5950_vm8, %v7149_v47, %v7164_v15  ;;  %v7593_v19 = vperm.slane %v7587_v58, %v20967_v35  ;;  %v17221_v37 = vpack.c.bf16 %v5424_v48, %v5410_v43  ;;  %v20974_v47 = vld [vmem:[#allocation31_spill] sm:$0xff] }
 0x4d8   : > { %v17208_v1 = vpack.c.bf16 %v5396_v32, %v5382_v49  ;;  %v7150_v49 = vrot.slane %v7145_v57, 4  ;;  %v17224_v62 = vsel %vm5950_vm8, %v7145_v57, %v7152_v22  ;;  %v7610_v32 = vrot.slane %v7597_v13, 4 }
 0x4d9   : > { %v17227_v55 = vsel %vm5950_vm8, %v7162_v54, %v7137_v24  ;;  %v7598_v60 = vrot.slane %v7593_v19, 4  ;;  %v17230_v27 = vsel %vm5950_vm8, %v7593_v19, %v7600_v4  ;;  %v17242_v24 = vsel %vm5950_vm8, %v7597_v13, %v7612_v61  ;;  %v20975_v4 = vld [vmem:[#allocation40_spill] sm:$0xff] }
 0x4da   : > { %v17233_v39 = vsel %vm5950_vm8, %v7150_v49, %v7133_v34  ;;  %v17239_v22 = vsel %vm5950_vm8, %v7610_v32, %v7585_v40  ;;  %v20973_v40 = vld [vmem:[#allocation27_spill] sm:$0xff] }
 0x4db   : > { %v17236_v15 = vsel %vm5950_vm8, %v7598_v60, %v7581_v5  ;;  %v20972_v5 = vld [vmem:[#allocation19_spill] sm:$0xff] }
 0x4dc   : > { %12526 = vmatmul.msk.bf16.vlgmr.msrb.gmra.mxu0 %vm3698_vm7, %v17070_v29  ;;  %12527 = vmatmul.msk.bf16.vlgmr.msrb.gmra.mxu1 %vm3698_vm7, %v17070_v29 }
 0x4dd   : > { %v5398_v20 = vpop.f32.mrf.mxu1  ;;  %v5412_v43 = vpop.f32.mrf.mxu2  ;;  %12528 = vmatmul.msk.bf16.vlgmr.msrb.gmra.mxu2 %vm3698_vm7, %v17070_v29  ;;  %12529 = vmatmul.msk.bf16.vlgmr.msrb.gmra.mxu3 %vm3698_vm7, %v17070_v29 }
 0x4de   : > { %v5426_v48 = vpop.f32.mrf.mxu3  ;;  %8445 = vmatpush.bf16.msrb.mxu0 %v20972_v5  ;;  %8459 = vmatpush.bf16.msrb.mxu1 %v20973_v40  ;;  %v20977_v40 = vld [vmem:[#allocation36_spill] sm:$0xff] }
 0x4df   : > { %v5384_v33 = vpop.f32.mrf.mxu0  ;;  %v17250_v34 = vpack.c.bf16 %v5426_v48, %v5412_v43  ;;  %8473 = vmatpush.bf16.msrb.mxu2 %v20974_v47  ;;  %8487 = vmatpush.bf16.msrb.mxu3 %v20975_v4  ;;  %v20976_v48 = vld [vmem:[#allocation60_spill] sm:$0xff]  ;;  %v20978_v47 = vld [vmem:[#allocation37_spill] sm:$0xff] }
 0x4e0   : > { %v17244_v53 = vpack.c.bf16 %v5398_v20, %v5384_v33  ;;  %v6893_v5 = vperm.slane %v17055_v2, %v20976_v48  ;;  %v6881_v4 = vperm.slane %v17064_v59, %v20976_v48  ;;  %v6877_v59 = vperm.slane %v17075_v51, %v20976_v48 }
 0x4e2   : > { %v6900_v28 = vrot.slane %v6881_v4, 4  ;;  %v6896_v51 = vrot.slane %v6877_v59, 4 }
 0x4e4   : > { %v17307_v21 = vsel %vm5950_vm8, %v6893_v5, %v6900_v28  ;;  %v7101_v28 = vperm.slane %v17133_v63, %v20976_v48 }
 0x4e5   : > { %v5452_v58 = vpop.f32.mrf.mxu1  ;;  %v5466_v54 = vpop.f32.mrf.mxu2 }
 0x4e6   : > { %v5480_v19 = vpop.f32.mrf.mxu3 }
 0x4e7   : > { %v5438_v57 = vpop.f32.mrf.mxu0  ;;  %v17262_v49 = vpack.c.bf16 %v5480_v19, %v5466_v54  ;;  %v20980_v54 = vld [vmem:[#allocation53_spill] sm:$0xff] }
 0x4e8   : > { %v17260_v13 = vpack.c.bf16 %v5452_v58, %v5438_v57  ;;  %v6889_v57 = vperm.slane %v17067_v9, %v20976_v48  ;;  %v20979_v58 = vld [vmem:[#allocation58_spill] sm:$0xff] }
 0x4ea   : > { %v6894_v9 = vrot.slane %v6889_v57, 4 }
 0x4ec   : > { %12530 = vmatmul.msk.bf16.vlgmr.msra.gmra.mxu0 %vm3698_vm7, %v17070_v29  ;;  %12531 = vmatmul.msk.bf16.vlgmr.msra.gmra.mxu1 %vm3698_vm7, %v17070_v29  ;;  %v17304_v46 = vsel %vm5950_vm8, %v6894_v9, %v6877_v59  ;;  %v17320_v59 = vperm.slane %v17114_v12, %v20976_v48  ;;  %v7561_v9 = vperm.slane %v17139_v52, %v20976_v48 }
 0x4ed   : > { %v5454_v60 = vpop.f32.mrf.mxu1  ;;  %v5468_v20 = vpop.f32.mrf.mxu2  ;;  %12532 = vmatmul.msk.bf16.vlgmr.msra.gmra.mxu2 %vm3698_vm7, %v17070_v29  ;;  %12533 = vmatmul.msk.bf16.vlgmr.msra.gmra.mxu3 %vm3698_vm7, %v17070_v29  ;;  %v6949_v12 = vperm.slane %v17158_v56, %v20976_v48  ;;  %v6937_v56 = vperm.slane %v17175_v3, %v20976_v48  ;;  %v7120_v3 = vrot.slane %v7101_v28, 4 }
 0x4ee   : > { %v5482_v61 = vpop.f32.mrf.mxu3  ;;  %8517 = vmatpush.bf16.msra.mxu0 %v20977_v40  ;;  %8531 = vmatpush.bf16.msra.mxu1 %v20978_v47  ;;  %v7341_v47 = vperm.slane %v17061_v42, %v20976_v48  ;;  %20981 = vst [vmem:[#allocation26_spill] sm:$0xff] %v17320_v59 }
 0x4ef   : > { %v5440_v32 = vpop.f32.mrf.mxu0  ;;  %v17266_v43 = vpack.c.bf16 %v5482_v61, %v5468_v20  ;;  %8545 = vmatpush.bf16.msra.mxu2 %v20979_v58  ;;  %8559 = vmatpush.bf16.msra.mxu3 %v20980_v54  ;;  %v6898_v61 = vrot.slane %v6893_v5, 4  ;;  %v7329_v58 = vperm.slane %v17078_v44, %v20976_v48  ;;  %v7337_v54 = vperm.slane %v17081_v8, %v20976_v48 }
 0x4f0   : > { %v17264_v33 = vpack.c.bf16 %v5454_v60, %v5440_v32  ;;  %v7325_v44 = vperm.slane %v17084_v16, %v20976_v48  ;;  %v6954_v31 = vrot.slane %v6949_v12, 4 }
 0x4f1   : > { %v7342_v25 = vrot.slane %v7337_v54, 4  ;;  %v7348_v36 = vrot.slane %v7329_v58, 4 }
 0x4f3   : > { %v17340_v63 = vsel %vm5950_vm8, %v7342_v25, %v7325_v44  ;;  %v17343_v52 = vsel %vm5950_vm8, %v7341_v47, %v7348_v36  ;;  %v6945_v25 = vperm.slane %v17178_v30, %v20976_v48  ;;  %v20986_v36 = vld [vmem:[#allocation44_spill] sm:$0xff] }
 0x4f5   : > { %v5508_v19 = vpop.f32.mrf.mxu1  ;;  %v5522_v60 = vpop.f32.mrf.mxu2 }
 0x4f6   : > { %v5536_v20 = vpop.f32.mrf.mxu3 }
 0x4f7   : > { %v5494_v2 = vpop.f32.mrf.mxu0  ;;  %v17288_v40 = vpack.c.bf16 %v5536_v20, %v5522_v60  ;;  %v7113_v60 = vperm.slane %v17126_v11, %v20976_v48  ;;  %v17316_v11 = vsel %vm5950_vm8, %v6889_v57, %v6896_v51  ;;  %v7344_v57 = vrot.slane %v7325_v44, 4  ;;  %v20985_v51 = vld [vmem:[#allocation51_spill] sm:$0xff] }
 0x4f8   : > { %v17286_v32 = vpack.c.bf16 %v5508_v19, %v5494_v2  ;;  %v17299_v2 = vsel %vm5950_vm8, %v6898_v61, %v6881_v4  ;;  %v7346_v19 = vrot.slane %v7341_v47, 4 }
 0x4f9   : > { %v7118_v5 = vrot.slane %v7113_v60, 4 }
 0x4fa   : > { %v17325_v16 = vsel %vm5950_vm8, %v7346_v19, %v7329_v58  ;;  %v17347_v58 = vperm.slane %v17123_v45, %v20976_v48  ;;  %v7122_v19 = vrot.slane %v17320_v59, 4  ;;  %v17359_v45 = vsel %vm5950_vm8, %v7337_v54, %v7344_v57 }
 0x4fb   : > { %v17375_v54 = vsel %vm5950_vm8, %v7113_v60, %v7120_v3  ;;  %v7381_v57 = vperm.slane %v17202_v41, %v20976_v48  ;;  %v6955_v60 = vsel %vm5950_vm8, %v6954_v31, %v6937_v56  ;;  %v7949_v41 = vshrl.u32 %v17299_v2, 16 }
 0x4fc   : > { %12534 = vmatmul.msk.bf16.vlgmr.msrb.gmra.mxu0 %vm3698_vm7, %v17070_v29  ;;  %12535 = vmatmul.msk.bf16.vlgmr.msrb.gmra.mxu1 %vm3698_vm7, %v17070_v29  ;;  %20982 = vst [vmem:[#allocation45_spill] sm:$0xff] %v17347_v58 }
 0x4fd   : > { %v5510_v42 = vpop.f32.mrf.mxu1  ;;  %v5524_v4 = vpop.f32.mrf.mxu2  ;;  %12536 = vmatmul.msk.bf16.vlgmr.msrb.gmra.mxu2 %vm3698_vm7, %v17070_v29  ;;  %12537 = vmatmul.msk.bf16.vlgmr.msrb.gmra.mxu3 %vm3698_vm7, %v17070_v29 }
 0x4fe   : > { %v5538_v61 = vpop.f32.mrf.mxu3  ;;  %8617 = vmatpush.bf16.msrb.mxu2 %v20985_v51  ;;  %8631 = vmatpush.bf16.msrb.mxu3 %v20986_v36  ;;  %v7566_v36 = vrot.slane %v7561_v9, 4 }
 0x4ff   : > { %v5496_v20 = vpop.f32.mrf.mxu0  ;;  %v17313_v18 = vpack.c.bf16 %v5538_v61, %v5524_v4  ;;  %v17362_v4 = vsel %vm5950_vm8, %v7118_v5, %v7101_v28  ;;  %v7549_v61 = vperm.slane %v17142_v23, %v20976_v48  ;;  %v17379_v28 = vsel %vm5950_vm8, %v7122_v19, %v17347_v58 }
 0x500   : > { %v17311_v8 = vpack.c.bf16 %v5510_v42, %v5496_v20  ;;  %v20983_v20 = vld [vmem:[#allocation38_spill] sm:$0xff]  ;;  %v20984_v42 = vld [vmem:[#allocation47_spill] sm:$0xff]  ;;  %20988 = vst [vmem:[#allocation76_spill] sm:$0xff] %v17379_v28  ;;  %v6933_v23 = vperm.slane %v17189_v38, %v20976_v48  ;;  %v6956_v5 = vrot.slane %v6937_v56, 4  ;;  %v17397_v38 = vpack.i.b16 %v6955_v60, %v17299_v2 }
 0x501   : > { %8589 = vmatpush.bf16.msrb.mxu0 %v20983_v20  ;;  %8603 = vmatpush.bf16.msrb.mxu1 %v20984_v42  ;;  %v17368_v20 = vperm.slane %v17168_v17, %v20976_v48  ;;  %v6950_v17 = vrot.slane %v6945_v25, 4  ;;  %v17390_v3 = vsel %vm5950_vm8, %v7566_v36, %v7549_v61  ;;  %v7568_v19 = vrot.slane %v7549_v61, 4 }
 0x502   : > { %20989 = vst [vmem:[#allocation24_spill] sm:$0xff] %v17397_v38  ;;  %v6952_v28 = vrot.slane %v6933_v23, 4  ;;  %v17402_v31 = vsel %vm5950_vm8, %v6949_v12, %v6956_v5  ;;  %v7937_v2 = vshrl.u32 %v17304_v46, 16  ;;  %v7400_v5 = vrot.slane %v7381_v57, 4 }
 0x503   : > { %v17405_v56 = vsel %vm5950_vm8, %v7561_v9, %v7568_v19  ;;  %v20996_v19 = vld [vmem:[#allocation59_spill] sm:$0xff] }
 0x505   : > { %v5564_v44 = vpop.f32.mrf.mxu1  ;;  %v5578_v42 = vpop.f32.mrf.mxu2 }
 0x506   : > { %v5592_v51 = vpop.f32.mrf.mxu3 }
 0x507   : > { %v5550_v47 = vpop.f32.mrf.mxu0  ;;  %v17372_v59 = vpack.c.bf16 %v5592_v51, %v5578_v42  ;;  %v17394_v42 = vperm.slane %v17192_v7, %v20976_v48  ;;  %v7950_v51 = vshrl.u32 %v6955_v60, 16 }
 0x508   : > { %v17370_v30 = vpack.c.bf16 %v5564_v44, %v5550_v47  ;;  %v7402_v47 = vrot.slane %v17368_v20, 4  ;;  %v7393_v44 = vperm.slane %v17195_v6, %v20976_v48  ;;  %v6951_v6 = vsel %vm5950_vm8, %v6950_v17, %v6933_v23 }
 0x509   : > { %20987 = vst [vmem:[#allocation70_spill] sm:$0xff] %v17372_v59  ;;  %v17410_v35 = vpack.i.b16 %v6951_v6, %v17304_v46  ;;  %v7938_v60 = vshrl.u32 %v6951_v6, 16  ;;  %v6953_v23 = vsel %vm5950_vm8, %v6945_v25, %v6952_v28  ;;  %v17416_v12 = vpack.i.b16 %v7950_v51, %v7949_v41 }
 0x50a   : > { %v7398_v38 = vrot.slane %v7393_v44, 4  ;;  %v7403_v9 = vsel %vm5950_vm8, %v7402_v47, %v17394_v42  ;;  %v7943_v46 = vshrl.u32 %v17316_v11, 16  ;;  %v20995_v47 = vld [vmem:[#allocation42_spill] sm:$0xff] }
 0x50b   : > { %20990 = vst [vmem:[#allocation20_spill] sm:$0xff] %v17410_v35  ;;  %v17418_v17 = vpack.i.b16 %v7938_v60, %v7937_v2  ;;  %v17431_v25 = vpack.i.b16 %v7403_v9, %v17325_v16  ;;  %v21070_v35 = vld [vmem:[#allocation26_spill] sm:$0xff] }
 0x50c   : > { %20991 = vst [vmem:[#allocation73_spill] sm:$0xff] %v17416_v12  ;;  %12538 = vmatmul.msk.bf16.vlgmr.msra.gmra.mxu0 %vm3698_vm7, %v17070_v29  ;;  %12539 = vmatmul.msk.bf16.vlgmr.msra.gmra.mxu1 %vm3698_vm7, %v17070_v29  ;;  %v7399_v28 = vsel %vm5950_vm8, %v7398_v38, %v7381_v57  ;;  %v7401_v57 = vsel %vm5950_vm8, %v7393_v44, %v7400_v5  ;;  %v6960_v38 = vrot.slane %v17208_v1, 4  ;;  %v7404_v44 = vrot.slane %v17394_v42, 4 }
 0x50d   : > { %v5566_v10 = vpop.f32.mrf.mxu1  ;;  %v5580_v7 = vpop.f32.mrf.mxu2  ;;  %20992 = vst [vmem:[#allocation63_spill] sm:$0xff] %v17418_v17  ;;  %12540 = vmatmul.msk.bf16.vlgmr.msra.gmra.mxu2 %vm3698_vm7, %v17070_v29  ;;  %12541 = vmatmul.msk.bf16.vlgmr.msra.gmra.mxu3 %vm3698_vm7, %v17070_v29  ;;  %v17441_v41 = vpack.i.b16 %v7399_v28, %v17340_v63  ;;  %v8034_v51 = vshrl.u32 %v7399_v28, 16 }
 0x50e   : > { %v5594_v36 = vpop.f32.mrf.mxu3  ;;  %20994 = vst [vmem:[#allocation33_spill] sm:$0xff] %v17431_v25  ;;  %8661 = vmatpush.bf16.msra.mxu0 %v20995_v47  ;;  %8675 = vmatpush.bf16.msra.mxu1 %v20996_v19 }
 0x50f   : > { %v5552_v0 = vpop.f32.mrf.mxu0  ;;  %v17413_v59 = vpack.c.bf16 %v5594_v36, %v5580_v7  ;;  %20997 = vst [vmem:[#allocation43_spill] sm:$0xff] %v17441_v41  ;;  %v20999_v7 = vld [vmem:[#allocation52_spill] sm:$0xff]  ;;  %v21000_v36 = vld [vmem:[#allocation54_spill] sm:$0xff] }
 0x510   : > { %v17407_v61 = vpack.c.bf16 %v5566_v10, %v5552_v0  ;;  %v17421_v10 = vpack.i.b16 %v6953_v23, %v17316_v11  ;;  %v7944_v0 = vshrl.u32 %v6953_v23, 16  ;;  %v8033_v11 = vshrl.u32 %v17340_v63, 16  ;;  %8689 = vmatpush.bf16.msra.mxu2 %v20999_v7  ;;  %8703 = vmatpush.bf16.msra.mxu3 %v21000_v36 }
 0x511   : > { %v7408_v63 = vrot.slane %v17221_v37, 4 }
 0x512   : > { %20993 = vst [vmem:[#allocation25_spill] sm:$0xff] %v17421_v10  ;;  %v17444_v6 = vpack.i.b16 %v7944_v0, %v7943_v46  ;;  %v17450_v25 = vpack.i.b16 %v8034_v51, %v8033_v11  ;;  %v17454_v0 = vpack.i.b16 %v7401_v57, %v17359_v45  ;;  %v8046_v46 = vshrl.u32 %v7403_v9, 16 }
 0x513   : > { %v8045_v11 = vshrl.u32 %v17325_v16, 16  ;;  %v17483_v16 = vperm.slane %v17227_v55, %v20976_v48  ;;  %v7632_v55 = vrot.slane %v17250_v34, 4 }
 0x514   : > { %20998 = vst [vmem:[#allocation39_spill] sm:$0xff] %v17444_v6  ;;  %v17830_v6 = vld [vmem:[%s13180_s7] sm:$0xff] }
 0x515   : > { %v5620_v60 = vpop.f32.mrf.mxu1  ;;  %v5634_v47 = vpop.f32.mrf.mxu2  ;;  %21001 = vst [vmem:[#allocation19_spill] sm:$0xff] %v17450_v25 }
 0x516   : > { %v5648_v19 = vpop.f32.mrf.mxu3  ;;  %21002 = vst [vmem:[#allocation27_spill] sm:$0xff] %v17454_v0 }
 0x517   : > { %v5606_v2 = vpop.f32.mrf.mxu0  ;;  %v5910_v28 = vpack.c.bf16 %v5648_v19, %v5634_v47  ;;  %v8040_v47 = vshrl.u32 %v7401_v57, 16  ;;  %v17493_v57 = vperm.slane %v17239_v22, %v20976_v48  ;;  %v7956_v22 = vshrl.u32 %v17402_v31, 16 }
 0x518   : > { %v5909_v23 = vpack.c.bf16 %v5620_v60, %v5606_v2  ;;  %v8039_v60 = vshrl.u32 %v17359_v45, 16  ;;  %v7405_v45 = vsel %vm5950_vm8, %v17368_v20, %v7404_v44  ;;  %v7955_v20 = vshrl.u32 %v17307_v21, 16 }
 0x519   : > { %v7406_v5 = vrot.slane %v5910_v28, 4  ;;  %v17461_v2 = vsel %vm5950_vm8, %v5910_v28, %v7408_v63  ;;  %v7184_v63 = vrot.slane %v17244_v53, 4 }
 0x51a   : > { %v6958_v7 = vrot.slane %v5909_v23, 4  ;;  %v17457_v36 = vsel %vm5950_vm8, %v5909_v23, %v6960_v38  ;;  %v17473_v38 = vpack.i.b16 %v8046_v46, %v8045_v11  ;;  %v17475_v42 = vpack.i.b16 %v8040_v47, %v8039_v60 }
 0x51b   : > { %v17471_v9 = vsel %vm5950_vm8, %v7406_v5, %v17221_v37  ;;  %v17479_v23 = vpack.i.b16 %v17402_v31, %v17307_v21  ;;  %v17489_v37 = vperm.slane %v17233_v39, %v20976_v48  ;;  %v17498_v11 = vpack.i.b16 %v7405_v45, %v17343_v52 }
 0x51c   : > { %v17466_v51 = vsel %vm5950_vm8, %v6958_v7, %v17208_v1  ;;  %21003 = vst [vmem:[#allocation31_spill] sm:$0xff] %v17473_v38  ;;  %v8052_v60 = vshrl.u32 %v7405_v45, 16  ;;  %v7174_v47 = vrot.slane %v17483_v16, 4  ;;  %v7622_v21 = vrot.slane %v17493_v57, 4  ;;  %12542 = vmatmul.msk.bf16.vlgmr.msrb.gmra.mxu0 %vm3698_vm7, %v17070_v29  ;;  %12543 = vmatmul.msk.bf16.vlgmr.msrb.gmra.mxu1 %vm3698_vm7, %v17070_v29 }
 0x51d   : > { %21004 = vst [vmem:[#allocation40_spill] sm:$0xff] %v17475_v42  ;;  %v5622_v19 = vpop.f32.mrf.mxu1  ;;  %v5636_v46 = vpop.f32.mrf.mxu2  ;;  %v17523_v45 = vpack.i.b16 %v7956_v22, %v7955_v20  ;;  %12544 = vmatmul.msk.bf16.vlgmr.msrb.gmra.mxu2 %vm3698_vm7, %v17070_v29  ;;  %12545 = vmatmul.msk.bf16.vlgmr.msrb.gmra.mxu3 %vm3698_vm7, %v17070_v29  ;;  %v7016_v20 = vrot.slane %v17260_v13, 4  ;;  %v21056_v38 = vrot.slane %v17413_v59, 4 }
 0x51e   : > { %21005 = vst [vmem:[#allocation36_spill] sm:$0xff] %v17479_v23  ;;  %v5650_v7 = vpop.f32.mrf.mxu3 }
 0x51f   : > { %v5608_v1 = vpop.f32.mrf.mxu0  ;;  %v5942_v5 = vpack.c.bf16 %v5650_v7, %v5636_v46  ;;  %21006 = vst [vmem:[#allocation37_spill] sm:$0xff] %v17498_v11  ;;  %v8051_v46 = vshrl.u32 %v17343_v52, 16  ;;  %v17512_v7 = vperm.slane %v17236_v15, %v20976_v48 }
 0x520   : > { %v5941_v28 = vpack.c.bf16 %v5622_v19, %v5608_v1  ;;  %21007 = vst [vmem:[#allocation58_spill] sm:$0xff] %v17523_v45 }
 0x521   : > { %v7630_v1 = vrot.slane %v5942_v5, 4  ;;  %v17507_v19 = vsel %vm5950_vm8, %v5942_v5, %v7632_v55  ;;  %v17533_v52 = vpack.i.b16 %v8052_v60, %v8051_v46  ;;  %v21012_v55 = vld [vmem:[#allocation49_spill] sm:$0xff]  ;;  %v21013_v5 = vld [vmem:[#allocation56_spill] sm:$0xff]  ;;  %v7175_v60 = vsel %vm5950_vm8, %v7174_v47, %v17489_v37 }
 0x522   : > { %v7182_v44 = vrot.slane %v5941_v28, 4  ;;  %v17502_v39 = vsel %vm5950_vm8, %v5941_v28, %v7184_v63  ;;  %v17537_v63 = vperm.slane %v17136_v26, %v20976_v48  ;;  %v17545_v28 = vperm.slane %v17218_v14, %v20976_v48  ;;  %8733 = vmatpush.bf16.msrb.mxu0 %v21012_v55  ;;  %8747 = vmatpush.bf16.msrb.mxu1 %v21013_v5 }
 0x523   : > { %v17531_v15 = vsel %vm5950_vm8, %v7630_v1, %v17250_v34  ;;  %21008 = vst [vmem:[#allocation53_spill] sm:$0xff] %v17533_v52  ;;  %v17551_v34 = vperm.slane %v17224_v62, %v20976_v48  ;;  %v17555_v26 = vperm.slane %v17230_v27, %v20976_v48  ;;  %v7464_v1 = vrot.slane %v17262_v49, 4 }
 0x524   : > { %v17521_v31 = vsel %vm5950_vm8, %v7182_v44, %v17244_v53  ;;  %21009 = vst [vmem:[#allocation38_spill] sm:$0xff] %v17537_v63  ;;  %v17541_v53 = vperm.slane %v17120_v50, %v20976_v48  ;;  %v21016_v50 = vld [vmem:[#allocation67_spill] sm:$0xff]  ;;  %v21017_v44 = vld [vmem:[#allocation18_spill] sm:$0xff]  ;;  %v17564_v5 = vpack.i.b16 %v7175_v60, %v17362_v4  ;;  %v7623_v27 = vsel %vm5950_vm8, %v7622_v21, %v17512_v7 }
 0x525   : > { %21011 = vst [vmem:[#allocation51_spill] sm:$0xff] %v17545_v28  ;;  %8761 = vmatpush.bf16.msrb.mxu2 %v21016_v50  ;;  %8775 = vmatpush.bf16.msrb.mxu3 %v21017_v44  ;;  %v5676_v22 = vpop.f32.mrf.mxu1  ;;  %v5690_v62 = vpop.f32.mrf.mxu2  ;;  %v17569_v50 = vpack.i.b16 %v7623_v27, %v17390_v3  ;;  %v7962_v44 = vshrl.u32 %v7175_v60, 16  ;;  %v8058_v45 = vshrl.u32 %v7623_v27, 16  ;;  %v17573_v47 = vperm.slane %v17242_v24, %v20976_v48 }
 0x526   : > { %21010 = vst [vmem:[#allocation47_spill] sm:$0xff] %v17541_v53  ;;  %v5704_v55 = vpop.f32.mrf.mxu3  ;;  %v8057_v21 = vshrl.u32 %v17390_v3, 16  ;;  %v7688_v27 = vrot.slane %v17266_v43, 4  ;;  %v7624_v48 = vrot.slane %v17512_v7, 4 }
 0x527   : > { %21014 = vst [vmem:[#allocation44_spill] sm:$0xff] %v17551_v34  ;;  %v5662_v14 = vpop.f32.mrf.mxu0  ;;  %v5912_v52 = vpack.c.bf16 %v5704_v55, %v5690_v62  ;;  %v7570_v62 = vrot.slane %v17541_v53, 4 }
 0x528   : > { %21015 = vst [vmem:[#allocation42_spill] sm:$0xff] %v17555_v26  ;;  %v5911_v46 = vpack.c.bf16 %v5676_v22, %v5662_v14  ;;  %v7961_v22 = vshrl.u32 %v17362_v4, 16  ;;  %v7625_v7 = vsel %vm5950_vm8, %v17493_v57, %v7624_v48  ;;  %v7967_v57 = vshrl.u32 %v17375_v54, 16 }
 0x529   : > { %21018 = vst [vmem:[#allocation59_spill] sm:$0xff] %v17564_v5  ;;  %v7462_v5 = vrot.slane %v5912_v52, 4  ;;  %v17580_v23 = vsel %vm5950_vm8, %v5912_v52, %v7464_v1  ;;  %v17596_v52 = vpack.i.b16 %v8058_v45, %v8057_v21  ;;  %v7420_v45 = vrot.slane %v17288_v40, 4 }
 0x52a   : > { %21019 = vst [vmem:[#allocation52_spill] sm:$0xff] %v17569_v50  ;;  %v7014_v11 = vrot.slane %v5911_v46, 4  ;;  %v17576_v14 = vsel %vm5950_vm8, %v5911_v46, %v7016_v20  ;;  %v17588_v24 = vpack.i.b16 %v7962_v44, %v7961_v22  ;;  %v7178_v20 = vrot.slane %v17545_v28, 4 }
 0x52b   : > { %21020 = vst [vmem:[#allocation54_spill] sm:$0xff] %v17573_v47  ;;  %v17594_v4 = vsel %vm5950_vm8, %v7462_v5, %v17262_v49  ;;  %v7626_v46 = vrot.slane %v17573_v47, 4  ;;  %v6972_v44 = vrot.slane %v17286_v32, 4  ;;  %v7176_v49 = vrot.slane %v17489_v37, 4 }
 0x52c   : > { %v17586_v60 = vsel %vm5950_vm8, %v7014_v11, %v17260_v13  ;;  %21021 = vst [vmem:[#allocation49_spill] sm:$0xff] %v17588_v24  ;;  %v7240_v11 = vrot.slane %v17264_v33, 4  ;;  %v17613_v53 = vsel %vm5950_vm8, %v7178_v20, %v17551_v34  ;;  %v17617_v37 = vsel %vm5950_vm8, %v7570_v62, %v17537_v63  ;;  %12546 = vmatmul.msk.bf16.vlgmr.msra.gmra.mxu0 %vm3698_vm7, %v17070_v29  ;;  %v21030_v34 = vld [vmem:[#allocation35_spill] sm:$0xff] }
 0x52d   : > { %21022 = vst [vmem:[#allocation56_spill] sm:$0xff] %v17596_v52  ;;  %v5678_v55 = vpop.f32.mrf.mxu1  ;;  %v5692_v3 = vpop.f32.mrf.mxu2  ;;  %v7177_v47 = vsel %vm5950_vm8, %v17483_v16, %v7176_v49  ;;  %12547 = vmatmul.msk.bf16.vlgmr.msra.gmra.mxu1 %vm3698_vm7, %v17070_v29  ;;  %12548 = vmatmul.msk.bf16.vlgmr.msra.gmra.mxu2 %vm3698_vm7, %v17070_v29  ;;  %v21032_v49 = vld [vmem:[#allocation76_spill] sm:$0xff] }
 0x52e   : > { %v5706_v1 = vpop.f32.mrf.mxu3  ;;  %12549 = vmatmul.msk.bf16.vlgmr.msra.gmra.mxu3 %vm3698_vm7, %v17070_v29  ;;  %v7968_v63 = vshrl.u32 %v7177_v47, 16  ;;  %8833 = vmatpush.bf16.msra.mxu2 %v21030_v34 }
 0x52f   : > { %v5664_v22 = vpop.f32.mrf.mxu0  ;;  %v5944_v13 = vpack.c.bf16 %v5706_v1, %v5692_v3  ;;  %v17632_v1 = vpack.i.b16 %v7625_v7, %v17405_v56 }
 0x530   : > { %v5943_v21 = vpack.c.bf16 %v5678_v55, %v5664_v22  ;;  %v17623_v55 = vpack.i.b16 %v7177_v47, %v17375_v54  ;;  %v21025_v22 = vld [vmem:[#allocation70_spill] sm:$0xff]  ;;  %v21029_v54 = vld [vmem:[#allocation57_spill] sm:$0xff] }
 0x531   : > { %v7686_v3 = vrot.slane %v5944_v13, 4  ;;  %v17629_v20 = vsel %vm5950_vm8, %v5944_v13, %v7688_v27  ;;  %21024 = vst [vmem:[#allocation18_spill] sm:$0xff] %v17632_v1  ;;  %v6969_v13 = vperm.slane %v17457_v36, %v21029_v54  ;;  %v7417_v62 = vperm.slane %v17461_v2, %v21029_v54 }
 0x532   : > { %v7238_v28 = vrot.slane %v5943_v21, 4  ;;  %v17620_v5 = vsel %vm5950_vm8, %v5943_v21, %v7240_v11  ;;  %21023 = vst [vmem:[#allocation67_spill] sm:$0xff] %v17623_v55  ;;  %v8063_v11 = vshrl.u32 %v17405_v56, 16  ;;  %v17672_v36 = vsel %vm5950_vm8, %v7626_v46, %v17555_v26  ;;  %v21068_v55 = vld [vmem:[#allocation45_spill] sm:$0xff] }
 0x533   : > { %v17652_v27 = vsel %vm5950_vm8, %v7686_v3, %v17266_v43  ;;  %v21031_v43 = vld [vmem:[#allocation78_spill] sm:$0xff]  ;;  %v6965_v2 = vperm.slane %v17466_v51, %v21029_v54  ;;  %v17680_v56 = vpack.i.b16 %v17672_v36, %v17617_v37  ;;  %v6996_v46 = vrot.slane %v6969_v13, 4 }
 0x534   : > { %v17642_v48 = vsel %vm5950_vm8, %v7238_v28, %v17264_v33  ;;  %v21027_v33 = vld [vmem:[#allocation66_spill] sm:$0xff]  ;;  %v21028_v28 = vld [vmem:[#allocation64_spill] sm:$0xff]  ;;  %8847 = vmatpush.bf16.msra.mxu3 %v21031_v43  ;;  %v17676_v43 = vpack.i.b16 %v7968_v63, %v7967_v57  ;;  %v7413_v63 = vperm.slane %v17471_v9, %v21029_v54  ;;  %v21069_v50 = vrot.slane %v21068_v55, 4 }
 0x535   : > { %8805 = vmatpush.bf16.msra.mxu0 %v21027_v33  ;;  %8819 = vmatpush.bf16.msra.mxu1 %v21028_v28  ;;  %v5732_v21 = vpop.f32.mrf.mxu1  ;;  %v8064_v33 = vshrl.u32 %v7625_v7, 16  ;;  %v17668_v28 = vpack.i.b16 %v17613_v53, %v21032_v49  ;;  %v5746_v34 = vpop.f32.mrf.mxu2  ;;  %21035 = vst [vmem:[#allocation64_spill] sm:$0xff] %v17680_v56  ;;  %v6984_v7 = vrot.slane %v6965_v2, 4 }
 0x536   : > { %v5760_v16 = vpop.f32.mrf.mxu3  ;;  %21034 = vst [vmem:[#allocation66_spill] sm:$0xff] %v17676_v43 }
 0x537   : > { %v5718_v3 = vpop.f32.mrf.mxu0  ;;  %21033 = vst [vmem:[#allocation70_spill] sm:$0xff] %v17668_v28  ;;  %v5914_v58 = vpack.c.bf16 %v5760_v16, %v5746_v34  ;;  %v17684_v1 = vpack.i.b16 %v8064_v33, %v8063_v11  ;;  %v7444_v16 = vrot.slane %v7417_v62, 4 }
 0x538   : > { %v5913_v47 = vpack.c.bf16 %v5732_v21, %v5718_v3 }
 0x539   : > { %21036 = vst [vmem:[#allocation57_spill] sm:$0xff] %v17684_v1  ;;  %v7418_v3 = vrot.slane %v5914_v58, 4  ;;  %v7421_v56 = vsel %vm5950_vm8, %v5914_v58, %v7420_v45  ;;  %v7193_v45 = vperm.slane %v17502_v39, %v21029_v54  ;;  %v7189_v39 = vperm.slane %v17521_v31, %v21029_v54 }
 0x53a   : > { %v6970_v26 = vrot.slane %v5913_v47, 4  ;;  %v6973_v51 = vsel %vm5950_vm8, %v5913_v47, %v6972_v44  ;;  %v7429_v33 = vperm.slane %v7421_v56, %v21029_v54 }
 0x53b   : > { %v6981_v57 = vperm.slane %v6973_v51, %v21029_v54  ;;  %v7419_v9 = vsel %vm5950_vm8, %v7418_v3, %v17288_v40  ;;  %v7220_v31 = vrot.slane %v7193_v45, 4  ;;  %v7208_v17 = vrot.slane %v7189_v39, 4 }
 0x53c   : > { %v6971_v11 = vsel %vm5950_vm8, %v6970_v26, %v17286_v32  ;;  %v7425_v51 = vperm.slane %v7419_v9, %v21029_v54  ;;  %v7442_v21 = vrot.slane %v7429_v33, 4  ;;  %v17703_v58 = vsel %vm5950_vm8, %v7429_v33, %v7444_v16  ;;  %12550 = vmatmul.msk.bf16.vlgmr.msrb.gmra.mxu0 %vm3698_vm7, %v17070_v29 }
 0x53d   : > { %v6977_v34 = vperm.slane %v6971_v11, %v21029_v54  ;;  %v6994_v44 = vrot.slane %v6981_v57, 4  ;;  %v17697_v47 = vsel %vm5950_vm8, %v6981_v57, %v6996_v46  ;;  %v7432_v32 = vrot.slane %v7413_v63, 4  ;;  %v5734_v57 = vpop.f32.mrf.mxu1  ;;  %v5748_v40 = vpop.f32.mrf.mxu2  ;;  %12551 = vmatmul.msk.bf16.vlgmr.msrb.gmra.mxu1 %vm3698_vm7, %v17070_v29  ;;  %12552 = vmatmul.msk.bf16.vlgmr.msrb.gmra.mxu2 %vm3698_vm7, %v17070_v29 }
 0x53e   : > { %v7430_v28 = vrot.slane %v7425_v51, 4  ;;  %v5762_v3 = vpop.f32.mrf.mxu3  ;;  %12553 = vmatmul.msk.bf16.vlgmr.msrb.gmra.mxu3 %vm3698_vm7, %v17070_v29 }
 0x53f   : > { %v6982_v26 = vrot.slane %v6977_v34, 4  ;;  %v17707_v56 = vsel %vm5950_vm8, %v6977_v34, %v6984_v7  ;;  %v17710_v11 = vsel %vm5950_vm8, %v6994_v44, %v6969_v13  ;;  %v5720_v46 = vpop.f32.mrf.mxu0  ;;  %v17721_v13 = vsel %vm5950_vm8, %v7425_v51, %v7432_v32  ;;  %v21044_v32 = vld [vmem:[#allocation34_spill] sm:$0xff] }
 0x540   : > { %v17724_v34 = vsel %vm5950_vm8, %v7442_v21, %v7417_v62  ;;  %v17727_v44 = vsel %vm5950_vm8, %v7430_v28, %v7413_v63  ;;  %v5945_v51 = vpack.c.bf16 %v5734_v57, %v5720_v46  ;;  %v5946_v62 = vpack.c.bf16 %v5762_v3, %v5748_v40  ;;  %v21039_v40 = vld [vmem:[#allocation32_spill] sm:$0xff]  ;;  %8919 = vmatpush.bf16.msrb.mxu3 %v21044_v32 }
 0x541   : > { %v17718_v7 = vsel %vm5950_vm8, %v6982_v26, %v6965_v2  ;;  %v7641_v2 = vperm.slane %v17507_v19, %v21029_v54  ;;  %v7973_v21 = vshrl.u32 %v21032_v49, 16  ;;  %v7974_v63 = vshrl.u32 %v17613_v53, 16  ;;  %8877 = vmatpush.bf16.msrb.mxu0 %v21039_v40  ;;  %v21040_v49 = vld [vmem:[#allocation30_spill] sm:$0xff]  ;;  %v21043_v28 = vld [vmem:[#allocation28_spill] sm:$0xff] }
 0x542   : > { %v7637_v19 = vperm.slane %v17531_v15, %v21029_v54  ;;  %v7194_v26 = vrot.slane %v5945_v51, 4  ;;  %v21038_v46 = vrot.slane %v17311_v8, 4  ;;  %8891 = vmatpush.bf16.msrb.mxu1 %v21040_v49  ;;  %v7642_v3 = vrot.slane %v5946_v62, 4  ;;  %8905 = vmatpush.bf16.msrb.mxu2 %v21043_v28 }
 0x543   : > { %v21041_v15 = vrot.slane %v17313_v18, 4  ;;  %v17759_v16 = vpack.i.b16 %v7974_v63, %v7973_v21  ;;  %v7668_v29 = vrot.slane %v7641_v2, 4 }
 0x544   : > { %v7197_v57 = vsel %vm5950_vm8, %v5945_v51, %v21038_v46  ;;  %v7195_v51 = vsel %vm5950_vm8, %v7194_v26, %v17311_v8  ;;  %v7643_v21 = vsel %vm5950_vm8, %v7642_v3, %v17313_v18  ;;  %v7656_v26 = vrot.slane %v7637_v19, 4 }
 0x545   : > { %v7205_v53 = vperm.slane %v7197_v57, %v21029_v54  ;;  %v7645_v33 = vsel %vm5950_vm8, %v5946_v62, %v21041_v15  ;;  %21042 = vst [vmem:[#allocation35_spill] sm:$0xff] %v17759_v16  ;;  %v5788_v57 = vpop.f32.mrf.mxu1  ;;  %v7201_v49 = vperm.slane %v7195_v51, %v21029_v54  ;;  %v5802_v63 = vpop.f32.mrf.mxu2  ;;  %v7649_v32 = vperm.slane %v7643_v21, %v21029_v54 }
 0x546   : > { %v7653_v46 = vperm.slane %v7645_v33, %v21029_v54  ;;  %v5816_v28 = vpop.f32.mrf.mxu3  ;;  %v7025_v18 = vperm.slane %v17576_v14, %v21029_v54  ;;  %v8070_v21 = vshrl.u32 %v17672_v36, 16  ;;  %v8069_v36 = vshrl.u32 %v17617_v37, 16 }
 0x547   : > { %v5774_v40 = vpop.f32.mrf.mxu0  ;;  %v7218_v12 = vrot.slane %v7205_v53, 4  ;;  %v17768_v62 = vsel %vm5950_vm8, %v7205_v53, %v7220_v31  ;;  %v7206_v9 = vrot.slane %v7201_v49, 4  ;;  %v17778_v51 = vsel %vm5950_vm8, %v7201_v49, %v7208_v17 }
 0x548   : > { %v7666_v15 = vrot.slane %v7653_v46, 4  ;;  %v17774_v8 = vsel %vm5950_vm8, %v7653_v46, %v7668_v29  ;;  %v7654_v53 = vrot.slane %v7649_v32, 4  ;;  %v7473_v29 = vperm.slane %v17580_v23, %v21029_v54 }
 0x549   : > { %v17781_v31 = vsel %vm5950_vm8, %v7218_v12, %v7193_v45  ;;  %v17790_v46 = vsel %vm5950_vm8, %v7206_v9, %v7189_v39  ;;  %v17793_v17 = vsel %vm5950_vm8, %v7649_v32, %v7656_v26  ;;  %v7021_v23 = vperm.slane %v17586_v60, %v21029_v54 }
 0x54a   : > { %v17796_v12 = vsel %vm5950_vm8, %v7666_v15, %v7641_v2  ;;  %v17799_v45 = vsel %vm5950_vm8, %v7654_v53, %v7637_v19  ;;  %v5915_v9 = vpack.c.bf16 %v5788_v57, %v5774_v40  ;;  %v7052_v26 = vrot.slane %v7025_v18, 4 }
 0x54b   : > { %v5916_v2 = vpack.c.bf16 %v5816_v28, %v5802_v63  ;;  %v17809_v53 = vpack.i.b16 %v8070_v21, %v8069_v36  ;;  %v7469_v33 = vperm.slane %v17594_v4, %v21029_v54  ;;  %v7500_v37 = vrot.slane %v7473_v29, 4 }
 0x54c   : > { %v7026_v49 = vrot.slane %v5915_v9, 4  ;;  %v21046_v60 = vrot.slane %v17370_v30, 4  ;;  %v21047_v39 = vrot.slane %v21025_v22, 4  ;;  %v7040_v19 = vrot.slane %v7021_v23, 4  ;;  %12554 = vmatmul.msk.bf16.vlgmr.msra.gmra.mxu0 %vm3698_vm7, %v17830_v6 }
 0x54d   : > { %v5790_v3 = vpop.f32.mrf.mxu1  ;;  %21045 = vst [vmem:[#allocation78_spill] sm:$0xff] %v17809_v53  ;;  %v5804_v57 = vpop.f32.mrf.mxu2  ;;  %v7474_v28 = vrot.slane %v5916_v2, 4  ;;  %12555 = vmatmul.msk.bf16.vlgmr.msra.gmra.mxu1 %vm3698_vm7, %v17830_v6  ;;  %12556 = vmatmul.msk.bf16.vlgmr.msra.gmra.mxu2 %vm3698_vm7, %v17830_v6 }
 0x54e   : > { %v7029_v40 = vsel %vm5950_vm8, %v5915_v9, %v21046_v60  ;;  %v5818_v32 = vpop.f32.mrf.mxu3  ;;  %v7477_v21 = vsel %vm5950_vm8, %v5916_v2, %v21047_v39  ;;  %v7027_v4 = vsel %vm5950_vm8, %v7026_v49, %v17370_v30  ;;  %12557 = vmatmul.msk.bf16.vlgmr.msra.gmra.mxu3 %vm3698_vm7, %v17830_v6 }
 0x54f   : > { %v5776_v15 = vpop.f32.mrf.mxu0  ;;  %v7037_v63 = vperm.slane %v7029_v40, %v21029_v54  ;;  %v7485_v14 = vperm.slane %v7477_v21, %v21029_v54  ;;  %v5948_v53 = vpack.c.bf16 %v5818_v32, %v5804_v57  ;;  %v7033_v0 = vperm.slane %v7027_v4, %v21029_v54  ;;  %v21050_v21 = vld [vmem:[#allocation29_spill] sm:$0xff]  ;;  %v21051_v4 = vld [vmem:[#allocation68_spill] sm:$0xff] }
 0x550   : > { %v5947_v36 = vpack.c.bf16 %v5790_v3, %v5776_v15  ;;  %v7475_v40 = vsel %vm5950_vm8, %v7474_v28, %v21025_v22  ;;  %v7488_v32 = vrot.slane %v7469_v33, 4  ;;  %v21048_v15 = vld [vmem:[#allocation22_spill] sm:$0xff]  ;;  %8977 = vmatpush.bf16.msra.mxu2 %v21050_v21  ;;  %8991 = vmatpush.bf16.msra.mxu3 %v21051_v4  ;;  %v7245_v21 = vperm.slane %v17642_v48, %v21029_v54 }
 0x551   : > { %v7050_v9 = vrot.slane %v7037_v63, 4  ;;  %v17825_v60 = vsel %vm5950_vm8, %v7037_v63, %v7052_v26  ;;  %v7481_v30 = vperm.slane %v7475_v40, %v21029_v54  ;;  %v7498_v3 = vrot.slane %v7485_v14, 4  ;;  %8949 = vmatpush.bf16.msra.mxu0 %v21048_v15  ;;  %v21074_v28 = vld [vmem:[#allocation38_spill] sm:$0xff] }
 0x552   : > { %v17838_v49 = vsel %vm5950_vm8, %v7485_v14, %v7500_v37  ;;  %v7038_v22 = vrot.slane %v7033_v0, 4  ;;  %v17846_v26 = vsel %vm5950_vm8, %v7033_v0, %v7040_v19  ;;  %v7249_v14 = vperm.slane %v17620_v5, %v21029_v54  ;;  %v21049_v37 = vld [vmem:[#allocation55_spill] sm:$0xff] }
 0x553   : > { %v17849_v2 = vsel %vm5950_vm8, %v7050_v9, %v7025_v18  ;;  %8963 = vmatpush.bf16.msra.mxu1 %v21049_v37  ;;  %v7486_v57 = vrot.slane %v7481_v30, 4  ;;  %v17863_v18 = vsel %vm5950_vm8, %v7481_v30, %v7488_v32  ;;  %v17866_v5 = vsel %vm5950_vm8, %v7498_v3, %v7473_v29  ;;  %v17869_v9 = vld [vmem:[%s13184_s6] sm:$0xf]  ;;  %s12688_s6 = sshll.u32 (%p13032_p9), %s13010_s25, 5 }
 0x554   : > { %v17860_v0 = vsel %vm5950_vm8, %v7038_v22, %v7021_v23  ;;  %v7693_v22 = vperm.slane %v17652_v27, %v21029_v54  ;;  %v7250_v39 = vrot.slane %v5947_v36, 4  ;;  %v7698_v63 = vrot.slane %v5948_v53, 4  ;;  %s19652_s14 = scalar_lea.vmem (%p13032_p9), %s21253_s23, %s12688_s6 }
 0x555   : > { %v17871_v40 = vpop.f32.mrf.mxu1  ;;  %v17877_v4 = vsel %vm5950_vm8, %v7486_v57, %v7469_v33  ;;  %v17879_v23 = vpop.f32.mrf.mxu2  ;;  %v21055_v33 = vrot.slane %v17407_v61, 4  ;;  %v7701_v29 = vsel %vm5950_vm8, %v5948_v53, %v21056_v38  ;;  %v17896_v32 = vperm.slane %v17869_v9, 0  ;;  %v10704_v53 = vld [vmem:[%s373_s21] sm:$0xf] }
 0x556   : > { %v17881_v30 = vpop.f32.mrf.mxu3  ;;  %v7276_v15 = vrot.slane %v7249_v14, 4  ;;  %v7697_v27 = vperm.slane %v17629_v20, %v21029_v54  ;;  %v7251_v37 = vsel %vm5950_vm8, %v7250_v39, %v17407_v61  ;;  %v7264_v3 = vrot.slane %v7245_v21, 4 }
 0x557   : > { %v8159_v19 = vpop.f32.mrf.mxu0  ;;  %v7253_v57 = vsel %vm5950_vm8, %v5947_v36, %v21055_v33  ;;  %v7257_v36 = vperm.slane %v7251_v37, %v21029_v54  ;;  %v7699_v33 = vsel %vm5950_vm8, %v7698_v63, %v17413_v59  ;;  %v7709_v38 = vperm.slane %v7701_v29, %v21029_v54 }
 0x558   : > { %v7261_v48 = vperm.slane %v7253_v57, %v21029_v54  ;;  %v7712_v42 = vrot.slane %v7693_v22, 4  ;;  %v7705_v61 = vperm.slane %v7699_v33, %v21029_v54  ;;  %v10448_v41 = vmul.f32 %v17896_v32, %v8159_v19 }
 0x559   : > { %v7262_v39 = vrot.slane %v7257_v36, 4  ;;  %v17914_v57 = vsel %vm5950_vm8, %v7257_v36, %v7264_v3  ;;  %v7722_v37 = vrot.slane %v7709_v38, 4  ;;  %v17924_v10 = vperm.slane %v10704_v53, 0 }
 0x55a   : > { %v7274_v25 = vrot.slane %v7261_v48, 4  ;;  %v17910_v20 = vsel %vm5950_vm8, %v7261_v48, %v7276_v15  ;;  %21057 = vst [vmem:[#allocation76_spill] sm:$0xff] %v17914_v57  ;;  %v7710_v63 = vrot.slane %v7705_v61, 4  ;;  %v17921_v29 = vsel %vm5950_vm8, %v7705_v61, %v7712_v42 }
 0x55b   : > { %21059 = vst [vmem:[#allocation30_spill] sm:$0xff] %v17921_v29  ;;  %v7724_v54 = vrot.slane %v7697_v27, 4  ;;  %v17927_v33 = vsel %vm5950_vm8, %v7262_v39, %v7245_v21  ;;  %v17935_v42 = vsel %vm5950_vm8, %v7722_v37, %v7697_v27  ;;  %v17973_v27 = vperm.slane %v17869_v9, 3  ;;  %v21063_v39 = vld [vmem:[#allocation23_spill] sm:$0xff]  ;;  %v21064_v21 = vld [vmem:[#allocation72_spill] sm:$0xff] }
 0x55c   : > { %v17918_v59 = vsel %vm5950_vm8, %v7274_v25, %v7249_v14  ;;  %v17932_v14 = vsel %vm5950_vm8, %v7710_v63, %v7693_v22  ;;  %v10714_v25 = vadd.f32 %v17924_v10, %v10448_v41  ;;  %v17947_v22 = vperm.slane %v17869_v9, 1  ;;  %12558 = vmatmul.msk.bf16.vlgmr.msrb.gmra.mxu0 %vm3698_vm7, %v17830_v6 }
 0x55d   : > { %21058 = vst [vmem:[#allocation32_spill] sm:$0xff] %v17918_v59  ;;  %v8175_v48 = vpop.f32.mrf.mxu1  ;;  %v8189_v3 = vpop.f32.mrf.mxu2  ;;  %v17940_v59 = vsel %vm5950_vm8, %v7709_v38, %v7724_v54  ;;  %12559 = vmatmul.msk.bf16.vlgmr.msrb.gmra.mxu1 %vm3698_vm7, %v17830_v6  ;;  %v17955_v38 = vperm.slane %v10704_v53, 1  ;;  %v17958_v63 = vperm.slane %v17869_v9, 2  ;;  %v17960_v54 = vperm.slane %v10704_v53, 2  ;;  %12560 = vmatmul.msk.bf16.vlgmr.msrb.gmra.mxu2 %vm3698_vm7, %v17830_v6  ;;  %v21065_v9 = vld [vmem:[#allocation69_spill] sm:$0xff] }
 0x55e   : > { %v8203_v36 = vpop.f32.mrf.mxu3  ;;  %21061 = vst [vmem:[#allocation28_spill] sm:$0xff] %v17932_v14  ;;  %12561 = vmatmul.msk.bf16.vlgmr.msrb.gmra.mxu3 %vm3698_vm7, %v17830_v6  ;;  %v10449_v37 = vmul.f32 %v17947_v22, %v17871_v40  ;;  %v17975_v19 = vperm.slane %v10704_v53, 3  ;;  %9021 = vmatpush.bf16.msrb.mxu0 %v21063_v39  ;;  %v21066_v53 = vld [vmem:[#allocation75_spill] sm:$0xff]  ;;  %v10451_v39 = vmul.f32 %v17973_v27, %v17881_v30 }
 0x55f   : > { %v8161_v15 = vpop.f32.mrf.mxu0  ;;  %10970 = vst [vmem:[%s17967_s8] sm:$0xff] %v10714_v25  ;;  %9035 = vmatpush.bf16.msrb.mxu1 %v21064_v21  ;;  %v10450_v57 = vmul.f32 %v17958_v63, %v17879_v23  ;;  %v10453_v25 = vmul.f32 %v17947_v22, %v8175_v48  ;;  %9049 = vmatpush.bf16.msrb.mxu2 %v21065_v9  ;;  %v21076_v14 = vld [vmem:[#allocation47_spill] sm:$0xff] }
 0x560   : > { %v10452_v61 = vmul.f32 %v17896_v32, %v8161_v15  ;;  %9063 = vmatpush.bf16.msrb.mxu3 %v21066_v53  ;;  %v10715_v41 = vadd.f32 %v17955_v38, %v10449_v37  ;;  %v10454_v21 = vmul.f32 %v17958_v63, %v8189_v3  ;;  %v10455_v9 = vmul.f32 %v17973_v27, %v8203_v36  ;;  %v21081_v37 = vld [vmem:[#allocation54_spill] sm:$0xff] }
 0x561   : > { %v10716_v48 = vadd.f32 %v17960_v54, %v10450_v57  ;;  %v10717_v30 = vadd.f32 %v17975_v19, %v10451_v39  ;;  %v10719_v3 = vadd.f32 %v17955_v38, %v10453_v25 }
 0x562   : > { %v10718_v40 = vadd.f32 %v17924_v10, %v10452_v61  ;;  %10971 = vst [vmem:[%s17967_s8 + $0x8] sm:$0xff] %v10715_v41  ;;  %v10720_v57 = vadd.f32 %v17960_v54, %v10454_v21  ;;  %v7125_v41 = vsel %vm5950_vm8, %v21070_v35, %v21069_v50  ;;  %v10721_v25 = vadd.f32 %v17975_v19, %v10455_v9  ;;  %v21079_v9 = vld [vmem:[#allocation42_spill] sm:$0xff] }
 0x563   : > { %10972 = vst [vmem:[%s17967_s8 + $0x10] sm:$0xff] %v10716_v48  ;;  %v21073_v48 = vld [vmem:[#allocation51_spill] sm:$0xff] }
 0x564   : > { %10973 = vst [vmem:[%s17967_s8 + $0x18] sm:$0xff] %v10717_v30 }
 0x565   : > { %v8245_v52 = vpop.f32.mrf.mxu1  ;;  %v8259_v53 = vpop.f32.mrf.mxu2  ;;  %10974 = vst [vmem:[%s17967_s8 + $0x20] sm:$0xff] %v10718_v40 }
 0x566   : > { %v8273_v24 = vpop.f32.mrf.mxu3  ;;  %v10457_v15 = vmul.f32 %v17947_v22, %v8245_v52  ;;  %v10458_v36 = vmul.f32 %v17958_v63, %v8259_v53  ;;  %v21071_v52 = vld [vmem:[#allocation44_spill] sm:$0xff]  ;;  %v21075_v53 = vrot.slane %v21074_v28, 4  ;;  %10975 = vst [vmem:[%s17967_s8 + $0x28] sm:$0xff] %v10719_v3 }
 0x567   : > { %v8231_v23 = vpop.f32.mrf.mxu0  ;;  %v10459_v39 = vmul.f32 %v17973_v27, %v8273_v24  ;;  %v21080_v24 = vrot.slane %v21079_v9, 4  ;;  %10976 = vst [vmem:[%s17967_s8 + $0x30] sm:$0xff] %v10720_v57  ;;  %v21084_v57 = vld [vmem:[#allocation60_spill] sm:$0xff] }
 0x568   : > { %v10456_v29 = vmul.f32 %v17896_v32, %v8231_v23  ;;  %v21072_v23 = vrot.slane %v21071_v52, 4  ;;  %v7573_v61 = vsel %vm5950_vm8, %v21076_v14, %v21075_v53  ;;  %v7979_v14 = vshrl.u32 %v7125_v41, 16  ;;  %10977 = vst [vmem:[%s17967_s8 + $0x38] sm:$0xff] %v10721_v25 }
 0x569   : > { %v7629_v52 = vsel %vm5950_vm8, %v21081_v37, %v21080_v24  ;;  %v8075_v53 = vshrl.u32 %v7573_v61, 16  ;;  %v10725_v9 = vadd.f32 %v17975_v19, %v10459_v39  ;;  %v18053_v40 = vperm.slane %v17710_v11, %v21084_v57 }
 0x56a   : > { %v7181_v21 = vsel %vm5950_vm8, %v21073_v48, %v21072_v23  ;;  %v10722_v35 = vadd.f32 %v17924_v10, %v10456_v29  ;;  %v10723_v23 = vadd.f32 %v17955_v38, %v10457_v15  ;;  %v18031_v28 = vpack.i.b16 %v7629_v52, %v7573_v61 }
 0x56b   : > { %v18023_v30 = vpack.i.b16 %v7181_v21, %v7125_v41  ;;  %v7980_v48 = vshrl.u32 %v7181_v21, 16  ;;  %v10724_v29 = vadd.f32 %v17960_v54, %v10458_v36  ;;  %v8076_v55 = vshrl.u32 %v7629_v52, 16  ;;  %10981 = vst [vmem:[%s17967_s8 + $0x58] sm:$0xff] %v10725_v9 }
 0x56c   : > { %21082 = vst [vmem:[#allocation22_spill] sm:$0xff] %v18031_v28  ;;  %v18044_v36 = vperm.slane %v17697_v47, %v21084_v57  ;;  %12562 = vmatmul.msk.bf16.vlgmr.msra.gmra.mxu0 %vm3698_vm7, %v17830_v6 }
 0x56d   : > { %21078 = vst [vmem:[#allocation34_spill] sm:$0xff] %v18023_v30  ;;  %v8247_v3 = vpop.f32.mrf.mxu1  ;;  %v18040_v41 = vpack.i.b16 %v7980_v48, %v7979_v14  ;;  %v8261_v39 = vpop.f32.mrf.mxu2  ;;  %v18049_v52 = vpack.i.b16 %v8076_v55, %v8075_v53  ;;  %v18057_v14 = vperm.slane %v17703_v58, %v21084_v57  ;;  %v18064_v48 = vperm.slane %v17707_v56, %v21084_v57 }
 0x56e   : > { %10978 = vst [vmem:[%s17967_s8 + $0x40] sm:$0xff] %v10722_v35  ;;  %v10461_v25 = vmul.f32 %v17947_v22, %v8247_v3  ;;  %v8275_v21 = vpop.f32.mrf.mxu3  ;;  %v10462_v47 = vmul.f32 %v17958_v63, %v8261_v39  ;;  %v18068_v55 = vperm.slane %v17721_v13, %v21084_v57  ;;  %v18079_v53 = vperm.slane %v17768_v62, %v21084_v57 }
 0x56f   : > { %v8233_v37 = vpop.f32.mrf.mxu0  ;;  %21083 = vst [vmem:[#allocation55_spill] sm:$0xff] %v18040_v41  ;;  %v10463_v35 = vmul.f32 %v17973_v27, %v8275_v21  ;;  %12563 = vmatmul.msk.bf16.vlgmr.msra.gmra.mxu1 %vm3698_vm7, %v17830_v6  ;;  %v18098_v3 = vperm.slane %v17718_v7, %v21084_v57  ;;  %12564 = vmatmul.msk.bf16.vlgmr.msra.gmra.mxu2 %vm3698_vm7, %v17830_v6  ;;  %v7012_v39 = vrot.slane %v18064_v48, 4 }
 0x570   : > { %v10460_v61 = vmul.f32 %v17896_v32, %v8233_v37  ;;  %21085 = vst [vmem:[#allocation29_spill] sm:$0xff] %v18049_v52  ;;  %v10727_v58 = vadd.f32 %v17955_v38, %v10461_v25  ;;  %v10728_v56 = vadd.f32 %v17960_v54, %v10462_v47  ;;  %v7458_v25 = vrot.slane %v18057_v14, 4  ;;  %12565 = vmatmul.msk.bf16.vlgmr.msra.gmra.mxu3 %vm3698_vm7, %v17830_v6  ;;  %v21088_v47 = vld [vmem:[#allocation71_spill] sm:$0xff] }
 0x571   : > { %10979 = vst [vmem:[%s17967_s8 + $0x48] sm:$0xff] %v10723_v23  ;;  %v18075_v23 = vperm.slane %v17724_v34, %v21084_v57  ;;  %v10729_v13 = vadd.f32 %v17975_v19, %v10463_v35  ;;  %v18111_v7 = vperm.slane %v17727_v44, %v21084_v57  ;;  %v18115_v21 = vperm.slane %v17781_v31, %v21084_v57  ;;  %v21089_v35 = vld [vmem:[#allocation74_spill] sm:$0xff]  ;;  %v21091_v34 = vld [vmem:[#allocation41_spill] sm:$0xff]  ;;  %v21092_v31 = vld [vmem:[#allocation48_spill] sm:$0xff] }
 0x572   : > { %10980 = vst [vmem:[%s17967_s8 + $0x50] sm:$0xff] %v10724_v29  ;;  %v10726_v11 = vadd.f32 %v17924_v10, %v10460_v61  ;;  %v18086_v29 = vperm.slane %v17774_v8, %v21084_v57  ;;  %v7006_v8 = vrot.slane %v18053_v40, 4  ;;  %v7010_v61 = vrot.slane %v18044_v36, 4  ;;  %9093 = vmatpush.bf16.msra.mxu0 %v21088_v47  ;;  %9107 = vmatpush.bf16.msra.mxu1 %v21089_v35 }
 0x573   : > { %21086 = vst [vmem:[#allocation68_spill] sm:$0xff] %v18079_v53  ;;  %v7454_v37 = vrot.slane %v18075_v23, 4  ;;  %v18125_v62 = vperm.slane %v17778_v51, %v21084_v57  ;;  %9121 = vmatpush.bf16.msra.mxu2 %v21091_v34  ;;  %9135 = vmatpush.bf16.msra.mxu3 %v21092_v31  ;;  %v18140_v34 = vperm.slane %v17796_v12, %v21084_v57 }
 0x574   : > { %10982 = vst [vmem:[%s17967_s8 + $0x60] sm:$0xff] %v10726_v11 }
 0x575   : > { %10983 = vst [vmem:[%s17967_s8 + $0x68] sm:$0xff] %v10727_v58  ;;  %v8317_v35 = vpop.f32.mrf.mxu1  ;;  %v8331_v15 = vpop.f32.mrf.mxu2 }
 0x576   : > { %10984 = vst [vmem:[%s17967_s8 + $0x70] sm:$0xff] %v10728_v56  ;;  %v18133_v56 = vperm.slane %v17790_v46, %v21084_v57  ;;  %v10465_v51 = vmul.f32 %v17947_v22, %v8317_v35  ;;  %v8345_v58 = vpop.f32.mrf.mxu3  ;;  %v10466_v46 = vmul.f32 %v17958_v63, %v8331_v15  ;;  %v18151_v35 = vperm.slane %v17838_v49, %v21084_v57 }
 0x577   : > { %21090 = vst [vmem:[#allocation23_spill] sm:$0xff] %v18125_v62  ;;  %v8303_v47 = vpop.f32.mrf.mxu0  ;;  %v10467_v31 = vmul.f32 %v17973_v27, %v8345_v58  ;;  %v18168_v49 = vperm.slane %v17793_v17, %v21084_v57  ;;  %v18186_v17 = vperm.slane %v17860_v0, %v21084_v57  ;;  %v18202_v0 = vsel %vm5950_vm8, %v7006_v8, %v18098_v3 }
 0x578   : > { %10985 = vst [vmem:[%s17967_s8 + $0x78] sm:$0xff] %v10729_v13  ;;  %v10464_v24 = vmul.f32 %v17896_v32, %v8303_v47  ;;  %v18144_v13 = vperm.slane %v17825_v60, %v21084_v57  ;;  %v10731_v12 = vadd.f32 %v17955_v38, %v10465_v51  ;;  %v18158_v60 = vperm.slane %v17849_v2, %v21084_v57 }
 0x579   : > { %v10732_v15 = vadd.f32 %v17960_v54, %v10466_v46  ;;  %v10733_v58 = vadd.f32 %v17975_v19, %v10467_v31  ;;  %v18164_v47 = vperm.slane %v17799_v45, %v21084_v57  ;;  %v18181_v45 = vsel %vm5950_vm8, %v7010_v61, %v18064_v48 }
 0x57a   : > { %v10730_v11 = vadd.f32 %v17924_v10, %v10464_v24  ;;  %v18172_v24 = vperm.slane %v17846_v26, %v21084_v57  ;;  %10987 = vst [vmem:[%s17967_s8 + $0x88] sm:$0xff] %v10731_v12  ;;  %v18190_v26 = vperm.slane %v17863_v18, %v21084_v57  ;;  %v7008_v31 = vrot.slane %v18098_v3, 4 }
 0x57b   : > { %10988 = vst [vmem:[%s17967_s8 + $0x90] sm:$0xff] %v10732_v15  ;;  %v18207_v18 = vsel %vm5950_vm8, %v18044_v36, %v7012_v39  ;;  %v18212_v15 = vperm.slane %v17877_v4, %v21084_v57  ;;  %v18218_v8 = vperm.slane %v17910_v20, %v21084_v57  ;;  %v21093_v20 = vld [vmem:[#allocation32_spill] sm:$0xff] }
 0x57c   : > { %10986 = vst [vmem:[%s17967_s8 + $0x80] sm:$0xff] %v10730_v11  ;;  %v18194_v11 = vperm.slane %v17866_v5, %v21084_v57  ;;  %v18224_v39 = vsel %vm5950_vm8, %v18053_v40, %v7008_v31  ;;  %v18232_v51 = vperm.slane %v21093_v20, %v21084_v57  ;;  %v18240_v40 = vsel %vm5950_vm8, %v7458_v25, %v18068_v55  ;;  %v21094_v31 = vld [vmem:[#allocation76_spill] sm:$0xff]  ;;  %v21098_v25 = vld [vmem:[#allocation79_spill] sm:$0xff] }
 0x57d   : > { %10989 = vst [vmem:[%s17967_s8 + $0x98] sm:$0xff] %v10733_v58  ;;  %v8319_v44 = vpop.f32.mrf.mxu1  ;;  %v8333_v12 = vpop.f32.mrf.mxu2  ;;  %12566 = vmatmul.msk.bf16.vlgmr.msrb.gmra.mxu0 %vm3698_vm7, %v17830_v6 }
 0x57e   : > { %v10469_v2 = vmul.f32 %v17947_v22, %v8319_v44  ;;  %v8347_v48 = vpop.f32.mrf.mxu3  ;;  %v10470_v3 = vmul.f32 %v17958_v63, %v8333_v12  ;;  %9165 = vmatpush.bf16.msrb.mxu0 %v21098_v25 }
 0x57f   : > { %v8305_v61 = vpop.f32.mrf.mxu0  ;;  %v10471_v36 = vmul.f32 %v17973_v27, %v8347_v48  ;;  %12567 = vmatmul.msk.bf16.vlgmr.msrb.gmra.mxu1 %vm3698_vm7, %v17830_v6  ;;  %12568 = vmatmul.msk.bf16.vlgmr.msrb.gmra.mxu2 %vm3698_vm7, %v17830_v6 }
 0x580   : > { %v10468_v58 = vmul.f32 %v17896_v32, %v8305_v61  ;;  %v10735_v5 = vadd.f32 %v17955_v38, %v10469_v2  ;;  %v10736_v12 = vadd.f32 %v17960_v54, %v10470_v3  ;;  %v18244_v61 = vperm.slane %v21094_v31, %v21084_v57  ;;  %12569 = vmatmul.msk.bf16.vlgmr.msrb.gmra.mxu3 %vm3698_vm7, %v17830_v6  ;;  %v21097_v31 = vld [vmem:[#allocation30_spill] sm:$0xff] }
 0x581   : > { %v10737_v48 = vadd.f32 %v17975_v19, %v10471_v36  ;;  %v18248_v2 = vperm.slane %v17935_v42, %v21084_v57  ;;  %v7456_v42 = vrot.slane %v18111_v7, 4  ;;  %v21095_v3 = vrot.slane %v18068_v55, 4  ;;  %v21100_v55 = vld [vmem:[#allocation77_spill] sm:$0xff] }
 0x582   : > { %v10734_v44 = vadd.f32 %v17924_v10, %v10468_v58  ;;  %v18252_v58 = vperm.slane %v17940_v59, %v21084_v57  ;;  %10991 = vst [vmem:[%s17967_s8 + $0xa8] sm:$0xff] %v10735_v5  ;;  %v18269_v59 = vsel %vm5950_vm8, %v7454_v37, %v18111_v7  ;;  %v21096_v5 = vld [vmem:[#allocation28_spill] sm:$0xff]  ;;  %v18288_v37 = vperm.slane %v21097_v31, %v21084_v57  ;;  %v21099_v7 = vld [vmem:[#allocation50_spill] sm:$0xff] }
 0x583   : > { %v18276_v36 = vsel %vm5950_vm8, %v18057_v14, %v21095_v3  ;;  %v18284_v20 = vperm.slane %v21096_v5, %v21084_v57  ;;  %9179 = vmatpush.bf16.msrb.mxu1 %v21099_v7  ;;  %10992 = vst [vmem:[%s17967_s8 + $0xb0] sm:$0xff] %v10736_v12  ;;  %9193 = vmatpush.bf16.msrb.mxu2 %v21100_v55  ;;  %v21101_v3 = vld [vmem:[#allocation62_spill] sm:$0xff]  ;;  %v7232_v12 = vrot.slane %v18133_v56, 4  ;;  %v7985_v31 = vshrl.u32 %v18202_v0, 16 }
 0x584   : > { %10990 = vst [vmem:[%s17967_s8 + $0xa0] sm:$0xff] %v10734_v44  ;;  %v18280_v44 = vperm.slane %v17927_v33, %v21084_v57  ;;  %9207 = vmatpush.bf16.msrb.mxu3 %v21101_v3  ;;  %v18299_v5 = vsel %vm5950_vm8, %v18075_v23, %v7456_v42  ;;  %v21102_v57 = vrot.slane %v18115_v21, 4 }
 0x585   : > { %10993 = vst [vmem:[%s17967_s8 + $0xb8] sm:$0xff] %v10737_v48  ;;  %v8389_v4 = vpop.f32.mrf.mxu1  ;;  %v8403_v3 = vpop.f32.mrf.mxu2 }
 0x586   : > { %v18305_v25 = vsel %vm5950_vm8, %v21102_v57, %v18133_v56  ;;  %v10473_v55 = vmul.f32 %v17947_v22, %v8389_v4  ;;  %v8417_v23 = vpop.f32.mrf.mxu3  ;;  %v10474_v42 = vmul.f32 %v17958_v63, %v8403_v3  ;;  %v18317_v56 = vsel %vm5950_vm8, %v18115_v21, %v7232_v12 }
 0x587   : > { %v8375_v33 = vpop.f32.mrf.mxu0  ;;  %v10475_v14 = vmul.f32 %v17973_v27, %v8417_v23  ;;  %v21103_v4 = vrot.slane %v18079_v53, 4 }
 0x588   : > { %v10472_v48 = vmul.f32 %v17896_v32, %v8375_v33  ;;  %v10739_v33 = vadd.f32 %v17955_v38, %v10473_v55  ;;  %v10740_v23 = vadd.f32 %v17960_v54, %v10474_v42  ;;  %v21105_v42 = vrot.slane %v18144_v13, 4 }
 0x589   : > { %v18326_v3 = vsel %vm5950_vm8, %v21103_v4, %v18125_v62  ;;  %v10741_v57 = vadd.f32 %v17975_v19, %v10475_v14  ;;  %v21106_v4 = vrot.slane %v18140_v34, 4  ;;  %v7680_v55 = vrot.slane %v18164_v47, 4  ;;  %v21116_v62 = vld [vmem:[#allocation46_spill] sm:$0xff] }
 0x58a   : > { %v10738_v7 = vadd.f32 %v17924_v10, %v10472_v48  ;;  %21104 = vst [vmem:[#allocation72_spill] sm:$0xff] %v18326_v3  ;;  %v18342_v14 = vsel %vm5950_vm8, %v21105_v42, %v18172_v24 }
 0x58b   : > { %10995 = vst [vmem:[%s17967_s8 + $0xc8] sm:$0xff] %v10739_v33  ;;  %v18355_v33 = vpack.i.b16 %v18342_v14, %v18181_v45  ;;  %v18374_v42 = vsel %vm5950_vm8, %v18140_v34, %v7680_v55 }
 0x58c   : > { %10994 = vst [vmem:[%s17967_s8 + $0xc0] sm:$0xff] %v10738_v7  ;;  %v18348_v7 = vsel %vm5950_vm8, %v21106_v4, %v18164_v47  ;;  %v21107_v4 = vrot.slane %v18158_v60, 4  ;;  %v7064_v47 = vrot.slane %v18186_v17, 4 }
 0x58d   : > { %10996 = vst [vmem:[%s17967_s8 + $0xd0] sm:$0xff] %v10740_v23  ;;  %v8391_v48 = vpop.f32.mrf.mxu1  ;;  %v21108_v23 = vrot.slane %v18172_v24, 4  ;;  %v8405_v52 = vpop.f32.mrf.mxu2  ;;  %v9578_v34 = vunpack.c.l.b16 %v18355_v33  ;;  %12570 = vmatmul.msk.bf16.vlgmr.msra.gmra.mxu0 %vm3698_vm7, %v17830_v6 }
 0x58e   : > { %10997 = vst [vmem:[%s17967_s8 + $0xd8] sm:$0xff] %v10741_v57  ;;  %v7063_v12 = vsel %vm5950_vm8, %v21107_v4, %v18186_v17  ;;  %v10477_v46 = vmul.f32 %v17947_v22, %v8391_v48  ;;  %v8419_v28 = vpop.f32.mrf.mxu3  ;;  %v10478_v24 = vmul.f32 %v17958_v63, %v8405_v52 }
 0x58f   : > { %v8377_v21 = vpop.f32.mrf.mxu0  ;;  %v18370_v41 = vsel %vm5950_vm8, %v18144_v13, %v21108_v23  ;;  %v7984_v4 = vpack.i.b16 %v7063_v12, %v18202_v0  ;;  %v7986_v17 = vshrl.u32 %v7063_v12, 16  ;;  %v10479_v30 = vmul.f32 %v17973_v27, %v8419_v28  ;;  %12571 = vmatmul.msk.bf16.vlgmr.msra.gmra.mxu1 %vm3698_vm7, %v17830_v6  ;;  %v21109_v28 = vld [vmem:[#allocation20_spill] sm:$0xff]  ;;  %12572 = vmatmul.msk.bf16.vlgmr.msra.gmra.mxu2 %vm3698_vm7, %v17830_v6 }
 0x590   : > { %v10476_v57 = vmul.f32 %v17896_v32, %v8377_v21  ;;  %v7065_v13 = vsel %vm5950_vm8, %v18158_v60, %v7064_v47  ;;  %v10743_v21 = vadd.f32 %v17955_v38, %v10477_v46  ;;  %v10744_v0 = vadd.f32 %v17960_v54, %v10478_v24  ;;  %12573 = vmatmul.msk.bf16.vlgmr.msra.gmra.mxu3 %vm3698_vm7, %v17830_v6 }
 0x591   : > { %v9290_v48 = vunpack.c.l.b16 %v7984_v4  ;;  %v9291_v23 = vunpack.c.h.b16 %v7984_v4  ;;  %v10745_v12 = vadd.f32 %v17975_v19, %v10479_v30  ;;  %v7987_v53 = vpack.i.b16 %v7986_v17, %v7985_v31  ;;  %9279 = vmatpush.bf16.msra.mxu3 %v21116_v62 }
 0x592   : > { %v10742_v55 = vadd.f32 %v17924_v10, %v10476_v57  ;;  %v7990_v52 = vpack.i.b16 %v7065_v13, %v18224_v39  ;;  %v21110_v60 = vunpack.c.l.b16 %v21109_v28  ;;  %v21111_v47 = vunpack.c.h.b16 %v21109_v28  ;;  %10999 = vst [vmem:[%s17967_s8 + $0xe8] sm:$0xff] %v10743_v21  ;;  %v21115_v21 = vld [vmem:[#allocation65_spill] sm:$0xff] }
 0x593   : > { %v7992_v30 = vshrl.u32 %v7065_v13, 16  ;;  %v9579_v31 = vunpack.c.h.b16 %v18355_v33  ;;  %v21112_v4 = vrot.slane %v18194_v11, 4  ;;  %v9362_v24 = vunpack.c.l.b16 %v7987_v53  ;;  %v21114_v13 = vld [vmem:[#allocation21_spill] sm:$0xff]  ;;  %11000 = vst [vmem:[%s17967_s8 + $0xf0] sm:$0xff] %v10744_v0  ;;  %9265 = vmatpush.bf16.msra.mxu2 %v21115_v21 }
 0x594   : > { %10998 = vst [vmem:[%s17967_s8 + $0xe0] sm:$0xff] %v10742_v55  ;;  %v18396_v46 = vpack.c.b16 %v9290_v48, %v21110_v60  ;;  %v18400_v57 = vpack.c.b16 %v9291_v23, %v21111_v47  ;;  %v9363_v55 = vunpack.c.h.b16 %v7987_v53  ;;  %v9434_v48 = vunpack.c.l.b16 %v7990_v52  ;;  %v21113_v23 = vld [vmem:[#allocation61_spill] sm:$0xff]  ;;  %9251 = vmatpush.bf16.msra.mxu1 %v21114_v13  ;;  %v21117_v53 = vld [vmem:[#allocation63_spill] sm:$0xff] }
 0x595   : > { %v7511_v17 = vsel %vm5950_vm8, %v21112_v4, %v18212_v15  ;;  %9237 = vmatpush.bf16.msra.mxu0 %v21113_v23  ;;  %v9435_v60 = vunpack.c.h.b16 %v7990_v52  ;;  %v7512_v47 = vrot.slane %v18212_v15, 4  ;;  %11001 = vst [vmem:[%s17967_s8 + $0xf8] sm:$0xff] %v10745_v12  ;;  %v8461_v16 = vpop.f32.mrf.mxu1  ;;  %v21118_v9 = vunpack.c.l.b16 %v21117_v53  ;;  %v21120_v13 = vld [vmem:[#allocation25_spill] sm:$0xff]  ;;  %v8475_v62 = vpop.f32.mrf.mxu2 }
 0x596   : > { %v8080_v33 = vpack.i.b16 %v7511_v17, %v18269_v59  ;;  %v8082_v28 = vshrl.u32 %v7511_v17, 16  ;;  %v21119_v23 = vunpack.c.h.b16 %v21117_v53  ;;  %v21121_v17 = vunpack.c.l.b16 %v21120_v13  ;;  %v8489_v12 = vpop.f32.mrf.mxu3 }
 0x597   : > { %v8447_v4 = vpop.f32.mrf.mxu0  ;;  %v18422_v50 = vpack.c.b16 %v9362_v24, %v21118_v9  ;;  %v10481_v21 = vmul.f32 %v17947_v22, %v8461_v16  ;;  %v10482_v9 = vmul.f32 %v17958_v63, %v8475_v62  ;;  %v10483_v24 = vmul.f32 %v17973_v27, %v8489_v12 }
 0x598   : > { %v18426_v0 = vpack.c.b16 %v9363_v55, %v21119_v23  ;;  %v18430_v52 = vpack.c.b16 %v9434_v48, %v21121_v17  ;;  %v10480_v15 = vmul.f32 %v17896_v32, %v8447_v4  ;;  %v9292_v1 = vunpack.c.l.b16 %v8080_v33  ;;  %v21125_v17 = vld [vmem:[#allocation43_spill] sm:$0xff] }
 0x599   : > { %v9293_v43 = vunpack.c.h.b16 %v8080_v33  ;;  %v21123_v55 = vshrl.u32 %v18269_v59, 16  ;;  %v21124_v48 = vunpack.c.h.b16 %v21120_v13  ;;  %v10747_v16 = vadd.f32 %v17955_v38, %v10481_v21 }
 0x59a   : > { %21122 = vst [vmem:[#allocation69_spill] sm:$0xff] %v18430_v52  ;;  %v10746_v4 = vadd.f32 %v17924_v10, %v10480_v15  ;;  %v21126_v52 = vunpack.c.l.b16 %v21125_v17  ;;  %v21127_v33 = vunpack.c.h.b16 %v21125_v17  ;;  %v10748_v59 = vadd.f32 %v17960_v54, %v10482_v9  ;;  %v21133_v9 = vld [vmem:[#allocation19_spill] sm:$0xff] }
 0x59b   : > { %v8083_v53 = vpack.i.b16 %v8082_v28, %v21123_v55  ;;  %v18440_v23 = vpack.c.b16 %v9435_v60, %v21124_v48  ;;  %v10749_v28 = vadd.f32 %v17975_v19, %v10483_v24  ;;  %v7513_v15 = vsel %vm5950_vm8, %v18194_v11, %v7512_v47  ;;  %11003 = vst [vmem:[%s17967_s8 + $0x108] sm:$0xff] %v10747_v16 }
 0x59c   : > { %v18446_v3 = vpack.c.b16 %v9292_v1, %v21126_v52  ;;  %v18450_v62 = vpack.c.b16 %v9293_v43, %v21127_v33  ;;  %11002 = vst [vmem:[%s17967_s8 + $0x100] sm:$0xff] %v10746_v4  ;;  %v21128_v21 = vshrl.u32 %v18224_v39, 16  ;;  %v21129_v52 = vld [vmem:[#allocation24_spill] sm:$0xff]  ;;  %v21134_v24 = vunpack.c.l.b16 %v21133_v9 }
 0x59d   : > { %v9364_v13 = vunpack.c.l.b16 %v8083_v53  ;;  %v9365_v60 = vunpack.c.h.b16 %v8083_v53  ;;  %v21130_v12 = vunpack.c.l.b16 %v21129_v52  ;;  %v21131_v43 = vunpack.c.h.b16 %v21129_v52  ;;  %11004 = vst [vmem:[%s17967_s8 + $0x110] sm:$0xff] %v10748_v59  ;;  %12574 = vmatmul.msk.bf16.vlgmr.msrb.gmra.mxu0 %vm3698_vm7, %v17830_v6 }
 0x59e   : > { %v7993_v1 = vpack.i.b16 %v7992_v30, %v21128_v21  ;;  %v21135_v4 = vunpack.c.h.b16 %v21133_v9  ;;  %v8086_v11 = vpack.i.b16 %v7513_v15, %v18299_v5  ;;  %v8088_v39 = vshrl.u32 %v7513_v15, 16  ;;  %11005 = vst [vmem:[%s17967_s8 + $0x118] sm:$0xff] %v10749_v28  ;;  %9309 = vmatpush.bf16.msrb.mxu0 %v18396_v46 }
 0x59f   : > { %v18461_v55 = vpack.c.b16 %v9578_v34, %v21130_v12  ;;  %v18465_v48 = vpack.c.b16 %v9579_v31, %v21131_v43  ;;  %v18470_v53 = vpack.c.b16 %v9364_v13, %v21134_v24  ;;  %v21136_v47 = vrot.slane %v18151_v35, 4  ;;  %v8449_v21 = vpop.f32.mrf.mxu0  ;;  %v8477_v24 = vpop.f32.mrf.mxu2  ;;  %12575 = vmatmul.msk.bf16.vlgmr.msrb.gmra.mxu1 %vm3698_vm7, %v17830_v6  ;;  %12576 = vmatmul.msk.bf16.vlgmr.msrb.gmra.mxu2 %vm3698_vm7, %v17830_v6 }
 0x5a0   : > { %v18474_v17 = vpack.c.b16 %v9365_v60, %v21135_v4  ;;  %v9506_v30 = vunpack.c.l.b16 %v7993_v1  ;;  %v9507_v34 = vunpack.c.h.b16 %v7993_v1  ;;  %v21137_v16 = vshrl.u32 %v18181_v45, 16  ;;  %v8463_v60 = vpop.f32.mrf.mxu1  ;;  %v8491_v4 = vpop.f32.mrf.mxu3  ;;  %v21140_v45 = vld [vmem:[#allocation39_spill] sm:$0xff]  ;;  %12577 = vmatmul.msk.bf16.vlgmr.msrb.gmra.mxu3 %vm3698_vm7, %v17830_v6  ;;  %9323 = vmatpush.bf16.msrb.mxu1 %v18400_v57 }
 0x5a1   : > { %21132 = vst [vmem:[#allocation75_spill] sm:$0xff] %v18465_v48  ;;  %v7515_v31 = vsel %vm5950_vm8, %v21136_v47, %v18190_v26  ;;  %v21138_v33 = vshrl.u32 %v18342_v14, 16  ;;  %v9436_v52 = vunpack.c.l.b16 %v8086_v11  ;;  %v9437_v12 = vunpack.c.h.b16 %v8086_v11  ;;  %9337 = vmatpush.bf16.msrb.mxu2 %v18446_v3  ;;  %9351 = vmatpush.bf16.msrb.mxu3 %v18450_v62 }
 0x5a2   : > { %v21139_v15 = vshrl.u32 %v18299_v5, 16  ;;  %v8092_v1 = vpack.i.b16 %v7515_v31, %v18240_v40  ;;  %v10484_v43 = vmul.f32 %v17896_v32, %v8449_v21  ;;  %v10485_v9 = vmul.f32 %v17947_v22, %v8463_v60 }
 0x5a3   : > { %v7999_v13 = vpack.i.b16 %v21138_v33, %v21137_v16  ;;  %v21141_v47 = vunpack.c.l.b16 %v21140_v45  ;;  %v21142_v28 = vunpack.c.h.b16 %v21140_v45  ;;  %v10486_v5 = vmul.f32 %v17958_v63, %v8477_v24 }
 0x5a4   : > { %v8089_v59 = vpack.i.b16 %v8088_v39, %v21139_v15  ;;  %v10487_v11 = vmul.f32 %v17973_v27, %v8491_v4  ;;  %v21143_v39 = vld [vmem:[#allocation27_spill] sm:$0xff]  ;;  %v9580_v4 = vunpack.c.l.b16 %v8092_v1  ;;  %v9581_v48 = vunpack.c.h.b16 %v8092_v1  ;;  %v21149_v1 = vld [vmem:[#allocation33_spill] sm:$0xff] }
 0x5a5   : > { %v18494_v14 = vpack.c.b16 %v9506_v30, %v21141_v47  ;;  %v18498_v16 = vpack.c.b16 %v9507_v34, %v21142_v28  ;;  %v21144_v33 = vunpack.c.l.b16 %v21143_v39  ;;  %v21145_v60 = vunpack.c.h.b16 %v21143_v39 }
 0x5a6   : > { %v10750_v30 = vadd.f32 %v17924_v10, %v10484_v43  ;;  %v10751_v47 = vadd.f32 %v17955_v38, %v10485_v9  ;;  %v9508_v45 = vunpack.c.l.b16 %v8089_v59  ;;  %v9509_v34 = vunpack.c.h.b16 %v8089_v59 }
 0x5a7   : > { %v18504_v21 = vpack.c.b16 %v9436_v52, %v21144_v33  ;;  %v18508_v15 = vpack.c.b16 %v9437_v12, %v21145_v60  ;;  %v10752_v28 = vadd.f32 %v17960_v54, %v10486_v5  ;;  %v10753_v24 = vadd.f32 %v17975_v19, %v10487_v11  ;;  %v21146_v52 = vld [vmem:[#allocation40_spill] sm:$0xff]  ;;  %v8519_v46 = vpop.f32.mrf.mxu0 }
 0x5a8   : > { %11006 = vst [vmem:[%s17967_s8 + $0x120] sm:$0xff] %v10750_v30  ;;  %v21147_v12 = vunpack.c.l.b16 %v21146_v52  ;;  %v21148_v59 = vunpack.c.h.b16 %v21146_v52  ;;  %v9650_v5 = vunpack.c.l.b16 %v7999_v13  ;;  %v9651_v11 = vunpack.c.h.b16 %v7999_v13  ;;  %v21152_v13 = vld [vmem:[#allocation73_spill] sm:$0xff]  ;;  %v8561_v62 = vpop.f32.mrf.mxu3 }
 0x5a9   : > { %11007 = vst [vmem:[%s17967_s8 + $0x128] sm:$0xff] %v10751_v47  ;;  %v21150_v39 = vunpack.c.l.b16 %v21149_v1  ;;  %v21151_v60 = vunpack.c.h.b16 %v21149_v1  ;;  %v21153_v52 = vunpack.c.l.b16 %v21152_v13  ;;  %v21154_v47 = vunpack.c.h.b16 %v21152_v13  ;;  %v8547_v1 = vpop.f32.mrf.mxu2 }
 0x5aa   : > { %v18521_v43 = vpack.c.b16 %v9508_v45, %v21147_v12  ;;  %v18525_v9 = vpack.c.b16 %v9509_v34, %v21148_v59  ;;  %v8094_v45 = vshrl.u32 %v7515_v31, 16  ;;  %v8004_v34 = vshrl.u32 %v18370_v41, 16  ;;  %11008 = vst [vmem:[%s17967_s8 + $0x130] sm:$0xff] %v10752_v28  ;;  %v8533_v31 = vpop.f32.mrf.mxu1 }
 0x5ab   : > { %v18534_v33 = vpack.c.b16 %v9580_v4, %v21150_v39  ;;  %v18538_v30 = vpack.c.b16 %v9581_v48, %v21151_v60  ;;  %v18546_v6 = vpack.c.b16 %v9650_v5, %v21153_v52  ;;  %v18550_v4 = vpack.c.b16 %v9651_v11, %v21154_v47  ;;  %11009 = vst [vmem:[%s17967_s8 + $0x138] sm:$0xff] %v10753_v24 }
 0x5ac   : > { %v8002_v48 = vpack.i.b16 %v18370_v41, %v18207_v18  ;;  %v21155_v57 = vshrl.u32 %v18240_v40, 16  ;;  %v21156_v12 = vrot.slane %v18190_v26, 4  ;;  %v21157_v5 = vshrl.u32 %v18207_v18, 16 }
 0x5ad   : > { %v10488_v41 = vmul.f32 %v17896_v32, %v8519_v46  ;;  %v10489_v3 = vmul.f32 %v17947_v22, %v8533_v31  ;;  %v10490_v40 = vmul.f32 %v17958_v63, %v8547_v1  ;;  %v10491_v60 = vmul.f32 %v17973_v27, %v8561_v62 }
 0x5ae   : > { %v8095_v28 = vpack.i.b16 %v8094_v45, %v21155_v57  ;;  %v7517_v59 = vsel %vm5950_vm8, %v18151_v35, %v21156_v12  ;;  %v8005_v11 = vpack.i.b16 %v8004_v34, %v21157_v5  ;;  %v9722_v24 = vunpack.c.l.b16 %v8002_v48  ;;  %v21158_v34 = vld [vmem:[#allocation36_spill] sm:$0xff]  ;;  %v21163_v57 = vld [vmem:[#allocation31_spill] sm:$0xff] }
 0x5af   : > { %v9723_v39 = vunpack.c.h.b16 %v8002_v48  ;;  %v10754_v35 = vadd.f32 %v17924_v10, %v10488_v41  ;;  %v10755_v18 = vadd.f32 %v17955_v38, %v10489_v3  ;;  %v21159_v13 = vunpack.c.l.b16 %v21158_v34 }
 0x5b0   : > { %v9652_v26 = vunpack.c.l.b16 %v8095_v28  ;;  %v9653_v45 = vunpack.c.h.b16 %v8095_v28  ;;  %v21161_v47 = vunpack.c.h.b16 %v21158_v34  ;;  %v10756_v48 = vadd.f32 %v17960_v54, %v10490_v40 }
 0x5b1   : > { %v18573_v52 = vpack.c.b16 %v9722_v24, %v21159_v13  ;;  %v10757_v31 = vadd.f32 %v17975_v19, %v10491_v60  ;;  %v21164_v12 = vunpack.c.l.b16 %v21163_v57  ;;  %v21165_v5 = vunpack.c.h.b16 %v21163_v57  ;;  %11010 = vst [vmem:[%s17967_s8 + $0x140] sm:$0xff] %v10754_v35 }
 0x5b2   : > { %v18577_v46 = vpack.c.b16 %v9723_v39, %v21161_v47  ;;  %v8098_v3 = vpack.i.b16 %v7517_v59, %v18276_v36  ;;  %v9794_v1 = vunpack.c.l.b16 %v8005_v11  ;;  %v9795_v62 = vunpack.c.h.b16 %v8005_v11  ;;  %11011 = vst [vmem:[%s17967_s8 + $0x148] sm:$0xff] %v10755_v18  ;;  %v21168_v11 = vld [vmem:[#allocation58_spill] sm:$0xff] }
 0x5b3   : > { %21160 = vst [vmem:[#allocation45_spill] sm:$0xff] %v18573_v52  ;;  %v18583_v28 = vpack.c.b16 %v9652_v26, %v21164_v12  ;;  %v18587_v41 = vpack.c.b16 %v9653_v45, %v21165_v5  ;;  %v8100_v24 = vshrl.u32 %v7517_v59, 16  ;;  %v21166_v39 = vrot.slane %v18232_v51, 4  ;;  %v8521_v12 = vpop.f32.mrf.mxu0  ;;  %v8535_v5 = vpop.f32.mrf.mxu1 }
 0x5b4   : > { %21162 = vst [vmem:[#allocation26_spill] sm:$0xff] %v18577_v46  ;;  %v21167_v60 = vrot.slane %v18248_v2, 4  ;;  %v7288_v45 = vrot.slane %v18280_v44, 4  ;;  %v7736_v35 = vrot.slane %v18284_v20, 4  ;;  %v9724_v34 = vunpack.c.l.b16 %v8098_v3 }
 0x5b5   : > { %v7287_v40 = vsel %vm5950_vm8, %v21166_v39, %v18280_v44  ;;  %11012 = vst [vmem:[%s17967_s8 + $0x150] sm:$0xff] %v10756_v48  ;;  %v9725_v13 = vunpack.c.h.b16 %v8098_v3  ;;  %v21169_v59 = vunpack.c.l.b16 %v21168_v11  ;;  %v21171_v47 = vunpack.c.h.b16 %v21168_v11  ;;  %v8563_v11 = vpop.f32.mrf.mxu3 }
 0x5b6   : > { %v7735_v26 = vsel %vm5950_vm8, %v21167_v60, %v18284_v20  ;;  %11013 = vst [vmem:[%s17967_s8 + $0x158] sm:$0xff] %v10757_v31  ;;  %v21173_v39 = vshrl.u32 %v18276_v36, 16  ;;  %v8008_v44 = vpack.i.b16 %v7287_v40, %v18305_v25  ;;  %v8010_v48 = vshrl.u32 %v7287_v40, 16 }
 0x5b7   : > { %v18605_v18 = vpack.c.b16 %v9794_v1, %v21169_v59  ;;  %v18609_v57 = vpack.c.b16 %v9795_v62, %v21171_v47  ;;  %v8104_v20 = vpack.i.b16 %v7735_v26, %v18348_v7  ;;  %v10492_v3 = vmul.f32 %v17896_v32, %v8521_v12  ;;  %v8549_v59 = vpop.f32.mrf.mxu2  ;;  %v21174_v62 = vld [vmem:[#allocation37_spill] sm:$0xff] }
 0x5b8   : > { %v8101_v60 = vpack.i.b16 %v8100_v24, %v21173_v39  ;;  %v10493_v1 = vmul.f32 %v17947_v22, %v8535_v5  ;;  %v21175_v47 = vunpack.c.l.b16 %v21174_v62  ;;  %v10494_v24 = vmul.f32 %v17958_v63, %v8549_v59 }
 0x5b9   : > { %21170 = vst [vmem:[#allocation44_spill] sm:$0xff] %v18605_v18  ;;  %v10495_v40 = vmul.f32 %v17973_v27, %v8563_v11  ;;  %v10758_v5 = vadd.f32 %v17924_v10, %v10492_v3  ;;  %v9866_v46 = vunpack.c.l.b16 %v8008_v44  ;;  %v9867_v52 = vunpack.c.h.b16 %v8008_v44  ;;  %v21180_v44 = vld [vmem:[#allocation59_spill] sm:$0xff] }
 0x5ba   : > { %21172 = vst [vmem:[#allocation51_spill] sm:$0xff] %v18609_v57  ;;  %v18620_v31 = vpack.c.b16 %v9724_v34, %v21175_v47  ;;  %v21176_v57 = vunpack.c.h.b16 %v21174_v62  ;;  %v9796_v39 = vunpack.c.l.b16 %v8101_v60  ;;  %v9797_v12 = vunpack.c.h.b16 %v8101_v60  ;;  %v18641_v60 = vld [vmem:[%s13180_s7] sm:$0xff] }
 0x5bb   : > { %v10759_v18 = vadd.f32 %v17955_v38, %v10493_v1  ;;  %v10760_v34 = vadd.f32 %v17960_v54, %v10494_v24  ;;  %v10761_v62 = vadd.f32 %v17975_v19, %v10495_v40  ;;  %12578 = vmatmul.msk.bf16.vlgmr.msra.gmra.mxu0 %vm3698_vm7, %v18641_v60  ;;  %12579 = vmatmul.msk.bf16.vlgmr.msra.gmra.mxu1 %vm3698_vm7, %v18641_v60  ;;  %v21181_v3 = vunpack.c.l.b16 %v21180_v44 }
 0x5bc   : > { %v18624_v36 = vpack.c.b16 %v9725_v13, %v21176_v57  ;;  %v21177_v13 = vld [vmem:[#allocation53_spill] sm:$0xff]  ;;  %11014 = vst [vmem:[%s17967_s8 + $0x160] sm:$0xff] %v10758_v5  ;;  %v21182_v24 = vunpack.c.h.b16 %v21180_v44  ;;  %12580 = vmatmul.msk.bf16.vlgmr.msra.gmra.mxu2 %vm3698_vm7, %v18641_v60  ;;  %12581 = vmatmul.msk.bf16.vlgmr.msra.gmra.mxu3 %vm3698_vm7, %v18641_v60  ;;  %v21183_v5 = vshrl.u32 %v18305_v25, 16 }
 0x5bd   : > { %v21178_v57 = vunpack.c.l.b16 %v21177_v13  ;;  %v21179_v59 = vunpack.c.h.b16 %v21177_v13  ;;  %v18650_v1 = vpack.c.b16 %v9866_v46, %v21181_v3  ;;  %11015 = vst [vmem:[%s17967_s8 + $0x168] sm:$0xff] %v10759_v18  ;;  %v7289_v46 = vsel %vm5950_vm8, %v18232_v51, %v7288_v45  ;;  %9381 = vmatpush.bf16.msra.mxu0 %v18422_v50  ;;  %9395 = vmatpush.bf16.msra.mxu1 %v18426_v0  ;;  %v8591_v51 = vpop.f32.mrf.mxu0  ;;  %v8605_v50 = vpop.f32.mrf.mxu1 }
 0x5be   : > { %v18654_v40 = vpack.c.b16 %v9867_v52, %v21182_v24  ;;  %v8011_v13 = vpack.i.b16 %v8010_v48, %v21183_v5  ;;  %v8111_v52 = vshrl.u32 %v18374_v42, 16  ;;  %11016 = vst [vmem:[%s17967_s8 + $0x170] sm:$0xff] %v10760_v34  ;;  %v8014_v25 = vpack.i.b16 %v7289_v46, %v18317_v56  ;;  %9409 = vmatpush.bf16.msra.mxu2 %v18470_v53  ;;  %v8633_v53 = vpop.f32.mrf.mxu3 }
 0x5bf   : > { %v18634_v47 = vpack.c.b16 %v9796_v39, %v21178_v57  ;;  %v18638_v11 = vpack.c.b16 %v9797_v12, %v21179_v59  ;;  %v9868_v39 = vunpack.c.l.b16 %v8104_v20  ;;  %v9869_v12 = vunpack.c.h.b16 %v8104_v20  ;;  %v21184_v20 = vld [vmem:[#allocation52_spill] sm:$0xff]  ;;  %9423 = vmatpush.bf16.msra.mxu3 %v18474_v17  ;;  %11017 = vst [vmem:[%s17967_s8 + $0x178] sm:$0xff] %v10761_v62 }
 0x5c0   : > { %v8106_v57 = vshrl.u32 %v7735_v26, 16  ;;  %v21185_v59 = vunpack.c.l.b16 %v21184_v20  ;;  %v21186_v18 = vunpack.c.h.b16 %v21184_v20  ;;  %v9938_v26 = vunpack.c.l.b16 %v8011_v13 }
 0x5c1   : > { %v9939_v0 = vunpack.c.h.b16 %v8011_v13  ;;  %v21188_v45 = vshrl.u32 %v18348_v7, 16  ;;  %v7737_v34 = vsel %vm5950_vm8, %v18248_v2, %v7736_v35  ;;  %v10496_v24 = vmul.f32 %v17896_v32, %v8591_v51  ;;  %v21189_v13 = vld [vmem:[#allocation49_spill] sm:$0xff] }
 0x5c2   : > { %v18671_v44 = vpack.c.b16 %v9868_v39, %v21185_v59  ;;  %v18675_v3 = vpack.c.b16 %v9869_v12, %v21186_v18  ;;  %v10497_v39 = vmul.f32 %v17947_v22, %v8605_v50  ;;  %v8619_v12 = vpop.f32.mrf.mxu2  ;;  %v10010_v5 = vunpack.c.l.b16 %v8014_v25 }
 0x5c3   : > { %v8107_v48 = vpack.i.b16 %v8106_v57, %v21188_v45  ;;  %v10011_v17 = vunpack.c.h.b16 %v8014_v25  ;;  %v10498_v62 = vmul.f32 %v17958_v63, %v8619_v12  ;;  %v10499_v20 = vmul.f32 %v17973_v27, %v8633_v53  ;;  %v21193_v12 = vld [vmem:[#allocation67_spill] sm:$0xff] }
 0x5c4   : > { %21187 = vst [vmem:[#allocation38_spill] sm:$0xff] %v18675_v3  ;;  %v21190_v59 = vunpack.c.l.b16 %v21189_v13  ;;  %v21191_v2 = vunpack.c.h.b16 %v21189_v13  ;;  %v10762_v57 = vadd.f32 %v17924_v10, %v10496_v24  ;;  %v10763_v18 = vadd.f32 %v17955_v38, %v10497_v39 }
 0x5c5   : > { %v9940_v51 = vunpack.c.l.b16 %v8107_v48  ;;  %v9941_v25 = vunpack.c.h.b16 %v8107_v48  ;;  %v10764_v50 = vadd.f32 %v17960_v54, %v10498_v62  ;;  %v10765_v45 = vadd.f32 %v17975_v19, %v10499_v20 }
 0x5c6   : > { %v18691_v7 = vpack.c.b16 %v9938_v26, %v21190_v59  ;;  %v18695_v35 = vpack.c.b16 %v9939_v0, %v21191_v2  ;;  %v21194_v53 = vunpack.c.l.b16 %v21193_v12  ;;  %v21196_v26 = vunpack.c.h.b16 %v21193_v12  ;;  %11018 = vst [vmem:[%s17967_s8 + $0x180] sm:$0xff] %v10762_v57  ;;  %v21198_v0 = vld [vmem:[#allocation56_spill] sm:$0xff] }
 0x5c7   : > { %v21199_v24 = vunpack.c.l.b16 %v21198_v0  ;;  %v21201_v48 = vunpack.c.h.b16 %v21198_v0  ;;  %v8110_v62 = vpack.i.b16 %v7737_v34, %v18374_v42  ;;  %v8016_v20 = vshrl.u32 %v7289_v46, 16  ;;  %11019 = vst [vmem:[%s17967_s8 + $0x188] sm:$0xff] %v10763_v18  ;;  %v8593_v0 = vpop.f32.mrf.mxu0 }
 0x5c8   : > { %21192 = vst [vmem:[#allocation47_spill] sm:$0xff] %v18695_v35  ;;  %v18703_v3 = vpack.c.b16 %v10010_v5, %v21194_v53  ;;  %v18707_v13 = vpack.c.b16 %v10011_v17, %v21196_v26  ;;  %v8112_v5 = vshrl.u32 %v7737_v34, 16  ;;  %v21203_v2 = vrot.slane %v18218_v8, 4  ;;  %v21207_v53 = vld [vmem:[#allocation72_spill] sm:$0xff] }
 0x5c9   : > { %v18712_v39 = vpack.c.b16 %v9940_v51, %v21199_v24  ;;  %v18716_v59 = vpack.c.b16 %v9941_v25, %v21201_v48  ;;  %v21204_v57 = vrot.slane %v18086_v29, 4  ;;  %v21205_v25 = vrot.slane %v18252_v58, 4  ;;  %11020 = vst [vmem:[%s17967_s8 + $0x190] sm:$0xff] %v10764_v50  ;;  %v8607_v24 = vpop.f32.mrf.mxu1 }
 0x5ca   : > { %21195 = vst [vmem:[#allocation42_spill] sm:$0xff] %v18703_v3  ;;  %v7291_v17 = vsel %vm5950_vm8, %v21203_v2, %v18244_v61  ;;  %v10012_v42 = vunpack.c.l.b16 %v8110_v62  ;;  %v10013_v46 = vunpack.c.h.b16 %v8110_v62  ;;  %v21206_v34 = vshrl.u32 %v18317_v56, 16  ;;  %v8621_v62 = vpop.f32.mrf.mxu2  ;;  %v8635_v3 = vpop.f32.mrf.mxu3  ;;  %v21208_v56 = vld [vmem:[#allocation18_spill] sm:$0xff] }
 0x5cb   : > { %21197 = vst [vmem:[#allocation54_spill] sm:$0xff] %v18707_v13  ;;  %v18728_v51 = vsel %vm5950_vm8, %v21204_v57, %v18168_v49  ;;  %v18734_v12 = vsel %vm5950_vm8, %v21205_v25, %v18288_v37  ;;  %v8020_v26 = vpack.i.b16 %v7291_v17, %v21207_v53  ;;  %v8113_v48 = vpack.i.b16 %v8112_v5, %v8111_v52 }
 0x5cc   : > { %21200 = vst [vmem:[#allocation60_spill] sm:$0xff] %v18712_v39  ;;  %v8017_v18 = vpack.i.b16 %v8016_v20, %v21206_v34  ;;  %v8116_v2 = vpack.i.b16 %v18734_v12, %v18728_v51  ;;  %v8021_v57 = vshrl.u32 %v21207_v53, 16  ;;  %v8022_v13 = vshrl.u32 %v7291_v17, 16  ;;  %12582 = vmatmul.msk.bf16.vlgmr.msrb.gmra.mxu0 %vm3698_vm7, %v18641_v60  ;;  %12583 = vmatmul.msk.bf16.vlgmr.msrb.gmra.mxu1 %vm3698_vm7, %v18641_v60 }
 0x5cd   : > { %21202 = vst [vmem:[#allocation71_spill] sm:$0xff] %v18716_v59  ;;  %v10500_v25 = vmul.f32 %v17896_v32, %v8593_v0  ;;  %v10501_v50 = vmul.f32 %v17947_v22, %v8607_v24  ;;  %v21209_v20 = vunpack.c.l.b16 %v21208_v56  ;;  %v10502_v5 = vmul.f32 %v17958_v63, %v8621_v62  ;;  %12584 = vmatmul.msk.bf16.vlgmr.msrb.gmra.mxu2 %vm3698_vm7, %v18641_v60 }
 0x5ce   : > { %11021 = vst [vmem:[%s17967_s8 + $0x198] sm:$0xff] %v10765_v45  ;;  %v21210_v45 = vunpack.c.h.b16 %v21208_v56  ;;  %v10503_v53 = vmul.f32 %v17973_v27, %v8635_v3  ;;  %v10082_v17 = vunpack.c.l.b16 %v8017_v18  ;;  %v10083_v59 = vunpack.c.h.b16 %v8017_v18  ;;  %v21214_v18 = vld [vmem:[#allocation57_spill] sm:$0xff]  ;;  %12585 = vmatmul.msk.bf16.vlgmr.msrb.gmra.mxu3 %vm3698_vm7, %v18641_v60  ;;  %9467 = vmatpush.bf16.msrb.mxu1 %v18440_v23 }
 0x5cf   : > { %v18748_v34 = vpack.c.b16 %v10012_v42, %v21209_v20  ;;  %v10766_v0 = vadd.f32 %v17924_v10, %v10500_v25  ;;  %v10767_v24 = vadd.f32 %v17955_v38, %v10501_v50  ;;  %v10084_v39 = vunpack.c.l.b16 %v8113_v48  ;;  %v21211_v20 = vld [vmem:[#allocation66_spill] sm:$0xff]  ;;  %9481 = vmatpush.bf16.msrb.mxu2 %v18504_v21  ;;  %9495 = vmatpush.bf16.msrb.mxu3 %v18508_v15 }
 0x5d0   : > { %v18752_v52 = vpack.c.b16 %v10013_v46, %v21210_v45  ;;  %v10085_v35 = vunpack.c.h.b16 %v8113_v48  ;;  %v10768_v42 = vadd.f32 %v17960_v54, %v10502_v5  ;;  %v10769_v56 = vadd.f32 %v17975_v19, %v10503_v53 }
 0x5d1   : > { %v21212_v46 = vunpack.c.l.b16 %v21211_v20  ;;  %v21213_v62 = vunpack.c.h.b16 %v21211_v20  ;;  %11022 = vst [vmem:[%s17967_s8 + $0x1a0] sm:$0xff] %v10766_v0  ;;  %v21215_v48 = vunpack.c.l.b16 %v21214_v18  ;;  %v21216_v50 = vunpack.c.h.b16 %v21214_v18  ;;  %v8677_v23 = vpop.f32.mrf.mxu1 }
 0x5d2   : > { %v10154_v53 = vunpack.c.l.b16 %v8020_v26  ;;  %11023 = vst [vmem:[%s17967_s8 + $0x1a8] sm:$0xff] %v10767_v24  ;;  %v10157_v0 = vunpack.c.h.b16 %v8116_v2  ;;  %v8023_v20 = vpack.i.b16 %v8022_v13, %v8021_v57  ;;  %v8117_v24 = vshrl.u32 %v18728_v51, 16  ;;  %v8663_v13 = vpop.f32.mrf.mxu0  ;;  %v21223_v57 = vld [vmem:[#allocation64_spill] sm:$0xff]  ;;  %v8691_v21 = vpop.f32.mrf.mxu2 }
 0x5d3   : > { %v18762_v45 = vpack.c.b16 %v10082_v17, %v21212_v46  ;;  %v18766_v3 = vpack.c.b16 %v10083_v59, %v21213_v62  ;;  %v18775_v25 = vpack.c.b16 %v10084_v39, %v21215_v48  ;;  %v18779_v5 = vpack.c.b16 %v10085_v35, %v21216_v50  ;;  %v21217_v46 = vld [vmem:[#allocation78_spill] sm:$0xff]  ;;  %v21218_v62 = vld [vmem:[#allocation69_spill] sm:$0xff]  ;;  %11024 = vst [vmem:[%s17967_s8 + $0x1b0] sm:$0xff] %v10768_v42  ;;  %v8705_v15 = vpop.f32.mrf.mxu3 }
 0x5d4   : > { %v10155_v17 = vunpack.c.h.b16 %v8020_v26  ;;  %v10156_v59 = vunpack.c.l.b16 %v8116_v2  ;;  %v10224_v39 = vunpack.c.l.b16 %v21217_v46  ;;  %9453 = vmatpush.bf16.msrb.mxu0 %v21218_v62  ;;  %v21219_v35 = vld [vmem:[#allocation70_spill] sm:$0xff]  ;;  %v8118_v2 = vshrl.u32 %v18734_v12, 16  ;;  %11025 = vst [vmem:[%s17967_s8 + $0x1b8] sm:$0xff] %v10769_v56 }
 0x5d5   : > { %v21220_v26 = vunpack.c.l.b16 %v21219_v35  ;;  %v21221_v48 = vunpack.c.h.b16 %v21219_v35  ;;  %v21224_v42 = vunpack.c.l.b16 %v21223_v57  ;;  %v10504_v51 = vmul.f32 %v17896_v32, %v8663_v13 }
 0x5d6   : > { %v10505_v12 = vmul.f32 %v17947_v22, %v8677_v23  ;;  %v8119_v56 = vpack.i.b16 %v8118_v2, %v8117_v24 }
 0x5d7   : > { %v18792_v18 = vpack.c.b16 %v10154_v53, %v21220_v26  ;;  %v18796_v50 = vpack.c.b16 %v10155_v17, %v21221_v48  ;;  %v18805_v62 = vpack.c.b16 %v10156_v59, %v21224_v42  ;;  %v21226_v53 = vunpack.c.h.b16 %v21223_v57 }
 0x5d8   : > { %v10226_v17 = vunpack.c.l.b16 %v8023_v20  ;;  %v10227_v26 = vunpack.c.h.b16 %v8023_v20  ;;  %v10225_v48 = vunpack.c.h.b16 %v21217_v46  ;;  %v10506_v59 = vmul.f32 %v17958_v63, %v8691_v21 }
 0x5d9   : > { %21222 = vst [vmem:[#allocation74_spill] sm:$0xff] %v18796_v50  ;;  %v18809_v35 = vpack.c.b16 %v10157_v0, %v21226_v53  ;;  %v10507_v57 = vmul.f32 %v17973_v27, %v8705_v15  ;;  %v21228_v0 = vld [vmem:[#allocation35_spill] sm:$0xff]  ;;  %v10770_v53 = vadd.f32 %v17924_v10, %v10504_v51  ;;  %v10771_v24 = vadd.f32 %v17955_v38, %v10505_v12  ;;  %v21233_v50 = vld [vmem:[#allocation68_spill] sm:$0xff] }
 0x5da   : > { %21225 = vst [vmem:[#allocation41_spill] sm:$0xff] %v18805_v62  ;;  %v21229_v42 = vunpack.c.l.b16 %v21228_v0  ;;  %v21230_v13 = vunpack.c.h.b16 %v21228_v0  ;;  %v10228_v46 = vunpack.c.l.b16 %v8119_v56  ;;  %v10229_v2 = vunpack.c.h.b16 %v8119_v56  ;;  %v21231_v15 = vld [vmem:[#allocation23_spill] sm:$0xff]  ;;  %v8665_v12 = vpop.f32.mrf.mxu0  ;;  %v8679_v56 = vpop.f32.mrf.mxu1 }
 0x5db   : > { %21227 = vst [vmem:[#allocation48_spill] sm:$0xff] %v18809_v35  ;;  %v10772_v21 = vadd.f32 %v17960_v54, %v10506_v59  ;;  %v10773_v35 = vadd.f32 %v17975_v19, %v10507_v57  ;;  %v21232_v62 = vrot.slane %v21231_v15, 4  ;;  %v7684_v0 = vrot.slane %v18168_v49, 4 }
 0x5dc   : > { %v18818_v20 = vpack.c.b16 %v10226_v17, %v21229_v42  ;;  %v18822_v23 = vpack.c.b16 %v10227_v26, %v21230_v13  ;;  %11026 = vst [vmem:[%s17967_s8 + $0x1c0] sm:$0xff] %v10770_v53  ;;  %v18836_v26 = vpack.c.b16 %v10228_v46, %v10224_v39  ;;  %v18838_v51 = vpack.c.b16 %v10229_v2, %v10225_v48 }
 0x5dd   : > { %v18832_v17 = vsel %vm5950_vm8, %v21233_v50, %v21232_v62  ;;  %11027 = vst [vmem:[%s17967_s8 + $0x1c8] sm:$0xff] %v10771_v24  ;;  %v10508_v59 = vmul.f32 %v17896_v32, %v8665_v12  ;;  %v10509_v57 = vmul.f32 %v17947_v22, %v8679_v56  ;;  %v8693_v50 = vpop.f32.mrf.mxu2  ;;  %v8707_v62 = vpop.f32.mrf.mxu3  ;;  %v18847_v49 = vsel %vm5950_vm8, %v18086_v29, %v7684_v0 }
 0x5de   : > { %11028 = vst [vmem:[%s17967_s8 + $0x1d0] sm:$0xff] %v10772_v21  ;;  %v10510_v39 = vmul.f32 %v17958_v63, %v8693_v50  ;;  %v10511_v48 = vmul.f32 %v17973_v27, %v8707_v62  ;;  %12586 = vmatmul.msk.bf16.vlgmr.msra.gmra.mxu0 %vm3698_vm7, %v18641_v60  ;;  %12587 = vmatmul.msk.bf16.vlgmr.msra.gmra.mxu1 %vm3698_vm7, %v18641_v60  ;;  %v7292_v29 = vrot.slane %v18244_v61, 4  ;;  %v21234_v50 = vld [vmem:[#allocation34_spill] sm:$0xff] }
 0x5df   : > { %11029 = vst [vmem:[%s17967_s8 + $0x1d8] sm:$0xff] %v10773_v35  ;;  %v10774_v35 = vadd.f32 %v17924_v10, %v10508_v59  ;;  %v10775_v42 = vadd.f32 %v17955_v38, %v10509_v57  ;;  %12588 = vmatmul.msk.bf16.vlgmr.msra.gmra.mxu2 %vm3698_vm7, %v18641_v60  ;;  %12589 = vmatmul.msk.bf16.vlgmr.msra.gmra.mxu3 %vm3698_vm7, %v18641_v60  ;;  %v7740_v57 = vrot.slane %v18288_v37, 4  ;;  %v10294_v62 = vunpack.c.l.b16 %v21234_v50 }
 0x5e0   : > { %v10776_v13 = vadd.f32 %v17960_v54, %v10510_v39  ;;  %v10777_v53 = vadd.f32 %v17975_v19, %v10511_v48  ;;  %9525 = vmatpush.bf16.msra.mxu0 %v18494_v14  ;;  %9539 = vmatpush.bf16.msra.mxu1 %v18498_v16  ;;  %v7293_v0 = vsel %vm5950_vm8, %v18218_v8, %v7292_v29  ;;  %v10295_v39 = vunpack.c.h.b16 %v21234_v50  ;;  %v21235_v8 = vld [vmem:[#allocation22_spill] sm:$0xff] }
 0x5e1   : > { %11030 = vst [vmem:[%s17967_s8 + $0x1e0] sm:$0xff] %v10774_v35  ;;  %9553 = vmatpush.bf16.msra.mxu2 %v18521_v43  ;;  %9567 = vmatpush.bf16.msra.mxu3 %v18525_v9  ;;  %v8026_v59 = vpack.i.b16 %v7293_v0, %v18832_v17 }
 0x5e2   : > { %11031 = vst [vmem:[%s17967_s8 + $0x1e8] sm:$0xff] %v10775_v42  ;;  %v8735_v24 = vpop.f32.mrf.mxu0  ;;  %v8749_v46 = vpop.f32.mrf.mxu1  ;;  %v8027_v42 = vshrl.u32 %v18832_v17, 16 }
 0x5e3   : > { %11032 = vst [vmem:[%s17967_s8 + $0x1f0] sm:$0xff] %v10776_v13  ;;  %v10512_v2 = vmul.f32 %v17896_v32, %v8735_v24  ;;  %v10513_v21 = vmul.f32 %v17947_v22, %v8749_v46  ;;  %v10298_v48 = vunpack.c.l.b16 %v8026_v59  ;;  %v10299_v35 = vunpack.c.h.b16 %v8026_v59 }
 0x5e4   : > { %11033 = vst [vmem:[%s17967_s8 + $0x1f8] sm:$0xff] %v10777_v53  ;;  %v8028_v13 = vshrl.u32 %v7293_v0, 16  ;;  %v10296_v53 = vunpack.c.l.b16 %v21235_v8 }
 0x5e5   : > { %v8763_v15 = vpop.f32.mrf.mxu2  ;;  %v8777_v61 = vpop.f32.mrf.mxu3  ;;  %v10778_v43 = vadd.f32 %v17924_v10, %v10512_v2  ;;  %v10779_v9 = vadd.f32 %v17955_v38, %v10513_v21  ;;  %v18892_v46 = vpack.c.b16 %v10298_v48, %v10294_v62  ;;  %v18894_v37 = vpack.c.b16 %v10299_v35, %v10295_v39 }
 0x5e6   : > { %v10514_v14 = vmul.f32 %v17958_v63, %v8763_v15  ;;  %v10515_v16 = vmul.f32 %v17973_v27, %v8777_v61  ;;  %v10297_v2 = vunpack.c.h.b16 %v21235_v8  ;;  %v8029_v21 = vpack.i.b16 %v8028_v13, %v8027_v42 }
 0x5e7   : > { %11034 = vst [vmem:[%s17967_s8 + $0x200] sm:$0xff] %v10778_v43  ;;  %v21236_v43 = vld [vmem:[#allocation55_spill] sm:$0xff] }
 0x5e8   : > { %v10780_v12 = vadd.f32 %v17960_v54, %v10514_v14  ;;  %v10781_v56 = vadd.f32 %v17975_v19, %v10515_v16  ;;  %11035 = vst [vmem:[%s17967_s8 + $0x208] sm:$0xff] %v10779_v9  ;;  %v7741_v16 = vsel %vm5950_vm8, %v18252_v58, %v7740_v57  ;;  %v10366_v9 = vunpack.c.l.b16 %v21236_v43 }
 0x5e9   : > { %v10370_v59 = vunpack.c.l.b16 %v8029_v21  ;;  %v10367_v39 = vunpack.c.h.b16 %v21236_v43  ;;  %v10371_v48 = vunpack.c.h.b16 %v8029_v21 }
 0x5ea   : > { %11036 = vst [vmem:[%s17967_s8 + $0x210] sm:$0xff] %v10780_v12  ;;  %v8737_v29 = vpop.f32.mrf.mxu0  ;;  %v8751_v24 = vpop.f32.mrf.mxu1 }
 0x5eb   : > { %11037 = vst [vmem:[%s17967_s8 + $0x218] sm:$0xff] %v10781_v56  ;;  %v10516_v15 = vmul.f32 %v17896_v32, %v8737_v29  ;;  %v10517_v61 = vmul.f32 %v17947_v22, %v8751_v24  ;;  %v8122_v56 = vpack.i.b16 %v7741_v16, %v18847_v49  ;;  %v18915_v13 = vpack.c.b16 %v10370_v59, %v10366_v9 }
 0x5ec   : > { %v18917_v8 = vpack.c.b16 %v10371_v48, %v10367_v39  ;;  %v8123_v29 = vshrl.u32 %v18847_v49, 16  ;;  %v8124_v24 = vshrl.u32 %v7741_v16, 16  ;;  %v21238_v16 = vld [vmem:[#allocation29_spill] sm:$0xff] }
 0x5ed   : > { %v8765_v14 = vpop.f32.mrf.mxu2  ;;  %v8779_v17 = vpop.f32.mrf.mxu3  ;;  %v10782_v50 = vadd.f32 %v17924_v10, %v10516_v15  ;;  %v10783_v62 = vadd.f32 %v17955_v38, %v10517_v61  ;;  %v10300_v35 = vunpack.c.l.b16 %v8122_v56  ;;  %v10301_v42 = vunpack.c.h.b16 %v8122_v56  ;;  %v21237_v61 = vld [vmem:[#allocation75_spill] sm:$0xff] }
 0x5ee   : > { %v10518_v0 = vmul.f32 %v17958_v63, %v8765_v14  ;;  %v10519_v12 = vmul.f32 %v17973_v27, %v8779_v17  ;;  %12590 = vmatmul.msk.bf16.vlgmr.msrb.gmra.mxu0 %vm3698_vm7, %v18641_v60  ;;  %12591 = vmatmul.msk.bf16.vlgmr.msrb.gmra.mxu1 %vm3698_vm7, %v18641_v60  ;;  %v8125_v14 = vpack.i.b16 %v8124_v24, %v8123_v29  ;;  %v10368_v43 = vunpack.c.l.b16 %v21238_v16 }
 0x5ef   : > { %11038 = vst [vmem:[%s17967_s8 + $0x220] sm:$0xff] %v10782_v50  ;;  %12592 = vmatmul.msk.bf16.vlgmr.msrb.gmra.mxu2 %vm3698_vm7, %v18641_v60  ;;  %12593 = vmatmul.msk.bf16.vlgmr.msrb.gmra.mxu3 %vm3698_vm7, %v18641_v60  ;;  %v18925_v21 = vpack.c.b16 %v10300_v35, %v10296_v53  ;;  %v18927_v15 = vpack.c.b16 %v10301_v42, %v10297_v2  ;;  %v10369_v53 = vunpack.c.h.b16 %v21238_v16 }
 0x5f0   : > { %v10784_v58 = vadd.f32 %v17960_v54, %v10518_v0  ;;  %v10785_v57 = vadd.f32 %v17975_v19, %v10519_v12  ;;  %11039 = vst [vmem:[%s17967_s8 + $0x228] sm:$0xff] %v10783_v62  ;;  %9597 = vmatpush.bf16.msrb.mxu0 %v18461_v55  ;;  %9611 = vmatpush.bf16.msrb.mxu1 %v21237_v61  ;;  %v10373_v12 = vunpack.c.h.b16 %v8125_v14 }
 0x5f1   : > { %9625 = vmatpush.bf16.msrb.mxu2 %v18534_v33  ;;  %9639 = vmatpush.bf16.msrb.mxu3 %v18538_v30  ;;  %v10372_v33 = vunpack.c.l.b16 %v8125_v14 }
 0x5f2   : > { %11040 = vst [vmem:[%s17967_s8 + $0x230] sm:$0xff] %v10784_v58  ;;  %v8807_v49 = vpop.f32.mrf.mxu0  ;;  %v8821_v17 = vpop.f32.mrf.mxu1  ;;  %v18945_v39 = vpack.c.b16 %v10373_v12, %v10369_v53 }
 0x5f3   : > { %11041 = vst [vmem:[%s17967_s8 + $0x238] sm:$0xff] %v10785_v57  ;;  %v10520_v2 = vmul.f32 %v17896_v32, %v8807_v49  ;;  %v10521_v55 = vmul.f32 %v17947_v22, %v8821_v17  ;;  %v18943_v62 = vpack.c.b16 %v10372_v33, %v10368_v43 }
 0x5f5   : > { %v8835_v9 = vpop.f32.mrf.mxu2  ;;  %v8849_v0 = vpop.f32.mrf.mxu3  ;;  %v10786_v59 = vadd.f32 %v17924_v10, %v10520_v2  ;;  %v10787_v50 = vadd.f32 %v17955_v38, %v10521_v55 }
 0x5f6   : > { %v10522_v30 = vmul.f32 %v17958_v63, %v8835_v9  ;;  %v10523_v56 = vmul.f32 %v17973_v27, %v8849_v0 }
 0x5f7   : > { %11042 = vst [vmem:[%s17967_s8 + $0x240] sm:$0xff] %v10786_v59 }
 0x5f8   : > { %v10788_v48 = vadd.f32 %v17960_v54, %v10522_v30  ;;  %v10789_v58 = vadd.f32 %v17975_v19, %v10523_v56  ;;  %11043 = vst [vmem:[%s17967_s8 + $0x248] sm:$0xff] %v10787_v50 }
 0x5fa   : > { %11044 = vst [vmem:[%s17967_s8 + $0x250] sm:$0xff] %v10788_v48  ;;  %v8809_v57 = vpop.f32.mrf.mxu0  ;;  %v8823_v35 = vpop.f32.mrf.mxu1 }
 0x5fb   : > { %11045 = vst [vmem:[%s17967_s8 + $0x258] sm:$0xff] %v10789_v58  ;;  %v10524_v42 = vmul.f32 %v17896_v32, %v8809_v57  ;;  %v10525_v29 = vmul.f32 %v17947_v22, %v8823_v35 }
 0x5fd   : > { %v8837_v24 = vpop.f32.mrf.mxu2  ;;  %v8851_v61 = vpop.f32.mrf.mxu3  ;;  %v10790_v17 = vadd.f32 %v17924_v10, %v10524_v42  ;;  %v10791_v16 = vadd.f32 %v17955_v38, %v10525_v29 }
 0x5fe   : > { %v10526_v14 = vmul.f32 %v17958_v63, %v8837_v24  ;;  %v10527_v49 = vmul.f32 %v17973_v27, %v8851_v61  ;;  %12594 = vmatmul.msk.bf16.vlgmr.msra.gmra.mxu0 %vm3698_vm7, %v18641_v60  ;;  %12595 = vmatmul.msk.bf16.vlgmr.msra.gmra.mxu1 %vm3698_vm7, %v18641_v60 }
 0x5ff   : > { %11046 = vst [vmem:[%s17967_s8 + $0x260] sm:$0xff] %v10790_v17  ;;  %12596 = vmatmul.msk.bf16.vlgmr.msra.gmra.mxu2 %vm3698_vm7, %v18641_v60  ;;  %12597 = vmatmul.msk.bf16.vlgmr.msra.gmra.mxu3 %vm3698_vm7, %v18641_v60  ;;  %v21239_v17 = vld [vmem:[#allocation45_spill] sm:$0xff] }
 0x600   : > { %v10792_v43 = vadd.f32 %v17960_v54, %v10526_v14  ;;  %v10793_v53 = vadd.f32 %v17975_v19, %v10527_v49  ;;  %11047 = vst [vmem:[%s17967_s8 + $0x268] sm:$0xff] %v10791_v16  ;;  %9669 = vmatpush.bf16.msra.mxu0 %v18546_v6  ;;  %9683 = vmatpush.bf16.msra.mxu1 %v18550_v4  ;;  %v21240_v16 = vld [vmem:[#allocation26_spill] sm:$0xff] }
 0x601   : > { %9697 = vmatpush.bf16.msra.mxu2 %v18583_v28  ;;  %9711 = vmatpush.bf16.msra.mxu3 %v18587_v41 }
 0x602   : > { %11048 = vst [vmem:[%s17967_s8 + $0x270] sm:$0xff] %v10792_v43  ;;  %v8879_v2 = vpop.f32.mrf.mxu0  ;;  %v8893_v55 = vpop.f32.mrf.mxu1 }
 0x603   : > { %11049 = vst [vmem:[%s17967_s8 + $0x278] sm:$0xff] %v10793_v53  ;;  %v10528_v9 = vmul.f32 %v17896_v32, %v8879_v2  ;;  %v10529_v0 = vmul.f32 %v17947_v22, %v8893_v55 }
 0x605   : > { %v8907_v33 = vpop.f32.mrf.mxu2  ;;  %v8921_v6 = vpop.f32.mrf.mxu3  ;;  %v10794_v28 = vadd.f32 %v17924_v10, %v10528_v9  ;;  %v10795_v30 = vadd.f32 %v17955_v38, %v10529_v0 }
 0x606   : > { %v10530_v4 = vmul.f32 %v17958_v63, %v8907_v33  ;;  %v10531_v12 = vmul.f32 %v17973_v27, %v8921_v6 }
 0x607   : > { %11050 = vst [vmem:[%s17967_s8 + $0x280] sm:$0xff] %v10794_v28 }
 0x608   : > { %v10796_v41 = vadd.f32 %v17960_v54, %v10530_v4  ;;  %v10797_v56 = vadd.f32 %v17975_v19, %v10531_v12  ;;  %11051 = vst [vmem:[%s17967_s8 + $0x288] sm:$0xff] %v10795_v30 }
 0x60a   : > { %11052 = vst [vmem:[%s17967_s8 + $0x290] sm:$0xff] %v10796_v41  ;;  %v8881_v59 = vpop.f32.mrf.mxu0  ;;  %v8895_v50 = vpop.f32.mrf.mxu1 }
 0x60b   : > { %11053 = vst [vmem:[%s17967_s8 + $0x298] sm:$0xff] %v10797_v56  ;;  %v10532_v48 = vmul.f32 %v17896_v32, %v8881_v59  ;;  %v10533_v58 = vmul.f32 %v17947_v22, %v8895_v50 }
 0x60d   : > { %v8909_v57 = vpop.f32.mrf.mxu2  ;;  %v8923_v35 = vpop.f32.mrf.mxu3  ;;  %v10798_v24 = vadd.f32 %v17924_v10, %v10532_v48  ;;  %v10799_v61 = vadd.f32 %v17955_v38, %v10533_v58 }
 0x60e   : > { %v10534_v42 = vmul.f32 %v17958_v63, %v8909_v57  ;;  %v10535_v29 = vmul.f32 %v17973_v27, %v8923_v35  ;;  %12598 = vmatmul.msk.bf16.vlgmr.msrb.gmra.mxu0 %vm3698_vm7, %v18641_v60  ;;  %12599 = vmatmul.msk.bf16.vlgmr.msrb.gmra.mxu1 %vm3698_vm7, %v18641_v60 }
 0x60f   : > { %11054 = vst [vmem:[%s17967_s8 + $0x2a0] sm:$0xff] %v10798_v24  ;;  %12600 = vmatmul.msk.bf16.vlgmr.msrb.gmra.mxu2 %vm3698_vm7, %v18641_v60  ;;  %12601 = vmatmul.msk.bf16.vlgmr.msrb.gmra.mxu3 %vm3698_vm7, %v18641_v60  ;;  %v21241_v24 = vld [vmem:[#allocation44_spill] sm:$0xff] }
 0x610   : > { %v10800_v14 = vadd.f32 %v17960_v54, %v10534_v42  ;;  %v10801_v49 = vadd.f32 %v17975_v19, %v10535_v29  ;;  %11055 = vst [vmem:[%s17967_s8 + $0x2a8] sm:$0xff] %v10799_v61  ;;  %9741 = vmatpush.bf16.msrb.mxu0 %v21239_v17  ;;  %9755 = vmatpush.bf16.msrb.mxu1 %v21240_v16  ;;  %v21242_v61 = vld [vmem:[#allocation51_spill] sm:$0xff] }
 0x611   : > { %9769 = vmatpush.bf16.msrb.mxu2 %v18620_v31  ;;  %9783 = vmatpush.bf16.msrb.mxu3 %v18624_v36 }
 0x612   : > { %11056 = vst [vmem:[%s17967_s8 + $0x2b0] sm:$0xff] %v10800_v14  ;;  %v8951_v43 = vpop.f32.mrf.mxu0  ;;  %v8965_v53 = vpop.f32.mrf.mxu1 }
 0x613   : > { %11057 = vst [vmem:[%s17967_s8 + $0x2b8] sm:$0xff] %v10801_v49  ;;  %v10536_v2 = vmul.f32 %v17896_v32, %v8951_v43  ;;  %v10537_v55 = vmul.f32 %v17947_v22, %v8965_v53 }
 0x615   : > { %v8979_v9 = vpop.f32.mrf.mxu2  ;;  %v8993_v0 = vpop.f32.mrf.mxu3  ;;  %v10802_v31 = vadd.f32 %v17924_v10, %v10536_v2  ;;  %v10803_v4 = vadd.f32 %v17955_v38, %v10537_v55 }
 0x616   : > { %v10538_v33 = vmul.f32 %v17958_v63, %v8979_v9  ;;  %v10539_v6 = vmul.f32 %v17973_v27, %v8993_v0 }
 0x617   : > { %11058 = vst [vmem:[%s17967_s8 + $0x2c0] sm:$0xff] %v10802_v31 }
 0x618   : > { %v10804_v36 = vadd.f32 %v17960_v54, %v10538_v33  ;;  %v10805_v12 = vadd.f32 %v17975_v19, %v10539_v6  ;;  %11059 = vst [vmem:[%s17967_s8 + $0x2c8] sm:$0xff] %v10803_v4 }
 0x61a   : > { %11060 = vst [vmem:[%s17967_s8 + $0x2d0] sm:$0xff] %v10804_v36  ;;  %v8953_v28 = vpop.f32.mrf.mxu0  ;;  %v8967_v30 = vpop.f32.mrf.mxu1 }
 0x61b   : > { %11061 = vst [vmem:[%s17967_s8 + $0x2d8] sm:$0xff] %v10805_v12  ;;  %v10540_v41 = vmul.f32 %v17896_v32, %v8953_v28  ;;  %v10541_v56 = vmul.f32 %v17947_v22, %v8967_v30 }
 0x61d   : > { %v8981_v59 = vpop.f32.mrf.mxu2  ;;  %v8995_v50 = vpop.f32.mrf.mxu3  ;;  %v10806_v57 = vadd.f32 %v17924_v10, %v10540_v41  ;;  %v10807_v35 = vadd.f32 %v17955_v38, %v10541_v56 }
 0x61e   : > { %v10542_v48 = vmul.f32 %v17958_v63, %v8981_v59  ;;  %v10543_v58 = vmul.f32 %v17973_v27, %v8995_v50  ;;  %12602 = vmatmul.msk.bf16.vlgmr.msra.gmra.mxu0 %vm3698_vm7, %v18641_v60  ;;  %12603 = vmatmul.msk.bf16.vlgmr.msra.gmra.mxu1 %vm3698_vm7, %v18641_v60 }
 0x61f   : > { %11062 = vst [vmem:[%s17967_s8 + $0x2e0] sm:$0xff] %v10806_v57  ;;  %12604 = vmatmul.msk.bf16.vlgmr.msra.gmra.mxu2 %vm3698_vm7, %v18641_v60  ;;  %12605 = vmatmul.msk.bf16.vlgmr.msra.gmra.mxu3 %vm3698_vm7, %v18641_v60 }
 0x620   : > { %v10808_v42 = vadd.f32 %v17960_v54, %v10542_v48  ;;  %v10809_v29 = vadd.f32 %v17975_v19, %v10543_v58  ;;  %11063 = vst [vmem:[%s17967_s8 + $0x2e8] sm:$0xff] %v10807_v35  ;;  %9813 = vmatpush.bf16.msra.mxu0 %v21241_v24  ;;  %9827 = vmatpush.bf16.msra.mxu1 %v21242_v61  ;;  %v21243_v48 = vld [vmem:[#allocation38_spill] sm:$0xff] }
 0x621   : > { %9841 = vmatpush.bf16.msra.mxu2 %v18634_v47  ;;  %9855 = vmatpush.bf16.msra.mxu3 %v18638_v11 }
 0x622   : > { %11064 = vst [vmem:[%s17967_s8 + $0x2f0] sm:$0xff] %v10808_v42  ;;  %v9023_v14 = vpop.f32.mrf.mxu0  ;;  %v9037_v49 = vpop.f32.mrf.mxu1 }
 0x623   : > { %11065 = vst [vmem:[%s17967_s8 + $0x2f8] sm:$0xff] %v10809_v29  ;;  %v10544_v17 = vmul.f32 %v17896_v32, %v9023_v14  ;;  %v10545_v16 = vmul.f32 %v17947_v22, %v9037_v49 }
 0x625   : > { %v9051_v43 = vpop.f32.mrf.mxu2  ;;  %v9065_v53 = vpop.f32.mrf.mxu3  ;;  %v10810_v47 = vadd.f32 %v17924_v10, %v10544_v17  ;;  %v10811_v9 = vadd.f32 %v17955_v38, %v10545_v16 }
 0x626   : > { %v10546_v2 = vmul.f32 %v17958_v63, %v9051_v43  ;;  %v10547_v55 = vmul.f32 %v17973_v27, %v9065_v53 }
 0x627   : > { %11066 = vst [vmem:[%s17967_s8 + $0x300] sm:$0xff] %v10810_v47 }
 0x628   : > { %v10812_v11 = vadd.f32 %v17960_v54, %v10546_v2  ;;  %v10813_v0 = vadd.f32 %v17975_v19, %v10547_v55  ;;  %11067 = vst [vmem:[%s17967_s8 + $0x308] sm:$0xff] %v10811_v9 }
 0x62a   : > { %11068 = vst [vmem:[%s17967_s8 + $0x310] sm:$0xff] %v10812_v11  ;;  %v9025_v33 = vpop.f32.mrf.mxu0  ;;  %v9039_v6 = vpop.f32.mrf.mxu1 }
 0x62b   : > { %11069 = vst [vmem:[%s17967_s8 + $0x318] sm:$0xff] %v10813_v0  ;;  %v10548_v31 = vmul.f32 %v17896_v32, %v9025_v33  ;;  %v10549_v4 = vmul.f32 %v17947_v22, %v9039_v6 }
 0x62d   : > { %v9053_v36 = vpop.f32.mrf.mxu2  ;;  %v9067_v12 = vpop.f32.mrf.mxu3  ;;  %v10814_v41 = vadd.f32 %v17924_v10, %v10548_v31  ;;  %v10815_v56 = vadd.f32 %v17955_v38, %v10549_v4  ;;  %v21244_v31 = vld [vmem:[#allocation47_spill] sm:$0xff]  ;;  %v21245_v4 = vld [vmem:[#allocation60_spill] sm:$0xff] }
 0x62e   : > { %v10550_v28 = vmul.f32 %v17958_v63, %v9053_v36  ;;  %v10551_v30 = vmul.f32 %v17973_v27, %v9067_v12  ;;  %12606 = vmatmul.msk.bf16.vlgmr.msrb.gmra.mxu0 %vm3698_vm7, %v18641_v60  ;;  %12607 = vmatmul.msk.bf16.vlgmr.msrb.gmra.mxu1 %vm3698_vm7, %v18641_v60  ;;  %v21246_v36 = vld [vmem:[#allocation71_spill] sm:$0xff] }
 0x62f   : > { %11070 = vst [vmem:[%s17967_s8 + $0x320] sm:$0xff] %v10814_v41  ;;  %12608 = vmatmul.msk.bf16.vlgmr.msrb.gmra.mxu2 %vm3698_vm7, %v18641_v60  ;;  %12609 = vmatmul.msk.bf16.vlgmr.msrb.gmra.mxu3 %vm3698_vm7, %v18641_v60 }
 0x630   : > { %v10816_v59 = vadd.f32 %v17960_v54, %v10550_v28  ;;  %v10817_v50 = vadd.f32 %v17975_v19, %v10551_v30  ;;  %11071 = vst [vmem:[%s17967_s8 + $0x328] sm:$0xff] %v10815_v56  ;;  %9885 = vmatpush.bf16.msrb.mxu0 %v18650_v1  ;;  %9899 = vmatpush.bf16.msrb.mxu1 %v18654_v40 }
 0x631   : > { %9913 = vmatpush.bf16.msrb.mxu2 %v18671_v44  ;;  %9927 = vmatpush.bf16.msrb.mxu3 %v21243_v48 }
 0x632   : > { %11072 = vst [vmem:[%s17967_s8 + $0x330] sm:$0xff] %v10816_v59  ;;  %v9095_v58 = vpop.f32.mrf.mxu0  ;;  %v9109_v57 = vpop.f32.mrf.mxu1 }
 0x633   : > { %11073 = vst [vmem:[%s17967_s8 + $0x338] sm:$0xff] %v10817_v50  ;;  %v10552_v35 = vmul.f32 %v17896_v32, %v9095_v58  ;;  %v10553_v42 = vmul.f32 %v17947_v22, %v9109_v57 }
 0x635   : > { %v9123_v29 = vpop.f32.mrf.mxu2  ;;  %v9137_v1 = vpop.f32.mrf.mxu3  ;;  %v10818_v44 = vadd.f32 %v17924_v10, %v10552_v35  ;;  %v10819_v61 = vadd.f32 %v17955_v38, %v10553_v42 }
 0x636   : > { %v10554_v40 = vmul.f32 %v17958_v63, %v9123_v29  ;;  %v10555_v24 = vmul.f32 %v17973_v27, %v9137_v1 }
 0x637   : > { %11074 = vst [vmem:[%s17967_s8 + $0x340] sm:$0xff] %v10818_v44 }
 0x638   : > { %v10820_v14 = vadd.f32 %v17960_v54, %v10554_v40  ;;  %v10821_v49 = vadd.f32 %v17975_v19, %v10555_v24  ;;  %11075 = vst [vmem:[%s17967_s8 + $0x348] sm:$0xff] %v10819_v61 }
 0x63a   : > { %11076 = vst [vmem:[%s17967_s8 + $0x350] sm:$0xff] %v10820_v14  ;;  %v9097_v17 = vpop.f32.mrf.mxu0  ;;  %v9111_v16 = vpop.f32.mrf.mxu1 }
 0x63b   : > { %11077 = vst [vmem:[%s17967_s8 + $0x358] sm:$0xff] %v10821_v49  ;;  %v10556_v43 = vmul.f32 %v17896_v32, %v9097_v17  ;;  %v10557_v53 = vmul.f32 %v17947_v22, %v9111_v16 }
 0x63d   : > { %v9125_v2 = vpop.f32.mrf.mxu2  ;;  %v9139_v55 = vpop.f32.mrf.mxu3  ;;  %v10822_v11 = vadd.f32 %v17924_v10, %v10556_v43  ;;  %v10823_v0 = vadd.f32 %v17955_v38, %v10557_v53  ;;  %v21247_v53 = vld [vmem:[#allocation42_spill] sm:$0xff] }
 0x63e   : > { %v10558_v47 = vmul.f32 %v17958_v63, %v9125_v2  ;;  %v10559_v9 = vmul.f32 %v17973_v27, %v9139_v55  ;;  %12610 = vmatmul.msk.bf16.vlgmr.msra.gmra.mxu0 %vm3698_vm7, %v18641_v60  ;;  %12611 = vmatmul.msk.bf16.vlgmr.msra.gmra.mxu1 %vm3698_vm7, %v18641_v60  ;;  %v21248_v2 = vld [vmem:[#allocation54_spill] sm:$0xff] }
 0x63f   : > { %11078 = vst [vmem:[%s17967_s8 + $0x360] sm:$0xff] %v10822_v11  ;;  %12612 = vmatmul.msk.bf16.vlgmr.msra.gmra.mxu2 %vm3698_vm7, %v18641_v60  ;;  %12613 = vmatmul.msk.bf16.vlgmr.msra.gmra.mxu3 %vm3698_vm7, %v18641_v60 }
 0x640   : > { %v10824_v33 = vadd.f32 %v17960_v54, %v10558_v47  ;;  %v10825_v6 = vadd.f32 %v17975_v19, %v10559_v9  ;;  %11079 = vst [vmem:[%s17967_s8 + $0x368] sm:$0xff] %v10823_v0  ;;  %9957 = vmatpush.bf16.msra.mxu0 %v18691_v7  ;;  %9971 = vmatpush.bf16.msra.mxu1 %v21244_v31 }
 0x641   : > { %9985 = vmatpush.bf16.msra.mxu2 %v21245_v4  ;;  %9999 = vmatpush.bf16.msra.mxu3 %v21246_v36 }
 0x642   : > { %11080 = vst [vmem:[%s17967_s8 + $0x370] sm:$0xff] %v10824_v33  ;;  %v9167_v12 = vpop.f32.mrf.mxu0  ;;  %v9181_v28 = vpop.f32.mrf.mxu1 }
 0x643   : > { %11081 = vst [vmem:[%s17967_s8 + $0x378] sm:$0xff] %v10825_v6  ;;  %v10560_v30 = vmul.f32 %v17896_v32, %v9167_v12  ;;  %v10561_v41 = vmul.f32 %v17947_v22, %v9181_v28 }
 0x645   : > { %v9195_v56 = vpop.f32.mrf.mxu2  ;;  %v9209_v7 = vpop.f32.mrf.mxu3  ;;  %v10826_v48 = vadd.f32 %v17924_v10, %v10560_v30  ;;  %v10827_v58 = vadd.f32 %v17955_v38, %v10561_v41 }
 0x646   : > { %v10562_v59 = vmul.f32 %v17958_v63, %v9195_v56  ;;  %v10563_v50 = vmul.f32 %v17973_v27, %v9209_v7 }
 0x647   : > { %11082 = vst [vmem:[%s17967_s8 + $0x380] sm:$0xff] %v10826_v48 }
 0x648   : > { %v10828_v57 = vadd.f32 %v17960_v54, %v10562_v59  ;;  %v10829_v35 = vadd.f32 %v17975_v19, %v10563_v50  ;;  %11083 = vst [vmem:[%s17967_s8 + $0x388] sm:$0xff] %v10827_v58 }
 0x64a   : > { %11084 = vst [vmem:[%s17967_s8 + $0x390] sm:$0xff] %v10828_v57  ;;  %v9169_v42 = vpop.f32.mrf.mxu0  ;;  %v9183_v29 = vpop.f32.mrf.mxu1 }
 0x64b   : > { %11085 = vst [vmem:[%s17967_s8 + $0x398] sm:$0xff] %v10829_v35  ;;  %v10564_v1 = vmul.f32 %v17896_v32, %v9169_v42  ;;  %v10565_v40 = vmul.f32 %v17947_v22, %v9183_v29  ;;  %v19183_v42 = vld [vmem:[%s13180_s7] sm:$0xff] }
 0x64d   : > { %v9197_v24 = vpop.f32.mrf.mxu2  ;;  %v9211_v44 = vpop.f32.mrf.mxu3  ;;  %v10830_v49 = vadd.f32 %v17924_v10, %v10564_v1  ;;  %v10831_v17 = vadd.f32 %v17955_v38, %v10565_v40 }
 0x64e   : > { %v10566_v61 = vmul.f32 %v17958_v63, %v9197_v24  ;;  %v10567_v14 = vmul.f32 %v17973_v27, %v9211_v44  ;;  %12614 = vmatmul.msk.bf16.vlgmr.msrb.gmra.mxu0 %vm3698_vm7, %v18641_v60  ;;  %12615 = vmatmul.msk.bf16.vlgmr.msrb.gmra.mxu1 %vm3698_vm7, %v18641_v60 }
 0x64f   : > { %11086 = vst [vmem:[%s17967_s8 + $0x3a0] sm:$0xff] %v10830_v49  ;;  %12616 = vmatmul.msk.bf16.vlgmr.msrb.gmra.mxu2 %vm3698_vm7, %v18641_v60  ;;  %12617 = vmatmul.msk.bf16.vlgmr.msrb.gmra.mxu3 %vm3698_vm7, %v18641_v60 }
 0x650   : > { %v10832_v16 = vadd.f32 %v17960_v54, %v10566_v61  ;;  %v10833_v43 = vadd.f32 %v17975_v19, %v10567_v14  ;;  %11087 = vst [vmem:[%s17967_s8 + $0x3a8] sm:$0xff] %v10831_v17  ;;  %10029 = vmatpush.bf16.msrb.mxu0 %v21247_v53  ;;  %10043 = vmatpush.bf16.msrb.mxu1 %v21248_v2 }
 0x651   : > { %10057 = vmatpush.bf16.msrb.mxu2 %v18748_v34  ;;  %10071 = vmatpush.bf16.msrb.mxu3 %v18752_v52 }
 0x652   : > { %11088 = vst [vmem:[%s17967_s8 + $0x3b0] sm:$0xff] %v10832_v16  ;;  %v9239_v55 = vpop.f32.mrf.mxu0  ;;  %v9253_v47 = vpop.f32.mrf.mxu1 }
 0x653   : > { %11089 = vst [vmem:[%s17967_s8 + $0x3b8] sm:$0xff] %v10833_v43  ;;  %v10568_v9 = vmul.f32 %v17896_v32, %v9239_v55  ;;  %v10569_v11 = vmul.f32 %v17947_v22, %v9253_v47 }
 0x655   : > { %v9267_v0 = vpop.f32.mrf.mxu2  ;;  %v9281_v33 = vpop.f32.mrf.mxu3  ;;  %v10834_v34 = vadd.f32 %v17924_v10, %v10568_v9  ;;  %v10835_v4 = vadd.f32 %v17955_v38, %v10569_v11 }
 0x656   : > { %v10570_v6 = vmul.f32 %v17958_v63, %v9267_v0  ;;  %v10571_v31 = vmul.f32 %v17973_v27, %v9281_v33 }
 0x657   : > { %11090 = vst [vmem:[%s17967_s8 + $0x3c0] sm:$0xff] %v10834_v34  ;;  %v21251_v34 = vld [vmem:[#allocation48_spill] sm:$0xff] }
 0x658   : > { %v10836_v52 = vadd.f32 %v17960_v54, %v10570_v6  ;;  %v10837_v36 = vadd.f32 %v17975_v19, %v10571_v31  ;;  %11091 = vst [vmem:[%s17967_s8 + $0x3c8] sm:$0xff] %v10835_v4  ;;  %v21249_v6 = vld [vmem:[#allocation74_spill] sm:$0xff]  ;;  %v21250_v31 = vld [vmem:[#allocation41_spill] sm:$0xff] }
 0x65a   : > { %11092 = vst [vmem:[%s17967_s8 + $0x3d0] sm:$0xff] %v10836_v52  ;;  %v9241_v12 = vpop.f32.mrf.mxu0  ;;  %v9255_v28 = vpop.f32.mrf.mxu1 }
 0x65b   : > { %11093 = vst [vmem:[%s17967_s8 + $0x3d8] sm:$0xff] %v10837_v36  ;;  %v10572_v30 = vmul.f32 %v17896_v32, %v9241_v12  ;;  %v10573_v41 = vmul.f32 %v17947_v22, %v9255_v28 }
 0x65d   : > { %v9269_v56 = vpop.f32.mrf.mxu2  ;;  %v9283_v7 = vpop.f32.mrf.mxu3  ;;  %v10838_v48 = vadd.f32 %v17924_v10, %v10572_v30  ;;  %v10839_v58 = vadd.f32 %v17955_v38, %v10573_v41 }
 0x65e   : > { %v10574_v59 = vmul.f32 %v17958_v63, %v9269_v56  ;;  %v10575_v50 = vmul.f32 %v17973_v27, %v9283_v7  ;;  %12618 = vmatmul.msk.bf16.vlgmr.msra.gmra.mxu0 %vm3698_vm7, %v18641_v60  ;;  %12619 = vmatmul.msk.bf16.vlgmr.msra.gmra.mxu1 %vm3698_vm7, %v18641_v60 }
 0x65f   : > { %11094 = vst [vmem:[%s17967_s8 + $0x3e0] sm:$0xff] %v10838_v48  ;;  %12620 = vmatmul.msk.bf16.vlgmr.msra.gmra.mxu2 %vm3698_vm7, %v19183_v42  ;;  %12621 = vmatmul.msk.bf16.vlgmr.msra.gmra.mxu3 %vm3698_vm7, %v19183_v42 }
 0x660   : > { %v10840_v57 = vadd.f32 %v17960_v54, %v10574_v59  ;;  %v10841_v35 = vadd.f32 %v17975_v19, %v10575_v50  ;;  %11095 = vst [vmem:[%s17967_s8 + $0x3e8] sm:$0xff] %v10839_v58  ;;  %10101 = vmatpush.bf16.msra.mxu0 %v18762_v45  ;;  %10115 = vmatpush.bf16.msra.mxu1 %v18766_v3 }
 0x661   : > { %10129 = vmatpush.bf16.msra.mxu2 %v18775_v25  ;;  %10143 = vmatpush.bf16.msra.mxu3 %v18779_v5 }
 0x662   : > { %11096 = vst [vmem:[%s17967_s8 + $0x3f0] sm:$0xff] %v10840_v57  ;;  %v9311_v60 = vpop.f32.mrf.mxu0  ;;  %v9325_v29 = vpop.f32.mrf.mxu1 }
 0x663   : > { %11097 = vst [vmem:[%s17967_s8 + $0x3f8] sm:$0xff] %v10841_v35  ;;  %v10576_v1 = vmul.f32 %v17896_v32, %v9311_v60  ;;  %v10577_v40 = vmul.f32 %v17947_v22, %v9325_v29 }
 0x665   : > { %v9339_v24 = vpop.f32.mrf.mxu2  ;;  %v9353_v45 = vpop.f32.mrf.mxu3  ;;  %v10842_v25 = vadd.f32 %v17924_v10, %v10576_v1  ;;  %v10843_v61 = vadd.f32 %v17955_v38, %v10577_v40 }
 0x666   : > { %v10578_v3 = vmul.f32 %v17958_v63, %v9339_v24  ;;  %v10579_v44 = vmul.f32 %v17973_v27, %v9353_v45 }
 0x667   : > { %11098 = vst [vmem:[%s17967_s8 + $0x400] sm:$0xff] %v10842_v25 }
 0x668   : > { %v10844_v5 = vadd.f32 %v17960_v54, %v10578_v3  ;;  %v10845_v14 = vadd.f32 %v17975_v19, %v10579_v44  ;;  %11099 = vst [vmem:[%s17967_s8 + $0x408] sm:$0xff] %v10843_v61 }
 0x66a   : > { %11100 = vst [vmem:[%s17967_s8 + $0x410] sm:$0xff] %v10844_v5  ;;  %v9313_v49 = vpop.f32.mrf.mxu0  ;;  %v9327_v17 = vpop.f32.mrf.mxu1 }
 0x66b   : > { %11101 = vst [vmem:[%s17967_s8 + $0x418] sm:$0xff] %v10845_v14  ;;  %v10580_v16 = vmul.f32 %v17896_v32, %v9313_v49  ;;  %v10581_v43 = vmul.f32 %v17947_v22, %v9327_v17 }
 0x66d   : > { %v9341_v53 = vpop.f32.mrf.mxu2  ;;  %v9355_v2 = vpop.f32.mrf.mxu3  ;;  %v10846_v9 = vadd.f32 %v17924_v10, %v10580_v16  ;;  %v10847_v11 = vadd.f32 %v17955_v38, %v10581_v43 }
 0x66e   : > { %v10582_v55 = vmul.f32 %v17958_v63, %v9341_v53  ;;  %v10583_v47 = vmul.f32 %v17973_v27, %v9355_v2  ;;  %12622 = vmatmul.msk.bf16.vlgmr.msrb.gmra.mxu0 %vm3698_vm7, %v19183_v42  ;;  %12623 = vmatmul.msk.bf16.vlgmr.msrb.gmra.mxu1 %vm3698_vm7, %v19183_v42 }
 0x66f   : > { %11102 = vst [vmem:[%s17967_s8 + $0x420] sm:$0xff] %v10846_v9  ;;  %12624 = vmatmul.msk.bf16.vlgmr.msrb.gmra.mxu2 %vm3698_vm7, %v19183_v42  ;;  %12625 = vmatmul.msk.bf16.vlgmr.msrb.gmra.mxu3 %vm3698_vm7, %v19183_v42 }
 0x670   : > { %v10848_v0 = vadd.f32 %v17960_v54, %v10582_v55  ;;  %v10849_v33 = vadd.f32 %v17975_v19, %v10583_v47  ;;  %11103 = vst [vmem:[%s17967_s8 + $0x428] sm:$0xff] %v10847_v11  ;;  %10173 = vmatpush.bf16.msrb.mxu0 %v18792_v18  ;;  %10187 = vmatpush.bf16.msrb.mxu1 %v21249_v6 }
 0x671   : > { %10201 = vmatpush.bf16.msrb.mxu2 %v21250_v31  ;;  %10215 = vmatpush.bf16.msrb.mxu3 %v21251_v34 }
 0x672   : > { %11104 = vst [vmem:[%s17967_s8 + $0x430] sm:$0xff] %v10848_v0  ;;  %v9383_v4 = vpop.f32.mrf.mxu0  ;;  %v9397_v52 = vpop.f32.mrf.mxu1 }
 0x673   : > { %11105 = vst [vmem:[%s17967_s8 + $0x438] sm:$0xff] %v10849_v33  ;;  %v10584_v36 = vmul.f32 %v17896_v32, %v9383_v4  ;;  %v10585_v12 = vmul.f32 %v17947_v22, %v9397_v52 }
 0x675   : > { %v9411_v28 = vpop.f32.mrf.mxu2  ;;  %v9425_v18 = vpop.f32.mrf.mxu3  ;;  %v10850_v56 = vadd.f32 %v17924_v10, %v10584_v36  ;;  %v10851_v7 = vadd.f32 %v17955_v38, %v10585_v12 }
 0x676   : > { %v10586_v30 = vmul.f32 %v17958_v63, %v9411_v28  ;;  %v10587_v41 = vmul.f32 %v17973_v27, %v9425_v18 }
 0x677   : > { %11106 = vst [vmem:[%s17967_s8 + $0x440] sm:$0xff] %v10850_v56 }
 0x678   : > { %v10852_v59 = vadd.f32 %v17960_v54, %v10586_v30  ;;  %v10853_v50 = vadd.f32 %v17975_v19, %v10587_v41  ;;  %11107 = vst [vmem:[%s17967_s8 + $0x448] sm:$0xff] %v10851_v7 }
 0x67a   : > { %11108 = vst [vmem:[%s17967_s8 + $0x450] sm:$0xff] %v10852_v59  ;;  %v9385_v48 = vpop.f32.mrf.mxu0  ;;  %v9399_v58 = vpop.f32.mrf.mxu1 }
 0x67b   : > { %11109 = vst [vmem:[%s17967_s8 + $0x458] sm:$0xff] %v10853_v50  ;;  %v10588_v57 = vmul.f32 %v17896_v32, %v9385_v48  ;;  %v10589_v35 = vmul.f32 %v17947_v22, %v9399_v58 }
 0x67d   : > { %v9413_v60 = vpop.f32.mrf.mxu2  ;;  %v9427_v29 = vpop.f32.mrf.mxu3  ;;  %v10854_v24 = vadd.f32 %v17924_v10, %v10588_v57  ;;  %v10855_v45 = vadd.f32 %v17955_v38, %v10589_v35 }
 0x67e   : > { %v10590_v1 = vmul.f32 %v17958_v63, %v9413_v60  ;;  %v10591_v40 = vmul.f32 %v17973_v27, %v9427_v29  ;;  %12626 = vmatmul.msk.bf16.vlgmr.msra.gmra.mxu0 %vm3698_vm7, %v19183_v42  ;;  %12627 = vmatmul.msk.bf16.vlgmr.msra.gmra.mxu1 %vm3698_vm7, %v19183_v42 }
 0x67f   : > { %11110 = vst [vmem:[%s17967_s8 + $0x460] sm:$0xff] %v10854_v24  ;;  %12628 = vmatmul.msk.bf16.vlgmr.msra.gmra.mxu2 %vm3698_vm7, %v19183_v42  ;;  %12629 = vmatmul.msk.bf16.vlgmr.msra.gmra.mxu3 %vm3698_vm7, %v19183_v42 }
 0x680   : > { %v10856_v3 = vadd.f32 %v17960_v54, %v10590_v1  ;;  %v10857_v44 = vadd.f32 %v17975_v19, %v10591_v40  ;;  %11111 = vst [vmem:[%s17967_s8 + $0x468] sm:$0xff] %v10855_v45  ;;  %10245 = vmatpush.bf16.msra.mxu0 %v18818_v20  ;;  %10259 = vmatpush.bf16.msra.mxu1 %v18822_v23 }
 0x681   : > { %10273 = vmatpush.bf16.msra.mxu2 %v18836_v26  ;;  %10287 = vmatpush.bf16.msra.mxu3 %v18838_v51 }
 0x682   : > { %11112 = vst [vmem:[%s17967_s8 + $0x470] sm:$0xff] %v10856_v3  ;;  %v9455_v25 = vpop.f32.mrf.mxu0  ;;  %v9469_v61 = vpop.f32.mrf.mxu1 }
 0x683   : > { %11113 = vst [vmem:[%s17967_s8 + $0x478] sm:$0xff] %v10857_v44  ;;  %v10592_v5 = vmul.f32 %v17896_v32, %v9455_v25  ;;  %v10593_v14 = vmul.f32 %v17947_v22, %v9469_v61 }
 0x685   : > { %v9483_v49 = vpop.f32.mrf.mxu2  ;;  %v9497_v20 = vpop.f32.mrf.mxu3  ;;  %v10858_v26 = vadd.f32 %v17924_v10, %v10592_v5  ;;  %v10859_v16 = vadd.f32 %v17955_v38, %v10593_v14 }
 0x686   : > { %v10594_v23 = vmul.f32 %v17958_v63, %v9483_v49  ;;  %v10595_v17 = vmul.f32 %v17973_v27, %v9497_v20 }
 0x687   : > { %11114 = vst [vmem:[%s17967_s8 + $0x480] sm:$0xff] %v10858_v26 }
 0x688   : > { %v10860_v51 = vadd.f32 %v17960_v54, %v10594_v23  ;;  %v10861_v43 = vadd.f32 %v17975_v19, %v10595_v17  ;;  %11115 = vst [vmem:[%s17967_s8 + $0x488] sm:$0xff] %v10859_v16 }
 0x68a   : > { %11116 = vst [vmem:[%s17967_s8 + $0x490] sm:$0xff] %v10860_v51  ;;  %v9457_v53 = vpop.f32.mrf.mxu0  ;;  %v9471_v2 = vpop.f32.mrf.mxu1 }
 0x68b   : > { %11117 = vst [vmem:[%s17967_s8 + $0x498] sm:$0xff] %v10861_v43  ;;  %v10596_v55 = vmul.f32 %v17896_v32, %v9457_v53  ;;  %v10597_v47 = vmul.f32 %v17947_v22, %v9471_v2 }
 0x68d   : > { %v9485_v9 = vpop.f32.mrf.mxu2  ;;  %v9499_v11 = vpop.f32.mrf.mxu3  ;;  %v10862_v6 = vadd.f32 %v17924_v10, %v10596_v55  ;;  %v10863_v31 = vadd.f32 %v17955_v38, %v10597_v47 }
 0x68e   : > { %v10598_v0 = vmul.f32 %v17958_v63, %v9485_v9  ;;  %v10599_v33 = vmul.f32 %v17973_v27, %v9499_v11  ;;  %12630 = vmatmul.msk.bf16.vlgmr.msrb.gmra.mxu0 %vm3698_vm7, %v19183_v42  ;;  %12631 = vmatmul.msk.bf16.vlgmr.msrb.gmra.mxu1 %vm3698_vm7, %v19183_v42 }
 0x68f   : > { %11118 = vst [vmem:[%s17967_s8 + $0x4a0] sm:$0xff] %v10862_v6  ;;  %12632 = vmatmul.msk.bf16.vlgmr.msrb.gmra.mxu2 %vm3698_vm7, %v19183_v42  ;;  %12633 = vmatmul.msk.bf16.vlgmr.msrb.gmra.mxu3 %vm3698_vm7, %v19183_v42 }
 0x690   : > { %v10864_v34 = vadd.f32 %v17960_v54, %v10598_v0  ;;  %v10865_v4 = vadd.f32 %v17975_v19, %v10599_v33  ;;  %11119 = vst [vmem:[%s17967_s8 + $0x4a8] sm:$0xff] %v10863_v31  ;;  %10317 = vmatpush.bf16.msrb.mxu0 %v18892_v46  ;;  %10331 = vmatpush.bf16.msrb.mxu1 %v18894_v37 }
 0x691   : > { %10345 = vmatpush.bf16.msrb.mxu2 %v18925_v21  ;;  %10359 = vmatpush.bf16.msrb.mxu3 %v18927_v15 }
 0x692   : > { %11120 = vst [vmem:[%s17967_s8 + $0x4b0] sm:$0xff] %v10864_v34  ;;  %v9527_v52 = vpop.f32.mrf.mxu0  ;;  %v9541_v36 = vpop.f32.mrf.mxu1 }
 0x693   : > { %11121 = vst [vmem:[%s17967_s8 + $0x4b8] sm:$0xff] %v10865_v4  ;;  %v10600_v12 = vmul.f32 %v17896_v32, %v9527_v52  ;;  %v10601_v28 = vmul.f32 %v17947_v22, %v9541_v36 }
 0x695   : > { %v9555_v18 = vpop.f32.mrf.mxu2  ;;  %v9569_v46 = vpop.f32.mrf.mxu3  ;;  %v10866_v21 = vadd.f32 %v17924_v10, %v10600_v12  ;;  %v10867_v41 = vadd.f32 %v17955_v38, %v10601_v28 }
 0x696   : > { %v10602_v37 = vmul.f32 %v17958_v63, %v9555_v18  ;;  %v10603_v30 = vmul.f32 %v17973_v27, %v9569_v46 }
 0x697   : > { %11122 = vst [vmem:[%s17967_s8 + $0x4c0] sm:$0xff] %v10866_v21 }
 0x698   : > { %v10868_v15 = vadd.f32 %v17960_v54, %v10602_v37  ;;  %v10869_v56 = vadd.f32 %v17975_v19, %v10603_v30  ;;  %11123 = vst [vmem:[%s17967_s8 + $0x4c8] sm:$0xff] %v10867_v41 }
 0x69a   : > { %11124 = vst [vmem:[%s17967_s8 + $0x4d0] sm:$0xff] %v10868_v15  ;;  %v9529_v7 = vpop.f32.mrf.mxu0  ;;  %v9543_v59 = vpop.f32.mrf.mxu1 }
 0x69b   : > { %11125 = vst [vmem:[%s17967_s8 + $0x4d8] sm:$0xff] %v10869_v56  ;;  %v10604_v50 = vmul.f32 %v17896_v32, %v9529_v7  ;;  %v10605_v48 = vmul.f32 %v17947_v22, %v9543_v59 }
 0x69d   : > { %v9557_v58 = vpop.f32.mrf.mxu2  ;;  %v9571_v57 = vpop.f32.mrf.mxu3  ;;  %v10870_v29 = vadd.f32 %v17924_v10, %v10604_v50  ;;  %v10871_v1 = vadd.f32 %v17955_v38, %v10605_v48 }
 0x69e   : > { %v10606_v35 = vmul.f32 %v17958_v63, %v9557_v58  ;;  %v10607_v60 = vmul.f32 %v17973_v27, %v9571_v57  ;;  %12634 = vmatmul.msk.bf16.vlgmr.msra.gmra.mxu0 %vm3698_vm7, %v19183_v42  ;;  %12635 = vmatmul.msk.bf16.vlgmr.msra.gmra.mxu1 %vm3698_vm7, %v19183_v42 }
 0x69f   : > { %11126 = vst [vmem:[%s17967_s8 + $0x4e0] sm:$0xff] %v10870_v29  ;;  %12636 = vmatmul.msk.bf16.vlgmr.msra.gmra.mxu2 %vm3698_vm7, %v19183_v42  ;;  %12637 = vmatmul.msk.bf16.vlgmr.msra.gmra.mxu3 %vm3698_vm7, %v19183_v42 }
 0x6a0   : > { %v10872_v40 = vadd.f32 %v17960_v54, %v10606_v35  ;;  %v10873_v24 = vadd.f32 %v17975_v19, %v10607_v60  ;;  %11127 = vst [vmem:[%s17967_s8 + $0x4e8] sm:$0xff] %v10871_v1  ;;  %10389 = vmatpush.bf16.msra.mxu0 %v18915_v13  ;;  %10403 = vmatpush.bf16.msra.mxu1 %v18917_v8 }
 0x6a1   : > { %10417 = vmatpush.bf16.msra.mxu2 %v18943_v62  ;;  %10431 = vmatpush.bf16.msra.mxu3 %v18945_v39 }
 0x6a2   : > { %11128 = vst [vmem:[%s17967_s8 + $0x4f0] sm:$0xff] %v10872_v40  ;;  %v9599_v45 = vpop.f32.mrf.mxu0  ;;  %v9613_v3 = vpop.f32.mrf.mxu1 }
 0x6a3   : > { %11129 = vst [vmem:[%s17967_s8 + $0x4f8] sm:$0xff] %v10873_v24  ;;  %v10608_v44 = vmul.f32 %v17896_v32, %v9599_v45  ;;  %v10609_v25 = vmul.f32 %v17947_v22, %v9613_v3 }
 0x6a5   : > { %v9627_v61 = vpop.f32.mrf.mxu2  ;;  %v9641_v13 = vpop.f32.mrf.mxu3  ;;  %v10874_v62 = vadd.f32 %v17924_v10, %v10608_v44  ;;  %v10875_v14 = vadd.f32 %v17955_v38, %v10609_v25 }
 0x6a6   : > { %v10610_v8 = vmul.f32 %v17958_v63, %v9627_v61  ;;  %v10611_v5 = vmul.f32 %v17973_v27, %v9641_v13 }
 0x6a7   : > { %11130 = vst [vmem:[%s17967_s8 + $0x500] sm:$0xff] %v10874_v62 }
 0x6a8   : > { %v10876_v39 = vadd.f32 %v17960_v54, %v10610_v8  ;;  %v10877_v49 = vadd.f32 %v17975_v19, %v10611_v5  ;;  %11131 = vst [vmem:[%s17967_s8 + $0x508] sm:$0xff] %v10875_v14 }
 0x6aa   : > { %11132 = vst [vmem:[%s17967_s8 + $0x510] sm:$0xff] %v10876_v39  ;;  %v9601_v20 = vpop.f32.mrf.mxu0  ;;  %v9615_v23 = vpop.f32.mrf.mxu1 }
 0x6ab   : > { %11133 = vst [vmem:[%s17967_s8 + $0x518] sm:$0xff] %v10877_v49  ;;  %v10612_v17 = vmul.f32 %v17896_v32, %v9601_v20  ;;  %v10613_v26 = vmul.f32 %v17947_v22, %v9615_v23 }
 0x6ad   : > { %v9629_v16 = vpop.f32.mrf.mxu2  ;;  %v9643_v51 = vpop.f32.mrf.mxu3  ;;  %v10878_v2 = vadd.f32 %v17924_v10, %v10612_v17  ;;  %v10879_v55 = vadd.f32 %v17955_v38, %v10613_v26 }
 0x6ae   : > { %v10614_v43 = vmul.f32 %v17958_v63, %v9629_v16  ;;  %v10615_v53 = vmul.f32 %v17973_v27, %v9643_v51  ;;  %12638 = vmatmul.msk.bf16.vlgmr.msrb.gmra.mxu0 %vm3698_vm7, %v19183_v42  ;;  %12639 = vmatmul.msk.bf16.vlgmr.msrb.gmra.mxu1 %vm3698_vm7, %v19183_v42 }
 0x6af   : > { %11134 = vst [vmem:[%s17967_s8 + $0x520] sm:$0xff] %v10878_v2  ;;  %12640 = vmatmul.msk.bf16.vlgmr.msrb.gmra.mxu2 %vm3698_vm7, %v19183_v42  ;;  %12641 = vmatmul.msk.bf16.vlgmr.msrb.gmra.mxu3 %vm3698_vm7, %v19183_v42 }
 0x6b0   : > { %v10880_v47 = vadd.f32 %v17960_v54, %v10614_v43  ;;  %v10881_v9 = vadd.f32 %v17975_v19, %v10615_v53  ;;  %11135 = vst [vmem:[%s17967_s8 + $0x528] sm:$0xff] %v10879_v55 }
 0x6b2   : > { %11136 = vst [vmem:[%s17967_s8 + $0x530] sm:$0xff] %v10880_v47  ;;  %v9671_v11 = vpop.f32.mrf.mxu0  ;;  %v9685_v0 = vpop.f32.mrf.mxu1 }
 0x6b3   : > { %11137 = vst [vmem:[%s17967_s8 + $0x538] sm:$0xff] %v10881_v9  ;;  %v10616_v33 = vmul.f32 %v17896_v32, %v9671_v11  ;;  %v10617_v6 = vmul.f32 %v17947_v22, %v9685_v0 }
 0x6b5   : > { %v9699_v31 = vpop.f32.mrf.mxu2  ;;  %v9713_v34 = vpop.f32.mrf.mxu3  ;;  %v10882_v36 = vadd.f32 %v17924_v10, %v10616_v33  ;;  %v10883_v12 = vadd.f32 %v17955_v38, %v10617_v6 }
 0x6b6   : > { %v10618_v4 = vmul.f32 %v17958_v63, %v9699_v31  ;;  %v10619_v52 = vmul.f32 %v17973_v27, %v9713_v34 }
 0x6b7   : > { %11138 = vst [vmem:[%s17967_s8 + $0x540] sm:$0xff] %v10882_v36 }
 0x6b8   : > { %v10884_v28 = vadd.f32 %v17960_v54, %v10618_v4  ;;  %v10885_v18 = vadd.f32 %v17975_v19, %v10619_v52  ;;  %11139 = vst [vmem:[%s17967_s8 + $0x548] sm:$0xff] %v10883_v12 }
 0x6ba   : > { %11140 = vst [vmem:[%s17967_s8 + $0x550] sm:$0xff] %v10884_v28  ;;  %v9673_v46 = vpop.f32.mrf.mxu0  ;;  %v9687_v37 = vpop.f32.mrf.mxu1 }
 0x6bb   : > { %11141 = vst [vmem:[%s17967_s8 + $0x558] sm:$0xff] %v10885_v18  ;;  %v10620_v30 = vmul.f32 %v17896_v32, %v9673_v46  ;;  %v10621_v21 = vmul.f32 %v17947_v22, %v9687_v37 }
 0x6bd   : > { %v9701_v41 = vpop.f32.mrf.mxu2  ;;  %v9715_v15 = vpop.f32.mrf.mxu3  ;;  %v10886_v59 = vadd.f32 %v17924_v10, %v10620_v30  ;;  %v10887_v50 = vadd.f32 %v17955_v38, %v10621_v21 }
 0x6be   : > { %v10622_v56 = vmul.f32 %v17958_v63, %v9701_v41  ;;  %v10623_v7 = vmul.f32 %v17973_v27, %v9715_v15  ;;  %12642 = vmatmul.msk.bf16.vlgmr.msra.gmra.mxu0 %vm3698_vm7, %v19183_v42  ;;  %12643 = vmatmul.msk.bf16.vlgmr.msra.gmra.mxu1 %vm3698_vm7, %v19183_v42 }
 0x6bf   : > { %11142 = vst [vmem:[%s17967_s8 + $0x560] sm:$0xff] %v10886_v59  ;;  %12644 = vmatmul.msk.bf16.vlgmr.msra.gmra.mxu2 %vm3698_vm7, %v19183_v42  ;;  %12645 = vmatmul.msk.bf16.vlgmr.msra.gmra.mxu3 %vm3698_vm7, %v19183_v42 }
 0x6c0   : > { %v10888_v48 = vadd.f32 %v17960_v54, %v10622_v56  ;;  %v10889_v58 = vadd.f32 %v17975_v19, %v10623_v7  ;;  %11143 = vst [vmem:[%s17967_s8 + $0x568] sm:$0xff] %v10887_v50 }
 0x6c2   : > { %11144 = vst [vmem:[%s17967_s8 + $0x570] sm:$0xff] %v10888_v48  ;;  %v9743_v57 = vpop.f32.mrf.mxu0  ;;  %v9757_v35 = vpop.f32.mrf.mxu1 }
 0x6c3   : > { %11145 = vst [vmem:[%s17967_s8 + $0x578] sm:$0xff] %v10889_v58  ;;  %v10624_v60 = vmul.f32 %v17896_v32, %v9743_v57  ;;  %v10625_v29 = vmul.f32 %v17947_v22, %v9757_v35 }
 0x6c5   : > { %v9771_v1 = vpop.f32.mrf.mxu2  ;;  %v9785_v40 = vpop.f32.mrf.mxu3  ;;  %v10890_v3 = vadd.f32 %v17924_v10, %v10624_v60  ;;  %v10891_v42 = vadd.f32 %v17955_v38, %v10625_v29 }
 0x6c6   : > { %v10626_v24 = vmul.f32 %v17958_v63, %v9771_v1  ;;  %v10627_v45 = vmul.f32 %v17973_v27, %v9785_v40 }
 0x6c7   : > { %11146 = vst [vmem:[%s17967_s8 + $0x580] sm:$0xff] %v10890_v3 }
 0x6c8   : > { %v10892_v44 = vadd.f32 %v17960_v54, %v10626_v24  ;;  %v10893_v25 = vadd.f32 %v17975_v19, %v10627_v45  ;;  %11147 = vst [vmem:[%s17967_s8 + $0x588] sm:$0xff] %v10891_v42 }
 0x6ca   : > { %11148 = vst [vmem:[%s17967_s8 + $0x590] sm:$0xff] %v10892_v44  ;;  %v9745_v61 = vpop.f32.mrf.mxu0  ;;  %v9759_v13 = vpop.f32.mrf.mxu1 }
 0x6cb   : > { %11149 = vst [vmem:[%s17967_s8 + $0x598] sm:$0xff] %v10893_v25  ;;  %v10628_v8 = vmul.f32 %v17896_v32, %v9745_v61  ;;  %v10629_v5 = vmul.f32 %v17947_v22, %v9759_v13 }
 0x6cd   : > { %v9773_v62 = vpop.f32.mrf.mxu2  ;;  %v9787_v14 = vpop.f32.mrf.mxu3  ;;  %v10894_v20 = vadd.f32 %v17924_v10, %v10628_v8  ;;  %v10895_v23 = vadd.f32 %v17955_v38, %v10629_v5 }
 0x6ce   : > { %v10630_v39 = vmul.f32 %v17958_v63, %v9773_v62  ;;  %v10631_v49 = vmul.f32 %v17973_v27, %v9787_v14 }
 0x6cf   : > { %11150 = vst [vmem:[%s17967_s8 + $0x5a0] sm:$0xff] %v10894_v20 }
 0x6d0   : > { %v10896_v17 = vadd.f32 %v17960_v54, %v10630_v39  ;;  %v10897_v26 = vadd.f32 %v17975_v19, %v10631_v49  ;;  %11151 = vst [vmem:[%s17967_s8 + $0x5a8] sm:$0xff] %v10895_v23 }
 0x6d2   : > { %11152 = vst [vmem:[%s17967_s8 + $0x5b0] sm:$0xff] %v10896_v17  ;;  %v9815_v16 = vpop.f32.mrf.mxu0  ;;  %v9829_v51 = vpop.f32.mrf.mxu1 }
 0x6d3   : > { %11153 = vst [vmem:[%s17967_s8 + $0x5b8] sm:$0xff] %v10897_v26  ;;  %v10632_v43 = vmul.f32 %v17896_v32, %v9815_v16  ;;  %v10633_v53 = vmul.f32 %v17947_v22, %v9829_v51 }
 0x6d5   : > { %v9843_v2 = vpop.f32.mrf.mxu2  ;;  %v9857_v55 = vpop.f32.mrf.mxu3  ;;  %v10898_v11 = vadd.f32 %v17924_v10, %v10632_v43  ;;  %v10899_v0 = vadd.f32 %v17955_v38, %v10633_v53 }
 0x6d6   : > { %v10634_v47 = vmul.f32 %v17958_v63, %v9843_v2  ;;  %v10635_v9 = vmul.f32 %v17973_v27, %v9857_v55 }
 0x6d7   : > { %11154 = vst [vmem:[%s17967_s8 + $0x5c0] sm:$0xff] %v10898_v11 }
 0x6d8   : > { %v10900_v33 = vadd.f32 %v17960_v54, %v10634_v47  ;;  %v10901_v6 = vadd.f32 %v17975_v19, %v10635_v9  ;;  %11155 = vst [vmem:[%s17967_s8 + $0x5c8] sm:$0xff] %v10899_v0 }
 0x6da   : > { %11156 = vst [vmem:[%s17967_s8 + $0x5d0] sm:$0xff] %v10900_v33  ;;  %v9817_v31 = vpop.f32.mrf.mxu0  ;;  %v9831_v34 = vpop.f32.mrf.mxu1 }
 0x6db   : > { %11157 = vst [vmem:[%s17967_s8 + $0x5d8] sm:$0xff] %v10901_v6  ;;  %v10636_v4 = vmul.f32 %v17896_v32, %v9817_v31  ;;  %v10637_v52 = vmul.f32 %v17947_v22, %v9831_v34 }
 0x6dd   : > { %v9845_v36 = vpop.f32.mrf.mxu2  ;;  %v9859_v12 = vpop.f32.mrf.mxu3  ;;  %v10902_v46 = vadd.f32 %v17924_v10, %v10636_v4  ;;  %v10903_v37 = vadd.f32 %v17955_v38, %v10637_v52 }
 0x6de   : > { %v10638_v28 = vmul.f32 %v17958_v63, %v9845_v36  ;;  %v10639_v18 = vmul.f32 %v17973_v27, %v9859_v12 }
 0x6df   : > { %11158 = vst [vmem:[%s17967_s8 + $0x5e0] sm:$0xff] %v10902_v46 }
 0x6e0   : > { %v10904_v30 = vadd.f32 %v17960_v54, %v10638_v28  ;;  %v10905_v21 = vadd.f32 %v17975_v19, %v10639_v18  ;;  %11159 = vst [vmem:[%s17967_s8 + $0x5e8] sm:$0xff] %v10903_v37 }
 0x6e2   : > { %11160 = vst [vmem:[%s17967_s8 + $0x5f0] sm:$0xff] %v10904_v30  ;;  %v9887_v41 = vpop.f32.mrf.mxu0  ;;  %v9901_v15 = vpop.f32.mrf.mxu1 }
 0x6e3   : > { %11161 = vst [vmem:[%s17967_s8 + $0x5f8] sm:$0xff] %v10905_v21  ;;  %v10640_v56 = vmul.f32 %v17896_v32, %v9887_v41  ;;  %v10641_v7 = vmul.f32 %v17947_v22, %v9901_v15 }
 0x6e5   : > { %v9915_v59 = vpop.f32.mrf.mxu2  ;;  %v9929_v50 = vpop.f32.mrf.mxu3  ;;  %v10906_v57 = vadd.f32 %v17924_v10, %v10640_v56  ;;  %v10907_v35 = vadd.f32 %v17955_v38, %v10641_v7 }
 0x6e6   : > { %v10642_v48 = vmul.f32 %v17958_v63, %v9915_v59  ;;  %v10643_v58 = vmul.f32 %v17973_v27, %v9929_v50 }
 0x6e7   : > { %11162 = vst [vmem:[%s17967_s8 + $0x600] sm:$0xff] %v10906_v57 }
 0x6e8   : > { %v10908_v60 = vadd.f32 %v17960_v54, %v10642_v48  ;;  %v10909_v29 = vadd.f32 %v17975_v19, %v10643_v58  ;;  %11163 = vst [vmem:[%s17967_s8 + $0x608] sm:$0xff] %v10907_v35 }
 0x6ea   : > { %11164 = vst [vmem:[%s17967_s8 + $0x610] sm:$0xff] %v10908_v60  ;;  %v9889_v1 = vpop.f32.mrf.mxu0  ;;  %v9903_v40 = vpop.f32.mrf.mxu1 }
 0x6eb   : > { %11165 = vst [vmem:[%s17967_s8 + $0x618] sm:$0xff] %v10909_v29  ;;  %v10644_v24 = vmul.f32 %v17896_v32, %v9889_v1  ;;  %v10645_v45 = vmul.f32 %v17947_v22, %v9903_v40 }
 0x6ed   : > { %v9917_v3 = vpop.f32.mrf.mxu2  ;;  %v9931_v42 = vpop.f32.mrf.mxu3  ;;  %v10910_v61 = vadd.f32 %v17924_v10, %v10644_v24  ;;  %v10911_v13 = vadd.f32 %v17955_v38, %v10645_v45 }
 0x6ee   : > { %v10646_v44 = vmul.f32 %v17958_v63, %v9917_v3  ;;  %v10647_v25 = vmul.f32 %v17973_v27, %v9931_v42 }
 0x6ef   : > { %11166 = vst [vmem:[%s17967_s8 + $0x620] sm:$0xff] %v10910_v61 }
 0x6f0   : > { %v10912_v8 = vadd.f32 %v17960_v54, %v10646_v44  ;;  %v10913_v5 = vadd.f32 %v17975_v19, %v10647_v25  ;;  %11167 = vst [vmem:[%s17967_s8 + $0x628] sm:$0xff] %v10911_v13 }
 0x6f2   : > { %11168 = vst [vmem:[%s17967_s8 + $0x630] sm:$0xff] %v10912_v8  ;;  %v9959_v62 = vpop.f32.mrf.mxu0  ;;  %v9973_v14 = vpop.f32.mrf.mxu1 }
 0x6f3   : > { %11169 = vst [vmem:[%s17967_s8 + $0x638] sm:$0xff] %v10913_v5  ;;  %v10648_v39 = vmul.f32 %v17896_v32, %v9959_v62  ;;  %v10649_v49 = vmul.f32 %v17947_v22, %v9973_v14 }
 0x6f5   : > { %v9987_v20 = vpop.f32.mrf.mxu2  ;;  %v10001_v23 = vpop.f32.mrf.mxu3  ;;  %v10914_v16 = vadd.f32 %v17924_v10, %v10648_v39  ;;  %v10915_v51 = vadd.f32 %v17955_v38, %v10649_v49 }
 0x6f6   : > { %v10650_v17 = vmul.f32 %v17958_v63, %v9987_v20  ;;  %v10651_v26 = vmul.f32 %v17973_v27, %v10001_v23 }
 0x6f7   : > { %11170 = vst [vmem:[%s17967_s8 + $0x640] sm:$0xff] %v10914_v16 }
 0x6f8   : > { %v10916_v43 = vadd.f32 %v17960_v54, %v10650_v17  ;;  %v10917_v53 = vadd.f32 %v17975_v19, %v10651_v26  ;;  %11171 = vst [vmem:[%s17967_s8 + $0x648] sm:$0xff] %v10915_v51 }
 0x6fa   : > { %11172 = vst [vmem:[%s17967_s8 + $0x650] sm:$0xff] %v10916_v43  ;;  %v9961_v2 = vpop.f32.mrf.mxu0  ;;  %v9975_v55 = vpop.f32.mrf.mxu1 }
 0x6fb   : > { %11173 = vst [vmem:[%s17967_s8 + $0x658] sm:$0xff] %v10917_v53  ;;  %v10652_v47 = vmul.f32 %v17896_v32, %v9961_v2  ;;  %v10653_v9 = vmul.f32 %v17947_v22, %v9975_v55 }
 0x6fd   : > { %v9989_v11 = vpop.f32.mrf.mxu2  ;;  %v10003_v0 = vpop.f32.mrf.mxu3  ;;  %v10918_v31 = vadd.f32 %v17924_v10, %v10652_v47  ;;  %v10919_v34 = vadd.f32 %v17955_v38, %v10653_v9 }
 0x6fe   : > { %v10654_v33 = vmul.f32 %v17958_v63, %v9989_v11  ;;  %v10655_v6 = vmul.f32 %v17973_v27, %v10003_v0 }
 0x6ff   : > { %11174 = vst [vmem:[%s17967_s8 + $0x660] sm:$0xff] %v10918_v31 }
 0x700   : > { %v10920_v4 = vadd.f32 %v17960_v54, %v10654_v33  ;;  %v10921_v52 = vadd.f32 %v17975_v19, %v10655_v6  ;;  %11175 = vst [vmem:[%s17967_s8 + $0x668] sm:$0xff] %v10919_v34 }
 0x702   : > { %11176 = vst [vmem:[%s17967_s8 + $0x670] sm:$0xff] %v10920_v4  ;;  %v10031_v36 = vpop.f32.mrf.mxu0  ;;  %v10045_v12 = vpop.f32.mrf.mxu1 }
 0x703   : > { %11177 = vst [vmem:[%s17967_s8 + $0x678] sm:$0xff] %v10921_v52  ;;  %v10656_v28 = vmul.f32 %v17896_v32, %v10031_v36  ;;  %v10657_v18 = vmul.f32 %v17947_v22, %v10045_v12 }
 0x705   : > { %v10059_v46 = vpop.f32.mrf.mxu2  ;;  %v10073_v37 = vpop.f32.mrf.mxu3  ;;  %v10922_v41 = vadd.f32 %v17924_v10, %v10656_v28  ;;  %v10923_v15 = vadd.f32 %v17955_v38, %v10657_v18 }
 0x706   : > { %v10658_v30 = vmul.f32 %v17958_v63, %v10059_v46  ;;  %v10659_v21 = vmul.f32 %v17973_v27, %v10073_v37 }
 0x707   : > { %11178 = vst [vmem:[%s17967_s8 + $0x680] sm:$0xff] %v10922_v41 }
 0x708   : > { %v10924_v56 = vadd.f32 %v17960_v54, %v10658_v30  ;;  %v10925_v7 = vadd.f32 %v17975_v19, %v10659_v21  ;;  %11179 = vst [vmem:[%s17967_s8 + $0x688] sm:$0xff] %v10923_v15 }
 0x70a   : > { %11180 = vst [vmem:[%s17967_s8 + $0x690] sm:$0xff] %v10924_v56  ;;  %v10033_v59 = vpop.f32.mrf.mxu0  ;;  %v10047_v50 = vpop.f32.mrf.mxu1 }
 0x70b   : > { %11181 = vst [vmem:[%s17967_s8 + $0x698] sm:$0xff] %v10925_v7  ;;  %v10660_v48 = vmul.f32 %v17896_v32, %v10033_v59  ;;  %v10661_v58 = vmul.f32 %v17947_v22, %v10047_v50 }
 0x70d   : > { %v10061_v57 = vpop.f32.mrf.mxu2  ;;  %v10075_v35 = vpop.f32.mrf.mxu3  ;;  %v10926_v1 = vadd.f32 %v17924_v10, %v10660_v48  ;;  %v10927_v40 = vadd.f32 %v17955_v38, %v10661_v58 }
 0x70e   : > { %v10662_v60 = vmul.f32 %v17958_v63, %v10061_v57  ;;  %v10663_v29 = vmul.f32 %v17973_v27, %v10075_v35 }
 0x70f   : > { %11182 = vst [vmem:[%s17967_s8 + $0x6a0] sm:$0xff] %v10926_v1 }
 0x710   : > { %v10928_v24 = vadd.f32 %v17960_v54, %v10662_v60  ;;  %v10929_v45 = vadd.f32 %v17975_v19, %v10663_v29  ;;  %11183 = vst [vmem:[%s17967_s8 + $0x6a8] sm:$0xff] %v10927_v40 }
 0x712   : > { %11184 = vst [vmem:[%s17967_s8 + $0x6b0] sm:$0xff] %v10928_v24  ;;  %v10103_v3 = vpop.f32.mrf.mxu0  ;;  %v10117_v42 = vpop.f32.mrf.mxu1 }
 0x713   : > { %11185 = vst [vmem:[%s17967_s8 + $0x6b8] sm:$0xff] %v10929_v45  ;;  %v10664_v44 = vmul.f32 %v17896_v32, %v10103_v3  ;;  %v10665_v25 = vmul.f32 %v17947_v22, %v10117_v42 }
 0x715   : > { %v10131_v61 = vpop.f32.mrf.mxu2  ;;  %v10145_v13 = vpop.f32.mrf.mxu3  ;;  %v10930_v62 = vadd.f32 %v17924_v10, %v10664_v44  ;;  %v10931_v14 = vadd.f32 %v17955_v38, %v10665_v25 }
 0x716   : > { %v10666_v8 = vmul.f32 %v17958_v63, %v10131_v61  ;;  %v10667_v5 = vmul.f32 %v17973_v27, %v10145_v13 }
 0x717   : > { %11186 = vst [vmem:[%s17967_s8 + $0x6c0] sm:$0xff] %v10930_v62 }
 0x718   : > { %v10932_v39 = vadd.f32 %v17960_v54, %v10666_v8  ;;  %v10933_v49 = vadd.f32 %v17975_v19, %v10667_v5  ;;  %11187 = vst [vmem:[%s17967_s8 + $0x6c8] sm:$0xff] %v10931_v14 }
 0x71a   : > { %11188 = vst [vmem:[%s17967_s8 + $0x6d0] sm:$0xff] %v10932_v39  ;;  %v10105_v20 = vpop.f32.mrf.mxu0  ;;  %v10119_v23 = vpop.f32.mrf.mxu1 }
 0x71b   : > { %11189 = vst [vmem:[%s17967_s8 + $0x6d8] sm:$0xff] %v10933_v49  ;;  %v10668_v17 = vmul.f32 %v17896_v32, %v10105_v20  ;;  %v10669_v26 = vmul.f32 %v17947_v22, %v10119_v23 }
 0x71d   : > { %v10133_v16 = vpop.f32.mrf.mxu2  ;;  %v10147_v51 = vpop.f32.mrf.mxu3  ;;  %v10934_v2 = vadd.f32 %v17924_v10, %v10668_v17  ;;  %v10935_v55 = vadd.f32 %v17955_v38, %v10669_v26 }
 0x71e   : > { %v10670_v43 = vmul.f32 %v17958_v63, %v10133_v16  ;;  %v10671_v53 = vmul.f32 %v17973_v27, %v10147_v51 }
 0x71f   : > { %11190 = vst [vmem:[%s17967_s8 + $0x6e0] sm:$0xff] %v10934_v2 }
 0x720   : > { %v10936_v47 = vadd.f32 %v17960_v54, %v10670_v43  ;;  %v10937_v9 = vadd.f32 %v17975_v19, %v10671_v53  ;;  %11191 = vst [vmem:[%s17967_s8 + $0x6e8] sm:$0xff] %v10935_v55 }
 0x722   : > { %11192 = vst [vmem:[%s17967_s8 + $0x6f0] sm:$0xff] %v10936_v47  ;;  %v10175_v11 = vpop.f32.mrf.mxu0  ;;  %v10189_v0 = vpop.f32.mrf.mxu1 }
 0x723   : > { %11193 = vst [vmem:[%s17967_s8 + $0x6f8] sm:$0xff] %v10937_v9  ;;  %v10672_v33 = vmul.f32 %v17896_v32, %v10175_v11  ;;  %v10673_v6 = vmul.f32 %v17947_v22, %v10189_v0 }
 0x725   : > { %v10203_v31 = vpop.f32.mrf.mxu2  ;;  %v10217_v34 = vpop.f32.mrf.mxu3  ;;  %v10938_v36 = vadd.f32 %v17924_v10, %v10672_v33  ;;  %v10939_v12 = vadd.f32 %v17955_v38, %v10673_v6 }
 0x726   : > { %v10674_v4 = vmul.f32 %v17958_v63, %v10203_v31  ;;  %v10675_v52 = vmul.f32 %v17973_v27, %v10217_v34 }
 0x727   : > { %11194 = vst [vmem:[%s17967_s8 + $0x700] sm:$0xff] %v10938_v36 }
 0x728   : > { %v10940_v28 = vadd.f32 %v17960_v54, %v10674_v4  ;;  %v10941_v18 = vadd.f32 %v17975_v19, %v10675_v52  ;;  %11195 = vst [vmem:[%s17967_s8 + $0x708] sm:$0xff] %v10939_v12 }
 0x72a   : > { %11196 = vst [vmem:[%s17967_s8 + $0x710] sm:$0xff] %v10940_v28  ;;  %v10177_v46 = vpop.f32.mrf.mxu0  ;;  %v10191_v37 = vpop.f32.mrf.mxu1 }
 0x72b   : > { %11197 = vst [vmem:[%s17967_s8 + $0x718] sm:$0xff] %v10941_v18  ;;  %v10676_v30 = vmul.f32 %v17896_v32, %v10177_v46  ;;  %v10677_v21 = vmul.f32 %v17947_v22, %v10191_v37 }
 0x72d   : > { %v10205_v41 = vpop.f32.mrf.mxu2  ;;  %v10219_v15 = vpop.f32.mrf.mxu3  ;;  %v10942_v59 = vadd.f32 %v17924_v10, %v10676_v30  ;;  %v10943_v50 = vadd.f32 %v17955_v38, %v10677_v21 }
 0x72e   : > { %v10678_v56 = vmul.f32 %v17958_v63, %v10205_v41  ;;  %v10679_v7 = vmul.f32 %v17973_v27, %v10219_v15 }
 0x72f   : > { %11198 = vst [vmem:[%s17967_s8 + $0x720] sm:$0xff] %v10942_v59 }
 0x730   : > { %v10944_v48 = vadd.f32 %v17960_v54, %v10678_v56  ;;  %v10945_v58 = vadd.f32 %v17975_v19, %v10679_v7  ;;  %11199 = vst [vmem:[%s17967_s8 + $0x728] sm:$0xff] %v10943_v50 }
 0x732   : > { %11200 = vst [vmem:[%s17967_s8 + $0x730] sm:$0xff] %v10944_v48  ;;  %v10247_v57 = vpop.f32.mrf.mxu0  ;;  %v10261_v35 = vpop.f32.mrf.mxu1 }
 0x733   : > { %11201 = vst [vmem:[%s17967_s8 + $0x738] sm:$0xff] %v10945_v58  ;;  %v10680_v60 = vmul.f32 %v17896_v32, %v10247_v57  ;;  %v10681_v29 = vmul.f32 %v17947_v22, %v10261_v35 }
 0x735   : > { %v10275_v1 = vpop.f32.mrf.mxu2  ;;  %v10289_v40 = vpop.f32.mrf.mxu3  ;;  %v10946_v3 = vadd.f32 %v17924_v10, %v10680_v60  ;;  %v10947_v42 = vadd.f32 %v17955_v38, %v10681_v29 }
 0x736   : > { %v10682_v24 = vmul.f32 %v17958_v63, %v10275_v1  ;;  %v10683_v45 = vmul.f32 %v17973_v27, %v10289_v40 }
 0x737   : > { %11202 = vst [vmem:[%s17967_s8 + $0x740] sm:$0xff] %v10946_v3 }
 0x738   : > { %v10948_v44 = vadd.f32 %v17960_v54, %v10682_v24  ;;  %v10949_v25 = vadd.f32 %v17975_v19, %v10683_v45  ;;  %11203 = vst [vmem:[%s17967_s8 + $0x748] sm:$0xff] %v10947_v42 }
 0x73a   : > { %11204 = vst [vmem:[%s17967_s8 + $0x750] sm:$0xff] %v10948_v44  ;;  %v10249_v61 = vpop.f32.mrf.mxu0  ;;  %v10263_v13 = vpop.f32.mrf.mxu1 }
 0x73b   : > { %11205 = vst [vmem:[%s17967_s8 + $0x758] sm:$0xff] %v10949_v25  ;;  %v10684_v8 = vmul.f32 %v17896_v32, %v10249_v61  ;;  %v10685_v5 = vmul.f32 %v17947_v22, %v10263_v13 }
 0x73d   : > { %v10277_v62 = vpop.f32.mrf.mxu2  ;;  %v10291_v14 = vpop.f32.mrf.mxu3  ;;  %v10950_v20 = vadd.f32 %v17924_v10, %v10684_v8  ;;  %v10951_v23 = vadd.f32 %v17955_v38, %v10685_v5 }
 0x73e   : > { %v10686_v39 = vmul.f32 %v17958_v63, %v10277_v62  ;;  %v10687_v49 = vmul.f32 %v17973_v27, %v10291_v14  ;;  %v11264_v62 = vld [vmem:[%s17967_s8 + $0x40] sm:$0xff] (%p13032_p9)  ;;  %v11266_v14 = vld [vmem:[%s17967_s8 + $0x48] sm:$0xff] (%p13032_p9) }
 0x73f   : > { %11206 = vst [vmem:[%s17967_s8 + $0x760] sm:$0xff] %v10950_v20  ;;  %v11272_v20 = vld [vmem:[%s17967_s8 + $0x60] sm:$0xff] (%p13032_p9) }
 0x740   : > { %v10952_v17 = vadd.f32 %v17960_v54, %v10686_v39  ;;  %v10953_v26 = vadd.f32 %v17975_v19, %v10687_v49  ;;  %11207 = vst [vmem:[%s17967_s8 + $0x768] sm:$0xff] %v10951_v23  ;;  %v11268_v39 = vld [vmem:[%s17967_s8 + $0x50] sm:$0xff] (%p13032_p9)  ;;  %v11270_v49 = vld [vmem:[%s17967_s8 + $0x58] sm:$0xff] (%p13032_p9)  ;;  %v11274_v23 = vld [vmem:[%s17967_s8 + $0x68] sm:$0xff] (%p13032_p9) }
 0x741   : > { %11265 = vst [vmem:[%s19652_s14 + $0x100] sm:$0xff] (%p13032_p9), %v11264_v62  ;;  %v11392_v62 = vld [vmem:[%s17967_s8 + $0x240] sm:$0xff] (%p13032_p9) }
 0x742   : > { %11208 = vst [vmem:[%s17967_s8 + $0x770] sm:$0xff] %v10952_v17  ;;  %v10319_v16 = vpop.f32.mrf.mxu0  ;;  %v10333_v51 = vpop.f32.mrf.mxu1  ;;  %v11276_v17 = vld [vmem:[%s17967_s8 + $0x70] sm:$0xff] (%p13032_p9) }
 0x743   : > { %11209 = vst [vmem:[%s17967_s8 + $0x778] sm:$0xff] %v10953_v26  ;;  %v10688_v43 = vmul.f32 %v17896_v32, %v10319_v16  ;;  %v10689_v53 = vmul.f32 %v17947_v22, %v10333_v51  ;;  %v11278_v26 = vld [vmem:[%s17967_s8 + $0x78] sm:$0xff] (%p13032_p9)  ;;  %v11280_v16 = vld [vmem:[%s17967_s8 + $0x80] sm:$0xff] (%p13032_p9)  ;;  %v11282_v51 = vld [vmem:[%s17967_s8 + $0x88] sm:$0xff] (%p13032_p9) }
 0x744   : > { %11267 = vst [vmem:[%s19652_s14 + $0x108] sm:$0xff] (%p13032_p9), %v11266_v14  ;;  %v11394_v14 = vld [vmem:[%s17967_s8 + $0x248] sm:$0xff] (%p13032_p9) }
 0x745   : > { %v10347_v2 = vpop.f32.mrf.mxu2  ;;  %v10361_v55 = vpop.f32.mrf.mxu3  ;;  %v10954_v11 = vadd.f32 %v17924_v10, %v10688_v43  ;;  %v10955_v0 = vadd.f32 %v17955_v38, %v10689_v53  ;;  %11269 = vst [vmem:[%s19652_s14 + $0x110] sm:$0xff] (%p13032_p9), %v11268_v39  ;;  %v11284_v43 = vld [vmem:[%s17967_s8 + $0x90] sm:$0xff] (%p13032_p9)  ;;  %v11286_v53 = vld [vmem:[%s17967_s8 + $0x98] sm:$0xff] (%p13032_p9) }
 0x746   : > { %v10690_v47 = vmul.f32 %v17958_v63, %v10347_v2  ;;  %v10691_v9 = vmul.f32 %v17973_v27, %v10361_v55  ;;  %11271 = vst [vmem:[%s19652_s14 + $0x118] sm:$0xff] (%p13032_p9), %v11270_v49  ;;  %v11288_v2 = vld [vmem:[%s17967_s8 + $0xa0] sm:$0xff] (%p13032_p9)  ;;  %v11290_v55 = vld [vmem:[%s17967_s8 + $0xa8] sm:$0xff] (%p13032_p9)  ;;  %v11396_v39 = vld [vmem:[%s17967_s8 + $0x250] sm:$0xff] (%p13032_p9) }
 0x747   : > { %11210 = vst [vmem:[%s17967_s8 + $0x780] sm:$0xff] %v10954_v11  ;;  %v11296_v11 = vld [vmem:[%s17967_s8 + $0xc0] sm:$0xff] (%p13032_p9)  ;;  %v11398_v49 = vld [vmem:[%s17967_s8 + $0x258] sm:$0xff] (%p13032_p9) }
 0x748   : > { %v10956_v33 = vadd.f32 %v17960_v54, %v10690_v47  ;;  %v10957_v6 = vadd.f32 %v17975_v19, %v10691_v9  ;;  %11211 = vst [vmem:[%s17967_s8 + $0x788] sm:$0xff] %v10955_v0  ;;  %v11292_v47 = vld [vmem:[%s17967_s8 + $0xb0] sm:$0xff] (%p13032_p9)  ;;  %v11294_v9 = vld [vmem:[%s17967_s8 + $0xb8] sm:$0xff] (%p13032_p9)  ;;  %v11298_v0 = vld [vmem:[%s17967_s8 + $0xc8] sm:$0xff] (%p13032_p9) }
 0x749   : > { %11273 = vst [vmem:[%s19652_s14 + $0x180] sm:$0xff] (%p13032_p9), %v11272_v20  ;;  %v11400_v20 = vld [vmem:[%s17967_s8 + $0x260] sm:$0xff] (%p13032_p9) }
 0x74a   : > { %11212 = vst [vmem:[%s17967_s8 + $0x790] sm:$0xff] %v10956_v33  ;;  %v10321_v31 = vpop.f32.mrf.mxu0  ;;  %v10335_v34 = vpop.f32.mrf.mxu1  ;;  %v11300_v33 = vld [vmem:[%s17967_s8 + $0xd0] sm:$0xff] (%p13032_p9) }
 0x74b   : > { %11213 = vst [vmem:[%s17967_s8 + $0x798] sm:$0xff] %v10957_v6  ;;  %v10692_v4 = vmul.f32 %v17896_v32, %v10321_v31  ;;  %v10693_v52 = vmul.f32 %v17947_v22, %v10335_v34  ;;  %v11302_v6 = vld [vmem:[%s17967_s8 + $0xd8] sm:$0xff] (%p13032_p9)  ;;  %v11304_v31 = vld [vmem:[%s17967_s8 + $0xe0] sm:$0xff] (%p13032_p9)  ;;  %v11306_v34 = vld [vmem:[%s17967_s8 + $0xe8] sm:$0xff] (%p13032_p9) }
 0x74c   : > { %11275 = vst [vmem:[%s19652_s14 + $0x188] sm:$0xff] (%p13032_p9), %v11274_v23  ;;  %v11402_v23 = vld [vmem:[%s17967_s8 + $0x268] sm:$0xff] (%p13032_p9) }
 0x74d   : > { %v10349_v36 = vpop.f32.mrf.mxu2  ;;  %v10363_v12 = vpop.f32.mrf.mxu3  ;;  %v10958_v46 = vadd.f32 %v17924_v10, %v10692_v4  ;;  %v10959_v37 = vadd.f32 %v17955_v38, %v10693_v52  ;;  %11277 = vst [vmem:[%s19652_s14 + $0x190] sm:$0xff] (%p13032_p9), %v11276_v17  ;;  %v11308_v4 = vld [vmem:[%s17967_s8 + $0xf0] sm:$0xff] (%p13032_p9)  ;;  %v11310_v52 = vld [vmem:[%s17967_s8 + $0xf8] sm:$0xff] (%p13032_p9) }
 0x74e   : > { %v10694_v28 = vmul.f32 %v17958_v63, %v10349_v36  ;;  %v10695_v18 = vmul.f32 %v17973_v27, %v10363_v12  ;;  %11279 = vst [vmem:[%s19652_s14 + $0x198] sm:$0xff] (%p13032_p9), %v11278_v26  ;;  %v11312_v36 = vld [vmem:[%s17967_s8 + $0x100] sm:$0xff] (%p13032_p9)  ;;  %v11314_v12 = vld [vmem:[%s17967_s8 + $0x108] sm:$0xff] (%p13032_p9)  ;;  %v11404_v17 = vld [vmem:[%s17967_s8 + $0x270] sm:$0xff] (%p13032_p9) }
 0x74f   : > { %11214 = vst [vmem:[%s17967_s8 + $0x7a0] sm:$0xff] %v10958_v46  ;;  %v11320_v46 = vld [vmem:[%s17967_s8 + $0x120] sm:$0xff] (%p13032_p9)  ;;  %v11406_v26 = vld [vmem:[%s17967_s8 + $0x278] sm:$0xff] (%p13032_p9) }
 0x750   : > { %v10960_v30 = vadd.f32 %v17960_v54, %v10694_v28  ;;  %v10961_v21 = vadd.f32 %v17975_v19, %v10695_v18  ;;  %11215 = vst [vmem:[%s17967_s8 + $0x7a8] sm:$0xff] %v10959_v37  ;;  %v11316_v28 = vld [vmem:[%s17967_s8 + $0x110] sm:$0xff] (%p13032_p9)  ;;  %v11318_v18 = vld [vmem:[%s17967_s8 + $0x118] sm:$0xff] (%p13032_p9)  ;;  %v11322_v37 = vld [vmem:[%s17967_s8 + $0x128] sm:$0xff] (%p13032_p9) }
 0x751   : > { %11281 = vst [vmem:[%s19652_s14 + $0x200] sm:$0xff] (%p13032_p9), %v11280_v16  ;;  %v11408_v16 = vld [vmem:[%s17967_s8 + $0x280] sm:$0xff] (%p13032_p9) }
 0x752   : > { %11216 = vst [vmem:[%s17967_s8 + $0x7b0] sm:$0xff] %v10960_v30  ;;  %v10391_v41 = vpop.f32.mrf.mxu0  ;;  %v10405_v15 = vpop.f32.mrf.mxu1  ;;  %v11324_v30 = vld [vmem:[%s17967_s8 + $0x130] sm:$0xff] (%p13032_p9) }
 0x753   : > { %11217 = vst [vmem:[%s17967_s8 + $0x7b8] sm:$0xff] %v10961_v21  ;;  %v10696_v56 = vmul.f32 %v17896_v32, %v10391_v41  ;;  %v10697_v7 = vmul.f32 %v17947_v22, %v10405_v15  ;;  %v11326_v21 = vld [vmem:[%s17967_s8 + $0x138] sm:$0xff] (%p13032_p9)  ;;  %v11328_v41 = vld [vmem:[%s17967_s8 + $0x140] sm:$0xff] (%p13032_p9)  ;;  %v11330_v15 = vld [vmem:[%s17967_s8 + $0x148] sm:$0xff] (%p13032_p9) }
 0x754   : > { %11283 = vst [vmem:[%s19652_s14 + $0x208] sm:$0xff] (%p13032_p9), %v11282_v51  ;;  %v11410_v51 = vld [vmem:[%s17967_s8 + $0x288] sm:$0xff] (%p13032_p9) }
 0x755   : > { %v10419_v59 = vpop.f32.mrf.mxu2  ;;  %v10433_v50 = vpop.f32.mrf.mxu3  ;;  %v10962_v57 = vadd.f32 %v17924_v10, %v10696_v56  ;;  %v10963_v35 = vadd.f32 %v17955_v38, %v10697_v7  ;;  %11285 = vst [vmem:[%s19652_s14 + $0x210] sm:$0xff] (%p13032_p9), %v11284_v43  ;;  %v11332_v56 = vld [vmem:[%s17967_s8 + $0x150] sm:$0xff] (%p13032_p9)  ;;  %v11334_v7 = vld [vmem:[%s17967_s8 + $0x158] sm:$0xff] (%p13032_p9) }
 0x756   : > { %v10698_v48 = vmul.f32 %v17958_v63, %v10419_v59  ;;  %v10699_v58 = vmul.f32 %v17973_v27, %v10433_v50  ;;  %11287 = vst [vmem:[%s19652_s14 + $0x218] sm:$0xff] (%p13032_p9), %v11286_v53  ;;  %v11336_v59 = vld [vmem:[%s17967_s8 + $0x160] sm:$0xff] (%p13032_p9)  ;;  %v11338_v50 = vld [vmem:[%s17967_s8 + $0x168] sm:$0xff] (%p13032_p9)  ;;  %v11412_v43 = vld [vmem:[%s17967_s8 + $0x290] sm:$0xff] (%p13032_p9) }
 0x757   : > { %11218 = vst [vmem:[%s17967_s8 + $0x7c0] sm:$0xff] %v10962_v57  ;;  %v11344_v57 = vld [vmem:[%s17967_s8 + $0x180] sm:$0xff] (%p13032_p9)  ;;  %v11414_v53 = vld [vmem:[%s17967_s8 + $0x298] sm:$0xff] (%p13032_p9) }
 0x758   : > { %v10964_v60 = vadd.f32 %v17960_v54, %v10698_v48  ;;  %v10965_v29 = vadd.f32 %v17975_v19, %v10699_v58  ;;  %11219 = vst [vmem:[%s17967_s8 + $0x7c8] sm:$0xff] %v10963_v35  ;;  %v11340_v48 = vld [vmem:[%s17967_s8 + $0x170] sm:$0xff] (%p13032_p9)  ;;  %v11342_v58 = vld [vmem:[%s17967_s8 + $0x178] sm:$0xff] (%p13032_p9)  ;;  %v11346_v35 = vld [vmem:[%s17967_s8 + $0x188] sm:$0xff] (%p13032_p9) }
 0x759   : > { %11289 = vst [vmem:[%s19652_s14 + $0x280] sm:$0xff] (%p13032_p9), %v11288_v2  ;;  %v11416_v2 = vld [vmem:[%s17967_s8 + $0x2a0] sm:$0xff] (%p13032_p9) }
 0x75a   : > { %11220 = vst [vmem:[%s17967_s8 + $0x7d0] sm:$0xff] %v10964_v60  ;;  %v10393_v1 = vpop.f32.mrf.mxu0  ;;  %v10407_v40 = vpop.f32.mrf.mxu1  ;;  %v11348_v60 = vld [vmem:[%s17967_s8 + $0x190] sm:$0xff] (%p13032_p9) }
 0x75b   : > { %11221 = vst [vmem:[%s17967_s8 + $0x7d8] sm:$0xff] %v10965_v29  ;;  %v10700_v24 = vmul.f32 %v17896_v32, %v10393_v1  ;;  %v10701_v45 = vmul.f32 %v17947_v22, %v10407_v40  ;;  %v11250_v32 = vld [vmem:[%s17967_s8 + $0x8] sm:$0xff] (%p13032_p9)  ;;  %v11254_v22 = vld [vmem:[%s17967_s8 + $0x18] sm:$0xff] (%p13032_p9)  ;;  %v11352_v1 = vld [vmem:[%s17967_s8 + $0x1a0] sm:$0xff] (%p13032_p9) }
 0x75c   : > { %11251 = vst [vmem:[%s19652_s14 + $0x8] sm:$0xff] (%p13032_p9), %v11250_v32  ;;  %v11350_v29 = vld [vmem:[%s17967_s8 + $0x198] sm:$0xff] (%p13032_p9)  ;;  %v11354_v40 = vld [vmem:[%s17967_s8 + $0x1a8] sm:$0xff] (%p13032_p9) }
 0x75d   : > { %v10421_v3 = vpop.f32.mrf.mxu2  ;;  %v10435_v42 = vpop.f32.mrf.mxu3  ;;  %v10966_v61 = vadd.f32 %v17924_v10, %v10700_v24  ;;  %v10967_v13 = vadd.f32 %v17955_v38, %v10701_v45  ;;  %v11248_v10 = vld [vmem:[%s17967_s8] sm:$0xff] (%p13032_p9)  ;;  %v11258_v38 = vld [vmem:[%s17967_s8 + $0x28] sm:$0xff] (%p13032_p9)  ;;  %11255 = vst [vmem:[%s19652_s14 + $0x18] sm:$0xff] (%p13032_p9), %v11254_v22  ;;  %v11356_v24 = vld [vmem:[%s17967_s8 + $0x1b0] sm:$0xff] (%p13032_p9) }
 0x75e   : > { %v10702_v44 = vmul.f32 %v17958_v63, %v10421_v3  ;;  %v10703_v25 = vmul.f32 %v17973_v27, %v10435_v42  ;;  %11249 = vst [vmem:[%s19652_s14] sm:$0xff] (%p13032_p9), %v11248_v10  ;;  %v11256_v27 = vld [vmem:[%s17967_s8 + $0x20] sm:$0xff] (%p13032_p9)  ;;  %v11260_v63 = vld [vmem:[%s17967_s8 + $0x30] sm:$0xff] (%p13032_p9)  ;;  %v11358_v45 = vld [vmem:[%s17967_s8 + $0x1b8] sm:$0xff] (%p13032_p9) }
 0x75f   : > { %11222 = vst [vmem:[%s17967_s8 + $0x7e0] sm:$0xff] %v10966_v61  ;;  %11232 = sbr.rel (!%p13032_p9) target bundleno = 2131 (0x853), region = 68  ;;  %v11360_v3 = vld [vmem:[%s17967_s8 + $0x1c0] sm:$0xff] (%p13032_p9)  ;;  %v11362_v42 = vld [vmem:[%s17967_s8 + $0x1c8] sm:$0xff] (%p13032_p9)  ;;  %v11382_v22 = vld [vmem:[%s17967_s8 + $0x218] sm:$0xff] (%p13032_p9) }
 0x760   : > { %v10968_v8 = vadd.f32 %v17960_v54, %v10702_v44  ;;  %v10969_v5 = vadd.f32 %v17975_v19, %v10703_v25  ;;  %11223 = vst [vmem:[%s17967_s8 + $0x7e8] sm:$0xff] %v10967_v13  ;;  %v11252_v19 = vld [vmem:[%s17967_s8 + $0x10] sm:$0xff] (%p13032_p9)  ;;  %v11262_v54 = vld [vmem:[%s17967_s8 + $0x38] sm:$0xff] (%p13032_p9)  ;;  %v11368_v61 = vld [vmem:[%s17967_s8 + $0x1e0] sm:$0xff] (%p13032_p9) }
 0x761   : > { %11253 = vst [vmem:[%s19652_s14 + $0x10] sm:$0xff] (%p13032_p9), %v11252_v19  ;;  %v11364_v44 = vld [vmem:[%s17967_s8 + $0x1d0] sm:$0xff] (%p13032_p9)  ;;  %v11366_v25 = vld [vmem:[%s17967_s8 + $0x1d8] sm:$0xff] (%p13032_p9)  ;;  %v11370_v13 = vld [vmem:[%s17967_s8 + $0x1e8] sm:$0xff] (%p13032_p9) }
 0x762   : > { %11224 = vst [vmem:[%s17967_s8 + $0x7f0] sm:$0xff] %v10968_v8  ;;  %v11372_v8 = vld [vmem:[%s17967_s8 + $0x1f0] sm:$0xff] (%p13032_p9)  ;;  %v11376_v10 = vld [vmem:[%s17967_s8 + $0x200] sm:$0xff] (%p13032_p9)  ;;  %v11378_v32 = vld [vmem:[%s17967_s8 + $0x208] sm:$0xff] (%p13032_p9) }
 0x763   : > { %11225 = vst [vmem:[%s17967_s8 + $0x7f8] sm:$0xff] %v10969_v5  ;;  %v11374_v5 = vld [vmem:[%s17967_s8 + $0x1f8] sm:$0xff] (%p13032_p9)  ;;  %v11380_v19 = vld [vmem:[%s17967_s8 + $0x210] sm:$0xff] (%p13032_p9) }
 0x764   : > { %11257 = vst [vmem:[%s19652_s14 + $0x80] sm:$0xff] %v11256_v27  ;;  %v11384_v27 = vld [vmem:[%s17967_s8 + $0x220] sm:$0xff] }
 0x765   : > { %11259 = vst [vmem:[%s19652_s14 + $0x88] sm:$0xff] %v11258_v38  ;;  %v11386_v38 = vld [vmem:[%s17967_s8 + $0x228] sm:$0xff] }
 0x766   : > { %11261 = vst [vmem:[%s19652_s14 + $0x90] sm:$0xff] %v11260_v63  ;;  %v11388_v63 = vld [vmem:[%s17967_s8 + $0x230] sm:$0xff] }
 0x767   : > { %11263 = vst [vmem:[%s19652_s14 + $0x98] sm:$0xff] %v11262_v54  ;;  %v11390_v54 = vld [vmem:[%s17967_s8 + $0x238] sm:$0xff] }
 0x768   : > { %11291 = vst [vmem:[%s19652_s14 + $0x288] sm:$0xff] %v11290_v55  ;;  %v11418_v55 = vld [vmem:[%s17967_s8 + $0x2a8] sm:$0xff] }
 0x769   : > { %11293 = vst [vmem:[%s19652_s14 + $0x290] sm:$0xff] %v11292_v47  ;;  %v11420_v47 = vld [vmem:[%s17967_s8 + $0x2b0] sm:$0xff] }
 0x76a   : > { %11295 = vst [vmem:[%s19652_s14 + $0x298] sm:$0xff] %v11294_v9  ;;  %v11422_v9 = vld [vmem:[%s17967_s8 + $0x2b8] sm:$0xff] }
 0x76b   : > { %11297 = vst [vmem:[%s19652_s14 + $0x300] sm:$0xff] %v11296_v11  ;;  %v11424_v11 = vld [vmem:[%s17967_s8 + $0x2c0] sm:$0xff] }
 0x76c   : > { %11299 = vst [vmem:[%s19652_s14 + $0x308] sm:$0xff] %v11298_v0  ;;  %v11426_v0 = vld [vmem:[%s17967_s8 + $0x2c8] sm:$0xff] }
 0x76d   : > { %11301 = vst [vmem:[%s19652_s14 + $0x310] sm:$0xff] %v11300_v33  ;;  %v11428_v33 = vld [vmem:[%s17967_s8 + $0x2d0] sm:$0xff] }
 0x76e   : > { %11303 = vst [vmem:[%s19652_s14 + $0x318] sm:$0xff] %v11302_v6  ;;  %v11430_v6 = vld [vmem:[%s17967_s8 + $0x2d8] sm:$0xff] }
 0x76f   : > { %11305 = vst [vmem:[%s19652_s14 + $0x380] sm:$0xff] %v11304_v31  ;;  %v11432_v31 = vld [vmem:[%s17967_s8 + $0x2e0] sm:$0xff] }
 0x770   : > { %11307 = vst [vmem:[%s19652_s14 + $0x388] sm:$0xff] %v11306_v34  ;;  %v11434_v34 = vld [vmem:[%s17967_s8 + $0x2e8] sm:$0xff] }
 0x771   : > { %11309 = vst [vmem:[%s19652_s14 + $0x390] sm:$0xff] %v11308_v4  ;;  %v11436_v4 = vld [vmem:[%s17967_s8 + $0x2f0] sm:$0xff] }
 0x772   : > { %11311 = vst [vmem:[%s19652_s14 + $0x398] sm:$0xff] %v11310_v52  ;;  %v11438_v52 = vld [vmem:[%s17967_s8 + $0x2f8] sm:$0xff] }
 0x773   : > { %11313 = vst [vmem:[%s19652_s14 + $0x400] sm:$0xff] %v11312_v36  ;;  %v11440_v36 = vld [vmem:[%s17967_s8 + $0x300] sm:$0xff] }
 0x774   : > { %11315 = vst [vmem:[%s19652_s14 + $0x408] sm:$0xff] %v11314_v12  ;;  %v11442_v12 = vld [vmem:[%s17967_s8 + $0x308] sm:$0xff] }
 0x775   : > { %11317 = vst [vmem:[%s19652_s14 + $0x410] sm:$0xff] %v11316_v28  ;;  %v11444_v28 = vld [vmem:[%s17967_s8 + $0x310] sm:$0xff] }
 0x776   : > { %11319 = vst [vmem:[%s19652_s14 + $0x418] sm:$0xff] %v11318_v18  ;;  %v11446_v18 = vld [vmem:[%s17967_s8 + $0x318] sm:$0xff] }
 0x777   : > { %11321 = vst [vmem:[%s19652_s14 + $0x480] sm:$0xff] %v11320_v46  ;;  %v11448_v46 = vld [vmem:[%s17967_s8 + $0x320] sm:$0xff] }
 0x778   : > { %11323 = vst [vmem:[%s19652_s14 + $0x488] sm:$0xff] %v11322_v37  ;;  %v11450_v37 = vld [vmem:[%s17967_s8 + $0x328] sm:$0xff] }
 0x779   : > { %11325 = vst [vmem:[%s19652_s14 + $0x490] sm:$0xff] %v11324_v30  ;;  %v11452_v30 = vld [vmem:[%s17967_s8 + $0x330] sm:$0xff] }
 0x77a   : > { %11327 = vst [vmem:[%s19652_s14 + $0x498] sm:$0xff] %v11326_v21  ;;  %v11454_v21 = vld [vmem:[%s17967_s8 + $0x338] sm:$0xff] }
 0x77b   : > { %11329 = vst [vmem:[%s19652_s14 + $0x500] sm:$0xff] %v11328_v41  ;;  %v11456_v41 = vld [vmem:[%s17967_s8 + $0x340] sm:$0xff] }
 0x77c   : > { %11331 = vst [vmem:[%s19652_s14 + $0x508] sm:$0xff] %v11330_v15  ;;  %v11458_v15 = vld [vmem:[%s17967_s8 + $0x348] sm:$0xff] }
 0x77d   : > { %11333 = vst [vmem:[%s19652_s14 + $0x510] sm:$0xff] %v11332_v56  ;;  %v11460_v56 = vld [vmem:[%s17967_s8 + $0x350] sm:$0xff] }
 0x77e   : > { %11335 = vst [vmem:[%s19652_s14 + $0x518] sm:$0xff] %v11334_v7  ;;  %v11462_v7 = vld [vmem:[%s17967_s8 + $0x358] sm:$0xff] }
 0x77f   : > { %11337 = vst [vmem:[%s19652_s14 + $0x580] sm:$0xff] %v11336_v59  ;;  %v11464_v59 = vld [vmem:[%s17967_s8 + $0x360] sm:$0xff] }
 0x780   : > { %11339 = vst [vmem:[%s19652_s14 + $0x588] sm:$0xff] %v11338_v50  ;;  %v11466_v50 = vld [vmem:[%s17967_s8 + $0x368] sm:$0xff] }
 0x781   : > { %11341 = vst [vmem:[%s19652_s14 + $0x590] sm:$0xff] %v11340_v48  ;;  %v11468_v48 = vld [vmem:[%s17967_s8 + $0x370] sm:$0xff] }
 0x782   : > { %11343 = vst [vmem:[%s19652_s14 + $0x598] sm:$0xff] %v11342_v58  ;;  %v11470_v58 = vld [vmem:[%s17967_s8 + $0x378] sm:$0xff] }
 0x783   : > { %11345 = vst [vmem:[%s19652_s14 + $0x600] sm:$0xff] %v11344_v57  ;;  %v11472_v57 = vld [vmem:[%s17967_s8 + $0x380] sm:$0xff] }
 0x784   : > { %11347 = vst [vmem:[%s19652_s14 + $0x608] sm:$0xff] %v11346_v35  ;;  %v11474_v35 = vld [vmem:[%s17967_s8 + $0x388] sm:$0xff] }
 0x785   : > { %11349 = vst [vmem:[%s19652_s14 + $0x610] sm:$0xff] %v11348_v60  ;;  %v11476_v60 = vld [vmem:[%s17967_s8 + $0x390] sm:$0xff] }
 0x786   : > { %11351 = vst [vmem:[%s19652_s14 + $0x618] sm:$0xff] %v11350_v29  ;;  %v11478_v29 = vld [vmem:[%s17967_s8 + $0x398] sm:$0xff] }
 0x787   : > { %11353 = vst [vmem:[%s19652_s14 + $0x680] sm:$0xff] %v11352_v1  ;;  %v11480_v1 = vld [vmem:[%s17967_s8 + $0x3a0] sm:$0xff] }
 0x788   : > { %11355 = vst [vmem:[%s19652_s14 + $0x688] sm:$0xff] %v11354_v40  ;;  %v11482_v40 = vld [vmem:[%s17967_s8 + $0x3a8] sm:$0xff] }
 0x789   : > { %11357 = vst [vmem:[%s19652_s14 + $0x690] sm:$0xff] %v11356_v24  ;;  %v11484_v24 = vld [vmem:[%s17967_s8 + $0x3b0] sm:$0xff] }
 0x78a   : > { %11359 = vst [vmem:[%s19652_s14 + $0x698] sm:$0xff] %v11358_v45  ;;  %v11486_v45 = vld [vmem:[%s17967_s8 + $0x3b8] sm:$0xff] }
 0x78b   : > { %11361 = vst [vmem:[%s19652_s14 + $0x700] sm:$0xff] %v11360_v3  ;;  %v11488_v3 = vld [vmem:[%s17967_s8 + $0x3c0] sm:$0xff] }
 0x78c   : > { %11363 = vst [vmem:[%s19652_s14 + $0x708] sm:$0xff] %v11362_v42  ;;  %v11490_v42 = vld [vmem:[%s17967_s8 + $0x3c8] sm:$0xff] }
 0x78d   : > { %11365 = vst [vmem:[%s19652_s14 + $0x710] sm:$0xff] %v11364_v44  ;;  %v11492_v44 = vld [vmem:[%s17967_s8 + $0x3d0] sm:$0xff] }
 0x78e   : > { %11367 = vst [vmem:[%s19652_s14 + $0x718] sm:$0xff] %v11366_v25  ;;  %v11494_v25 = vld [vmem:[%s17967_s8 + $0x3d8] sm:$0xff] }
 0x78f   : > { %11369 = vst [vmem:[%s19652_s14 + $0x780] sm:$0xff] %v11368_v61  ;;  %v11496_v61 = vld [vmem:[%s17967_s8 + $0x3e0] sm:$0xff] }
 0x790   : > { %11371 = vst [vmem:[%s19652_s14 + $0x788] sm:$0xff] %v11370_v13  ;;  %v11498_v13 = vld [vmem:[%s17967_s8 + $0x3e8] sm:$0xff] }
 0x791   : > { %11373 = vst [vmem:[%s19652_s14 + $0x790] sm:$0xff] %v11372_v8  ;;  %v11500_v8 = vld [vmem:[%s17967_s8 + $0x3f0] sm:$0xff] }
 0x792   : > { %11375 = vst [vmem:[%s19652_s14 + $0x798] sm:$0xff] %v11374_v5  ;;  %v11502_v5 = vld [vmem:[%s17967_s8 + $0x3f8] sm:$0xff] }
 0x793   : > { %11377 = vst [vmem:[%s19652_s14 + $0x800] sm:$0xff] %v11376_v10  ;;  %v11504_v10 = vld [vmem:[%s17967_s8 + $0x400] sm:$0xff] }
 0x794   : > { %11379 = vst [vmem:[%s19652_s14 + $0x808] sm:$0xff] %v11378_v32  ;;  %v11506_v32 = vld [vmem:[%s17967_s8 + $0x408] sm:$0xff] }
 0x795   : > { %11381 = vst [vmem:[%s19652_s14 + $0x810] sm:$0xff] %v11380_v19  ;;  %v11508_v19 = vld [vmem:[%s17967_s8 + $0x410] sm:$0xff] }
 0x796   : > { %11383 = vst [vmem:[%s19652_s14 + $0x818] sm:$0xff] %v11382_v22  ;;  %v11510_v22 = vld [vmem:[%s17967_s8 + $0x418] sm:$0xff] }
 0x797   : > { %11385 = vst [vmem:[%s19652_s14 + $0x880] sm:$0xff] %v11384_v27  ;;  %v11512_v27 = vld [vmem:[%s17967_s8 + $0x420] sm:$0xff] }
 0x798   : > { %11387 = vst [vmem:[%s19652_s14 + $0x888] sm:$0xff] %v11386_v38  ;;  %v11514_v38 = vld [vmem:[%s17967_s8 + $0x428] sm:$0xff] }
 0x799   : > { %11389 = vst [vmem:[%s19652_s14 + $0x890] sm:$0xff] %v11388_v63  ;;  %v11516_v63 = vld [vmem:[%s17967_s8 + $0x430] sm:$0xff] }
 0x79a   : > { %11391 = vst [vmem:[%s19652_s14 + $0x898] sm:$0xff] %v11390_v54  ;;  %v11518_v54 = vld [vmem:[%s17967_s8 + $0x438] sm:$0xff] }
 0x79b   : > { %11393 = vst [vmem:[%s19652_s14 + $0x900] sm:$0xff] %v11392_v62  ;;  %v11520_v62 = vld [vmem:[%s17967_s8 + $0x440] sm:$0xff] }
 0x79c   : > { %11395 = vst [vmem:[%s19652_s14 + $0x908] sm:$0xff] %v11394_v14  ;;  %v11522_v14 = vld [vmem:[%s17967_s8 + $0x448] sm:$0xff] }
 0x79d   : > { %11397 = vst [vmem:[%s19652_s14 + $0x910] sm:$0xff] %v11396_v39  ;;  %v11524_v39 = vld [vmem:[%s17967_s8 + $0x450] sm:$0xff] }
 0x79e   : > { %11399 = vst [vmem:[%s19652_s14 + $0x918] sm:$0xff] %v11398_v49  ;;  %v11526_v49 = vld [vmem:[%s17967_s8 + $0x458] sm:$0xff] }
 0x79f   : > { %11401 = vst [vmem:[%s19652_s14 + $0x980] sm:$0xff] %v11400_v20  ;;  %v11528_v20 = vld [vmem:[%s17967_s8 + $0x460] sm:$0xff] }
 0x7a0   : > { %11403 = vst [vmem:[%s19652_s14 + $0x988] sm:$0xff] %v11402_v23  ;;  %v11530_v23 = vld [vmem:[%s17967_s8 + $0x468] sm:$0xff] }
 0x7a1   : > { %11405 = vst [vmem:[%s19652_s14 + $0x990] sm:$0xff] %v11404_v17  ;;  %v11532_v17 = vld [vmem:[%s17967_s8 + $0x470] sm:$0xff] }
 0x7a2   : > { %11407 = vst [vmem:[%s19652_s14 + $0x998] sm:$0xff] %v11406_v26  ;;  %v11534_v26 = vld [vmem:[%s17967_s8 + $0x478] sm:$0xff] }
 0x7a3   : > { %11409 = vst [vmem:[%s19652_s14 + $0xa00] sm:$0xff] %v11408_v16  ;;  %v11536_v16 = vld [vmem:[%s17967_s8 + $0x480] sm:$0xff] }
 0x7a4   : > { %11411 = vst [vmem:[%s19652_s14 + $0xa08] sm:$0xff] %v11410_v51  ;;  %v11538_v51 = vld [vmem:[%s17967_s8 + $0x488] sm:$0xff] }
 0x7a5   : > { %11413 = vst [vmem:[%s19652_s14 + $0xa10] sm:$0xff] %v11412_v43  ;;  %v11540_v43 = vld [vmem:[%s17967_s8 + $0x490] sm:$0xff] }
 0x7a6   : > { %11415 = vst [vmem:[%s19652_s14 + $0xa18] sm:$0xff] %v11414_v53  ;;  %v11542_v53 = vld [vmem:[%s17967_s8 + $0x498] sm:$0xff] }
 0x7a7   : > { %11417 = vst [vmem:[%s19652_s14 + $0xa80] sm:$0xff] %v11416_v2  ;;  %v11544_v2 = vld [vmem:[%s17967_s8 + $0x4a0] sm:$0xff] }
 0x7a8   : > { %11419 = vst [vmem:[%s19652_s14 + $0xa88] sm:$0xff] %v11418_v55  ;;  %v11546_v55 = vld [vmem:[%s17967_s8 + $0x4a8] sm:$0xff] }
 0x7a9   : > { %11421 = vst [vmem:[%s19652_s14 + $0xa90] sm:$0xff] %v11420_v47  ;;  %v11548_v47 = vld [vmem:[%s17967_s8 + $0x4b0] sm:$0xff] }
 0x7aa   : > { %11423 = vst [vmem:[%s19652_s14 + $0xa98] sm:$0xff] %v11422_v9  ;;  %v11550_v9 = vld [vmem:[%s17967_s8 + $0x4b8] sm:$0xff] }
 0x7ab   : > { %11425 = vst [vmem:[%s19652_s14 + $0xb00] sm:$0xff] %v11424_v11  ;;  %v11552_v11 = vld [vmem:[%s17967_s8 + $0x4c0] sm:$0xff] }
 0x7ac   : > { %11427 = vst [vmem:[%s19652_s14 + $0xb08] sm:$0xff] %v11426_v0  ;;  %v11554_v0 = vld [vmem:[%s17967_s8 + $0x4c8] sm:$0xff] }
 0x7ad   : > { %11429 = vst [vmem:[%s19652_s14 + $0xb10] sm:$0xff] %v11428_v33  ;;  %v11556_v33 = vld [vmem:[%s17967_s8 + $0x4d0] sm:$0xff] }
 0x7ae   : > { %11431 = vst [vmem:[%s19652_s14 + $0xb18] sm:$0xff] %v11430_v6  ;;  %v11558_v6 = vld [vmem:[%s17967_s8 + $0x4d8] sm:$0xff] }
 0x7af   : > { %11433 = vst [vmem:[%s19652_s14 + $0xb80] sm:$0xff] %v11432_v31  ;;  %v11560_v31 = vld [vmem:[%s17967_s8 + $0x4e0] sm:$0xff] }
 0x7b0   : > { %11435 = vst [vmem:[%s19652_s14 + $0xb88] sm:$0xff] %v11434_v34  ;;  %v11562_v34 = vld [vmem:[%s17967_s8 + $0x4e8] sm:$0xff] }
 0x7b1   : > { %11437 = vst [vmem:[%s19652_s14 + $0xb90] sm:$0xff] %v11436_v4  ;;  %v11564_v4 = vld [vmem:[%s17967_s8 + $0x4f0] sm:$0xff] }
 0x7b2   : > { %11439 = vst [vmem:[%s19652_s14 + $0xb98] sm:$0xff] %v11438_v52  ;;  %v11566_v52 = vld [vmem:[%s17967_s8 + $0x4f8] sm:$0xff] }
 0x7b3   : > { %11441 = vst [vmem:[%s19652_s14 + $0xc00] sm:$0xff] %v11440_v36  ;;  %v11568_v36 = vld [vmem:[%s17967_s8 + $0x500] sm:$0xff] }
 0x7b4   : > { %11443 = vst [vmem:[%s19652_s14 + $0xc08] sm:$0xff] %v11442_v12  ;;  %v11570_v12 = vld [vmem:[%s17967_s8 + $0x508] sm:$0xff] }
 0x7b5   : > { %11445 = vst [vmem:[%s19652_s14 + $0xc10] sm:$0xff] %v11444_v28  ;;  %v11572_v28 = vld [vmem:[%s17967_s8 + $0x510] sm:$0xff] }
 0x7b6   : > { %11447 = vst [vmem:[%s19652_s14 + $0xc18] sm:$0xff] %v11446_v18  ;;  %v11574_v18 = vld [vmem:[%s17967_s8 + $0x518] sm:$0xff] }
 0x7b7   : > { %11449 = vst [vmem:[%s19652_s14 + $0xc80] sm:$0xff] %v11448_v46  ;;  %v11576_v46 = vld [vmem:[%s17967_s8 + $0x520] sm:$0xff] }
 0x7b8   : > { %11451 = vst [vmem:[%s19652_s14 + $0xc88] sm:$0xff] %v11450_v37  ;;  %v11578_v37 = vld [vmem:[%s17967_s8 + $0x528] sm:$0xff] }
 0x7b9   : > { %11453 = vst [vmem:[%s19652_s14 + $0xc90] sm:$0xff] %v11452_v30  ;;  %v11580_v30 = vld [vmem:[%s17967_s8 + $0x530] sm:$0xff] }
 0x7ba   : > { %11455 = vst [vmem:[%s19652_s14 + $0xc98] sm:$0xff] %v11454_v21  ;;  %v11582_v21 = vld [vmem:[%s17967_s8 + $0x538] sm:$0xff] }
 0x7bb   : > { %11457 = vst [vmem:[%s19652_s14 + $0xd00] sm:$0xff] %v11456_v41  ;;  %v11584_v41 = vld [vmem:[%s17967_s8 + $0x540] sm:$0xff] }
 0x7bc   : > { %11459 = vst [vmem:[%s19652_s14 + $0xd08] sm:$0xff] %v11458_v15  ;;  %v11586_v15 = vld [vmem:[%s17967_s8 + $0x548] sm:$0xff] }
 0x7bd   : > { %11461 = vst [vmem:[%s19652_s14 + $0xd10] sm:$0xff] %v11460_v56  ;;  %v11588_v56 = vld [vmem:[%s17967_s8 + $0x550] sm:$0xff] }
 0x7be   : > { %11463 = vst [vmem:[%s19652_s14 + $0xd18] sm:$0xff] %v11462_v7  ;;  %v11590_v7 = vld [vmem:[%s17967_s8 + $0x558] sm:$0xff] }
 0x7bf   : > { %11465 = vst [vmem:[%s19652_s14 + $0xd80] sm:$0xff] %v11464_v59  ;;  %v11592_v59 = vld [vmem:[%s17967_s8 + $0x560] sm:$0xff] }
 0x7c0   : > { %11467 = vst [vmem:[%s19652_s14 + $0xd88] sm:$0xff] %v11466_v50  ;;  %v11594_v50 = vld [vmem:[%s17967_s8 + $0x568] sm:$0xff] }
 0x7c1   : > { %11469 = vst [vmem:[%s19652_s14 + $0xd90] sm:$0xff] %v11468_v48  ;;  %v11596_v48 = vld [vmem:[%s17967_s8 + $0x570] sm:$0xff] }
 0x7c2   : > { %11471 = vst [vmem:[%s19652_s14 + $0xd98] sm:$0xff] %v11470_v58  ;;  %v11598_v58 = vld [vmem:[%s17967_s8 + $0x578] sm:$0xff] }
 0x7c3   : > { %11473 = vst [vmem:[%s19652_s14 + $0xe00] sm:$0xff] %v11472_v57  ;;  %v11600_v57 = vld [vmem:[%s17967_s8 + $0x580] sm:$0xff] }
 0x7c4   : > { %11475 = vst [vmem:[%s19652_s14 + $0xe08] sm:$0xff] %v11474_v35  ;;  %v11602_v35 = vld [vmem:[%s17967_s8 + $0x588] sm:$0xff] }
 0x7c5   : > { %11477 = vst [vmem:[%s19652_s14 + $0xe10] sm:$0xff] %v11476_v60  ;;  %v11604_v60 = vld [vmem:[%s17967_s8 + $0x590] sm:$0xff] }
 0x7c6   : > { %11479 = vst [vmem:[%s19652_s14 + $0xe18] sm:$0xff] %v11478_v29  ;;  %v11606_v29 = vld [vmem:[%s17967_s8 + $0x598] sm:$0xff] }
 0x7c7   : > { %11481 = vst [vmem:[%s19652_s14 + $0xe80] sm:$0xff] %v11480_v1  ;;  %v11608_v1 = vld [vmem:[%s17967_s8 + $0x5a0] sm:$0xff] }
 0x7c8   : > { %11483 = vst [vmem:[%s19652_s14 + $0xe88] sm:$0xff] %v11482_v40  ;;  %v11610_v40 = vld [vmem:[%s17967_s8 + $0x5a8] sm:$0xff] }
 0x7c9   : > { %11485 = vst [vmem:[%s19652_s14 + $0xe90] sm:$0xff] %v11484_v24  ;;  %v11612_v24 = vld [vmem:[%s17967_s8 + $0x5b0] sm:$0xff] }
 0x7ca   : > { %11487 = vst [vmem:[%s19652_s14 + $0xe98] sm:$0xff] %v11486_v45  ;;  %v11614_v45 = vld [vmem:[%s17967_s8 + $0x5b8] sm:$0xff] }
 0x7cb   : > { %11489 = vst [vmem:[%s19652_s14 + $0xf00] sm:$0xff] %v11488_v3  ;;  %v11616_v3 = vld [vmem:[%s17967_s8 + $0x5c0] sm:$0xff] }
 0x7cc   : > { %11491 = vst [vmem:[%s19652_s14 + $0xf08] sm:$0xff] %v11490_v42  ;;  %v11618_v42 = vld [vmem:[%s17967_s8 + $0x5c8] sm:$0xff] }
 0x7cd   : > { %11493 = vst [vmem:[%s19652_s14 + $0xf10] sm:$0xff] %v11492_v44  ;;  %v11620_v44 = vld [vmem:[%s17967_s8 + $0x5d0] sm:$0xff] }
 0x7ce   : > { %11495 = vst [vmem:[%s19652_s14 + $0xf18] sm:$0xff] %v11494_v25  ;;  %v11622_v25 = vld [vmem:[%s17967_s8 + $0x5d8] sm:$0xff] }
 0x7cf   : > { %11497 = vst [vmem:[%s19652_s14 + $0xf80] sm:$0xff] %v11496_v61  ;;  %v11624_v61 = vld [vmem:[%s17967_s8 + $0x5e0] sm:$0xff] }
 0x7d0   : > { %11499 = vst [vmem:[%s19652_s14 + $0xf88] sm:$0xff] %v11498_v13  ;;  %v11626_v13 = vld [vmem:[%s17967_s8 + $0x5e8] sm:$0xff] }
 0x7d1   : > { %11501 = vst [vmem:[%s19652_s14 + $0xf90] sm:$0xff] %v11500_v8  ;;  %v11628_v8 = vld [vmem:[%s17967_s8 + $0x5f0] sm:$0xff] }
 0x7d2   : > { %11503 = vst [vmem:[%s19652_s14 + $0xf98] sm:$0xff] %v11502_v5  ;;  %v11630_v5 = vld [vmem:[%s17967_s8 + $0x5f8] sm:$0xff] }
 0x7d3   : > { %11505 = vst [vmem:[%s19652_s14 + $0x1000] sm:$0xff] %v11504_v10  ;;  %v11632_v10 = vld [vmem:[%s17967_s8 + $0x600] sm:$0xff] }
 0x7d4   : > { %11507 = vst [vmem:[%s19652_s14 + $0x1008] sm:$0xff] %v11506_v32  ;;  %v11634_v32 = vld [vmem:[%s17967_s8 + $0x608] sm:$0xff] }
 0x7d5   : > { %11509 = vst [vmem:[%s19652_s14 + $0x1010] sm:$0xff] %v11508_v19  ;;  %v11636_v19 = vld [vmem:[%s17967_s8 + $0x610] sm:$0xff] }
 0x7d6   : > { %11511 = vst [vmem:[%s19652_s14 + $0x1018] sm:$0xff] %v11510_v22  ;;  %v11638_v22 = vld [vmem:[%s17967_s8 + $0x618] sm:$0xff] }
 0x7d7   : > { %11513 = vst [vmem:[%s19652_s14 + $0x1080] sm:$0xff] %v11512_v27  ;;  %v11640_v27 = vld [vmem:[%s17967_s8 + $0x620] sm:$0xff] }
 0x7d8   : > { %11515 = vst [vmem:[%s19652_s14 + $0x1088] sm:$0xff] %v11514_v38  ;;  %v11642_v38 = vld [vmem:[%s17967_s8 + $0x628] sm:$0xff] }
 0x7d9   : > { %11517 = vst [vmem:[%s19652_s14 + $0x1090] sm:$0xff] %v11516_v63  ;;  %v11644_v63 = vld [vmem:[%s17967_s8 + $0x630] sm:$0xff] }
 0x7da   : > { %11519 = vst [vmem:[%s19652_s14 + $0x1098] sm:$0xff] %v11518_v54  ;;  %v11646_v54 = vld [vmem:[%s17967_s8 + $0x638] sm:$0xff] }
 0x7db   : > { %11521 = vst [vmem:[%s19652_s14 + $0x1100] sm:$0xff] %v11520_v62  ;;  %v11648_v62 = vld [vmem:[%s17967_s8 + $0x640] sm:$0xff] }
 0x7dc   : > { %11523 = vst [vmem:[%s19652_s14 + $0x1108] sm:$0xff] %v11522_v14  ;;  %v11650_v14 = vld [vmem:[%s17967_s8 + $0x648] sm:$0xff] }
 0x7dd   : > { %11525 = vst [vmem:[%s19652_s14 + $0x1110] sm:$0xff] %v11524_v39  ;;  %v11652_v39 = vld [vmem:[%s17967_s8 + $0x650] sm:$0xff] }
 0x7de   : > { %11527 = vst [vmem:[%s19652_s14 + $0x1118] sm:$0xff] %v11526_v49  ;;  %v11654_v49 = vld [vmem:[%s17967_s8 + $0x658] sm:$0xff] }
 0x7df   : > { %11529 = vst [vmem:[%s19652_s14 + $0x1180] sm:$0xff] %v11528_v20  ;;  %v11656_v20 = vld [vmem:[%s17967_s8 + $0x660] sm:$0xff] }
 0x7e0   : > { %11531 = vst [vmem:[%s19652_s14 + $0x1188] sm:$0xff] %v11530_v23  ;;  %v11658_v23 = vld [vmem:[%s17967_s8 + $0x668] sm:$0xff] }
 0x7e1   : > { %11533 = vst [vmem:[%s19652_s14 + $0x1190] sm:$0xff] %v11532_v17  ;;  %v11660_v17 = vld [vmem:[%s17967_s8 + $0x670] sm:$0xff] }
 0x7e2   : > { %11535 = vst [vmem:[%s19652_s14 + $0x1198] sm:$0xff] %v11534_v26  ;;  %v11662_v26 = vld [vmem:[%s17967_s8 + $0x678] sm:$0xff] }
 0x7e3   : > { %11537 = vst [vmem:[%s19652_s14 + $0x1200] sm:$0xff] %v11536_v16  ;;  %v11664_v16 = vld [vmem:[%s17967_s8 + $0x680] sm:$0xff] }
 0x7e4   : > { %11539 = vst [vmem:[%s19652_s14 + $0x1208] sm:$0xff] %v11538_v51  ;;  %v11666_v51 = vld [vmem:[%s17967_s8 + $0x688] sm:$0xff] }
 0x7e5   : > { %11541 = vst [vmem:[%s19652_s14 + $0x1210] sm:$0xff] %v11540_v43  ;;  %v11668_v43 = vld [vmem:[%s17967_s8 + $0x690] sm:$0xff] }
 0x7e6   : > { %11543 = vst [vmem:[%s19652_s14 + $0x1218] sm:$0xff] %v11542_v53  ;;  %v11670_v53 = vld [vmem:[%s17967_s8 + $0x698] sm:$0xff] }
 0x7e7   : > { %11545 = vst [vmem:[%s19652_s14 + $0x1280] sm:$0xff] %v11544_v2  ;;  %v11672_v2 = vld [vmem:[%s17967_s8 + $0x6a0] sm:$0xff] }
 0x7e8   : > { %11547 = vst [vmem:[%s19652_s14 + $0x1288] sm:$0xff] %v11546_v55  ;;  %v11674_v55 = vld [vmem:[%s17967_s8 + $0x6a8] sm:$0xff] }
 0x7e9   : > { %11549 = vst [vmem:[%s19652_s14 + $0x1290] sm:$0xff] %v11548_v47  ;;  %v11676_v47 = vld [vmem:[%s17967_s8 + $0x6b0] sm:$0xff] }
 0x7ea   : > { %11551 = vst [vmem:[%s19652_s14 + $0x1298] sm:$0xff] %v11550_v9  ;;  %v11678_v9 = vld [vmem:[%s17967_s8 + $0x6b8] sm:$0xff] }
 0x7eb   : > { %11553 = vst [vmem:[%s19652_s14 + $0x1300] sm:$0xff] %v11552_v11  ;;  %v11680_v11 = vld [vmem:[%s17967_s8 + $0x6c0] sm:$0xff] }
 0x7ec   : > { %11555 = vst [vmem:[%s19652_s14 + $0x1308] sm:$0xff] %v11554_v0  ;;  %v11682_v0 = vld [vmem:[%s17967_s8 + $0x6c8] sm:$0xff] }
 0x7ed   : > { %11557 = vst [vmem:[%s19652_s14 + $0x1310] sm:$0xff] %v11556_v33  ;;  %v11684_v33 = vld [vmem:[%s17967_s8 + $0x6d0] sm:$0xff] }
 0x7ee   : > { %11559 = vst [vmem:[%s19652_s14 + $0x1318] sm:$0xff] %v11558_v6  ;;  %v11686_v6 = vld [vmem:[%s17967_s8 + $0x6d8] sm:$0xff] }
 0x7ef   : > { %11561 = vst [vmem:[%s19652_s14 + $0x1380] sm:$0xff] %v11560_v31  ;;  %v11688_v31 = vld [vmem:[%s17967_s8 + $0x6e0] sm:$0xff] }
 0x7f0   : > { %11563 = vst [vmem:[%s19652_s14 + $0x1388] sm:$0xff] %v11562_v34  ;;  %v11690_v34 = vld [vmem:[%s17967_s8 + $0x6e8] sm:$0xff] }
 0x7f1   : > { %11565 = vst [vmem:[%s19652_s14 + $0x1390] sm:$0xff] %v11564_v4  ;;  %v11692_v4 = vld [vmem:[%s17967_s8 + $0x6f0] sm:$0xff] }
 0x7f2   : > { %11567 = vst [vmem:[%s19652_s14 + $0x1398] sm:$0xff] %v11566_v52  ;;  %v11694_v52 = vld [vmem:[%s17967_s8 + $0x6f8] sm:$0xff] }
 0x7f3   : > { %11569 = vst [vmem:[%s19652_s14 + $0x1400] sm:$0xff] %v11568_v36  ;;  %v11696_v36 = vld [vmem:[%s17967_s8 + $0x700] sm:$0xff] }
 0x7f4   : > { %11571 = vst [vmem:[%s19652_s14 + $0x1408] sm:$0xff] %v11570_v12  ;;  %v11698_v12 = vld [vmem:[%s17967_s8 + $0x708] sm:$0xff] }
 0x7f5   : > { %11573 = vst [vmem:[%s19652_s14 + $0x1410] sm:$0xff] %v11572_v28  ;;  %v11700_v28 = vld [vmem:[%s17967_s8 + $0x710] sm:$0xff] }
 0x7f6   : > { %11575 = vst [vmem:[%s19652_s14 + $0x1418] sm:$0xff] %v11574_v18  ;;  %v11702_v18 = vld [vmem:[%s17967_s8 + $0x718] sm:$0xff] }
 0x7f7   : > { %11577 = vst [vmem:[%s19652_s14 + $0x1480] sm:$0xff] %v11576_v46  ;;  %v11704_v46 = vld [vmem:[%s17967_s8 + $0x720] sm:$0xff] }
 0x7f8   : > { %11579 = vst [vmem:[%s19652_s14 + $0x1488] sm:$0xff] %v11578_v37  ;;  %v11706_v37 = vld [vmem:[%s17967_s8 + $0x728] sm:$0xff] }
 0x7f9   : > { %11581 = vst [vmem:[%s19652_s14 + $0x1490] sm:$0xff] %v11580_v30  ;;  %v11708_v30 = vld [vmem:[%s17967_s8 + $0x730] sm:$0xff] }
 0x7fa   : > { %11583 = vst [vmem:[%s19652_s14 + $0x1498] sm:$0xff] %v11582_v21  ;;  %v11710_v21 = vld [vmem:[%s17967_s8 + $0x738] sm:$0xff] }
 0x7fb   : > { %11585 = vst [vmem:[%s19652_s14 + $0x1500] sm:$0xff] %v11584_v41  ;;  %v11712_v41 = vld [vmem:[%s17967_s8 + $0x740] sm:$0xff] }
 0x7fc   : > { %11587 = vst [vmem:[%s19652_s14 + $0x1508] sm:$0xff] %v11586_v15  ;;  %v11714_v15 = vld [vmem:[%s17967_s8 + $0x748] sm:$0xff] }
 0x7fd   : > { %11589 = vst [vmem:[%s19652_s14 + $0x1510] sm:$0xff] %v11588_v56  ;;  %v11716_v56 = vld [vmem:[%s17967_s8 + $0x750] sm:$0xff] }
 0x7fe   : > { %11591 = vst [vmem:[%s19652_s14 + $0x1518] sm:$0xff] %v11590_v7  ;;  %v11718_v7 = vld [vmem:[%s17967_s8 + $0x758] sm:$0xff] }
 0x7ff   : > { %11593 = vst [vmem:[%s19652_s14 + $0x1580] sm:$0xff] %v11592_v59  ;;  %v11720_v59 = vld [vmem:[%s17967_s8 + $0x760] sm:$0xff] }
 0x800   : > { %11595 = vst [vmem:[%s19652_s14 + $0x1588] sm:$0xff] %v11594_v50  ;;  %v11722_v50 = vld [vmem:[%s17967_s8 + $0x768] sm:$0xff] }
 0x801   : > { %11597 = vst [vmem:[%s19652_s14 + $0x1590] sm:$0xff] %v11596_v48  ;;  %v11724_v48 = vld [vmem:[%s17967_s8 + $0x770] sm:$0xff] }
 0x802   : > { %11599 = vst [vmem:[%s19652_s14 + $0x1598] sm:$0xff] %v11598_v58  ;;  %v11726_v58 = vld [vmem:[%s17967_s8 + $0x778] sm:$0xff] }
 0x803   : > { %11601 = vst [vmem:[%s19652_s14 + $0x1600] sm:$0xff] %v11600_v57  ;;  %v11728_v57 = vld [vmem:[%s17967_s8 + $0x780] sm:$0xff] }
 0x804   : > { %11603 = vst [vmem:[%s19652_s14 + $0x1608] sm:$0xff] %v11602_v35  ;;  %v11730_v35 = vld [vmem:[%s17967_s8 + $0x788] sm:$0xff] }
 0x805   : > { %11605 = vst [vmem:[%s19652_s14 + $0x1610] sm:$0xff] %v11604_v60  ;;  %v11732_v60 = vld [vmem:[%s17967_s8 + $0x790] sm:$0xff] }
 0x806   : > { %11607 = vst [vmem:[%s19652_s14 + $0x1618] sm:$0xff] %v11606_v29  ;;  %v11734_v29 = vld [vmem:[%s17967_s8 + $0x798] sm:$0xff] }
 0x807   : > { %11609 = vst [vmem:[%s19652_s14 + $0x1680] sm:$0xff] %v11608_v1  ;;  %v11736_v1 = vld [vmem:[%s17967_s8 + $0x7a0] sm:$0xff] }
 0x808   : > { %11611 = vst [vmem:[%s19652_s14 + $0x1688] sm:$0xff] %v11610_v40  ;;  %v11738_v40 = vld [vmem:[%s17967_s8 + $0x7a8] sm:$0xff] }
 0x809   : > { %11613 = vst [vmem:[%s19652_s14 + $0x1690] sm:$0xff] %v11612_v24  ;;  %v11740_v24 = vld [vmem:[%s17967_s8 + $0x7b0] sm:$0xff] }
 0x80a   : > { %11615 = vst [vmem:[%s19652_s14 + $0x1698] sm:$0xff] %v11614_v45  ;;  %v11742_v45 = vld [vmem:[%s17967_s8 + $0x7b8] sm:$0xff] }
 0x80b   : > { %11617 = vst [vmem:[%s19652_s14 + $0x1700] sm:$0xff] %v11616_v3  ;;  %v11744_v3 = vld [vmem:[%s17967_s8 + $0x7c0] sm:$0xff] }
 0x80c   : > { %11619 = vst [vmem:[%s19652_s14 + $0x1708] sm:$0xff] %v11618_v42  ;;  %v11746_v42 = vld [vmem:[%s17967_s8 + $0x7c8] sm:$0xff] }
 0x80d   : > { %11621 = vst [vmem:[%s19652_s14 + $0x1710] sm:$0xff] %v11620_v44  ;;  %v11748_v44 = vld [vmem:[%s17967_s8 + $0x7d0] sm:$0xff] }
 0x80e   : > { %11623 = vst [vmem:[%s19652_s14 + $0x1718] sm:$0xff] %v11622_v25  ;;  %v11750_v25 = vld [vmem:[%s17967_s8 + $0x7d8] sm:$0xff] }
 0x80f   : > { %11625 = vst [vmem:[%s19652_s14 + $0x1780] sm:$0xff] %v11624_v61  ;;  %v11752_v61 = vld [vmem:[%s17967_s8 + $0x7e0] sm:$0xff] }
 0x810   : > { %11627 = vst [vmem:[%s19652_s14 + $0x1788] sm:$0xff] %v11626_v13  ;;  %v11754_v13 = vld [vmem:[%s17967_s8 + $0x7e8] sm:$0xff] }
 0x811   : > { %11629 = vst [vmem:[%s19652_s14 + $0x1790] sm:$0xff] %v11628_v8  ;;  %v11756_v8 = vld [vmem:[%s17967_s8 + $0x7f0] sm:$0xff] }
 0x812   : > { %11631 = vst [vmem:[%s19652_s14 + $0x1798] sm:$0xff] %v11630_v5  ;;  %v11758_v5 = vld [vmem:[%s17967_s8 + $0x7f8] sm:$0xff] }
 0x813   : > { %11633 = vst [vmem:[%s19652_s14 + $0x1800] sm:$0xff] %v11632_v10 }
 0x814   : > { %11635 = vst [vmem:[%s19652_s14 + $0x1808] sm:$0xff] %v11634_v32 }
 0x815   : > { %11637 = vst [vmem:[%s19652_s14 + $0x1810] sm:$0xff] %v11636_v19 }
 0x816   : > { %11639 = vst [vmem:[%s19652_s14 + $0x1818] sm:$0xff] %v11638_v22 }
 0x817   : > { %11641 = vst [vmem:[%s19652_s14 + $0x1880] sm:$0xff] %v11640_v27 }
 0x818   : > { %11643 = vst [vmem:[%s19652_s14 + $0x1888] sm:$0xff] %v11642_v38 }
 0x819   : > { %11645 = vst [vmem:[%s19652_s14 + $0x1890] sm:$0xff] %v11644_v63 }
 0x81a   : > { %11647 = vst [vmem:[%s19652_s14 + $0x1898] sm:$0xff] %v11646_v54 }
 0x81b   : > { %11649 = vst [vmem:[%s19652_s14 + $0x1900] sm:$0xff] %v11648_v62 }
 0x81c   : > { %11651 = vst [vmem:[%s19652_s14 + $0x1908] sm:$0xff] %v11650_v14 }
 0x81d   : > { %11653 = vst [vmem:[%s19652_s14 + $0x1910] sm:$0xff] %v11652_v39 }
 0x81e   : > { %11655 = vst [vmem:[%s19652_s14 + $0x1918] sm:$0xff] %v11654_v49 }
 0x81f   : > { %11657 = vst [vmem:[%s19652_s14 + $0x1980] sm:$0xff] %v11656_v20 }
 0x820   : > { %11659 = vst [vmem:[%s19652_s14 + $0x1988] sm:$0xff] %v11658_v23 }
 0x821   : > { %11661 = vst [vmem:[%s19652_s14 + $0x1990] sm:$0xff] %v11660_v17 }
 0x822   : > { %11663 = vst [vmem:[%s19652_s14 + $0x1998] sm:$0xff] %v11662_v26 }
 0x823   : > { %11665 = vst [vmem:[%s19652_s14 + $0x1a00] sm:$0xff] %v11664_v16 }
 0x824   : > { %11667 = vst [vmem:[%s19652_s14 + $0x1a08] sm:$0xff] %v11666_v51 }
 0x825   : > { %11669 = vst [vmem:[%s19652_s14 + $0x1a10] sm:$0xff] %v11668_v43 }
 0x826   : > { %11671 = vst [vmem:[%s19652_s14 + $0x1a18] sm:$0xff] %v11670_v53 }
 0x827   : > { %11673 = vst [vmem:[%s19652_s14 + $0x1a80] sm:$0xff] %v11672_v2 }
 0x828   : > { %11675 = vst [vmem:[%s19652_s14 + $0x1a88] sm:$0xff] %v11674_v55 }
 0x829   : > { %11677 = vst [vmem:[%s19652_s14 + $0x1a90] sm:$0xff] %v11676_v47 }
 0x82a   : > { %11679 = vst [vmem:[%s19652_s14 + $0x1a98] sm:$0xff] %v11678_v9 }
 0x82b   : > { %11681 = vst [vmem:[%s19652_s14 + $0x1b00] sm:$0xff] %v11680_v11 }
 0x82c   : > { %11683 = vst [vmem:[%s19652_s14 + $0x1b08] sm:$0xff] %v11682_v0 }
 0x82d   : > { %11685 = vst [vmem:[%s19652_s14 + $0x1b10] sm:$0xff] %v11684_v33 }
 0x82e   : > { %11687 = vst [vmem:[%s19652_s14 + $0x1b18] sm:$0xff] %v11686_v6 }
 0x82f   : > { %11689 = vst [vmem:[%s19652_s14 + $0x1b80] sm:$0xff] %v11688_v31 }
 0x830   : > { %11691 = vst [vmem:[%s19652_s14 + $0x1b88] sm:$0xff] %v11690_v34 }
 0x831   : > { %11693 = vst [vmem:[%s19652_s14 + $0x1b90] sm:$0xff] %v11692_v4 }
 0x832   : > { %11695 = vst [vmem:[%s19652_s14 + $0x1b98] sm:$0xff] %v11694_v52 }
 0x833   : > { %11697 = vst [vmem:[%s19652_s14 + $0x1c00] sm:$0xff] %v11696_v36 }
 0x834   : > { %11699 = vst [vmem:[%s19652_s14 + $0x1c08] sm:$0xff] %v11698_v12 }
 0x835   : > { %11701 = vst [vmem:[%s19652_s14 + $0x1c10] sm:$0xff] %v11700_v28 }
 0x836   : > { %11703 = vst [vmem:[%s19652_s14 + $0x1c18] sm:$0xff] %v11702_v18 }
 0x837   : > { %11705 = vst [vmem:[%s19652_s14 + $0x1c80] sm:$0xff] %v11704_v46 }
 0x838   : > { %11707 = vst [vmem:[%s19652_s14 + $0x1c88] sm:$0xff] %v11706_v37 }
 0x839   : > { %11709 = vst [vmem:[%s19652_s14 + $0x1c90] sm:$0xff] %v11708_v30 }
 0x83a   : > { %11711 = vst [vmem:[%s19652_s14 + $0x1c98] sm:$0xff] %v11710_v21 }
 0x83b   : > { %11713 = vst [vmem:[%s19652_s14 + $0x1d00] sm:$0xff] %v11712_v41 }
 0x83c   : > { %11715 = vst [vmem:[%s19652_s14 + $0x1d08] sm:$0xff] %v11714_v15 }
 0x83d   : > { %11717 = vst [vmem:[%s19652_s14 + $0x1d10] sm:$0xff] %v11716_v56 }
 0x83e   : > { %11719 = vst [vmem:[%s19652_s14 + $0x1d18] sm:$0xff] %v11718_v7 }
 0x83f   : > { %11721 = vst [vmem:[%s19652_s14 + $0x1d80] sm:$0xff] %v11720_v59 }
 0x840   : > { %11723 = vst [vmem:[%s19652_s14 + $0x1d88] sm:$0xff] %v11722_v50 }
 0x841   : > { %11725 = vst [vmem:[%s19652_s14 + $0x1d90] sm:$0xff] %v11724_v48 }
 0x842   : > { %11727 = vst [vmem:[%s19652_s14 + $0x1d98] sm:$0xff] %v11726_v58 }
 0x843   : > { %11729 = vst [vmem:[%s19652_s14 + $0x1e00] sm:$0xff] %v11728_v57 }
 0x844   : > { %11731 = vst [vmem:[%s19652_s14 + $0x1e08] sm:$0xff] %v11730_v35 }
 0x845   : > { %11733 = vst [vmem:[%s19652_s14 + $0x1e10] sm:$0xff] %v11732_v60 }
 0x846   : > { %11735 = vst [vmem:[%s19652_s14 + $0x1e18] sm:$0xff] %v11734_v29 }
 0x847   : > { %11737 = vst [vmem:[%s19652_s14 + $0x1e80] sm:$0xff] %v11736_v1 }
 0x848   : > { %11739 = vst [vmem:[%s19652_s14 + $0x1e88] sm:$0xff] %v11738_v40 }
 0x849   : > { %11741 = vst [vmem:[%s19652_s14 + $0x1e90] sm:$0xff] %v11740_v24 }
 0x84a   : > { %11743 = vst [vmem:[%s19652_s14 + $0x1e98] sm:$0xff] %v11742_v45 }
 0x84b   : > { %11745 = vst [vmem:[%s19652_s14 + $0x1f00] sm:$0xff] %v11744_v3 }
 0x84c   : > { %11747 = vst [vmem:[%s19652_s14 + $0x1f08] sm:$0xff] %v11746_v42 }
 0x84d   : > { %11749 = vst [vmem:[%s19652_s14 + $0x1f10] sm:$0xff] %v11748_v44 }
 0x84e   : > { %11751 = vst [vmem:[%s19652_s14 + $0x1f18] sm:$0xff] %v11750_v25 }
 0x84f   : > { %11753 = vst [vmem:[%s19652_s14 + $0x1f80] sm:$0xff] %v11752_v61 }
 0x850   : > { %11755 = vst [vmem:[%s19652_s14 + $0x1f88] sm:$0xff] %v11754_v13 }
 0x851   : > { %11757 = vst [vmem:[%s19652_s14 + $0x1f90] sm:$0xff] %v11756_v8 }
 0x852   : > { %11759 = vst [vmem:[%s19652_s14 + $0x1f98] sm:$0xff] %v11758_v5 }
 0x853 PF: > { %s21254_s24 = sld [smem:[#allocation15_spill]]  ;;  %s21257_s21 = smov %s12942_s22 }
 0x854   : > { %s21255_s25 = sld [smem:[#allocation14_spill]] }
 0x855   : > { %s21256_s23 = sld [smem:[#allocation16_spill]] }
 0x859   : > { %p22_p7 = scmp.ge.s32.totalorder %s21254_s24, 6  }
 0x85a   : > { %s21258_s22 = smov %s21255_s25 }
 0x85b   :  { %24 = sbr.rel (!%p22_p7) target bundleno = 10 (0xa), region = 169 }
 0x860   :  { %11775 = vsyncpa [#allocation3], 1 }
 0x861   :  { %11777 = vsyncpa [#allocation3 + $0x1], 1 }
 0x862   :  { %11778 = vsyncpa [#allocation5], 1 }
 0x863   :  { %11780 = vsyncpa [#allocation5 + $0x1], 1 }
 0x864   :  { %11781 = vsyncpa [#allocation8], 1 }
 0x865   :  { %11783 = vsyncpa [#allocation8 + $0x1], 1 }

</bundles_post_ra>
